<compile_context>
chip_gen: v5e
topology: v5e:2x2
jax: 0.10.0
libtpu: 0.0.40
codegen_flags: <defaults>
</compile_context>

<pallas_src>
import functools

import jax
import jax.numpy as jnp
from jax.experimental import pallas as pl
from jax.experimental.pallas import tpu as pltpu

NUM_CLASSES = 10
CAMADAS = (2, 2, 2, 2)                 # BasicBlock counts per stage
STAGE_CHANNELS = (64, 128, 256, 512)


def _round_up(x, m):
    return (x + m - 1) // m * m


def _build_arch():
    blocks = []
    cin = 64
    for stage, (cout, n) in enumerate(zip(STAGE_CHANNELS, CAMADAS)):
        for b in range(n):
            stride = 2 if (stage > 0 and b == 0) else 1
            blocks.append(dict(cin=cin, cout=cout, stride=stride,
                               downsample=(stride != 1 or cin != cout)))
            cin = cout
    return tuple(blocks)


ARCH = _build_arch()       # static structure (strides / channels / downsample flags)


# ------------------------- fused matmul Pallas kernel -------------------------

def _mm_kernel(x_ref, w_ref, sb_ref, *rest, relu, has_res):
    """Tiled matmul, f32 accumulator, fused BN scale/shift (+residual, +ReLU)."""
    if has_res:
        res_ref, o_ref, acc_ref = rest
    else:
        o_ref, acc_ref = rest
        res_ref = None

    @pl.when(pl.program_id(2) == 0)
    def _():
        acc_ref[...] = jnp.zeros_like(acc_ref)

    acc_ref[...] += jnp.dot(x_ref[...], w_ref[...],
                            preferred_element_type=jnp.float32)

    @pl.when(pl.program_id(2) == pl.num_programs(2) - 1)
    def _():
        r = acc_ref[...] * sb_ref[0:1, :] + sb_ref[1:2, :]
        if has_res:
            r = r + res_ref[...].astype(jnp.float32)
        if relu:
            r = jnp.maximum(r, 0.0)
        o_ref[...] = r.astype(o_ref.dtype)


def _pick_tiles(M, Kp, Np):
    tm = 256 if M >= 512 else _round_up(M, 16)
    tk = next(t for t in (512, 384, 256, 128) if Kp % t == 0)   # adaptive K tile
    tn = 256 if Np % 256 == 0 else 128
    return tm, tk, tn


def matmul_scale_shift_act(x, w_pad, sb, res=None, *, n_valid, relu,
                           out_dtype=jnp.bfloat16):
    """act((x @ w) * scale + shift [+ res]).

    x:(M,K) bf16   w_pad:(Kp,Np) bf16 (pre-padded once at init)
    sb:(2,Np) f32 rows = (scale, shift)   res:(M,n_valid) bf16 or None
    """
    M, K = x.shape
    Kp, Np = w_pad.shape
    tm, tk, tn = _pick_tiles(M, Kp, Np)
    Mp = _round_up(M, tm)
    if (Mp, Kp) != (M, K):
        x = jnp.pad(x, ((0, Mp - M), (0, Kp - K)))

    inputs = [x, w_pad, sb]
    in_specs = [
        pl.BlockSpec((tm, tk), lambda i, j, k: (i, k)),
        pl.BlockSpec((tk, tn), lambda i, j, k: (k, j)),
        pl.BlockSpec((2, tn), lambda i, j, k: (0, j)),
    ]
    has_res = res is not None
    if has_res:
        if res.shape != (Mp, Np):
            res = jnp.pad(res, ((0, Mp - res.shape[0]), (0, Np - res.shape[1])))
        inputs.append(res)
        in_specs.append(pl.BlockSpec((tm, tn), lambda i, j, k: (i, j)))

    out = pl.pallas_call(
        functools.partial(_mm_kernel, relu=relu, has_res=has_res),
        out_shape=jax.ShapeDtypeStruct((Mp, Np), out_dtype),
        grid_spec=pltpu.PrefetchScalarGridSpec(
            num_scalar_prefetch=0,
            grid=(Mp // tm, Np // tn, Kp // tk),
            in_specs=in_specs,
            out_specs=pl.BlockSpec((tm, tn), lambda i, j, k: (i, j)),
            scratch_shapes=[pltpu.VMEM((tm, tn), jnp.float32)],
        ),
        compiler_params=pltpu.CompilerParams(
            dimension_semantics=("parallel", "parallel", "arbitrary")),
    )(*inputs)
    return out[:M, :n_valid]


# ------------------------------ conv layers -----------------------------------

def _im2col(x, kh, kw, stride, pad):
    """(N,H,W,C) -> (N*Ho*Wo, kh*kw*C) patches (plain-JAX glue, bf16)."""
    n, h, w, c = x.shape
    ho = (h + 2 * pad - kh) // stride + 1
    wo = (w + 2 * pad - kw) // stride + 1
    xp = jnp.pad(x, ((0, 0), (pad, pad), (pad, pad), (0, 0)))
    cols = []
    for dy in range(kh):
        for dx in range(kw):
            cols.append(xp[:, dy:dy + stride * (ho - 1) + 1:stride,
                           dx:dx + stride * (wo - 1) + 1:stride, :])
    patches = jnp.stack(cols, axis=3)             # (N,Ho,Wo,kh*kw,C)
    return patches.reshape(n * ho * wo, kh * kw * c), ho, wo


def conv_bn_act(x, p, cout, *, kh, kw, stride, pad, relu, residual=None):
    """Conv(kh,kw,stride,pad) + folded BN [+ residual] [+ ReLU]."""
    n = x.shape[0]
    patches, ho, wo = _im2col(x, kh, kw, stride, pad)
    res2d = None
    if residual is not None:
        res2d = residual.reshape(n * ho * wo, cout)
    out = matmul_scale_shift_act(patches, p['w'], p['sb'], res2d,
                                 n_valid=cout, relu=relu)
    return out.reshape(n, ho, wo, cout)


def conv1x1_bn(x, p, cout, stride):
    """1x1 strided conv + folded BN (downsample path) — no im2col needed."""
    xs = x[:, ::stride, ::stride, :]
    n, ho, wo, cin = xs.shape
    out = matmul_scale_shift_act(xs.reshape(n * ho * wo, cin), p['w'], p['sb'],
                                 n_valid=cout, relu=False)
    return out.reshape(n, ho, wo, cout)


# ------------------------------ max pooling -----------------------------------

def _max9_kernel(*refs):
    o_ref = refs[-1]
    m = refs[0][...]
    for r in refs[1:-1]:
        m = jnp.maximum(m, r[...])
    o_ref[...] = m


def maxpool3x3_s2p1(x):
    """MaxPool2d(kernel=3, stride=2, padding=1) on NHWC input."""
    n, h, w, c = x.shape
    ho = (h + 2 - 3) // 2 + 1
    wo = (w + 2 - 3) // 2 + 1
    neg = jnp.finfo(x.dtype).min
    xp = jnp.pad(x, ((0, 0), (1, 1), (1, 1), (0, 0)), constant_values=neg)
    views = []
    for dy in range(3):
        for dx in range(3):
            v = xp[:, dy:dy + 2 * (ho - 1) + 1:2, dx:dx + 2 * (wo - 1) + 1:2, :]
            # lane-dense 2-D view: last dim = wo*c (multiple of 128)
            views.append(v.reshape(n * ho, wo * c))
    spec = pl.BlockSpec((n * ho, wo * c), lambda i: (0, 0))
    out = pl.pallas_call(
        _max9_kernel,
        out_shape=jax.ShapeDtypeStruct((n * ho, wo * c), x.dtype),
        grid_spec=pltpu.PrefetchScalarGridSpec(
            num_scalar_prefetch=0,
            grid=(1,),
            in_specs=[spec] * 9,
            out_specs=spec,
        ),
        compiler_params=pltpu.CompilerParams(dimension_semantics=("arbitrary",)),
    )(*views)
    return out.reshape(n, ho, wo, c)


# --------------------- global average pool + FC (fused) ------------------------

def _pool_fc_kernel(x_ref, w_ref, b_ref, o_ref):
    x = x_ref[...].astype(jnp.float32)
    pooled = jnp.mean(x, axis=(1, 2))                   # AdaptiveAvgPool2d((1,1))
    o_ref[...] = jnp.dot(pooled, w_ref[...],
                         preferred_element_type=jnp.float32) + b_ref[...]


def global_pool_fc(x, w_pad, b_pad, n_classes):
    n, h, w, c = x.shape
    ncp = w_pad.shape[1]
    out = pl.pallas_call(
        _pool_fc_kernel,
        out_shape=jax.ShapeDtypeStruct((n, ncp), jnp.float32),
        grid_spec=pltpu.PrefetchScalarGridSpec(
            num_scalar_prefetch=0,
            grid=(1,),
            in_specs=[
                pl.BlockSpec((n, h, w, c), lambda i: (0, 0, 0, 0)),
                pl.BlockSpec((c, ncp), lambda i: (0, 0)),
                pl.BlockSpec((1, ncp), lambda i: (0, 0)),
            ],
            out_specs=pl.BlockSpec((n, ncp), lambda i: (0, 0)),
        ),
        compiler_params=pltpu.CompilerParams(dimension_semantics=("arbitrary",)),
    )(x, w_pad, b_pad)
    return out[:, :n_classes]


# --------------------------------- params --------------------------------------

def _conv_bn_params(key, kh, kw, cin, cout, conv_bias=False, eps=1e-5):
    """Conv weights reshaped to (K,Cout), padded to tile multiples, BN folded.

    BatchNorm is folded in eval mode (PyTorch-default gamma=1, beta=0,
    running_mean=0, running_var=1) into a per-channel (scale, shift) pair that
    the matmul kernel applies in its epilogue.
    """
    # TODO(synk): training-mode BatchNorm (batch statistics) is not implemented;
    # only inference/eval-mode BN (running stats) is folded into the kernel.
    k_w, k_b = jax.random.split(key)
    K = kh * kw * cin
    Kp = _round_up(K, 128)
    Np = _round_up(cout, 128)
    w = jax.random.normal(k_w, (kh, kw, cin, cout), jnp.float32) * (2.0 / K) ** 0.5
    w_pad = jnp.zeros((Kp, Np), jnp.float32).at[:K, :cout].set(w.reshape(K, cout))
    gamma = jnp.ones((cout,), jnp.float32)
    beta = jnp.zeros((cout,), jnp.float32)
    r_mean = jnp.zeros((cout,), jnp.float32)
    r_var = jnp.ones((cout,), jnp.float32)
    b_conv = (jax.random.normal(k_b, (cout,), jnp.float32) * (1.0 / K) ** 0.5
              if conv_bias else jnp.zeros((cout,), jnp.float32))
    scale = gamma / jnp.sqrt(r_var + eps)
    shift = (b_conv - r_mean) * scale + beta
    sb = jnp.zeros((2, Np), jnp.float32).at[0, :cout].set(scale).at[1, :cout].set(shift)
    return {'w': w_pad.astype(jnp.bfloat16), 'sb': sb}


def init_params(key):
    key, k1 = jax.random.split(key)
    params = {'conv1': _conv_bn_params(k1, 7, 7, 3, 64)}          # conv1: bias=False
    blocks = []
    for spec in ARCH:
        key, ka, kb, kc = jax.random.split(key, 4)
        blk = {
            'conv1': _conv_bn_params(ka, 3, 3, spec['cin'], spec['cout']),
            'conv2': _conv_bn_params(kb, 3, 3, spec['cout'], spec['cout']),
        }
        if spec['downsample']:
            blk['ds'] = _conv_bn_params(kc, 1, 1, spec['cin'], spec['cout'],
                                        conv_bias=True)
        blocks.append(blk)
    params['blocks'] = blocks
    key, kf = jax.random.split(key)
    ncp = _round_up(NUM_CLASSES, 128)
    fc_w = jax.random.normal(kf, (512, NUM_CLASSES), jnp.float32) * (1.0 / 512) ** 0.5
    params['fc_w'] = jnp.zeros((512, ncp), jnp.float32).at[:, :NUM_CLASSES].set(fc_w)
    params['fc_b'] = jnp.zeros((1, ncp), jnp.float32)
    return params


# -------------------------------- forward --------------------------------------

def resnet_forward(params, x_nchw):
    # NCHW -> NHWC, bf16 activations (f32 accumulation happens inside the kernels)
    x = jnp.transpose(x_nchw, (0, 2, 3, 1)).astype(jnp.bfloat16)
    x = conv_bn_act(x, params['conv1'], 64, kh=7, kw=7, stride=2, pad=3, relu=True)
    x = maxpool3x3_s2p1(x)
    for spec, bp in zip(ARCH, params['blocks']):
        if spec['downsample']:
            residual = conv1x1_bn(x, bp['ds'], spec['cout'], spec['stride'])
        else:
            residual = x
        y = conv_bn_act(x, bp['conv1'], spec['cout'], kh=3, kw=3,
                        stride=spec['stride'], pad=1, relu=True)
        # second conv: BN + residual add + ReLU all fused into the matmul epilogue
        x = conv_bn_act(y, bp['conv2'], spec['cout'], kh=3, kw=3,
                        stride=1, pad=1, relu=True, residual=residual)
    return global_pool_fc(x, params['fc_w'], params['fc_b'], NUM_CLASSES)


if __name__ == "__main__":
    key = jax.random.PRNGKey(0)
    kp, kx = jax.random.split(key)
    params = init_params(kp)
    # Small input: (N=2, C=3, H=W=32): 32 -conv1/s2-> 16 -maxpool/s2-> 8,
    # then stage strides 1,2,2,2 -> 8,4,2,1 -> global avg pool -> fc.
    x = jax.random.normal(kx, (2, 3, 32, 32), jnp.float32)
    fwd = jax.jit(resnet_forward)
    out = fwd(params, x)
    jax.block_until_ready(out)
    assert out.shape == (2, NUM_CLASSES), out.shape
    assert out.dtype == jnp.float32, out.dtype
    print("KERNEL_OK")
</pallas_src>

<mosaic_0001>
module attributes {stable_mosaic.version = 11 : i64} {
  func.func @_mm_kernel(%arg0: i32, %arg1: i32, %arg2: i32, %arg3: memref<256x256xbf16, #tpu.memory_space<vmem>>, %arg4: memref<256x128xbf16, #tpu.memory_space<vmem>>, %arg5: memref<2x128xf32, #tpu.memory_space<vmem>>, %arg6: memref<256x128xbf16, #tpu.memory_space<vmem>>, %arg7: memref<256x128xf32, #tpu.memory_space<vmem>>) attributes {dimension_semantics = [#tpu.dimension_semantics<parallel>, #tpu.dimension_semantics<parallel>, #tpu.dimension_semantics<arbitrary>], iteration_bounds = array<i64: 2, 1, 1>, scalar_prefetch = 0 : i64, scratch_operands = 1 : i64, tpu.core_type = #tpu.core_type<tc>, window_params = [{transform_indices = @transform_0, window_bounds = array<i64: 256, 256>}, {transform_indices = @transform_1, window_bounds = array<i64: 256, 128>}, {transform_indices = @transform_2, window_bounds = array<i64: 2, 128>}, {transform_indices = @transform_3, window_bounds = array<i64: 256, 128>}]} {
    %c0_i32 = arith.constant 0 : i32
    %0 = arith.cmpi eq, %arg2, %c0_i32 : i32
    %1 = arith.extui %0 : i1 to i32
    %c0_i32_0 = arith.constant 0 : i32
    %2 = arith.cmpi ne, %1, %c0_i32_0 : i32
    scf.if %2 {
      %cst_10 = arith.constant 0.000000e+00 : f32
      %12 = vector.broadcast %cst_10 : f32 to vector<256x128xf32>
      %c0_11 = arith.constant 0 : index
      %c0_12 = arith.constant 0 : index
      %13 = vector.load %arg7[%c0_11, %c0_12] : memref<256x128xf32, #tpu.memory_space<vmem>>, vector<256x128xf32>
      tpu.vector_store %arg7[%c0_11, %c0_12], %12 {strides = array<i32>} : memref<256x128xf32, #tpu.memory_space<vmem>>, vector<256x128xf32>,
    } else {
    }
    %c0 = arith.constant 0 : index
    %c0_1 = arith.constant 0 : index
    %3 = vector.load %arg7[%c0, %c0_1] : memref<256x128xf32, #tpu.memory_space<vmem>>, vector<256x128xf32>
    %c0_2 = arith.constant 0 : index
    %c0_3 = arith.constant 0 : index
    %4 = vector.load %arg3[%c0_2, %c0_3] : memref<256x256xbf16, #tpu.memory_space<vmem>>, vector<256x256xbf16>
    %c0_4 = arith.constant 0 : index
    %c0_5 = arith.constant 0 : index
    %5 = vector.load %arg4[%c0_4, %c0_5] : memref<256x128xbf16, #tpu.memory_space<vmem>>, vector<256x128xbf16>
    %cst = arith.constant dense<0.000000e+00> : vector<256x128xf32>
    %6 = tpu.matmul %4, %5, %cst {dimension_numbers = #tpu.dot_dimension_numbers<[1], [0], [0], [1], [0, 0, 1, 1], [], []>} : vector<256x256xbf16>, vector<256x128xbf16>, vector<256x128xf32> -> vector<256x128xf32>
    %7 = arith.addf %3, %6 : vector<256x128xf32>
    %c0_6 = arith.constant 0 : index
    %c0_7 = arith.constant 0 : index
    %8 = vector.load %arg7[%c0_6, %c0_7] : memref<256x128xf32, #tpu.memory_space<vmem>>, vector<256x128xf32>
    tpu.vector_store %arg7[%c0_6, %c0_7], %7 {strides = array<i32>} : memref<256x128xf32, #tpu.memory_space<vmem>>, vector<256x128xf32>,
    %c0_i32_8 = arith.constant 0 : i32
    %9 = arith.cmpi eq, %arg2, %c0_i32_8 : i32
    %10 = arith.extui %9 : i1 to i32
    %c0_i32_9 = arith.constant 0 : i32
    %11 = arith.cmpi ne, %10, %c0_i32_9 : i32
    scf.if %11 {
      %c0_10 = arith.constant 0 : index
      %c0_11 = arith.constant 0 : index
      %12 = vector.load %arg7[%c0_10, %c0_11] : memref<256x128xf32, #tpu.memory_space<vmem>>, vector<256x128xf32>
      %c0_12 = arith.constant 0 : index
      %c0_13 = arith.constant 0 : index
      %13 = vector.load %arg5[%c0_12, %c0_13] : memref<2x128xf32, #tpu.memory_space<vmem>>, vector<1x128xf32>
      %14 = vector.broadcast %13 : vector<1x128xf32> to vector<256x128xf32>
      %15 = arith.mulf %12, %14 : vector<256x128xf32>
      %c1 = arith.constant 1 : index
      %c0_14 = arith.constant 0 : index
      %16 = vector.load %arg5[%c1, %c0_14] : memref<2x128xf32, #tpu.memory_space<vmem>>, vector<1x128xf32>
      %17 = vector.broadcast %16 : vector<1x128xf32> to vector<256x128xf32>
      %18 = arith.addf %15, %17 : vector<256x128xf32>
      %cst_15 = arith.constant 0.000000e+00 : f32
      %19 = vector.broadcast %cst_15 : f32 to vector<256x128xf32>
      %20 = arith.maximumf %18, %19 : vector<256x128xf32>
      %21 = arith.truncf %20 : vector<256x128xf32> to vector<256x128xbf16>
      %c0_16 = arith.constant 0 : index
      %c0_17 = arith.constant 0 : index
      %22 = vector.load %arg6[%c0_16, %c0_17] : memref<256x128xbf16, #tpu.memory_space<vmem>>, vector<256x128xbf16>
      tpu.vector_store %arg6[%c0_16, %c0_17], %21 {strides = array<i32>} : memref<256x128xbf16, #tpu.memory_space<vmem>>, vector<256x128xbf16>,
    } else {
    }
    return
  }
  func.func @transform_0(%arg0: i32, %arg1: i32, %arg2: i32) -> (i32, i32) {
    %c0_i32 = arith.constant 0 : i32
    return %arg0, %arg2 : i32, i32
  }
  func.func @transform_1(%arg0: i32, %arg1: i32, %arg2: i32) -> (i32, i32) {
    %c0_i32 = arith.constant 0 : i32
    return %arg2, %arg1 : i32, i32
  }
  func.func @transform_2(%arg0: i32, %arg1: i32, %arg2: i32) -> (i32, i32) {
    %c0_i32 = arith.constant 0 : i32
    %c0_i32_0 = arith.constant 0 : i32
    return %c0_i32, %arg1 : i32, i32
  }
  func.func @transform_3(%arg0: i32, %arg1: i32, %arg2: i32) -> (i32, i32) {
    %c0_i32 = arith.constant 0 : i32
    return %arg0, %arg1 : i32, i32
  }
}

module attributes {stable_mosaic.version = 11 : i64} {
  func.func @_max9_kernel(%arg0: i32, %arg1: memref<16x512xbf16, #tpu.memory_space<vmem>>, %arg2: memref<16x512xbf16, #tpu.memory_space<vmem>>, %arg3: memref<16x512xbf16, #tpu.memory_space<vmem>>, %arg4: memref<16x512xbf16, #tpu.memory_space<vmem>>, %arg5: memref<16x512xbf16, #tpu.memory_space<vmem>>, %arg6: memref<16x512xbf16, #tpu.memory_space<vmem>>, %arg7: memref<16x512xbf16, #tpu.memory_space<vmem>>, %arg8: memref<16x512xbf16, #tpu.memory_space<vmem>>, %arg9: memref<16x512xbf16, #tpu.memory_space<vmem>>, %arg10: memref<16x512xbf16, #tpu.memory_space<vmem>>) attributes {dimension_semantics = [#tpu.dimension_semantics<arbitrary>], iteration_bounds = array<i64: 1>, scalar_prefetch = 0 : i64, scratch_operands = 0 : i64, tpu.core_type = #tpu.core_type<tc>, window_params = [{pipeline_mode = #tpu.pipeline_mode<synchronous>, transform_indices = @transform_0, window_bounds = array<i64: 16, 512>}, {pipeline_mode = #tpu.pipeline_mode<synchronous>, transform_indices = @transform_1, window_bounds = array<i64: 16, 512>}, {pipeline_mode = #tpu.pipeline_mode<synchronous>, transform_indices = @transform_2, window_bounds = array<i64: 16, 512>}, {pipeline_mode = #tpu.pipeline_mode<synchronous>, transform_indices = @transform_3, window_bounds = array<i64: 16, 512>}, {pipeline_mode = #tpu.pipeline_mode<synchronous>, transform_indices = @transform_4, window_bounds = array<i64: 16, 512>}, {pipeline_mode = #tpu.pipeline_mode<synchronous>, transform_indices = @transform_5, window_bounds = array<i64: 16, 512>}, {pipeline_mode = #tpu.pipeline_mode<synchronous>, transform_indices = @transform_6, window_bounds = array<i64: 16, 512>}, {pipeline_mode = #tpu.pipeline_mode<synchronous>, transform_indices = @transform_7, window_bounds = array<i64: 16, 512>}, {pipeline_mode = #tpu.pipeline_mode<synchronous>, transform_indices = @transform_8, window_bounds = array<i64: 16, 512>}, {pipeline_mode = #tpu.pipeline_mode<synchronous>, transform_indices = @transform_9, window_bounds = array<i64: 16, 512>}]} {
    %c0 = arith.constant 0 : index
    %c0_0 = arith.constant 0 : index
    %0 = vector.load %arg1[%c0, %c0_0] : memref<16x512xbf16, #tpu.memory_space<vmem>>, vector<16x512xbf16>
    %c0_1 = arith.constant 0 : index
    %c0_2 = arith.constant 0 : index
    %1 = vector.load %arg2[%c0_1, %c0_2] : memref<16x512xbf16, #tpu.memory_space<vmem>>, vector<16x512xbf16>
    %2 = arith.maximumf %0, %1 : vector<16x512xbf16>
    %c0_3 = arith.constant 0 : index
    %c0_4 = arith.constant 0 : index
    %3 = vector.load %arg3[%c0_3, %c0_4] : memref<16x512xbf16, #tpu.memory_space<vmem>>, vector<16x512xbf16>
    %4 = arith.maximumf %2, %3 : vector<16x512xbf16>
    %c0_5 = arith.constant 0 : index
    %c0_6 = arith.constant 0 : index
    %5 = vector.load %arg4[%c0_5, %c0_6] : memref<16x512xbf16, #tpu.memory_space<vmem>>, vector<16x512xbf16>
    %6 = arith.maximumf %4, %5 : vector<16x512xbf16>
    %c0_7 = arith.constant 0 : index
    %c0_8 = arith.constant 0 : index
    %7 = vector.load %arg5[%c0_7, %c0_8] : memref<16x512xbf16, #tpu.memory_space<vmem>>, vector<16x512xbf16>
    %8 = arith.maximumf %6, %7 : vector<16x512xbf16>
    %c0_9 = arith.constant 0 : index
    %c0_10 = arith.constant 0 : index
    %9 = vector.load %arg6[%c0_9, %c0_10] : memref<16x512xbf16, #tpu.memory_space<vmem>>, vector<16x512xbf16>
    %10 = arith.maximumf %8, %9 : vector<16x512xbf16>
    %c0_11 = arith.constant 0 : index
    %c0_12 = arith.constant 0 : index
    %11 = vector.load %arg7[%c0_11, %c0_12] : memref<16x512xbf16, #tpu.memory_space<vmem>>, vector<16x512xbf16>
    %12 = arith.maximumf %10, %11 : vector<16x512xbf16>
    %c0_13 = arith.constant 0 : index
    %c0_14 = arith.constant 0 : index
    %13 = vector.load %arg8[%c0_13, %c0_14] : memref<16x512xbf16, #tpu.memory_space<vmem>>, vector<16x512xbf16>
    %14 = arith.maximumf %12, %13 : vector<16x512xbf16>
    %c0_15 = arith.constant 0 : index
    %c0_16 = arith.constant 0 : index
    %15 = vector.load %arg9[%c0_15, %c0_16] : memref<16x512xbf16, #tpu.memory_space<vmem>>, vector<16x512xbf16>
    %16 = arith.maximumf %14, %15 : vector<16x512xbf16>
    %c0_17 = arith.constant 0 : index
    %c0_18 = arith.constant 0 : index
    %17 = vector.load %arg10[%c0_17, %c0_18] : memref<16x512xbf16, #tpu.memory_space<vmem>>, vector<16x512xbf16>
    tpu.vector_store %arg10[%c0_17, %c0_18], %16 {strides = array<i32>} : memref<16x512xbf16, #tpu.memory_space<vmem>>, vector<16x512xbf16>,
    return
  }
  func.func @transform_0(%arg0: i32) -> (i32, i32) {
    %c0_i32 = arith.constant 0 : i32
    %c0_i32_0 = arith.constant 0 : i32
    %c0_i32_1 = arith.constant 0 : i32
    return %c0_i32, %c0_i32_0 : i32, i32
  }
  func.func @transform_1(%arg0: i32) -> (i32, i32) {
    %c0_i32 = arith.constant 0 : i32
    %c0_i32_0 = arith.constant 0 : i32
    %c0_i32_1 = arith.constant 0 : i32
    return %c0_i32, %c0_i32_0 : i32, i32
  }
  func.func @transform_2(%arg0: i32) -> (i32, i32) {
    %c0_i32 = arith.constant 0 : i32
    %c0_i32_0 = arith.constant 0 : i32
    %c0_i32_1 = arith.constant 0 : i32
    return %c0_i32, %c0_i32_0 : i32, i32
  }
  func.func @transform_3(%arg0: i32) -> (i32, i32) {
    %c0_i32 = arith.constant 0 : i32
    %c0_i32_0 = arith.constant 0 : i32
    %c0_i32_1 = arith.constant 0 : i32
    return %c0_i32, %c0_i32_0 : i32, i32
  }
  func.func @transform_4(%arg0: i32) -> (i32, i32) {
    %c0_i32 = arith.constant 0 : i32
    %c0_i32_0 = arith.constant 0 : i32
    %c0_i32_1 = arith.constant 0 : i32
    return %c0_i32, %c0_i32_0 : i32, i32
  }
  func.func @transform_5(%arg0: i32) -> (i32, i32) {
    %c0_i32 = arith.constant 0 : i32
    %c0_i32_0 = arith.constant 0 : i32
    %c0_i32_1 = arith.constant 0 : i32
    return %c0_i32, %c0_i32_0 : i32, i32
  }
  func.func @transform_6(%arg0: i32) -> (i32, i32) {
    %c0_i32 = arith.constant 0 : i32
    %c0_i32_0 = arith.constant 0 : i32
    %c0_i32_1 = arith.constant 0 : i32
    return %c0_i32, %c0_i32_0 : i32, i32
  }
  func.func @transform_7(%arg0: i32) -> (i32, i32) {
    %c0_i32 = arith.constant 0 : i32
    %c0_i32_0 = arith.constant 0 : i32
    %c0_i32_1 = arith.constant 0 : i32
    return %c0_i32, %c0_i32_0 : i32, i32
  }
  func.func @transform_8(%arg0: i32) -> (i32, i32) {
    %c0_i32 = arith.constant 0 : i32
    %c0_i32_0 = arith.constant 0 : i32
    %c0_i32_1 = arith.constant 0 : i32
    return %c0_i32, %c0_i32_0 : i32, i32
  }
  func.func @transform_9(%arg0: i32) -> (i32, i32) {
    %c0_i32 = arith.constant 0 : i32
    %c0_i32_0 = arith.constant 0 : i32
    %c0_i32_1 = arith.constant 0 : i32
    return %c0_i32, %c0_i32_0 : i32, i32
  }
}

module attributes {stable_mosaic.version = 11 : i64} {
  func.func @_mm_kernel(%arg0: i32, %arg1: i32, %arg2: i32, %arg3: memref<128x128xbf16, #tpu.memory_space<vmem>>, %arg4: memref<128x128xbf16, #tpu.memory_space<vmem>>, %arg5: memref<2x128xf32, #tpu.memory_space<vmem>>, %arg6: memref<128x128xbf16, #tpu.memory_space<vmem>>, %arg7: memref<128x128xf32, #tpu.memory_space<vmem>>) attributes {dimension_semantics = [#tpu.dimension_semantics<parallel>, #tpu.dimension_semantics<parallel>, #tpu.dimension_semantics<arbitrary>], iteration_bounds = array<i64: 1, 1, 5>, scalar_prefetch = 0 : i64, scratch_operands = 1 : i64, tpu.core_type = #tpu.core_type<tc>, window_params = [{transform_indices = @transform_0, window_bounds = array<i64: 128, 128>}, {transform_indices = @transform_1, window_bounds = array<i64: 128, 128>}, {transform_indices = @transform_2, window_bounds = array<i64: 2, 128>}, {transform_indices = @transform_3, window_bounds = array<i64: 128, 128>}]} {
    %c0_i32 = arith.constant 0 : i32
    %0 = arith.cmpi eq, %arg2, %c0_i32 : i32
    %1 = arith.extui %0 : i1 to i32
    %c0_i32_0 = arith.constant 0 : i32
    %2 = arith.cmpi ne, %1, %c0_i32_0 : i32
    scf.if %2 {
      %cst_9 = arith.constant 0.000000e+00 : f32
      %12 = vector.broadcast %cst_9 : f32 to vector<128x128xf32>
      %c0_10 = arith.constant 0 : index
      %c0_11 = arith.constant 0 : index
      %13 = vector.load %arg7[%c0_10, %c0_11] : memref<128x128xf32, #tpu.memory_space<vmem>>, vector<128x128xf32>
      tpu.vector_store %arg7[%c0_10, %c0_11], %12 {strides = array<i32>} : memref<128x128xf32, #tpu.memory_space<vmem>>, vector<128x128xf32>,
    } else {
    }
    %c0 = arith.constant 0 : index
    %c0_1 = arith.constant 0 : index
    %3 = vector.load %arg7[%c0, %c0_1] : memref<128x128xf32, #tpu.memory_space<vmem>>, vector<128x128xf32>
    %c0_2 = arith.constant 0 : index
    %c0_3 = arith.constant 0 : index
    %4 = vector.load %arg3[%c0_2, %c0_3] : memref<128x128xbf16, #tpu.memory_space<vmem>>, vector<128x128xbf16>
    %c0_4 = arith.constant 0 : index
    %c0_5 = arith.constant 0 : index
    %5 = vector.load %arg4[%c0_4, %c0_5] : memref<128x128xbf16, #tpu.memory_space<vmem>>, vector<128x128xbf16>
    %cst = arith.constant dense<0.000000e+00> : vector<128x128xf32>
    %6 = tpu.matmul %4, %5, %cst {dimension_numbers = #tpu.dot_dimension_numbers<[1], [0], [0], [1], [0, 0, 1, 1], [], []>} : vector<128x128xbf16>, vector<128x128xbf16>, vector<128x128xf32> -> vector<128x128xf32>
    %7 = arith.addf %3, %6 : vector<128x128xf32>
    %c0_6 = arith.constant 0 : index
    %c0_7 = arith.constant 0 : index
    %8 = vector.load %arg7[%c0_6, %c0_7] : memref<128x128xf32, #tpu.memory_space<vmem>>, vector<128x128xf32>
    tpu.vector_store %arg7[%c0_6, %c0_7], %7 {strides = array<i32>} : memref<128x128xf32, #tpu.memory_space<vmem>>, vector<128x128xf32>,
    %c4_i32 = arith.constant 4 : i32
    %9 = arith.cmpi eq, %arg2, %c4_i32 : i32
    %10 = arith.extui %9 : i1 to i32
    %c0_i32_8 = arith.constant 0 : i32
    %11 = arith.cmpi ne, %10, %c0_i32_8 : i32
    scf.if %11 {
      %c0_9 = arith.constant 0 : index
      %c0_10 = arith.constant 0 : index
      %12 = vector.load %arg7[%c0_9, %c0_10] : memref<128x128xf32, #tpu.memory_space<vmem>>, vector<128x128xf32>
      %c0_11 = arith.constant 0 : index
      %c0_12 = arith.constant 0 : index
      %13 = vector.load %arg5[%c0_11, %c0_12] : memref<2x128xf32, #tpu.memory_space<vmem>>, vector<1x128xf32>
      %14 = vector.broadcast %13 : vector<1x128xf32> to vector<128x128xf32>
      %15 = arith.mulf %12, %14 : vector<128x128xf32>
      %c1 = arith.constant 1 : index
      %c0_13 = arith.constant 0 : index
      %16 = vector.load %arg5[%c1, %c0_13] : memref<2x128xf32, #tpu.memory_space<vmem>>, vector<1x128xf32>
      %17 = vector.broadcast %16 : vector<1x128xf32> to vector<128x128xf32>
      %18 = arith.addf %15, %17 : vector<128x128xf32>
      %cst_14 = arith.constant 0.000000e+00 : f32
      %19 = vector.broadcast %cst_14 : f32 to vector<128x128xf32>
      %20 = arith.maximumf %18, %19 : vector<128x128xf32>
      %21 = arith.truncf %20 : vector<128x128xf32> to vector<128x128xbf16>
      %c0_15 = arith.constant 0 : index
      %c0_16 = arith.constant 0 : index
      %22 = vector.load %arg6[%c0_15, %c0_16] : memref<128x128xbf16, #tpu.memory_space<vmem>>, vector<128x128xbf16>
      tpu.vector_store %arg6[%c0_15, %c0_16], %21 {strides = array<i32>} : memref<128x128xbf16, #tpu.memory_space<vmem>>, vector<128x128xbf16>,
    } else {
    }
    return
  }
  func.func @transform_0(%arg0: i32, %arg1: i32, %arg2: i32) -> (i32, i32) {
    %c0_i32 = arith.constant 0 : i32
    return %arg0, %arg2 : i32, i32
  }
  func.func @transform_1(%arg0: i32, %arg1: i32, %arg2: i32) -> (i32, i32) {
    %c0_i32 = arith.constant 0 : i32
    return %arg2, %arg1 : i32, i32
  }
  func.func @transform_2(%arg0: i32, %arg1: i32, %arg2: i32) -> (i32, i32) {
    %c0_i32 = arith.constant 0 : i32
    %c0_i32_0 = arith.constant 0 : i32
    return %c0_i32, %arg1 : i32, i32
  }
  func.func @transform_3(%arg0: i32, %arg1: i32, %arg2: i32) -> (i32, i32) {
    %c0_i32 = arith.constant 0 : i32
    return %arg0, %arg1 : i32, i32
  }
}

module attributes {stable_mosaic.version = 11 : i64} {
  func.func @_mm_kernel(%arg0: i32, %arg1: i32, %arg2: i32, %arg3: memref<128x128xbf16, #tpu.memory_space<vmem>>, %arg4: memref<128x128xbf16, #tpu.memory_space<vmem>>, %arg5: memref<2x128xf32, #tpu.memory_space<vmem>>, %arg6: memref<128x128xbf16, #tpu.memory_space<vmem>>, %arg7: memref<128x128xbf16, #tpu.memory_space<vmem>>, %arg8: memref<128x128xf32, #tpu.memory_space<vmem>>) attributes {dimension_semantics = [#tpu.dimension_semantics<parallel>, #tpu.dimension_semantics<parallel>, #tpu.dimension_semantics<arbitrary>], iteration_bounds = array<i64: 1, 1, 5>, scalar_prefetch = 0 : i64, scratch_operands = 1 : i64, tpu.core_type = #tpu.core_type<tc>, window_params = [{transform_indices = @transform_0, window_bounds = array<i64: 128, 128>}, {transform_indices = @transform_1, window_bounds = array<i64: 128, 128>}, {transform_indices = @transform_2, window_bounds = array<i64: 2, 128>}, {transform_indices = @transform_3, window_bounds = array<i64: 128, 128>}, {transform_indices = @transform_4, window_bounds = array<i64: 128, 128>}]} {
    %c0_i32 = arith.constant 0 : i32
    %0 = arith.cmpi eq, %arg2, %c0_i32 : i32
    %1 = arith.extui %0 : i1 to i32
    %c0_i32_0 = arith.constant 0 : i32
    %2 = arith.cmpi ne, %1, %c0_i32_0 : i32
    scf.if %2 {
      %cst_9 = arith.constant 0.000000e+00 : f32
      %12 = vector.broadcast %cst_9 : f32 to vector<128x128xf32>
      %c0_10 = arith.constant 0 : index
      %c0_11 = arith.constant 0 : index
      %13 = vector.load %arg8[%c0_10, %c0_11] : memref<128x128xf32, #tpu.memory_space<vmem>>, vector<128x128xf32>
      tpu.vector_store %arg8[%c0_10, %c0_11], %12 {strides = array<i32>} : memref<128x128xf32, #tpu.memory_space<vmem>>, vector<128x128xf32>,
    } else {
    }
    %c0 = arith.constant 0 : index
    %c0_1 = arith.constant 0 : index
    %3 = vector.load %arg8[%c0, %c0_1] : memref<128x128xf32, #tpu.memory_space<vmem>>, vector<128x128xf32>
    %c0_2 = arith.constant 0 : index
    %c0_3 = arith.constant 0 : index
    %4 = vector.load %arg3[%c0_2, %c0_3] : memref<128x128xbf16, #tpu.memory_space<vmem>>, vector<128x128xbf16>
    %c0_4 = arith.constant 0 : index
    %c0_5 = arith.constant 0 : index
    %5 = vector.load %arg4[%c0_4, %c0_5] : memref<128x128xbf16, #tpu.memory_space<vmem>>, vector<128x128xbf16>
    %cst = arith.constant dense<0.000000e+00> : vector<128x128xf32>
    %6 = tpu.matmul %4, %5, %cst {dimension_numbers = #tpu.dot_dimension_numbers<[1], [0], [0], [1], [0, 0, 1, 1], [], []>} : vector<128x128xbf16>, vector<128x128xbf16>, vector<128x128xf32> -> vector<128x128xf32>
    %7 = arith.addf %3, %6 : vector<128x128xf32>
    %c0_6 = arith.constant 0 : index
    %c0_7 = arith.constant 0 : index
    %8 = vector.load %arg8[%c0_6, %c0_7] : memref<128x128xf32, #tpu.memory_space<vmem>>, vector<128x128xf32>
    tpu.vector_store %arg8[%c0_6, %c0_7], %7 {strides = array<i32>} : memref<128x128xf32, #tpu.memory_space<vmem>>, vector<128x128xf32>,
    %c4_i32 = arith.constant 4 : i32
    %9 = arith.cmpi eq, %arg2, %c4_i32 : i32
    %10 = arith.extui %9 : i1 to i32
    %c0_i32_8 = arith.constant 0 : i32
    %11 = arith.cmpi ne, %10, %c0_i32_8 : i32
    scf.if %11 {
      %c0_9 = arith.constant 0 : index
      %c0_10 = arith.constant 0 : index
      %12 = vector.load %arg8[%c0_9, %c0_10] : memref<128x128xf32, #tpu.memory_space<vmem>>, vector<128x128xf32>
      %c0_11 = arith.constant 0 : index
      %c0_12 = arith.constant 0 : index
      %13 = vector.load %arg5[%c0_11, %c0_12] : memref<2x128xf32, #tpu.memory_space<vmem>>, vector<1x128xf32>
      %14 = vector.broadcast %13 : vector<1x128xf32> to vector<128x128xf32>
      %15 = arith.mulf %12, %14 : vector<128x128xf32>
      %c1 = arith.constant 1 : index
      %c0_13 = arith.constant 0 : index
      %16 = vector.load %arg5[%c1, %c0_13] : memref<2x128xf32, #tpu.memory_space<vmem>>, vector<1x128xf32>
      %17 = vector.broadcast %16 : vector<1x128xf32> to vector<128x128xf32>
      %18 = arith.addf %15, %17 : vector<128x128xf32>
      %c0_14 = arith.constant 0 : index
      %c0_15 = arith.constant 0 : index
      %19 = vector.load %arg6[%c0_14, %c0_15] : memref<128x128xbf16, #tpu.memory_space<vmem>>, vector<128x128xbf16>
      %20 = arith.extf %19 : vector<128x128xbf16> to vector<128x128xf32>
      %21 = arith.addf %18, %20 : vector<128x128xf32>
      %cst_16 = arith.constant 0.000000e+00 : f32
      %22 = vector.broadcast %cst_16 : f32 to vector<128x128xf32>
      %23 = arith.maximumf %21, %22 : vector<128x128xf32>
      %24 = arith.truncf %23 : vector<128x128xf32> to vector<128x128xbf16>
      %c0_17 = arith.constant 0 : index
      %c0_18 = arith.constant 0 : index
      %25 = vector.load %arg7[%c0_17, %c0_18] : memref<128x128xbf16, #tpu.memory_space<vmem>>, vector<128x128xbf16>
      tpu.vector_store %arg7[%c0_17, %c0_18], %24 {strides = array<i32>} : memref<128x128xbf16, #tpu.memory_space<vmem>>, vector<128x128xbf16>,
    } else {
    }
    return
  }
  func.func @transform_0(%arg0: i32, %arg1: i32, %arg2: i32) -> (i32, i32) {
    %c0_i32 = arith.constant 0 : i32
    return %arg0, %arg2 : i32, i32
  }
  func.func @transform_1(%arg0: i32, %arg1: i32, %arg2: i32) -> (i32, i32) {
    %c0_i32 = arith.constant 0 : i32
    return %arg2, %arg1 : i32, i32
  }
  func.func @transform_2(%arg0: i32, %arg1: i32, %arg2: i32) -> (i32, i32) {
    %c0_i32 = arith.constant 0 : i32
    %c0_i32_0 = arith.constant 0 : i32
    return %c0_i32, %arg1 : i32, i32
  }
  func.func @transform_3(%arg0: i32, %arg1: i32, %arg2: i32) -> (i32, i32) {
    %c0_i32 = arith.constant 0 : i32
    return %arg0, %arg1 : i32, i32
  }
  func.func @transform_4(%arg0: i32, %arg1: i32, %arg2: i32) -> (i32, i32) {
    %c0_i32 = arith.constant 0 : i32
    return %arg0, %arg1 : i32, i32
  }
}

module attributes {stable_mosaic.version = 11 : i64} {
  func.func @_mm_kernel(%arg0: i32, %arg1: i32, %arg2: i32, %arg3: memref<32x128xbf16, #tpu.memory_space<vmem>>, %arg4: memref<128x128xbf16, #tpu.memory_space<vmem>>, %arg5: memref<2x128xf32, #tpu.memory_space<vmem>>, %arg6: memref<32x128xbf16, #tpu.memory_space<vmem>>, %arg7: memref<32x128xf32, #tpu.memory_space<vmem>>) attributes {dimension_semantics = [#tpu.dimension_semantics<parallel>, #tpu.dimension_semantics<parallel>, #tpu.dimension_semantics<arbitrary>], iteration_bounds = array<i64: 1, 1, 5>, scalar_prefetch = 0 : i64, scratch_operands = 1 : i64, tpu.core_type = #tpu.core_type<tc>, window_params = [{transform_indices = @transform_0, window_bounds = array<i64: 32, 128>}, {transform_indices = @transform_1, window_bounds = array<i64: 128, 128>}, {transform_indices = @transform_2, window_bounds = array<i64: 2, 128>}, {transform_indices = @transform_3, window_bounds = array<i64: 32, 128>}]} {
    %c0_i32 = arith.constant 0 : i32
    %0 = arith.cmpi eq, %arg2, %c0_i32 : i32
    %1 = arith.extui %0 : i1 to i32
    %c0_i32_0 = arith.constant 0 : i32
    %2 = arith.cmpi ne, %1, %c0_i32_0 : i32
    scf.if %2 {
      %cst_9 = arith.constant 0.000000e+00 : f32
      %12 = vector.broadcast %cst_9 : f32 to vector<32x128xf32>
      %c0_10 = arith.constant 0 : index
      %c0_11 = arith.constant 0 : index
      %13 = vector.load %arg7[%c0_10, %c0_11] : memref<32x128xf32, #tpu.memory_space<vmem>>, vector<32x128xf32>
      tpu.vector_store %arg7[%c0_10, %c0_11], %12 {strides = array<i32>} : memref<32x128xf32, #tpu.memory_space<vmem>>, vector<32x128xf32>,
    } else {
    }
    %c0 = arith.constant 0 : index
    %c0_1 = arith.constant 0 : index
    %3 = vector.load %arg7[%c0, %c0_1] : memref<32x128xf32, #tpu.memory_space<vmem>>, vector<32x128xf32>
    %c0_2 = arith.constant 0 : index
    %c0_3 = arith.constant 0 : index
    %4 = vector.load %arg3[%c0_2, %c0_3] : memref<32x128xbf16, #tpu.memory_space<vmem>>, vector<32x128xbf16>
    %c0_4 = arith.constant 0 : index
    %c0_5 = arith.constant 0 : index
    %5 = vector.load %arg4[%c0_4, %c0_5] : memref<128x128xbf16, #tpu.memory_space<vmem>>, vector<128x128xbf16>
    %cst = arith.constant dense<0.000000e+00> : vector<32x128xf32>
    %6 = tpu.matmul %4, %5, %cst {dimension_numbers = #tpu.dot_dimension_numbers<[1], [0], [0], [1], [0, 0, 1, 1], [], []>} : vector<32x128xbf16>, vector<128x128xbf16>, vector<32x128xf32> -> vector<32x128xf32>
    %7 = arith.addf %3, %6 : vector<32x128xf32>
    %c0_6 = arith.constant 0 : index
    %c0_7 = arith.constant 0 : index
    %8 = vector.load %arg7[%c0_6, %c0_7] : memref<32x128xf32, #tpu.memory_space<vmem>>, vector<32x128xf32>
    tpu.vector_store %arg7[%c0_6, %c0_7], %7 {strides = array<i32>} : memref<32x128xf32, #tpu.memory_space<vmem>>, vector<32x128xf32>,
    %c4_i32 = arith.constant 4 : i32
    %9 = arith.cmpi eq, %arg2, %c4_i32 : i32
    %10 = arith.extui %9 : i1 to i32
    %c0_i32_8 = arith.constant 0 : i32
    %11 = arith.cmpi ne, %10, %c0_i32_8 : i32
    scf.if %11 {
      %c0_9 = arith.constant 0 : index
      %c0_10 = arith.constant 0 : index
      %12 = vector.load %arg7[%c0_9, %c0_10] : memref<32x128xf32, #tpu.memory_space<vmem>>, vector<32x128xf32>
      %c0_11 = arith.constant 0 : index
      %c0_12 = arith.constant 0 : index
      %13 = vector.load %arg5[%c0_11, %c0_12] : memref<2x128xf32, #tpu.memory_space<vmem>>, vector<1x128xf32>
      %14 = vector.broadcast %13 : vector<1x128xf32> to vector<32x128xf32>
      %15 = arith.mulf %12, %14 : vector<32x128xf32>
      %c1 = arith.constant 1 : index
      %c0_13 = arith.constant 0 : index
      %16 = vector.load %arg5[%c1, %c0_13] : memref<2x128xf32, #tpu.memory_space<vmem>>, vector<1x128xf32>
      %17 = vector.broadcast %16 : vector<1x128xf32> to vector<32x128xf32>
      %18 = arith.addf %15, %17 : vector<32x128xf32>
      %cst_14 = arith.constant 0.000000e+00 : f32
      %19 = vector.broadcast %cst_14 : f32 to vector<32x128xf32>
      %20 = arith.maximumf %18, %19 : vector<32x128xf32>
      %21 = arith.truncf %20 : vector<32x128xf32> to vector<32x128xbf16>
      %c0_15 = arith.constant 0 : index
      %c0_16 = arith.constant 0 : index
      %22 = vector.load %arg6[%c0_15, %c0_16] : memref<32x128xbf16, #tpu.memory_space<vmem>>, vector<32x128xbf16>
      tpu.vector_store %arg6[%c0_15, %c0_16], %21 {strides = array<i32>} : memref<32x128xbf16, #tpu.memory_space<vmem>>, vector<32x128xbf16>,
    } else {
    }
    return
  }
  func.func @transform_0(%arg0: i32, %arg1: i32, %arg2: i32) -> (i32, i32) {
    %c0_i32 = arith.constant 0 : i32
    return %arg0, %arg2 : i32, i32
  }
  func.func @transform_1(%arg0: i32, %arg1: i32, %arg2: i32) -> (i32, i32) {
    %c0_i32 = arith.constant 0 : i32
    return %arg2, %arg1 : i32, i32
  }
  func.func @transform_2(%arg0: i32, %arg1: i32, %arg2: i32) -> (i32, i32) {
    %c0_i32 = arith.constant 0 : i32
    %c0_i32_0 = arith.constant 0 : i32
    return %c0_i32, %arg1 : i32, i32
  }
  func.func @transform_3(%arg0: i32, %arg1: i32, %arg2: i32) -> (i32, i32) {
    %c0_i32 = arith.constant 0 : i32
    return %arg0, %arg1 : i32, i32
  }
}

module attributes {stable_mosaic.version = 11 : i64} {
  func.func @_mm_kernel(%arg0: i32, %arg1: i32, %arg2: i32, %arg3: memref<32x384xbf16, #tpu.memory_space<vmem>>, %arg4: memref<384x128xbf16, #tpu.memory_space<vmem>>, %arg5: memref<2x128xf32, #tpu.memory_space<vmem>>, %arg6: memref<32x128xbf16, #tpu.memory_space<vmem>>, %arg7: memref<32x128xbf16, #tpu.memory_space<vmem>>, %arg8: memref<32x128xf32, #tpu.memory_space<vmem>>) attributes {dimension_semantics = [#tpu.dimension_semantics<parallel>, #tpu.dimension_semantics<parallel>, #tpu.dimension_semantics<arbitrary>], iteration_bounds = array<i64: 1, 1, 3>, scalar_prefetch = 0 : i64, scratch_operands = 1 : i64, tpu.core_type = #tpu.core_type<tc>, window_params = [{transform_indices = @transform_0, window_bounds = array<i64: 32, 384>}, {transform_indices = @transform_1, window_bounds = array<i64: 384, 128>}, {transform_indices = @transform_2, window_bounds = array<i64: 2, 128>}, {transform_indices = @transform_3, window_bounds = array<i64: 32, 128>}, {transform_indices = @transform_4, window_bounds = array<i64: 32, 128>}]} {
    %c0_i32 = arith.constant 0 : i32
    %0 = arith.cmpi eq, %arg2, %c0_i32 : i32
    %1 = arith.extui %0 : i1 to i32
    %c0_i32_0 = arith.constant 0 : i32
    %2 = arith.cmpi ne, %1, %c0_i32_0 : i32
    scf.if %2 {
      %cst_9 = arith.constant 0.000000e+00 : f32
      %12 = vector.broadcast %cst_9 : f32 to vector<32x128xf32>
      %c0_10 = arith.constant 0 : index
      %c0_11 = arith.constant 0 : index
      %13 = vector.load %arg8[%c0_10, %c0_11] : memref<32x128xf32, #tpu.memory_space<vmem>>, vector<32x128xf32>
      tpu.vector_store %arg8[%c0_10, %c0_11], %12 {strides = array<i32>} : memref<32x128xf32, #tpu.memory_space<vmem>>, vector<32x128xf32>,
    } else {
    }
    %c0 = arith.constant 0 : index
    %c0_1 = arith.constant 0 : index
    %3 = vector.load %arg8[%c0, %c0_1] : memref<32x128xf32, #tpu.memory_space<vmem>>, vector<32x128xf32>
    %c0_2 = arith.constant 0 : index
    %c0_3 = arith.constant 0 : index
    %4 = vector.load %arg3[%c0_2, %c0_3] : memref<32x384xbf16, #tpu.memory_space<vmem>>, vector<32x384xbf16>
    %c0_4 = arith.constant 0 : index
    %c0_5 = arith.constant 0 : index
    %5 = vector.load %arg4[%c0_4, %c0_5] : memref<384x128xbf16, #tpu.memory_space<vmem>>, vector<384x128xbf16>
    %cst = arith.constant dense<0.000000e+00> : vector<32x128xf32>
    %6 = tpu.matmul %4, %5, %cst {dimension_numbers = #tpu.dot_dimension_numbers<[1], [0], [0], [1], [0, 0, 1, 1], [], []>} : vector<32x384xbf16>, vector<384x128xbf16>, vector<32x128xf32> -> vector<32x128xf32>
    %7 = arith.addf %3, %6 : vector<32x128xf32>
    %c0_6 = arith.constant 0 : index
    %c0_7 = arith.constant 0 : index
    %8 = vector.load %arg8[%c0_6, %c0_7] : memref<32x128xf32, #tpu.memory_space<vmem>>, vector<32x128xf32>
    tpu.vector_store %arg8[%c0_6, %c0_7], %7 {strides = array<i32>} : memref<32x128xf32, #tpu.memory_space<vmem>>, vector<32x128xf32>,
    %c2_i32 = arith.constant 2 : i32
    %9 = arith.cmpi eq, %arg2, %c2_i32 : i32
    %10 = arith.extui %9 : i1 to i32
    %c0_i32_8 = arith.constant 0 : i32
    %11 = arith.cmpi ne, %10, %c0_i32_8 : i32
    scf.if %11 {
      %c0_9 = arith.constant 0 : index
      %c0_10 = arith.constant 0 : index
      %12 = vector.load %arg8[%c0_9, %c0_10] : memref<32x128xf32, #tpu.memory_space<vmem>>, vector<32x128xf32>
      %c0_11 = arith.constant 0 : index
      %c0_12 = arith.constant 0 : index
      %13 = vector.load %arg5[%c0_11, %c0_12] : memref<2x128xf32, #tpu.memory_space<vmem>>, vector<1x128xf32>
      %14 = vector.broadcast %13 : vector<1x128xf32> to vector<32x128xf32>
      %15 = arith.mulf %12, %14 : vector<32x128xf32>
      %c1 = arith.constant 1 : index
      %c0_13 = arith.constant 0 : index
      %16 = vector.load %arg5[%c1, %c0_13] : memref<2x128xf32, #tpu.memory_space<vmem>>, vector<1x128xf32>
      %17 = vector.broadcast %16 : vector<1x128xf32> to vector<32x128xf32>
      %18 = arith.addf %15, %17 : vector<32x128xf32>
      %c0_14 = arith.constant 0 : index
      %c0_15 = arith.constant 0 : index
      %19 = vector.load %arg6[%c0_14, %c0_15] : memref<32x128xbf16, #tpu.memory_space<vmem>>, vector<32x128xbf16>
      %20 = arith.extf %19 : vector<32x128xbf16> to vector<32x128xf32>
      %21 = arith.addf %18, %20 : vector<32x128xf32>
      %cst_16 = arith.constant 0.000000e+00 : f32
      %22 = vector.broadcast %cst_16 : f32 to vector<32x128xf32>
      %23 = arith.maximumf %21, %22 : vector<32x128xf32>
      %24 = arith.truncf %23 : vector<32x128xf32> to vector<32x128xbf16>
      %c0_17 = arith.constant 0 : index
      %c0_18 = arith.constant 0 : index
      %25 = vector.load %arg7[%c0_17, %c0_18] : memref<32x128xbf16, #tpu.memory_space<vmem>>, vector<32x128xbf16>
      tpu.vector_store %arg7[%c0_17, %c0_18], %24 {strides = array<i32>} : memref<32x128xbf16, #tpu.memory_space<vmem>>, vector<32x128xbf16>,
    } else {
    }
    return
  }
  func.func @transform_0(%arg0: i32, %arg1: i32, %arg2: i32) -> (i32, i32) {
    %c0_i32 = arith.constant 0 : i32
    return %arg0, %arg2 : i32, i32
  }
  func.func @transform_1(%arg0: i32, %arg1: i32, %arg2: i32) -> (i32, i32) {
    %c0_i32 = arith.constant 0 : i32
    return %arg2, %arg1 : i32, i32
  }
  func.func @transform_2(%arg0: i32, %arg1: i32, %arg2: i32) -> (i32, i32) {
    %c0_i32 = arith.constant 0 : i32
    %c0_i32_0 = arith.constant 0 : i32
    return %c0_i32, %arg1 : i32, i32
  }
  func.func @transform_3(%arg0: i32, %arg1: i32, %arg2: i32) -> (i32, i32) {
    %c0_i32 = arith.constant 0 : i32
    return %arg0, %arg1 : i32, i32
  }
  func.func @transform_4(%arg0: i32, %arg1: i32, %arg2: i32) -> (i32, i32) {
    %c0_i32 = arith.constant 0 : i32
    return %arg0, %arg1 : i32, i32
  }
}

module attributes {stable_mosaic.version = 11 : i64} {
  func.func @_mm_kernel(%arg0: i32, %arg1: i32, %arg2: i32, %arg3: memref<32x128xbf16, #tpu.memory_space<vmem>>, %arg4: memref<128x128xbf16, #tpu.memory_space<vmem>>, %arg5: memref<2x128xf32, #tpu.memory_space<vmem>>, %arg6: memref<32x128xbf16, #tpu.memory_space<vmem>>, %arg7: memref<32x128xf32, #tpu.memory_space<vmem>>) attributes {dimension_semantics = [#tpu.dimension_semantics<parallel>, #tpu.dimension_semantics<parallel>, #tpu.dimension_semantics<arbitrary>], iteration_bounds = array<i64: 1, 1, 1>, scalar_prefetch = 0 : i64, scratch_operands = 1 : i64, tpu.core_type = #tpu.core_type<tc>, window_params = [{transform_indices = @transform_0, window_bounds = array<i64: 32, 128>}, {transform_indices = @transform_1, window_bounds = array<i64: 128, 128>}, {transform_indices = @transform_2, window_bounds = array<i64: 2, 128>}, {transform_indices = @transform_3, window_bounds = array<i64: 32, 128>}]} {
    %c0_i32 = arith.constant 0 : i32
    %0 = arith.cmpi eq, %arg2, %c0_i32 : i32
    %1 = arith.extui %0 : i1 to i32
    %c0_i32_0 = arith.constant 0 : i32
    %2 = arith.cmpi ne, %1, %c0_i32_0 : i32
    scf.if %2 {
      %cst_10 = arith.constant 0.000000e+00 : f32
      %12 = vector.broadcast %cst_10 : f32 to vector<32x128xf32>
      %c0_11 = arith.constant 0 : index
      %c0_12 = arith.constant 0 : index
      %13 = vector.load %arg7[%c0_11, %c0_12] : memref<32x128xf32, #tpu.memory_space<vmem>>, vector<32x128xf32>
      tpu.vector_store %arg7[%c0_11, %c0_12], %12 {strides = array<i32>} : memref<32x128xf32, #tpu.memory_space<vmem>>, vector<32x128xf32>,
    } else {
    }
    %c0 = arith.constant 0 : index
    %c0_1 = arith.constant 0 : index
    %3 = vector.load %arg7[%c0, %c0_1] : memref<32x128xf32, #tpu.memory_space<vmem>>, vector<32x128xf32>
    %c0_2 = arith.constant 0 : index
    %c0_3 = arith.constant 0 : index
    %4 = vector.load %arg3[%c0_2, %c0_3] : memref<32x128xbf16, #tpu.memory_space<vmem>>, vector<32x128xbf16>
    %c0_4 = arith.constant 0 : index
    %c0_5 = arith.constant 0 : index
    %5 = vector.load %arg4[%c0_4, %c0_5] : memref<128x128xbf16, #tpu.memory_space<vmem>>, vector<128x128xbf16>
    %cst = arith.constant dense<0.000000e+00> : vector<32x128xf32>
    %6 = tpu.matmul %4, %5, %cst {dimension_numbers = #tpu.dot_dimension_numbers<[1], [0], [0], [1], [0, 0, 1, 1], [], []>} : vector<32x128xbf16>, vector<128x128xbf16>, vector<32x128xf32> -> vector<32x128xf32>
    %7 = arith.addf %3, %6 : vector<32x128xf32>
    %c0_6 = arith.constant 0 : index
    %c0_7 = arith.constant 0 : index
    %8 = vector.load %arg7[%c0_6, %c0_7] : memref<32x128xf32, #tpu.memory_space<vmem>>, vector<32x128xf32>
    tpu.vector_store %arg7[%c0_6, %c0_7], %7 {strides = array<i32>} : memref<32x128xf32, #tpu.memory_space<vmem>>, vector<32x128xf32>,
    %c0_i32_8 = arith.constant 0 : i32
    %9 = arith.cmpi eq, %arg2, %c0_i32_8 : i32
    %10 = arith.extui %9 : i1 to i32
    %c0_i32_9 = arith.constant 0 : i32
    %11 = arith.cmpi ne, %10, %c0_i32_9 : i32
    scf.if %11 {
      %c0_10 = arith.constant 0 : index
      %c0_11 = arith.constant 0 : index
      %12 = vector.load %arg7[%c0_10, %c0_11] : memref<32x128xf32, #tpu.memory_space<vmem>>, vector<32x128xf32>
      %c0_12 = arith.constant 0 : index
      %c0_13 = arith.constant 0 : index
      %13 = vector.load %arg5[%c0_12, %c0_13] : memref<2x128xf32, #tpu.memory_space<vmem>>, vector<1x128xf32>
      %14 = vector.broadcast %13 : vector<1x128xf32> to vector<32x128xf32>
      %15 = arith.mulf %12, %14 : vector<32x128xf32>
      %c1 = arith.constant 1 : index
      %c0_14 = arith.constant 0 : index
      %16 = vector.load %arg5[%c1, %c0_14] : memref<2x128xf32, #tpu.memory_space<vmem>>, vector<1x128xf32>
      %17 = vector.broadcast %16 : vector<1x128xf32> to vector<32x128xf32>
      %18 = arith.addf %15, %17 : vector<32x128xf32>
      %19 = arith.truncf %18 : vector<32x128xf32> to vector<32x128xbf16>
      %c0_15 = arith.constant 0 : index
      %c0_16 = arith.constant 0 : index
      %20 = vector.load %arg6[%c0_15, %c0_16] : memref<32x128xbf16, #tpu.memory_space<vmem>>, vector<32x128xbf16>
      tpu.vector_store %arg6[%c0_15, %c0_16], %19 {strides = array<i32>} : memref<32x128xbf16, #tpu.memory_space<vmem>>, vector<32x128xbf16>,
    } else {
    }
    return
  }
  func.func @transform_0(%arg0: i32, %arg1: i32, %arg2: i32) -> (i32, i32) {
    %c0_i32 = arith.constant 0 : i32
    return %arg0, %arg2 : i32, i32
  }
  func.func @transform_1(%arg0: i32, %arg1: i32, %arg2: i32) -> (i32, i32) {
    %c0_i32 = arith.constant 0 : i32
    return %arg2, %arg1 : i32, i32
  }
  func.func @transform_2(%arg0: i32, %arg1: i32, %arg2: i32) -> (i32, i32) {
    %c0_i32 = arith.constant 0 : i32
    %c0_i32_0 = arith.constant 0 : i32
    return %c0_i32, %arg1 : i32, i32
  }
  func.func @transform_3(%arg0: i32, %arg1: i32, %arg2: i32) -> (i32, i32) {
    %c0_i32 = arith.constant 0 : i32
    return %arg0, %arg1 : i32, i32
  }
}

module attributes {stable_mosaic.version = 11 : i64} {
  func.func @_mm_kernel(%arg0: i32, %arg1: i32, %arg2: i32, %arg3: memref<32x384xbf16, #tpu.memory_space<vmem>>, %arg4: memref<384x128xbf16, #tpu.memory_space<vmem>>, %arg5: memref<2x128xf32, #tpu.memory_space<vmem>>, %arg6: memref<32x128xbf16, #tpu.memory_space<vmem>>, %arg7: memref<32x128xf32, #tpu.memory_space<vmem>>) attributes {dimension_semantics = [#tpu.dimension_semantics<parallel>, #tpu.dimension_semantics<parallel>, #tpu.dimension_semantics<arbitrary>], iteration_bounds = array<i64: 1, 1, 3>, scalar_prefetch = 0 : i64, scratch_operands = 1 : i64, tpu.core_type = #tpu.core_type<tc>, window_params = [{transform_indices = @transform_0, window_bounds = array<i64: 32, 384>}, {transform_indices = @transform_1, window_bounds = array<i64: 384, 128>}, {transform_indices = @transform_2, window_bounds = array<i64: 2, 128>}, {transform_indices = @transform_3, window_bounds = array<i64: 32, 128>}]} {
    %c0_i32 = arith.constant 0 : i32
    %0 = arith.cmpi eq, %arg2, %c0_i32 : i32
    %1 = arith.extui %0 : i1 to i32
    %c0_i32_0 = arith.constant 0 : i32
    %2 = arith.cmpi ne, %1, %c0_i32_0 : i32
    scf.if %2 {
      %cst_9 = arith.constant 0.000000e+00 : f32
      %12 = vector.broadcast %cst_9 : f32 to vector<32x128xf32>
      %c0_10 = arith.constant 0 : index
      %c0_11 = arith.constant 0 : index
      %13 = vector.load %arg7[%c0_10, %c0_11] : memref<32x128xf32, #tpu.memory_space<vmem>>, vector<32x128xf32>
      tpu.vector_store %arg7[%c0_10, %c0_11], %12 {strides = array<i32>} : memref<32x128xf32, #tpu.memory_space<vmem>>, vector<32x128xf32>,
    } else {
    }
    %c0 = arith.constant 0 : index
    %c0_1 = arith.constant 0 : index
    %3 = vector.load %arg7[%c0, %c0_1] : memref<32x128xf32, #tpu.memory_space<vmem>>, vector<32x128xf32>
    %c0_2 = arith.constant 0 : index
    %c0_3 = arith.constant 0 : index
    %4 = vector.load %arg3[%c0_2, %c0_3] : memref<32x384xbf16, #tpu.memory_space<vmem>>, vector<32x384xbf16>
    %c0_4 = arith.constant 0 : index
    %c0_5 = arith.constant 0 : index
    %5 = vector.load %arg4[%c0_4, %c0_5] : memref<384x128xbf16, #tpu.memory_space<vmem>>, vector<384x128xbf16>
    %cst = arith.constant dense<0.000000e+00> : vector<32x128xf32>
    %6 = tpu.matmul %4, %5, %cst {dimension_numbers = #tpu.dot_dimension_numbers<[1], [0], [0], [1], [0, 0, 1, 1], [], []>} : vector<32x384xbf16>, vector<384x128xbf16>, vector<32x128xf32> -> vector<32x128xf32>
    %7 = arith.addf %3, %6 : vector<32x128xf32>
    %c0_6 = arith.constant 0 : index
    %c0_7 = arith.constant 0 : index
    %8 = vector.load %arg7[%c0_6, %c0_7] : memref<32x128xf32, #tpu.memory_space<vmem>>, vector<32x128xf32>
    tpu.vector_store %arg7[%c0_6, %c0_7], %7 {strides = array<i32>} : memref<32x128xf32, #tpu.memory_space<vmem>>, vector<32x128xf32>,
    %c2_i32 = arith.constant 2 : i32
    %9 = arith.cmpi eq, %arg2, %c2_i32 : i32
    %10 = arith.extui %9 : i1 to i32
    %c0_i32_8 = arith.constant 0 : i32
    %11 = arith.cmpi ne, %10, %c0_i32_8 : i32
    scf.if %11 {
      %c0_9 = arith.constant 0 : index
      %c0_10 = arith.constant 0 : index
      %12 = vector.load %arg7[%c0_9, %c0_10] : memref<32x128xf32, #tpu.memory_space<vmem>>, vector<32x128xf32>
      %c0_11 = arith.constant 0 : index
      %c0_12 = arith.constant 0 : index
      %13 = vector.load %arg5[%c0_11, %c0_12] : memref<2x128xf32, #tpu.memory_space<vmem>>, vector<1x128xf32>
      %14 = vector.broadcast %13 : vector<1x128xf32> to vector<32x128xf32>
      %15 = arith.mulf %12, %14 : vector<32x128xf32>
      %c1 = arith.constant 1 : index
      %c0_13 = arith.constant 0 : index
      %16 = vector.load %arg5[%c1, %c0_13] : memref<2x128xf32, #tpu.memory_space<vmem>>, vector<1x128xf32>
      %17 = vector.broadcast %16 : vector<1x128xf32> to vector<32x128xf32>
      %18 = arith.addf %15, %17 : vector<32x128xf32>
      %cst_14 = arith.constant 0.000000e+00 : f32
      %19 = vector.broadcast %cst_14 : f32 to vector<32x128xf32>
      %20 = arith.maximumf %18, %19 : vector<32x128xf32>
      %21 = arith.truncf %20 : vector<32x128xf32> to vector<32x128xbf16>
      %c0_15 = arith.constant 0 : index
      %c0_16 = arith.constant 0 : index
      %22 = vector.load %arg6[%c0_15, %c0_16] : memref<32x128xbf16, #tpu.memory_space<vmem>>, vector<32x128xbf16>
      tpu.vector_store %arg6[%c0_15, %c0_16], %21 {strides = array<i32>} : memref<32x128xbf16, #tpu.memory_space<vmem>>, vector<32x128xbf16>,
    } else {
    }
    return
  }
  func.func @transform_0(%arg0: i32, %arg1: i32, %arg2: i32) -> (i32, i32) {
    %c0_i32 = arith.constant 0 : i32
    return %arg0, %arg2 : i32, i32
  }
  func.func @transform_1(%arg0: i32, %arg1: i32, %arg2: i32) -> (i32, i32) {
    %c0_i32 = arith.constant 0 : i32
    return %arg2, %arg1 : i32, i32
  }
  func.func @transform_2(%arg0: i32, %arg1: i32, %arg2: i32) -> (i32, i32) {
    %c0_i32 = arith.constant 0 : i32
    %c0_i32_0 = arith.constant 0 : i32
    return %c0_i32, %arg1 : i32, i32
  }
  func.func @transform_3(%arg0: i32, %arg1: i32, %arg2: i32) -> (i32, i32) {
    %c0_i32 = arith.constant 0 : i32
    return %arg0, %arg1 : i32, i32
  }
}

module attributes {stable_mosaic.version = 11 : i64} {
  func.func @_mm_kernel(%arg0: i32, %arg1: i32, %arg2: i32, %arg3: memref<16x384xbf16, #tpu.memory_space<vmem>>, %arg4: memref<384x256xbf16, #tpu.memory_space<vmem>>, %arg5: memref<2x256xf32, #tpu.memory_space<vmem>>, %arg6: memref<16x256xbf16, #tpu.memory_space<vmem>>, %arg7: memref<16x256xf32, #tpu.memory_space<vmem>>) attributes {dimension_semantics = [#tpu.dimension_semantics<parallel>, #tpu.dimension_semantics<parallel>, #tpu.dimension_semantics<arbitrary>], iteration_bounds = array<i64: 1, 1, 3>, scalar_prefetch = 0 : i64, scratch_operands = 1 : i64, tpu.core_type = #tpu.core_type<tc>, window_params = [{transform_indices = @transform_0, window_bounds = array<i64: 16, 384>}, {transform_indices = @transform_1, window_bounds = array<i64: 384, 256>}, {transform_indices = @transform_2, window_bounds = array<i64: 2, 256>}, {transform_indices = @transform_3, window_bounds = array<i64: 16, 256>}]} {
    %c0_i32 = arith.constant 0 : i32
    %0 = arith.cmpi eq, %arg2, %c0_i32 : i32
    %1 = arith.extui %0 : i1 to i32
    %c0_i32_0 = arith.constant 0 : i32
    %2 = arith.cmpi ne, %1, %c0_i32_0 : i32
    scf.if %2 {
      %cst_9 = arith.constant 0.000000e+00 : f32
      %12 = vector.broadcast %cst_9 : f32 to vector<16x256xf32>
      %c0_10 = arith.constant 0 : index
      %c0_11 = arith.constant 0 : index
      %13 = vector.load %arg7[%c0_10, %c0_11] : memref<16x256xf32, #tpu.memory_space<vmem>>, vector<16x256xf32>
      tpu.vector_store %arg7[%c0_10, %c0_11], %12 {strides = array<i32>} : memref<16x256xf32, #tpu.memory_space<vmem>>, vector<16x256xf32>,
    } else {
    }
    %c0 = arith.constant 0 : index
    %c0_1 = arith.constant 0 : index
    %3 = vector.load %arg7[%c0, %c0_1] : memref<16x256xf32, #tpu.memory_space<vmem>>, vector<16x256xf32>
    %c0_2 = arith.constant 0 : index
    %c0_3 = arith.constant 0 : index
    %4 = vector.load %arg3[%c0_2, %c0_3] : memref<16x384xbf16, #tpu.memory_space<vmem>>, vector<16x384xbf16>
    %c0_4 = arith.constant 0 : index
    %c0_5 = arith.constant 0 : index
    %5 = vector.load %arg4[%c0_4, %c0_5] : memref<384x256xbf16, #tpu.memory_space<vmem>>, vector<384x256xbf16>
    %cst = arith.constant dense<0.000000e+00> : vector<16x256xf32>
    %6 = tpu.matmul %4, %5, %cst {dimension_numbers = #tpu.dot_dimension_numbers<[1], [0], [0], [1], [0, 0, 1, 1], [], []>} : vector<16x384xbf16>, vector<384x256xbf16>, vector<16x256xf32> -> vector<16x256xf32>
    %7 = arith.addf %3, %6 : vector<16x256xf32>
    %c0_6 = arith.constant 0 : index
    %c0_7 = arith.constant 0 : index
    %8 = vector.load %arg7[%c0_6, %c0_7] : memref<16x256xf32, #tpu.memory_space<vmem>>, vector<16x256xf32>
    tpu.vector_store %arg7[%c0_6, %c0_7], %7 {strides = array<i32>} : memref<16x256xf32, #tpu.memory_space<vmem>>, vector<16x256xf32>,
    %c2_i32 = arith.constant 2 : i32
    %9 = arith.cmpi eq, %arg2, %c2_i32 : i32
    %10 = arith.extui %9 : i1 to i32
    %c0_i32_8 = arith.constant 0 : i32
    %11 = arith.cmpi ne, %10, %c0_i32_8 : i32
    scf.if %11 {
      %c0_9 = arith.constant 0 : index
      %c0_10 = arith.constant 0 : index
      %12 = vector.load %arg7[%c0_9, %c0_10] : memref<16x256xf32, #tpu.memory_space<vmem>>, vector<16x256xf32>
      %c0_11 = arith.constant 0 : index
      %c0_12 = arith.constant 0 : index
      %13 = vector.load %arg5[%c0_11, %c0_12] : memref<2x256xf32, #tpu.memory_space<vmem>>, vector<1x256xf32>
      %14 = vector.broadcast %13 : vector<1x256xf32> to vector<16x256xf32>
      %15 = arith.mulf %12, %14 : vector<16x256xf32>
      %c1 = arith.constant 1 : index
      %c0_13 = arith.constant 0 : index
      %16 = vector.load %arg5[%c1, %c0_13] : memref<2x256xf32, #tpu.memory_space<vmem>>, vector<1x256xf32>
      %17 = vector.broadcast %16 : vector<1x256xf32> to vector<16x256xf32>
      %18 = arith.addf %15, %17 : vector<16x256xf32>
      %cst_14 = arith.constant 0.000000e+00 : f32
      %19 = vector.broadcast %cst_14 : f32 to vector<16x256xf32>
      %20 = arith.maximumf %18, %19 : vector<16x256xf32>
      %21 = arith.truncf %20 : vector<16x256xf32> to vector<16x256xbf16>
      %c0_15 = arith.constant 0 : index
      %c0_16 = arith.constant 0 : index
      %22 = vector.load %arg6[%c0_15, %c0_16] : memref<16x256xbf16, #tpu.memory_space<vmem>>, vector<16x256xbf16>
      tpu.vector_store %arg6[%c0_15, %c0_16], %21 {strides = array<i32>} : memref<16x256xbf16, #tpu.memory_space<vmem>>, vector<16x256xbf16>,
    } else {
    }
    return
  }
  func.func @transform_0(%arg0: i32, %arg1: i32, %arg2: i32) -> (i32, i32) {
    %c0_i32 = arith.constant 0 : i32
    return %arg0, %arg2 : i32, i32
  }
  func.func @transform_1(%arg0: i32, %arg1: i32, %arg2: i32) -> (i32, i32) {
    %c0_i32 = arith.constant 0 : i32
    return %arg2, %arg1 : i32, i32
  }
  func.func @transform_2(%arg0: i32, %arg1: i32, %arg2: i32) -> (i32, i32) {
    %c0_i32 = arith.constant 0 : i32
    %c0_i32_0 = arith.constant 0 : i32
    return %c0_i32, %arg1 : i32, i32
  }
  func.func @transform_3(%arg0: i32, %arg1: i32, %arg2: i32) -> (i32, i32) {
    %c0_i32 = arith.constant 0 : i32
    return %arg0, %arg1 : i32, i32
  }
}

module attributes {stable_mosaic.version = 11 : i64} {
  func.func @_mm_kernel(%arg0: i32, %arg1: i32, %arg2: i32, %arg3: memref<16x128xbf16, #tpu.memory_space<vmem>>, %arg4: memref<128x256xbf16, #tpu.memory_space<vmem>>, %arg5: memref<2x256xf32, #tpu.memory_space<vmem>>, %arg6: memref<16x256xbf16, #tpu.memory_space<vmem>>, %arg7: memref<16x256xf32, #tpu.memory_space<vmem>>) attributes {dimension_semantics = [#tpu.dimension_semantics<parallel>, #tpu.dimension_semantics<parallel>, #tpu.dimension_semantics<arbitrary>], iteration_bounds = array<i64: 1, 1, 1>, scalar_prefetch = 0 : i64, scratch_operands = 1 : i64, tpu.core_type = #tpu.core_type<tc>, window_params = [{transform_indices = @transform_0, window_bounds = array<i64: 16, 128>}, {transform_indices = @transform_1, window_bounds = array<i64: 128, 256>}, {transform_indices = @transform_2, window_bounds = array<i64: 2, 256>}, {transform_indices = @transform_3, window_bounds = array<i64: 16, 256>}]} {
    %c0_i32 = arith.constant 0 : i32
    %0 = arith.cmpi eq, %arg2, %c0_i32 : i32
    %1 = arith.extui %0 : i1 to i32
    %c0_i32_0 = arith.constant 0 : i32
    %2 = arith.cmpi ne, %1, %c0_i32_0 : i32
    scf.if %2 {
      %cst_10 = arith.constant 0.000000e+00 : f32
      %12 = vector.broadcast %cst_10 : f32 to vector<16x256xf32>
      %c0_11 = arith.constant 0 : index
      %c0_12 = arith.constant 0 : index
      %13 = vector.load %arg7[%c0_11, %c0_12] : memref<16x256xf32, #tpu.memory_space<vmem>>, vector<16x256xf32>
      tpu.vector_store %arg7[%c0_11, %c0_12], %12 {strides = array<i32>} : memref<16x256xf32, #tpu.memory_space<vmem>>, vector<16x256xf32>,
    } else {
    }
    %c0 = arith.constant 0 : index
    %c0_1 = arith.constant 0 : index
    %3 = vector.load %arg7[%c0, %c0_1] : memref<16x256xf32, #tpu.memory_space<vmem>>, vector<16x256xf32>
    %c0_2 = arith.constant 0 : index
    %c0_3 = arith.constant 0 : index
    %4 = vector.load %arg3[%c0_2, %c0_3] : memref<16x128xbf16, #tpu.memory_space<vmem>>, vector<16x128xbf16>
    %c0_4 = arith.constant 0 : index
    %c0_5 = arith.constant 0 : index
    %5 = vector.load %arg4[%c0_4, %c0_5] : memref<128x256xbf16, #tpu.memory_space<vmem>>, vector<128x256xbf16>
    %cst = arith.constant dense<0.000000e+00> : vector<16x256xf32>
    %6 = tpu.matmul %4, %5, %cst {dimension_numbers = #tpu.dot_dimension_numbers<[1], [0], [0], [1], [0, 0, 1, 1], [], []>} : vector<16x128xbf16>, vector<128x256xbf16>, vector<16x256xf32> -> vector<16x256xf32>
    %7 = arith.addf %3, %6 : vector<16x256xf32>
    %c0_6 = arith.constant 0 : index
    %c0_7 = arith.constant 0 : index
    %8 = vector.load %arg7[%c0_6, %c0_7] : memref<16x256xf32, #tpu.memory_space<vmem>>, vector<16x256xf32>
    tpu.vector_store %arg7[%c0_6, %c0_7], %7 {strides = array<i32>} : memref<16x256xf32, #tpu.memory_space<vmem>>, vector<16x256xf32>,
    %c0_i32_8 = arith.constant 0 : i32
    %9 = arith.cmpi eq, %arg2, %c0_i32_8 : i32
    %10 = arith.extui %9 : i1 to i32
    %c0_i32_9 = arith.constant 0 : i32
    %11 = arith.cmpi ne, %10, %c0_i32_9 : i32
    scf.if %11 {
      %c0_10 = arith.constant 0 : index
      %c0_11 = arith.constant 0 : index
      %12 = vector.load %arg7[%c0_10, %c0_11] : memref<16x256xf32, #tpu.memory_space<vmem>>, vector<16x256xf32>
      %c0_12 = arith.constant 0 : index
      %c0_13 = arith.constant 0 : index
      %13 = vector.load %arg5[%c0_12, %c0_13] : memref<2x256xf32, #tpu.memory_space<vmem>>, vector<1x256xf32>
      %14 = vector.broadcast %13 : vector<1x256xf32> to vector<16x256xf32>
      %15 = arith.mulf %12, %14 : vector<16x256xf32>
      %c1 = arith.constant 1 : index
      %c0_14 = arith.constant 0 : index
      %16 = vector.load %arg5[%c1, %c0_14] : memref<2x256xf32, #tpu.memory_space<vmem>>, vector<1x256xf32>
      %17 = vector.broadcast %16 : vector<1x256xf32> to vector<16x256xf32>
      %18 = arith.addf %15, %17 : vector<16x256xf32>
      %19 = arith.truncf %18 : vector<16x256xf32> to vector<16x256xbf16>
      %c0_15 = arith.constant 0 : index
      %c0_16 = arith.constant 0 : index
      %20 = vector.load %arg6[%c0_15, %c0_16] : memref<16x256xbf16, #tpu.memory_space<vmem>>, vector<16x256xbf16>
      tpu.vector_store %arg6[%c0_15, %c0_16], %19 {strides = array<i32>} : memref<16x256xbf16, #tpu.memory_space<vmem>>, vector<16x256xbf16>,
    } else {
    }
    return
  }
  func.func @transform_0(%arg0: i32, %arg1: i32, %arg2: i32) -> (i32, i32) {
    %c0_i32 = arith.constant 0 : i32
    return %arg0, %arg2 : i32, i32
  }
  func.func @transform_1(%arg0: i32, %arg1: i32, %arg2: i32) -> (i32, i32) {
    %c0_i32 = arith.constant 0 : i32
    return %arg2, %arg1 : i32, i32
  }
  func.func @transform_2(%arg0: i32, %arg1: i32, %arg2: i32) -> (i32, i32) {
    %c0_i32 = arith.constant 0 : i32
    %c0_i32_0 = arith.constant 0 : i32
    return %c0_i32, %arg1 : i32, i32
  }
  func.func @transform_3(%arg0: i32, %arg1: i32, %arg2: i32) -> (i32, i32) {
    %c0_i32 = arith.constant 0 : i32
    return %arg0, %arg1 : i32, i32
  }
}

module attributes {stable_mosaic.version = 11 : i64} {
  func.func @_mm_kernel(%arg0: i32, %arg1: i32, %arg2: i32, %arg3: memref<16x384xbf16, #tpu.memory_space<vmem>>, %arg4: memref<384x256xbf16, #tpu.memory_space<vmem>>, %arg5: memref<2x256xf32, #tpu.memory_space<vmem>>, %arg6: memref<16x256xbf16, #tpu.memory_space<vmem>>, %arg7: memref<16x256xf32, #tpu.memory_space<vmem>>) attributes {dimension_semantics = [#tpu.dimension_semantics<parallel>, #tpu.dimension_semantics<parallel>, #tpu.dimension_semantics<arbitrary>], iteration_bounds = array<i64: 1, 1, 6>, scalar_prefetch = 0 : i64, scratch_operands = 1 : i64, tpu.core_type = #tpu.core_type<tc>, window_params = [{transform_indices = @transform_0, window_bounds = array<i64: 16, 384>}, {transform_indices = @transform_1, window_bounds = array<i64: 384, 256>}, {transform_indices = @transform_2, window_bounds = array<i64: 2, 256>}, {transform_indices = @transform_3, window_bounds = array<i64: 16, 256>}]} {
    %c0_i32 = arith.constant 0 : i32
    %0 = arith.cmpi eq, %arg2, %c0_i32 : i32
    %1 = arith.extui %0 : i1 to i32
    %c0_i32_0 = arith.constant 0 : i32
    %2 = arith.cmpi ne, %1, %c0_i32_0 : i32
    scf.if %2 {
      %cst_9 = arith.constant 0.000000e+00 : f32
      %12 = vector.broadcast %cst_9 : f32 to vector<16x256xf32>
      %c0_10 = arith.constant 0 : index
      %c0_11 = arith.constant 0 : index
      %13 = vector.load %arg7[%c0_10, %c0_11] : memref<16x256xf32, #tpu.memory_space<vmem>>, vector<16x256xf32>
      tpu.vector_store %arg7[%c0_10, %c0_11], %12 {strides = array<i32>} : memref<16x256xf32, #tpu.memory_space<vmem>>, vector<16x256xf32>,
    } else {
    }
    %c0 = arith.constant 0 : index
    %c0_1 = arith.constant 0 : index
    %3 = vector.load %arg7[%c0, %c0_1] : memref<16x256xf32, #tpu.memory_space<vmem>>, vector<16x256xf32>
    %c0_2 = arith.constant 0 : index
    %c0_3 = arith.constant 0 : index
    %4 = vector.load %arg3[%c0_2, %c0_3] : memref<16x384xbf16, #tpu.memory_space<vmem>>, vector<16x384xbf16>
    %c0_4 = arith.constant 0 : index
    %c0_5 = arith.constant 0 : index
    %5 = vector.load %arg4[%c0_4, %c0_5] : memref<384x256xbf16, #tpu.memory_space<vmem>>, vector<384x256xbf16>
    %cst = arith.constant dense<0.000000e+00> : vector<16x256xf32>
    %6 = tpu.matmul %4, %5, %cst {dimension_numbers = #tpu.dot_dimension_numbers<[1], [0], [0], [1], [0, 0, 1, 1], [], []>} : vector<16x384xbf16>, vector<384x256xbf16>, vector<16x256xf32> -> vector<16x256xf32>
    %7 = arith.addf %3, %6 : vector<16x256xf32>
    %c0_6 = arith.constant 0 : index
    %c0_7 = arith.constant 0 : index
    %8 = vector.load %arg7[%c0_6, %c0_7] : memref<16x256xf32, #tpu.memory_space<vmem>>, vector<16x256xf32>
    tpu.vector_store %arg7[%c0_6, %c0_7], %7 {strides = array<i32>} : memref<16x256xf32, #tpu.memory_space<vmem>>, vector<16x256xf32>,
    %c5_i32 = arith.constant 5 : i32
    %9 = arith.cmpi eq, %arg2, %c5_i32 : i32
    %10 = arith.extui %9 : i1 to i32
    %c0_i32_8 = arith.constant 0 : i32
    %11 = arith.cmpi ne, %10, %c0_i32_8 : i32
    scf.if %11 {
      %c0_9 = arith.constant 0 : index
      %c0_10 = arith.constant 0 : index
      %12 = vector.load %arg7[%c0_9, %c0_10] : memref<16x256xf32, #tpu.memory_space<vmem>>, vector<16x256xf32>
      %c0_11 = arith.constant 0 : index
      %c0_12 = arith.constant 0 : index
      %13 = vector.load %arg5[%c0_11, %c0_12] : memref<2x256xf32, #tpu.memory_space<vmem>>, vector<1x256xf32>
      %14 = vector.broadcast %13 : vector<1x256xf32> to vector<16x256xf32>
      %15 = arith.mulf %12, %14 : vector<16x256xf32>
      %c1 = arith.constant 1 : index
      %c0_13 = arith.constant 0 : index
      %16 = vector.load %arg5[%c1, %c0_13] : memref<2x256xf32, #tpu.memory_space<vmem>>, vector<1x256xf32>
      %17 = vector.broadcast %16 : vector<1x256xf32> to vector<16x256xf32>
      %18 = arith.addf %15, %17 : vector<16x256xf32>
      %cst_14 = arith.constant 0.000000e+00 : f32
      %19 = vector.broadcast %cst_14 : f32 to vector<16x256xf32>
      %20 = arith.maximumf %18, %19 : vector<16x256xf32>
      %21 = arith.truncf %20 : vector<16x256xf32> to vector<16x256xbf16>
      %c0_15 = arith.constant 0 : index
      %c0_16 = arith.constant 0 : index
      %22 = vector.load %arg6[%c0_15, %c0_16] : memref<16x256xbf16, #tpu.memory_space<vmem>>, vector<16x256xbf16>
      tpu.vector_store %arg6[%c0_15, %c0_16], %21 {strides = array<i32>} : memref<16x256xbf16, #tpu.memory_space<vmem>>, vector<16x256xbf16>,
    } else {
    }
    return
  }
  func.func @transform_0(%arg0: i32, %arg1: i32, %arg2: i32) -> (i32, i32) {
    %c0_i32 = arith.constant 0 : i32
    return %arg0, %arg2 : i32, i32
  }
  func.func @transform_1(%arg0: i32, %arg1: i32, %arg2: i32) -> (i32, i32) {
    %c0_i32 = arith.constant 0 : i32
    return %arg2, %arg1 : i32, i32
  }
  func.func @transform_2(%arg0: i32, %arg1: i32, %arg2: i32) -> (i32, i32) {
    %c0_i32 = arith.constant 0 : i32
    %c0_i32_0 = arith.constant 0 : i32
    return %c0_i32, %arg1 : i32, i32
  }
  func.func @transform_3(%arg0: i32, %arg1: i32, %arg2: i32) -> (i32, i32) {
    %c0_i32 = arith.constant 0 : i32
    return %arg0, %arg1 : i32, i32
  }
}

module attributes {stable_mosaic.version = 11 : i64} {
  func.func @_mm_kernel(%arg0: i32, %arg1: i32, %arg2: i32, %arg3: memref<16x384xbf16, #tpu.memory_space<vmem>>, %arg4: memref<384x256xbf16, #tpu.memory_space<vmem>>, %arg5: memref<2x256xf32, #tpu.memory_space<vmem>>, %arg6: memref<16x256xbf16, #tpu.memory_space<vmem>>, %arg7: memref<16x256xbf16, #tpu.memory_space<vmem>>, %arg8: memref<16x256xf32, #tpu.memory_space<vmem>>) attributes {dimension_semantics = [#tpu.dimension_semantics<parallel>, #tpu.dimension_semantics<parallel>, #tpu.dimension_semantics<arbitrary>], iteration_bounds = array<i64: 1, 1, 6>, scalar_prefetch = 0 : i64, scratch_operands = 1 : i64, tpu.core_type = #tpu.core_type<tc>, window_params = [{transform_indices = @transform_0, window_bounds = array<i64: 16, 384>}, {transform_indices = @transform_1, window_bounds = array<i64: 384, 256>}, {transform_indices = @transform_2, window_bounds = array<i64: 2, 256>}, {transform_indices = @transform_3, window_bounds = array<i64: 16, 256>}, {transform_indices = @transform_4, window_bounds = array<i64: 16, 256>}]} {
    %c0_i32 = arith.constant 0 : i32
    %0 = arith.cmpi eq, %arg2, %c0_i32 : i32
    %1 = arith.extui %0 : i1 to i32
    %c0_i32_0 = arith.constant 0 : i32
    %2 = arith.cmpi ne, %1, %c0_i32_0 : i32
    scf.if %2 {
      %cst_9 = arith.constant 0.000000e+00 : f32
      %12 = vector.broadcast %cst_9 : f32 to vector<16x256xf32>
      %c0_10 = arith.constant 0 : index
      %c0_11 = arith.constant 0 : index
      %13 = vector.load %arg8[%c0_10, %c0_11] : memref<16x256xf32, #tpu.memory_space<vmem>>, vector<16x256xf32>
      tpu.vector_store %arg8[%c0_10, %c0_11], %12 {strides = array<i32>} : memref<16x256xf32, #tpu.memory_space<vmem>>, vector<16x256xf32>,
    } else {
    }
    %c0 = arith.constant 0 : index
    %c0_1 = arith.constant 0 : index
    %3 = vector.load %arg8[%c0, %c0_1] : memref<16x256xf32, #tpu.memory_space<vmem>>, vector<16x256xf32>
    %c0_2 = arith.constant 0 : index
    %c0_3 = arith.constant 0 : index
    %4 = vector.load %arg3[%c0_2, %c0_3] : memref<16x384xbf16, #tpu.memory_space<vmem>>, vector<16x384xbf16>
    %c0_4 = arith.constant 0 : index
    %c0_5 = arith.constant 0 : index
    %5 = vector.load %arg4[%c0_4, %c0_5] : memref<384x256xbf16, #tpu.memory_space<vmem>>, vector<384x256xbf16>
    %cst = arith.constant dense<0.000000e+00> : vector<16x256xf32>
    %6 = tpu.matmul %4, %5, %cst {dimension_numbers = #tpu.dot_dimension_numbers<[1], [0], [0], [1], [0, 0, 1, 1], [], []>} : vector<16x384xbf16>, vector<384x256xbf16>, vector<16x256xf32> -> vector<16x256xf32>
    %7 = arith.addf %3, %6 : vector<16x256xf32>
    %c0_6 = arith.constant 0 : index
    %c0_7 = arith.constant 0 : index
    %8 = vector.load %arg8[%c0_6, %c0_7] : memref<16x256xf32, #tpu.memory_space<vmem>>, vector<16x256xf32>
    tpu.vector_store %arg8[%c0_6, %c0_7], %7 {strides = array<i32>} : memref<16x256xf32, #tpu.memory_space<vmem>>, vector<16x256xf32>,
    %c5_i32 = arith.constant 5 : i32
    %9 = arith.cmpi eq, %arg2, %c5_i32 : i32
    %10 = arith.extui %9 : i1 to i32
    %c0_i32_8 = arith.constant 0 : i32
    %11 = arith.cmpi ne, %10, %c0_i32_8 : i32
    scf.if %11 {
      %c0_9 = arith.constant 0 : index
      %c0_10 = arith.constant 0 : index
      %12 = vector.load %arg8[%c0_9, %c0_10] : memref<16x256xf32, #tpu.memory_space<vmem>>, vector<16x256xf32>
      %c0_11 = arith.constant 0 : index
      %c0_12 = arith.constant 0 : index
      %13 = vector.load %arg5[%c0_11, %c0_12] : memref<2x256xf32, #tpu.memory_space<vmem>>, vector<1x256xf32>
      %14 = vector.broadcast %13 : vector<1x256xf32> to vector<16x256xf32>
      %15 = arith.mulf %12, %14 : vector<16x256xf32>
      %c1 = arith.constant 1 : index
      %c0_13 = arith.constant 0 : index
      %16 = vector.load %arg5[%c1, %c0_13] : memref<2x256xf32, #tpu.memory_space<vmem>>, vector<1x256xf32>
      %17 = vector.broadcast %16 : vector<1x256xf32> to vector<16x256xf32>
      %18 = arith.addf %15, %17 : vector<16x256xf32>
      %c0_14 = arith.constant 0 : index
      %c0_15 = arith.constant 0 : index
      %19 = vector.load %arg6[%c0_14, %c0_15] : memref<16x256xbf16, #tpu.memory_space<vmem>>, vector<16x256xbf16>
      %20 = arith.extf %19 : vector<16x256xbf16> to vector<16x256xf32>
      %21 = arith.addf %18, %20 : vector<16x256xf32>
      %cst_16 = arith.constant 0.000000e+00 : f32
      %22 = vector.broadcast %cst_16 : f32 to vector<16x256xf32>
      %23 = arith.maximumf %21, %22 : vector<16x256xf32>
      %24 = arith.truncf %23 : vector<16x256xf32> to vector<16x256xbf16>
      %c0_17 = arith.constant 0 : index
      %c0_18 = arith.constant 0 : index
      %25 = vector.load %arg7[%c0_17, %c0_18] : memref<16x256xbf16, #tpu.memory_space<vmem>>, vector<16x256xbf16>
      tpu.vector_store %arg7[%c0_17, %c0_18], %24 {strides = array<i32>} : memref<16x256xbf16, #tpu.memory_space<vmem>>, vector<16x256xbf16>,
    } else {
    }
    return
  }
  func.func @transform_0(%arg0: i32, %arg1: i32, %arg2: i32) -> (i32, i32) {
    %c0_i32 = arith.constant 0 : i32
    return %arg0, %arg2 : i32, i32
  }
  func.func @transform_1(%arg0: i32, %arg1: i32, %arg2: i32) -> (i32, i32) {
    %c0_i32 = arith.constant 0 : i32
    return %arg2, %arg1 : i32, i32
  }
  func.func @transform_2(%arg0: i32, %arg1: i32, %arg2: i32) -> (i32, i32) {
    %c0_i32 = arith.constant 0 : i32
    %c0_i32_0 = arith.constant 0 : i32
    return %c0_i32, %arg1 : i32, i32
  }
  func.func @transform_3(%arg0: i32, %arg1: i32, %arg2: i32) -> (i32, i32) {
    %c0_i32 = arith.constant 0 : i32
    return %arg0, %arg1 : i32, i32
  }
  func.func @transform_4(%arg0: i32, %arg1: i32, %arg2: i32) -> (i32, i32) {
    %c0_i32 = arith.constant 0 : i32
    return %arg0, %arg1 : i32, i32
  }
}

module attributes {stable_mosaic.version = 11 : i64} {
  func.func @_mm_kernel(%arg0: i32, %arg1: i32, %arg2: i32, %arg3: memref<16x384xbf16, #tpu.memory_space<vmem>>, %arg4: memref<384x256xbf16, #tpu.memory_space<vmem>>, %arg5: memref<2x256xf32, #tpu.memory_space<vmem>>, %arg6: memref<16x256xbf16, #tpu.memory_space<vmem>>, %arg7: memref<16x256xf32, #tpu.memory_space<vmem>>) attributes {dimension_semantics = [#tpu.dimension_semantics<parallel>, #tpu.dimension_semantics<parallel>, #tpu.dimension_semantics<arbitrary>], iteration_bounds = array<i64: 1, 2, 6>, scalar_prefetch = 0 : i64, scratch_operands = 1 : i64, tpu.core_type = #tpu.core_type<tc>, window_params = [{transform_indices = @transform_0, window_bounds = array<i64: 16, 384>}, {transform_indices = @transform_1, window_bounds = array<i64: 384, 256>}, {transform_indices = @transform_2, window_bounds = array<i64: 2, 256>}, {transform_indices = @transform_3, window_bounds = array<i64: 16, 256>}]} {
    %c0_i32 = arith.constant 0 : i32
    %0 = arith.cmpi eq, %arg2, %c0_i32 : i32
    %1 = arith.extui %0 : i1 to i32
    %c0_i32_0 = arith.constant 0 : i32
    %2 = arith.cmpi ne, %1, %c0_i32_0 : i32
    scf.if %2 {
      %cst_9 = arith.constant 0.000000e+00 : f32
      %12 = vector.broadcast %cst_9 : f32 to vector<16x256xf32>
      %c0_10 = arith.constant 0 : index
      %c0_11 = arith.constant 0 : index
      %13 = vector.load %arg7[%c0_10, %c0_11] : memref<16x256xf32, #tpu.memory_space<vmem>>, vector<16x256xf32>
      tpu.vector_store %arg7[%c0_10, %c0_11], %12 {strides = array<i32>} : memref<16x256xf32, #tpu.memory_space<vmem>>, vector<16x256xf32>,
    } else {
    }
    %c0 = arith.constant 0 : index
    %c0_1 = arith.constant 0 : index
    %3 = vector.load %arg7[%c0, %c0_1] : memref<16x256xf32, #tpu.memory_space<vmem>>, vector<16x256xf32>
    %c0_2 = arith.constant 0 : index
    %c0_3 = arith.constant 0 : index
    %4 = vector.load %arg3[%c0_2, %c0_3] : memref<16x384xbf16, #tpu.memory_space<vmem>>, vector<16x384xbf16>
    %c0_4 = arith.constant 0 : index
    %c0_5 = arith.constant 0 : index
    %5 = vector.load %arg4[%c0_4, %c0_5] : memref<384x256xbf16, #tpu.memory_space<vmem>>, vector<384x256xbf16>
    %cst = arith.constant dense<0.000000e+00> : vector<16x256xf32>
    %6 = tpu.matmul %4, %5, %cst {dimension_numbers = #tpu.dot_dimension_numbers<[1], [0], [0], [1], [0, 0, 1, 1], [], []>} : vector<16x384xbf16>, vector<384x256xbf16>, vector<16x256xf32> -> vector<16x256xf32>
    %7 = arith.addf %3, %6 : vector<16x256xf32>
    %c0_6 = arith.constant 0 : index
    %c0_7 = arith.constant 0 : index
    %8 = vector.load %arg7[%c0_6, %c0_7] : memref<16x256xf32, #tpu.memory_space<vmem>>, vector<16x256xf32>
    tpu.vector_store %arg7[%c0_6, %c0_7], %7 {strides = array<i32>} : memref<16x256xf32, #tpu.memory_space<vmem>>, vector<16x256xf32>,
    %c5_i32 = arith.constant 5 : i32
    %9 = arith.cmpi eq, %arg2, %c5_i32 : i32
    %10 = arith.extui %9 : i1 to i32
    %c0_i32_8 = arith.constant 0 : i32
    %11 = arith.cmpi ne, %10, %c0_i32_8 : i32
    scf.if %11 {
      %c0_9 = arith.constant 0 : index
      %c0_10 = arith.constant 0 : index
      %12 = vector.load %arg7[%c0_9, %c0_10] : memref<16x256xf32, #tpu.memory_space<vmem>>, vector<16x256xf32>
      %c0_11 = arith.constant 0 : index
      %c0_12 = arith.constant 0 : index
      %13 = vector.load %arg5[%c0_11, %c0_12] : memref<2x256xf32, #tpu.memory_space<vmem>>, vector<1x256xf32>
      %14 = vector.broadcast %13 : vector<1x256xf32> to vector<16x256xf32>
      %15 = arith.mulf %12, %14 : vector<16x256xf32>
      %c1 = arith.constant 1 : index
      %c0_13 = arith.constant 0 : index
      %16 = vector.load %arg5[%c1, %c0_13] : memref<2x256xf32, #tpu.memory_space<vmem>>, vector<1x256xf32>
      %17 = vector.broadcast %16 : vector<1x256xf32> to vector<16x256xf32>
      %18 = arith.addf %15, %17 : vector<16x256xf32>
      %cst_14 = arith.constant 0.000000e+00 : f32
      %19 = vector.broadcast %cst_14 : f32 to vector<16x256xf32>
      %20 = arith.maximumf %18, %19 : vector<16x256xf32>
      %21 = arith.truncf %20 : vector<16x256xf32> to vector<16x256xbf16>
      %c0_15 = arith.constant 0 : index
      %c0_16 = arith.constant 0 : index
      %22 = vector.load %arg6[%c0_15, %c0_16] : memref<16x256xbf16, #tpu.memory_space<vmem>>, vector<16x256xbf16>
      tpu.vector_store %arg6[%c0_15, %c0_16], %21 {strides = array<i32>} : memref<16x256xbf16, #tpu.memory_space<vmem>>, vector<16x256xbf16>,
    } else {
    }
    return
  }
  func.func @transform_0(%arg0: i32, %arg1: i32, %arg2: i32) -> (i32, i32) {
    %c0_i32 = arith.constant 0 : i32
    return %arg0, %arg2 : i32, i32
  }
  func.func @transform_1(%arg0: i32, %arg1: i32, %arg2: i32) -> (i32, i32) {
    %c0_i32 = arith.constant 0 : i32
    return %arg2, %arg1 : i32, i32
  }
  func.func @transform_2(%arg0: i32, %arg1: i32, %arg2: i32) -> (i32, i32) {
    %c0_i32 = arith.constant 0 : i32
    %c0_i32_0 = arith.constant 0 : i32
    return %c0_i32, %arg1 : i32, i32
  }
  func.func @transform_3(%arg0: i32, %arg1: i32, %arg2: i32) -> (i32, i32) {
    %c0_i32 = arith.constant 0 : i32
    return %arg0, %arg1 : i32, i32
  }
}

module attributes {stable_mosaic.version = 11 : i64} {
  func.func @_mm_kernel(%arg0: i32, %arg1: i32, %arg2: i32, %arg3: memref<16x256xbf16, #tpu.memory_space<vmem>>, %arg4: memref<256x256xbf16, #tpu.memory_space<vmem>>, %arg5: memref<2x256xf32, #tpu.memory_space<vmem>>, %arg6: memref<16x256xbf16, #tpu.memory_space<vmem>>, %arg7: memref<16x256xf32, #tpu.memory_space<vmem>>) attributes {dimension_semantics = [#tpu.dimension_semantics<parallel>, #tpu.dimension_semantics<parallel>, #tpu.dimension_semantics<arbitrary>], iteration_bounds = array<i64: 1, 2, 1>, scalar_prefetch = 0 : i64, scratch_operands = 1 : i64, tpu.core_type = #tpu.core_type<tc>, window_params = [{transform_indices = @transform_0, window_bounds = array<i64: 16, 256>}, {transform_indices = @transform_1, window_bounds = array<i64: 256, 256>}, {transform_indices = @transform_2, window_bounds = array<i64: 2, 256>}, {transform_indices = @transform_3, window_bounds = array<i64: 16, 256>}]} {
    %c0_i32 = arith.constant 0 : i32
    %0 = arith.cmpi eq, %arg2, %c0_i32 : i32
    %1 = arith.extui %0 : i1 to i32
    %c0_i32_0 = arith.constant 0 : i32
    %2 = arith.cmpi ne, %1, %c0_i32_0 : i32
    scf.if %2 {
      %cst_10 = arith.constant 0.000000e+00 : f32
      %12 = vector.broadcast %cst_10 : f32 to vector<16x256xf32>
      %c0_11 = arith.constant 0 : index
      %c0_12 = arith.constant 0 : index
      %13 = vector.load %arg7[%c0_11, %c0_12] : memref<16x256xf32, #tpu.memory_space<vmem>>, vector<16x256xf32>
      tpu.vector_store %arg7[%c0_11, %c0_12], %12 {strides = array<i32>} : memref<16x256xf32, #tpu.memory_space<vmem>>, vector<16x256xf32>,
    } else {
    }
    %c0 = arith.constant 0 : index
    %c0_1 = arith.constant 0 : index
    %3 = vector.load %arg7[%c0, %c0_1] : memref<16x256xf32, #tpu.memory_space<vmem>>, vector<16x256xf32>
    %c0_2 = arith.constant 0 : index
    %c0_3 = arith.constant 0 : index
    %4 = vector.load %arg3[%c0_2, %c0_3] : memref<16x256xbf16, #tpu.memory_space<vmem>>, vector<16x256xbf16>
    %c0_4 = arith.constant 0 : index
    %c0_5 = arith.constant 0 : index
    %5 = vector.load %arg4[%c0_4, %c0_5] : memref<256x256xbf16, #tpu.memory_space<vmem>>, vector<256x256xbf16>
    %cst = arith.constant dense<0.000000e+00> : vector<16x256xf32>
    %6 = tpu.matmul %4, %5, %cst {dimension_numbers = #tpu.dot_dimension_numbers<[1], [0], [0], [1], [0, 0, 1, 1], [], []>} : vector<16x256xbf16>, vector<256x256xbf16>, vector<16x256xf32> -> vector<16x256xf32>
    %7 = arith.addf %3, %6 : vector<16x256xf32>
    %c0_6 = arith.constant 0 : index
    %c0_7 = arith.constant 0 : index
    %8 = vector.load %arg7[%c0_6, %c0_7] : memref<16x256xf32, #tpu.memory_space<vmem>>, vector<16x256xf32>
    tpu.vector_store %arg7[%c0_6, %c0_7], %7 {strides = array<i32>} : memref<16x256xf32, #tpu.memory_space<vmem>>, vector<16x256xf32>,
    %c0_i32_8 = arith.constant 0 : i32
    %9 = arith.cmpi eq, %arg2, %c0_i32_8 : i32
    %10 = arith.extui %9 : i1 to i32
    %c0_i32_9 = arith.constant 0 : i32
    %11 = arith.cmpi ne, %10, %c0_i32_9 : i32
    scf.if %11 {
      %c0_10 = arith.constant 0 : index
      %c0_11 = arith.constant 0 : index
      %12 = vector.load %arg7[%c0_10, %c0_11] : memref<16x256xf32, #tpu.memory_space<vmem>>, vector<16x256xf32>
      %c0_12 = arith.constant 0 : index
      %c0_13 = arith.constant 0 : index
      %13 = vector.load %arg5[%c0_12, %c0_13] : memref<2x256xf32, #tpu.memory_space<vmem>>, vector<1x256xf32>
      %14 = vector.broadcast %13 : vector<1x256xf32> to vector<16x256xf32>
      %15 = arith.mulf %12, %14 : vector<16x256xf32>
      %c1 = arith.constant 1 : index
      %c0_14 = arith.constant 0 : index
      %16 = vector.load %arg5[%c1, %c0_14] : memref<2x256xf32, #tpu.memory_space<vmem>>, vector<1x256xf32>
      %17 = vector.broadcast %16 : vector<1x256xf32> to vector<16x256xf32>
      %18 = arith.addf %15, %17 : vector<16x256xf32>
      %19 = arith.truncf %18 : vector<16x256xf32> to vector<16x256xbf16>
      %c0_15 = arith.constant 0 : index
      %c0_16 = arith.constant 0 : index
      %20 = vector.load %arg6[%c0_15, %c0_16] : memref<16x256xbf16, #tpu.memory_space<vmem>>, vector<16x256xbf16>
      tpu.vector_store %arg6[%c0_15, %c0_16], %19 {strides = array<i32>} : memref<16x256xbf16, #tpu.memory_space<vmem>>, vector<16x256xbf16>,
    } else {
    }
    return
  }
  func.func @transform_0(%arg0: i32, %arg1: i32, %arg2: i32) -> (i32, i32) {
    %c0_i32 = arith.constant 0 : i32
    return %arg0, %arg2 : i32, i32
  }
  func.func @transform_1(%arg0: i32, %arg1: i32, %arg2: i32) -> (i32, i32) {
    %c0_i32 = arith.constant 0 : i32
    return %arg2, %arg1 : i32, i32
  }
  func.func @transform_2(%arg0: i32, %arg1: i32, %arg2: i32) -> (i32, i32) {
    %c0_i32 = arith.constant 0 : i32
    %c0_i32_0 = arith.constant 0 : i32
    return %c0_i32, %arg1 : i32, i32
  }
  func.func @transform_3(%arg0: i32, %arg1: i32, %arg2: i32) -> (i32, i32) {
    %c0_i32 = arith.constant 0 : i32
    return %arg0, %arg1 : i32, i32
  }
}

module attributes {stable_mosaic.version = 11 : i64} {
  func.func @_mm_kernel(%arg0: i32, %arg1: i32, %arg2: i32, %arg3: memref<16x512xbf16, #tpu.memory_space<vmem>>, %arg4: memref<512x256xbf16, #tpu.memory_space<vmem>>, %arg5: memref<2x256xf32, #tpu.memory_space<vmem>>, %arg6: memref<16x256xbf16, #tpu.memory_space<vmem>>, %arg7: memref<16x256xbf16, #tpu.memory_space<vmem>>, %arg8: memref<16x256xf32, #tpu.memory_space<vmem>>) attributes {dimension_semantics = [#tpu.dimension_semantics<parallel>, #tpu.dimension_semantics<parallel>, #tpu.dimension_semantics<arbitrary>], iteration_bounds = array<i64: 1, 2, 9>, scalar_prefetch = 0 : i64, scratch_operands = 1 : i64, tpu.core_type = #tpu.core_type<tc>, window_params = [{transform_indices = @transform_0, window_bounds = array<i64: 16, 512>}, {transform_indices = @transform_1, window_bounds = array<i64: 512, 256>}, {transform_indices = @transform_2, window_bounds = array<i64: 2, 256>}, {transform_indices = @transform_3, window_bounds = array<i64: 16, 256>}, {transform_indices = @transform_4, window_bounds = array<i64: 16, 256>}]} {
    %c0_i32 = arith.constant 0 : i32
    %0 = arith.cmpi eq, %arg2, %c0_i32 : i32
    %1 = arith.extui %0 : i1 to i32
    %c0_i32_0 = arith.constant 0 : i32
    %2 = arith.cmpi ne, %1, %c0_i32_0 : i32
    scf.if %2 {
      %cst_9 = arith.constant 0.000000e+00 : f32
      %12 = vector.broadcast %cst_9 : f32 to vector<16x256xf32>
      %c0_10 = arith.constant 0 : index
      %c0_11 = arith.constant 0 : index
      %13 = vector.load %arg8[%c0_10, %c0_11] : memref<16x256xf32, #tpu.memory_space<vmem>>, vector<16x256xf32>
      tpu.vector_store %arg8[%c0_10, %c0_11], %12 {strides = array<i32>} : memref<16x256xf32, #tpu.memory_space<vmem>>, vector<16x256xf32>,
    } else {
    }
    %c0 = arith.constant 0 : index
    %c0_1 = arith.constant 0 : index
    %3 = vector.load %arg8[%c0, %c0_1] : memref<16x256xf32, #tpu.memory_space<vmem>>, vector<16x256xf32>
    %c0_2 = arith.constant 0 : index
    %c0_3 = arith.constant 0 : index
    %4 = vector.load %arg3[%c0_2, %c0_3] : memref<16x512xbf16, #tpu.memory_space<vmem>>, vector<16x512xbf16>
    %c0_4 = arith.constant 0 : index
    %c0_5 = arith.constant 0 : index
    %5 = vector.load %arg4[%c0_4, %c0_5] : memref<512x256xbf16, #tpu.memory_space<vmem>>, vector<512x256xbf16>
    %cst = arith.constant dense<0.000000e+00> : vector<16x256xf32>
    %6 = tpu.matmul %4, %5, %cst {dimension_numbers = #tpu.dot_dimension_numbers<[1], [0], [0], [1], [0, 0, 1, 1], [], []>} : vector<16x512xbf16>, vector<512x256xbf16>, vector<16x256xf32> -> vector<16x256xf32>
    %7 = arith.addf %3, %6 : vector<16x256xf32>
    %c0_6 = arith.constant 0 : index
    %c0_7 = arith.constant 0 : index
    %8 = vector.load %arg8[%c0_6, %c0_7] : memref<16x256xf32, #tpu.memory_space<vmem>>, vector<16x256xf32>
    tpu.vector_store %arg8[%c0_6, %c0_7], %7 {strides = array<i32>} : memref<16x256xf32, #tpu.memory_space<vmem>>, vector<16x256xf32>,
    %c8_i32 = arith.constant 8 : i32
    %9 = arith.cmpi eq, %arg2, %c8_i32 : i32
    %10 = arith.extui %9 : i1 to i32
    %c0_i32_8 = arith.constant 0 : i32
    %11 = arith.cmpi ne, %10, %c0_i32_8 : i32
    scf.if %11 {
      %c0_9 = arith.constant 0 : index
      %c0_10 = arith.constant 0 : index
      %12 = vector.load %arg8[%c0_9, %c0_10] : memref<16x256xf32, #tpu.memory_space<vmem>>, vector<16x256xf32>
      %c0_11 = arith.constant 0 : index
      %c0_12 = arith.constant 0 : index
      %13 = vector.load %arg5[%c0_11, %c0_12] : memref<2x256xf32, #tpu.memory_space<vmem>>, vector<1x256xf32>
      %14 = vector.broadcast %13 : vector<1x256xf32> to vector<16x256xf32>
      %15 = arith.mulf %12, %14 : vector<16x256xf32>
      %c1 = arith.constant 1 : index
      %c0_13 = arith.constant 0 : index
      %16 = vector.load %arg5[%c1, %c0_13] : memref<2x256xf32, #tpu.memory_space<vmem>>, vector<1x256xf32>
      %17 = vector.broadcast %16 : vector<1x256xf32> to vector<16x256xf32>
      %18 = arith.addf %15, %17 : vector<16x256xf32>
      %c0_14 = arith.constant 0 : index
      %c0_15 = arith.constant 0 : index
      %19 = vector.load %arg6[%c0_14, %c0_15] : memref<16x256xbf16, #tpu.memory_space<vmem>>, vector<16x256xbf16>
      %20 = arith.extf %19 : vector<16x256xbf16> to vector<16x256xf32>
      %21 = arith.addf %18, %20 : vector<16x256xf32>
      %cst_16 = arith.constant 0.000000e+00 : f32
      %22 = vector.broadcast %cst_16 : f32 to vector<16x256xf32>
      %23 = arith.maximumf %21, %22 : vector<16x256xf32>
      %24 = arith.truncf %23 : vector<16x256xf32> to vector<16x256xbf16>
      %c0_17 = arith.constant 0 : index
      %c0_18 = arith.constant 0 : index
      %25 = vector.load %arg7[%c0_17, %c0_18] : memref<16x256xbf16, #tpu.memory_space<vmem>>, vector<16x256xbf16>
      tpu.vector_store %arg7[%c0_17, %c0_18], %24 {strides = array<i32>} : memref<16x256xbf16, #tpu.memory_space<vmem>>, vector<16x256xbf16>,
    } else {
    }
    return
  }
  func.func @transform_0(%arg0: i32, %arg1: i32, %arg2: i32) -> (i32, i32) {
    %c0_i32 = arith.constant 0 : i32
    return %arg0, %arg2 : i32, i32
  }
  func.func @transform_1(%arg0: i32, %arg1: i32, %arg2: i32) -> (i32, i32) {
    %c0_i32 = arith.constant 0 : i32
    return %arg2, %arg1 : i32, i32
  }
  func.func @transform_2(%arg0: i32, %arg1: i32, %arg2: i32) -> (i32, i32) {
    %c0_i32 = arith.constant 0 : i32
    %c0_i32_0 = arith.constant 0 : i32
    return %c0_i32, %arg1 : i32, i32
  }
  func.func @transform_3(%arg0: i32, %arg1: i32, %arg2: i32) -> (i32, i32) {
    %c0_i32 = arith.constant 0 : i32
    return %arg0, %arg1 : i32, i32
  }
  func.func @transform_4(%arg0: i32, %arg1: i32, %arg2: i32) -> (i32, i32) {
    %c0_i32 = arith.constant 0 : i32
    return %arg0, %arg1 : i32, i32
  }
}

module attributes {stable_mosaic.version = 11 : i64} {
  func.func @_mm_kernel(%arg0: i32, %arg1: i32, %arg2: i32, %arg3: memref<16x512xbf16, #tpu.memory_space<vmem>>, %arg4: memref<512x256xbf16, #tpu.memory_space<vmem>>, %arg5: memref<2x256xf32, #tpu.memory_space<vmem>>, %arg6: memref<16x256xbf16, #tpu.memory_space<vmem>>, %arg7: memref<16x256xf32, #tpu.memory_space<vmem>>) attributes {dimension_semantics = [#tpu.dimension_semantics<parallel>, #tpu.dimension_semantics<parallel>, #tpu.dimension_semantics<arbitrary>], iteration_bounds = array<i64: 1, 2, 9>, scalar_prefetch = 0 : i64, scratch_operands = 1 : i64, tpu.core_type = #tpu.core_type<tc>, window_params = [{transform_indices = @transform_0, window_bounds = array<i64: 16, 512>}, {transform_indices = @transform_1, window_bounds = array<i64: 512, 256>}, {transform_indices = @transform_2, window_bounds = array<i64: 2, 256>}, {transform_indices = @transform_3, window_bounds = array<i64: 16, 256>}]} {
    %c0_i32 = arith.constant 0 : i32
    %0 = arith.cmpi eq, %arg2, %c0_i32 : i32
    %1 = arith.extui %0 : i1 to i32
    %c0_i32_0 = arith.constant 0 : i32
    %2 = arith.cmpi ne, %1, %c0_i32_0 : i32
    scf.if %2 {
      %cst_9 = arith.constant 0.000000e+00 : f32
      %12 = vector.broadcast %cst_9 : f32 to vector<16x256xf32>
      %c0_10 = arith.constant 0 : index
      %c0_11 = arith.constant 0 : index
      %13 = vector.load %arg7[%c0_10, %c0_11] : memref<16x256xf32, #tpu.memory_space<vmem>>, vector<16x256xf32>
      tpu.vector_store %arg7[%c0_10, %c0_11], %12 {strides = array<i32>} : memref<16x256xf32, #tpu.memory_space<vmem>>, vector<16x256xf32>,
    } else {
    }
    %c0 = arith.constant 0 : index
    %c0_1 = arith.constant 0 : index
    %3 = vector.load %arg7[%c0, %c0_1] : memref<16x256xf32, #tpu.memory_space<vmem>>, vector<16x256xf32>
    %c0_2 = arith.constant 0 : index
    %c0_3 = arith.constant 0 : index
    %4 = vector.load %arg3[%c0_2, %c0_3] : memref<16x512xbf16, #tpu.memory_space<vmem>>, vector<16x512xbf16>
    %c0_4 = arith.constant 0 : index
    %c0_5 = arith.constant 0 : index
    %5 = vector.load %arg4[%c0_4, %c0_5] : memref<512x256xbf16, #tpu.memory_space<vmem>>, vector<512x256xbf16>
    %cst = arith.constant dense<0.000000e+00> : vector<16x256xf32>
    %6 = tpu.matmul %4, %5, %cst {dimension_numbers = #tpu.dot_dimension_numbers<[1], [0], [0], [1], [0, 0, 1, 1], [], []>} : vector<16x512xbf16>, vector<512x256xbf16>, vector<16x256xf32> -> vector<16x256xf32>
    %7 = arith.addf %3, %6 : vector<16x256xf32>
    %c0_6 = arith.constant 0 : index
    %c0_7 = arith.constant 0 : index
    %8 = vector.load %arg7[%c0_6, %c0_7] : memref<16x256xf32, #tpu.memory_space<vmem>>, vector<16x256xf32>
    tpu.vector_store %arg7[%c0_6, %c0_7], %7 {strides = array<i32>} : memref<16x256xf32, #tpu.memory_space<vmem>>, vector<16x256xf32>,
    %c8_i32 = arith.constant 8 : i32
    %9 = arith.cmpi eq, %arg2, %c8_i32 : i32
    %10 = arith.extui %9 : i1 to i32
    %c0_i32_8 = arith.constant 0 : i32
    %11 = arith.cmpi ne, %10, %c0_i32_8 : i32
    scf.if %11 {
      %c0_9 = arith.constant 0 : index
      %c0_10 = arith.constant 0 : index
      %12 = vector.load %arg7[%c0_9, %c0_10] : memref<16x256xf32, #tpu.memory_space<vmem>>, vector<16x256xf32>
      %c0_11 = arith.constant 0 : index
      %c0_12 = arith.constant 0 : index
      %13 = vector.load %arg5[%c0_11, %c0_12] : memref<2x256xf32, #tpu.memory_space<vmem>>, vector<1x256xf32>
      %14 = vector.broadcast %13 : vector<1x256xf32> to vector<16x256xf32>
      %15 = arith.mulf %12, %14 : vector<16x256xf32>
      %c1 = arith.constant 1 : index
      %c0_13 = arith.constant 0 : index
      %16 = vector.load %arg5[%c1, %c0_13] : memref<2x256xf32, #tpu.memory_space<vmem>>, vector<1x256xf32>
      %17 = vector.broadcast %16 : vector<1x256xf32> to vector<16x256xf32>
      %18 = arith.addf %15, %17 : vector<16x256xf32>
      %cst_14 = arith.constant 0.000000e+00 : f32
      %19 = vector.broadcast %cst_14 : f32 to vector<16x256xf32>
      %20 = arith.maximumf %18, %19 : vector<16x256xf32>
      %21 = arith.truncf %20 : vector<16x256xf32> to vector<16x256xbf16>
      %c0_15 = arith.constant 0 : index
      %c0_16 = arith.constant 0 : index
      %22 = vector.load %arg6[%c0_15, %c0_16] : memref<16x256xbf16, #tpu.memory_space<vmem>>, vector<16x256xbf16>
      tpu.vector_store %arg6[%c0_15, %c0_16], %21 {strides = array<i32>} : memref<16x256xbf16, #tpu.memory_space<vmem>>, vector<16x256xbf16>,
    } else {
    }
    return
  }
  func.func @transform_0(%arg0: i32, %arg1: i32, %arg2: i32) -> (i32, i32) {
    %c0_i32 = arith.constant 0 : i32
    return %arg0, %arg2 : i32, i32
  }
  func.func @transform_1(%arg0: i32, %arg1: i32, %arg2: i32) -> (i32, i32) {
    %c0_i32 = arith.constant 0 : i32
    return %arg2, %arg1 : i32, i32
  }
  func.func @transform_2(%arg0: i32, %arg1: i32, %arg2: i32) -> (i32, i32) {
    %c0_i32 = arith.constant 0 : i32
    %c0_i32_0 = arith.constant 0 : i32
    return %c0_i32, %arg1 : i32, i32
  }
  func.func @transform_3(%arg0: i32, %arg1: i32, %arg2: i32) -> (i32, i32) {
    %c0_i32 = arith.constant 0 : i32
    return %arg0, %arg1 : i32, i32
  }
}

module attributes {stable_mosaic.version = 11 : i64} {
  func.func @_pool_fc_kernel(%arg0: i32, %arg1: memref<2x1x1x512xbf16, #tpu.memory_space<vmem>>, %arg2: memref<512x128xf32, #tpu.memory_space<vmem>>, %arg3: memref<1x128xf32, #tpu.memory_space<vmem>>, %arg4: memref<2x128xf32, #tpu.memory_space<vmem>>) attributes {dimension_semantics = [#tpu.dimension_semantics<arbitrary>], iteration_bounds = array<i64: 1>, scalar_prefetch = 0 : i64, scratch_operands = 0 : i64, tpu.core_type = #tpu.core_type<tc>, window_params = [{pipeline_mode = #tpu.pipeline_mode<synchronous>, transform_indices = @transform_0, window_bounds = array<i64: 2, 1, 1, 512>}, {pipeline_mode = #tpu.pipeline_mode<synchronous>, transform_indices = @transform_1, window_bounds = array<i64: 512, 128>}, {pipeline_mode = #tpu.pipeline_mode<synchronous>, transform_indices = @transform_2, window_bounds = array<i64: 1, 128>}, {pipeline_mode = #tpu.pipeline_mode<synchronous>, transform_indices = @transform_3, window_bounds = array<i64: 2, 128>}]} {
    %c0 = arith.constant 0 : index
    %c0_0 = arith.constant 0 : index
    %c0_1 = arith.constant 0 : index
    %c0_2 = arith.constant 0 : index
    %0 = vector.load %arg1[%c0, %c0_0, %c0_1, %c0_2] : memref<2x1x1x512xbf16, #tpu.memory_space<vmem>>, vector<2x1x1x512xbf16>
    %1 = arith.extf %0 : vector<2x1x1x512xbf16> to vector<2x1x1x512xf32>
    %cst = arith.constant dense<0.000000e+00> : vector<2x512xf32>
    %2 = vector.multi_reduction <add>, %1, %cst [1, 2] : vector<2x1x1x512xf32> to vector<2x512xf32>
    %cst_3 = arith.constant 1.000000e+00 : f32
    %3 = vector.broadcast %cst_3 : f32 to vector<2x512xf32>
    %4 = arith.divf %2, %3 : vector<2x512xf32>
    %c0_4 = arith.constant 0 : index
    %c0_5 = arith.constant 0 : index
    %5 = vector.load %arg2[%c0_4, %c0_5] : memref<512x128xf32, #tpu.memory_space<vmem>>, vector<512x128xf32>
    %cst_6 = arith.constant dense<0.000000e+00> : vector<2x128xf32>
    %6 = tpu.matmul %4, %5, %cst_6 {dimension_numbers = #tpu.dot_dimension_numbers<[1], [0], [0], [1], [0, 0, 1, 1], [], []>} : vector<2x512xf32>, vector<512x128xf32>, vector<2x128xf32> -> vector<2x128xf32>
    %c0_7 = arith.constant 0 : index
    %c0_8 = arith.constant 0 : index
    %7 = vector.load %arg3[%c0_7, %c0_8] : memref<1x128xf32, #tpu.memory_space<vmem>>, vector<1x128xf32>
    %8 = vector.broadcast %7 : vector<1x128xf32> to vector<2x128xf32>
    %9 = arith.addf %6, %8 : vector<2x128xf32>
    %c0_9 = arith.constant 0 : index
    %c0_10 = arith.constant 0 : index
    %10 = vector.load %arg4[%c0_9, %c0_10] : memref<2x128xf32, #tpu.memory_space<vmem>>, vector<2x128xf32>
    tpu.vector_store %arg4[%c0_9, %c0_10], %9 {strides = array<i32>} : memref<2x128xf32, #tpu.memory_space<vmem>>, vector<2x128xf32>,
    return
  }
  func.func @transform_0(%arg0: i32) -> (i32, i32, i32, i32) {
    %c0_i32 = arith.constant 0 : i32
    %c0_i32_0 = arith.constant 0 : i32
    %c0_i32_1 = arith.constant 0 : i32
    %c0_i32_2 = arith.constant 0 : i32
    %c0_i32_3 = arith.constant 0 : i32
    return %c0_i32, %c0_i32_0, %c0_i32_1, %c0_i32_2 : i32, i32, i32, i32
  }
  func.func @transform_1(%arg0: i32) -> (i32, i32) {
    %c0_i32 = arith.constant 0 : i32
    %c0_i32_0 = arith.constant 0 : i32
    %c0_i32_1 = arith.constant 0 : i32
    return %c0_i32, %c0_i32_0 : i32, i32
  }
  func.func @transform_2(%arg0: i32) -> (i32, i32) {
    %c0_i32 = arith.constant 0 : i32
    %c0_i32_0 = arith.constant 0 : i32
    %c0_i32_1 = arith.constant 0 : i32
    return %c0_i32, %c0_i32_0 : i32, i32
  }
  func.func @transform_3(%arg0: i32) -> (i32, i32) {
    %c0_i32 = arith.constant 0 : i32
    %c0_i32_0 = arith.constant 0 : i32
    %c0_i32_1 = arith.constant 0 : i32
    return %c0_i32, %c0_i32_0 : i32, i32
  }
}

</mosaic_0001>

<bundles_post_ra>
// kernel: resnet_forward.22
= control target key start
LH: loop header
LB: loop body
LE: loop exit
PB: predicated region body
PF: predicated region fallthrough
CT: control target
= control target key end

     0   :  { %s1652_s12 = smov 0   ;;  %s1654_s13 = smov 0   ;;  %s1898_s0 = inlined_call_operand.vmem [shape: bf16[512,256], index: 0, kind: input, shape index: {}]   ;;  %s1899_s1 = inlined_call_operand.vmem [shape: bf16[256,128], index: 1, kind: input, shape index: {}]   ;;  %s1900_s2 = inlined_call_operand.vmem [shape: f32[2,128], index: 2, kind: input, shape index: {}]   ;;  %s1901_s3 = inlined_call_operand.vmem [shape: bf16[512,128], index: 3, kind: output, shape index: {}]  }
   0x1   :  { %s1656_s14 = smov 0  }
   0x2 LB: > { %s32_s15 = sadd.s32 1, %s1626_s13  ;;  %p1222_p0 = scmp.ge.s32.totalorder %s1630_s14, 1  ;;  %s1630_s14 = sphi %s1656_s14, %s13_s14   ;;  %s1626_s13 = sphi %s1654_s13, %s1903_s13   ;;  %s1622_s12 = sphi %s1652_s12, %s1902_s12  }
   0x3   : > { %p34_p1 = scmp.ge.s32.totalorder %s32_s15, 2  ;;  %p192_p2 = scmp.lt.s32.totalorder %s1630_s14, 3 }
   0x5   : > { %s1905_s15 = smov (%p34_p1, %s32_s15), 0  ;;  %p193_p3 = pnand %p1222_p0, %p192_p2 }
   0x6   : > { %s1223_s28 = sshll.u32 (!%p193_p3), %s1622_s12, 5 }
   0x7   : > { %196 = sbr.rel (%p193_p3) target bundleno = 308 (0x134), region = 32  ;;  %p238_p4 = scmp.lt.s32.totalorder (!%p193_p3), %s1223_s28, 63 }
   0xc   : > { %v1462_v0 = vld [vmem:[%s1899_s1 + $0x38] sm:$0xff]  ;;  %v1461_v2 = vld [vmem:[%s1899_s1 + $0x30] sm:$0xff]  ;;  %v1460_v4 = vld [vmem:[%s1899_s1 + $0x28] sm:$0xff]  ;;  %s1907_s28 = smov (!%p238_p4, %s1223_s28), 63 }
   0xd   : > { %v1470_v1 = vld [vmem:[%s1899_s1 + $0x78] sm:$0xff]  ;;  %658 = vmatpush.bf16.msra.mxu0 %v1462_v0  ;;  %1566 = vmatpush.bf16.msra.mxu2 %v1462_v0  ;;  %v1469_v3 = vld [vmem:[%s1899_s1 + $0x70] sm:$0xff]  ;;  %v1468_v5 = vld [vmem:[%s1899_s1 + $0x68] sm:$0xff]  ;;  %s1422_s17 = sshll.u32 %s1907_s28, 3  ;;  %s1227_s7 = sshll.u32 %s1907_s28, 2 }
   0xe   : > { %747 = vmatpush.bf16.msra.mxu1 %v1470_v1  ;;  %1574 = vmatpush.bf16.msra.mxu3 %v1470_v1  ;;  %v1459_v6 = vld [vmem:[%s1899_s1 + $0x20] sm:$0xff]  ;;  %v1458_v8 = vld [vmem:[%s1899_s1 + $0x18] sm:$0xff]  ;;  %v1457_v10 = vld [vmem:[%s1899_s1 + $0x10] sm:$0xff]  ;;  %s1718_s22 = scalar_lea.vmem %s1898_s0, %s1422_s17  ;;  %s1812_s10 = scalar_lea.vmem %s1901_s3, %s1227_s7 }
   0xf   : > { %v1467_v7 = vld [vmem:[%s1899_s1 + $0x60] sm:$0xff]  ;;  %v1466_v9 = vld [vmem:[%s1899_s1 + $0x58] sm:$0xff]  ;;  %v1465_v11 = vld [vmem:[%s1899_s1 + $0x50] sm:$0xff] }
  0x10   : > { %v1456_v12 = vld [vmem:[%s1899_s1 + $0x8] sm:$0xff]  ;;  %v1455_v14 = vld [vmem:[%s1899_s1] sm:$0xff]  ;;  %v1238_v28 = vld [vmem:[%s1718_s22 + $0x10] sm:$0xf] }
  0x11   : > { %659 = vmatpush.bf16.msra.mxu0 %v1461_v2  ;;  %1567 = vmatpush.bf16.msra.mxu2 %v1461_v2  ;;  %v1464_v13 = vld [vmem:[%s1899_s1 + $0x48] sm:$0xff]  ;;  %v1463_v15 = vld [vmem:[%s1899_s1 + $0x40] sm:$0xff]  ;;  %v1426_v29 = vld [vmem:[%s1718_s22 + $0x14] sm:$0xf0] }
  0x12   : > { %748 = vmatpush.bf16.msra.mxu1 %v1469_v3  ;;  %1575 = vmatpush.bf16.msra.mxu3 %v1469_v3  ;;  %v1230_v16 = vld [vmem:[%s1718_s22] sm:$0xf]  ;;  %v1424_v17 = vld [vmem:[%s1718_s22 + $0x4] sm:$0xf0]  ;;  %v1423_v20 = vld [vmem:[%s1718_s22 + $0x4] sm:$0xf]  ;;  %v1239_v36 = vor.u32 %v1426_v29, %v1238_v28 }
  0x13   : > { %v1294_v18 = vld [vmem:[%s1718_s22 + $0x80] sm:$0xf]  ;;  %v1440_v19 = vld [vmem:[%s1718_s22 + $0x84] sm:$0xf0]  ;;  %v1232_v21 = vld [vmem:[%s1718_s22 + $0x8] sm:$0xf0]  ;;  %v1231_v24 = vor.u32 %v1424_v17, %v1230_v16 }
  0x14   : > { %v1439_v22 = vld [vmem:[%s1718_s22 + $0x84] sm:$0xf]  ;;  %v1296_v23 = vld [vmem:[%s1718_s22 + $0x88] sm:$0xf0]  ;;  %v1295_v25 = vor.u32 %v1440_v19, %v1294_v18  ;;  %v1235_v26 = vor.u32 %v1423_v20, %v1232_v21  ;;  %v1302_v30 = vld [vmem:[%s1718_s22 + $0x90] sm:$0xf] }
  0x15   : > { %660 = vmatpush.bf16.msra.mxu0 %v1460_v4  ;;  %1568 = vmatpush.bf16.msra.mxu2 %v1460_v4  ;;  %v1299_v27 = vor.u32 %v1439_v22, %v1296_v23  ;;  %v1442_v31 = vld [vmem:[%s1718_s22 + $0x94] sm:$0xf0]  ;;  %v1425_v32 = vld [vmem:[%s1718_s22 + $0x14] sm:$0xf]  ;;  %v1240_v33 = vld [vmem:[%s1718_s22 + $0x18] sm:$0xf0] }
  0x16   : > { %749 = vmatpush.bf16.msra.mxu1 %v1468_v5  ;;  %1576 = vmatpush.bf16.msra.mxu3 %v1468_v5  ;;  %v1441_v34 = vld [vmem:[%s1718_s22 + $0x94] sm:$0xf]  ;;  %v1304_v35 = vld [vmem:[%s1718_s22 + $0x98] sm:$0xf0]  ;;  %v1303_v37 = vor.u32 %v1442_v31, %v1302_v30  ;;  %v1243_v38 = vor.u32 %v1425_v32, %v1240_v33  ;;  %v1246_v40 = vld [vmem:[%s1718_s22 + $0x20] sm:$0xf] }
  0x17   : > { %v1307_v39 = vor.u32 %v1441_v34, %v1304_v35  ;;  %v1428_v41 = vld [vmem:[%s1718_s22 + $0x24] sm:$0xf0]  ;;  %v1310_v42 = vld [vmem:[%s1718_s22 + $0xa0] sm:$0xf]  ;;  %v1427_v44 = vld [vmem:[%s1718_s22 + $0x24] sm:$0xf] }
  0x18   : > { %v1444_v43 = vld [vmem:[%s1718_s22 + $0xa4] sm:$0xf0]  ;;  %v1248_v45 = vld [vmem:[%s1718_s22 + $0x28] sm:$0xf0]  ;;  %v1443_v46 = vld [vmem:[%s1718_s22 + $0xa4] sm:$0xf]  ;;  %v1247_v48 = vor.u32 %v1428_v41, %v1246_v40 }
  0x19   : > { %661 = vmatpush.bf16.msra.mxu0 %v1459_v6  ;;  %1569 = vmatpush.bf16.msra.mxu2 %v1459_v6  ;;  %v1312_v47 = vld [vmem:[%s1718_s22 + $0xa8] sm:$0xf0]  ;;  %v1311_v49 = vor.u32 %v1444_v43, %v1310_v42  ;;  %v1251_v50 = vor.u32 %v1427_v44, %v1248_v45  ;;  %v1254_v52 = vld [vmem:[%s1718_s22 + $0x30] sm:$0xf]  ;;  %v1430_v53 = vld [vmem:[%s1718_s22 + $0x34] sm:$0xf0] }
  0x1a   : > { %750 = vmatpush.bf16.msra.mxu1 %v1467_v7  ;;  %1577 = vmatpush.bf16.msra.mxu3 %v1467_v7  ;;  %v1315_v51 = vor.u32 %v1443_v46, %v1312_v47  ;;  %v1318_v54 = vld [vmem:[%s1718_s22 + $0xb0] sm:$0xf]  ;;  %v1446_v55 = vld [vmem:[%s1718_s22 + $0xb4] sm:$0xf0]  ;;  %v1429_v56 = vld [vmem:[%s1718_s22 + $0x34] sm:$0xf]  ;;  %v1255_v60 = vor.u32 %v1430_v53, %v1254_v52 }
  0x1b   : > { %v1256_v57 = vld [vmem:[%s1718_s22 + $0x38] sm:$0xf0]  ;;  %v1445_v58 = vld [vmem:[%s1718_s22 + $0xb4] sm:$0xf]  ;;  %v1319_v61 = vor.u32 %v1446_v55, %v1318_v54  ;;  %v1262_v0 = vld [vmem:[%s1718_s22 + $0x40] sm:$0xf] }
  0x1c   : > { %v1320_v59 = vld [vmem:[%s1718_s22 + $0xb8] sm:$0xf0]  ;;  %v1259_v62 = vor.u32 %v1429_v56, %v1256_v57  ;;  %v1432_v1 = vld [vmem:[%s1718_s22 + $0x44] sm:$0xf0]  ;;  %v1326_v2 = vld [vmem:[%s1718_s22 + $0xc0] sm:$0xf] }
  0x1d   : > { %662 = vmatpush.bf16.msra.mxu0 %v1458_v8  ;;  %1570 = vmatpush.bf16.msra.mxu2 %v1458_v8  ;;  %v1323_v63 = vor.u32 %v1445_v58, %v1320_v59  ;;  %v1448_v3 = vld [vmem:[%s1718_s22 + $0xc4] sm:$0xf0]  ;;  %v1431_v4 = vld [vmem:[%s1718_s22 + $0x44] sm:$0xf]  ;;  %v1264_v5 = vld [vmem:[%s1718_s22 + $0x48] sm:$0xf0]  ;;  %v1263_v8 = vor.u32 %v1432_v1, %v1262_v0 }
  0x1e   : > { %751 = vmatpush.bf16.msra.mxu1 %v1466_v9  ;;  %1578 = vmatpush.bf16.msra.mxu3 %v1466_v9  ;;  %v1447_v6 = vld [vmem:[%s1718_s22 + $0xc4] sm:$0xf]  ;;  %v1328_v7 = vld [vmem:[%s1718_s22 + $0xc8] sm:$0xf0]  ;;  %v1327_v9 = vor.u32 %v1448_v3, %v1326_v2  ;;  %v1433_v16 = vld [vmem:[%s1718_s22 + $0x54] sm:$0xf] }
  0x1f   : > { %v1272_v17 = vld [vmem:[%s1718_s22 + $0x58] sm:$0xf0]  ;;  %v1449_v18 = vld [vmem:[%s1718_s22 + $0xd4] sm:$0xf]  ;;  %v1435_v28 = vld [vmem:[%s1718_s22 + $0x64] sm:$0xf] }
  0x20   : > { %v1336_v19 = vld [vmem:[%s1718_s22 + $0xd8] sm:$0xf0]  ;;  %v1275_v22 = vor.u32 %v1433_v16, %v1272_v17  ;;  %v1280_v29 = vld [vmem:[%s1718_s22 + $0x68] sm:$0xf0]  ;;  %v1451_v30 = vld [vmem:[%s1718_s22 + $0xe4] sm:$0xf] }
  0x21   : > { %663 = vmatpush.bf16.msra.mxu0 %v1457_v10  ;;  %1571 = vmatpush.bf16.msra.mxu2 %v1457_v10  ;;  %v1267_v10 = vor.u32 %v1431_v4, %v1264_v5  ;;  %v1339_v23 = vor.u32 %v1449_v18, %v1336_v19  ;;  %v1344_v31 = vld [vmem:[%s1718_s22 + $0xe8] sm:$0xf0]  ;;  %v1283_v34 = vor.u32 %v1435_v28, %v1280_v29  ;;  %v1437_v40 = vld [vmem:[%s1718_s22 + $0x74] sm:$0xf]  ;;  %v1288_v41 = vld [vmem:[%s1718_s22 + $0x78] sm:$0xf0] }
  0x22   : > { %752 = vmatpush.bf16.msra.mxu1 %v1465_v11  ;;  %1579 = vmatpush.bf16.msra.mxu3 %v1465_v11  ;;  %v1331_v11 = vor.u32 %v1447_v6, %v1328_v7  ;;  %v1347_v35 = vor.u32 %v1451_v30, %v1344_v31  ;;  %v1453_v42 = vld [vmem:[%s1718_s22 + $0xf4] sm:$0xf]  ;;  %v1352_v43 = vld [vmem:[%s1718_s22 + $0xf8] sm:$0xf0]  ;;  %v1291_v46 = vor.u32 %v1437_v40, %v1288_v41  ;;  %v1802_v55 = vld [vmem:[%s1900_s2 + $0x1] ss:$0 sm:$0xff] }
  0x23   : > { %v1355_v47 = vor.u32 %v1453_v42, %v1352_v43 }
  0x25   : > { %664 = vmatpush.bf16.msra.mxu0 %v1456_v12  ;;  %1572 = vmatpush.bf16.msra.mxu2 %v1456_v12  ;;  %v1270_v12 = vld [vmem:[%s1718_s22 + $0x50] sm:$0xf] }
  0x26   : > { %753 = vmatpush.bf16.msra.mxu1 %v1464_v13  ;;  %1580 = vmatpush.bf16.msra.mxu3 %v1464_v13  ;;  %v1434_v13 = vld [vmem:[%s1718_s22 + $0x54] sm:$0xf0] }
  0x27   : > { %v1271_v20 = vor.u32 %v1434_v13, %v1270_v12 }
  0x29   : > { %665 = vmatpush.bf16.msra.mxu0 %v1455_v14  ;;  %1573 = vmatpush.bf16.msra.mxu2 %v1455_v14  ;;  %v1334_v14 = vld [vmem:[%s1718_s22 + $0xd0] sm:$0xf] }
  0x2a   : > { %754 = vmatpush.bf16.msra.mxu1 %v1463_v15  ;;  %1581 = vmatpush.bf16.msra.mxu3 %v1463_v15  ;;  %v1450_v15 = vld [vmem:[%s1718_s22 + $0xd4] sm:$0xf0] }
  0x2b   : > { %v1335_v21 = vor.u32 %v1450_v15, %v1334_v14 }
  0x2c   : > { %666 = vmatmul.bf16.vlgmr.msra.gmra.mxu0 %v1231_v24  ;;  %706 = vmatmul.bf16.vlgmr.msra.gmra.mxu2 %v1295_v25  ;;  %v1278_v24 = vld [vmem:[%s1718_s22 + $0x60] sm:$0xf]  ;;  %v1436_v25 = vld [vmem:[%s1718_s22 + $0x64] sm:$0xf0] }
  0x2d   : > { %755 = vmatmul.bf16.vlgmr.msra.gmra.mxu1 %v1235_v26  ;;  %795 = vmatmul.bf16.vlgmr.msra.gmra.mxu3 %v1299_v27  ;;  %v1342_v26 = vld [vmem:[%s1718_s22 + $0xe0] sm:$0xf]  ;;  %v1452_v27 = vld [vmem:[%s1718_s22 + $0xe4] sm:$0xf0]  ;;  %v1279_v32 = vor.u32 %v1436_v25, %v1278_v24 }
  0x2e   : > { %v1343_v33 = vor.u32 %v1452_v27, %v1342_v26 }
  0x3c   : > { %671 = vmatmul.bf16.gmra.mxu0 %v1239_v36  ;;  %711 = vmatmul.bf16.gmra.mxu2 %v1303_v37  ;;  %v1286_v36 = vld [vmem:[%s1718_s22 + $0x70] sm:$0xf]  ;;  %v1438_v37 = vld [vmem:[%s1718_s22 + $0x74] sm:$0xf0] }
  0x3d   : > { %760 = vmatmul.bf16.gmra.mxu1 %v1243_v38  ;;  %800 = vmatmul.bf16.gmra.mxu3 %v1307_v39  ;;  %v1350_v38 = vld [vmem:[%s1718_s22 + $0xf0] sm:$0xf]  ;;  %v1454_v39 = vld [vmem:[%s1718_s22 + $0xf4] sm:$0xf0]  ;;  %v1287_v44 = vor.u32 %v1438_v37, %v1286_v36 }
  0x3e   : > { %v1351_v45 = vor.u32 %v1454_v39, %v1350_v38 }
  0x4c   : > { %676 = vmatmul.bf16.gmra.mxu0 %v1247_v48  ;;  %716 = vmatmul.bf16.gmra.mxu2 %v1311_v49 }
  0x4d   : > { %765 = vmatmul.bf16.gmra.mxu1 %v1251_v50  ;;  %805 = vmatmul.bf16.gmra.mxu3 %v1315_v51  ;;  %v1796_v51 = vld [vmem:[%s1900_s2] ss:$0 sm:$0xff] }
  0x5c   : > { %681 = vmatmul.bf16.gmra.mxu0 %v1255_v60  ;;  %721 = vmatmul.bf16.gmra.mxu2 %v1319_v61 }
  0x5d   : > { %770 = vmatmul.bf16.gmra.mxu1 %v1259_v62  ;;  %810 = vmatmul.bf16.gmra.mxu3 %v1323_v63 }
  0x6c   : > { %686 = vmatmul.bf16.gmra.mxu0 %v1263_v8  ;;  %726 = vmatmul.bf16.gmra.mxu2 %v1327_v9 }
  0x6d   : > { %775 = vmatmul.bf16.gmra.mxu1 %v1267_v10  ;;  %815 = vmatmul.bf16.gmra.mxu3 %v1331_v11 }
  0x7c   : > { %691 = vmatmul.bf16.gmra.mxu0 %v1271_v20  ;;  %731 = vmatmul.bf16.gmra.mxu2 %v1335_v21 }
  0x7d   : > { %780 = vmatmul.bf16.gmra.mxu1 %v1275_v22  ;;  %820 = vmatmul.bf16.gmra.mxu3 %v1339_v23 }
  0x8c   : > { %696 = vmatmul.bf16.gmra.mxu0 %v1279_v32  ;;  %736 = vmatmul.bf16.gmra.mxu2 %v1343_v33 }
  0x8d   : > { %785 = vmatmul.bf16.gmra.mxu1 %v1283_v34  ;;  %825 = vmatmul.bf16.gmra.mxu3 %v1347_v35 }
  0x9c   : > { %701 = vmatmul.bf16.gmra.mxu0 %v1287_v44  ;;  %741 = vmatmul.bf16.gmra.mxu2 %v1351_v45 }
  0x9d   : > { %790 = vmatmul.bf16.gmra.mxu1 %v1291_v46  ;;  %830 = vmatmul.bf16.gmra.mxu3 %v1355_v47 }
  0xa9   : > { %v667_v48 = vpop.f32.mrf.mxu0 }
  0xaa   : > { %v756_v49 = vpop.f32.mrf.mxu1 }
  0xab   : > { %v757_v50 = vadd.f32 %v756_v49, %v667_v48 }
  0xad   : > { %v937_v54 = vmul.f32 %v1796_v51, %v757_v50 }
  0xaf   : > { %v707_v52 = vpop.f32.mrf.mxu2  ;;  %v971_v60 = vadd.f32 %v1802_v55, %v937_v54 }
  0xb0   : > { %v796_v53 = vpop.f32.mrf.mxu3 }
  0xb1   : > { %v669_v56 = vpop.f32.mrf.mxu0  ;;  %v797_v58 = vadd.f32 %v796_v53, %v707_v52  ;;  %v1003_v2 = vmax.f32 %v971_v60, 0.0 }
  0xb2   : > { %v758_v57 = vpop.f32.mrf.mxu1 }
  0xb3   : > { %v759_v59 = vadd.f32 %v758_v57, %v669_v56  ;;  %v953_v62 = vmul.f32 %v1796_v51, %v797_v58 }
  0xb5   : > { %v938_v61 = vmul.f32 %v1796_v51, %v759_v59  ;;  %v987_v7 = vadd.f32 %v1802_v55, %v953_v62 }
  0xb7   : > { %v972_v63 = vadd.f32 %v1802_v55, %v938_v61  ;;  %v709_v0 = vpop.f32.mrf.mxu2  ;;  %v1019_v12 = vmax.f32 %v987_v7, 0.0 }
  0xb8   : > { %v798_v1 = vpop.f32.mrf.mxu3 }
  0xb9   : > { %v1004_v3 = vmax.f32 %v972_v63, 0.0  ;;  %v799_v4 = vadd.f32 %v798_v1, %v709_v0  ;;  %v672_v5 = vpop.f32.mrf.mxu0 }
  0xba   : > { %v761_v6 = vpop.f32.mrf.mxu1 }
  0xbb   : > { %v1474_v8 = vpack.c.bf16 %v1004_v3, %v1003_v2  ;;  %v954_v9 = vmul.f32 %v1796_v51, %v799_v4  ;;  %v762_v11 = vadd.f32 %v761_v6, %v672_v5 }
  0xbd   : > { %1475 = vst [vmem:[%s1812_s10] sm:$0xff] %v1474_v8   ;;  %v988_v10 = vadd.f32 %v1802_v55, %v954_v9  ;;  %v939_v17 = vmul.f32 %v1796_v51, %v762_v11 }
  0xbf   : > { %v1020_v13 = vmax.f32 %v988_v10, 0.0  ;;  %v712_v14 = vpop.f32.mrf.mxu2  ;;  %v973_v22 = vadd.f32 %v1802_v55, %v939_v17 }
  0xc0   : > { %v801_v15 = vpop.f32.mrf.mxu3 }
  0xc1   : > { %v1514_v16 = vpack.c.bf16 %v1020_v13, %v1019_v12  ;;  %v674_v18 = vpop.f32.mrf.mxu0  ;;  %v802_v20 = vadd.f32 %v801_v15, %v712_v14  ;;  %v1005_v28 = vmax.f32 %v973_v22, 0.0 }
  0xc2   : > { %v763_v19 = vpop.f32.mrf.mxu1 }
  0xc3   : > { %1558 = vst [vmem:[%s1812_s10 + $0x40] sm:$0xff] %v1514_v16   ;;  %v764_v21 = vadd.f32 %v763_v19, %v674_v18  ;;  %v955_v24 = vmul.f32 %v1796_v51, %v802_v20 }
  0xc5   : > { %v940_v23 = vmul.f32 %v1796_v51, %v764_v21  ;;  %v989_v33 = vadd.f32 %v1802_v55, %v955_v24 }
  0xc7   : > { %v974_v25 = vadd.f32 %v1802_v55, %v940_v23  ;;  %v714_v26 = vpop.f32.mrf.mxu2  ;;  %v1021_v38 = vmax.f32 %v989_v33, 0.0 }
  0xc8   : > { %v803_v27 = vpop.f32.mrf.mxu3 }
  0xc9   : > { %v1006_v29 = vmax.f32 %v974_v25, 0.0  ;;  %v804_v30 = vadd.f32 %v803_v27, %v714_v26  ;;  %v677_v31 = vpop.f32.mrf.mxu0 }
  0xca   : > { %v766_v32 = vpop.f32.mrf.mxu1 }
  0xcb   : > { %v1479_v34 = vpack.c.bf16 %v1006_v29, %v1005_v28  ;;  %v956_v35 = vmul.f32 %v1796_v51, %v804_v30  ;;  %v767_v37 = vadd.f32 %v766_v32, %v677_v31 }
  0xcd   : > { %1551 = vst [vmem:[%s1812_s10 + $0x8] sm:$0xff] %v1479_v34   ;;  %v990_v36 = vadd.f32 %v1802_v55, %v956_v35  ;;  %v941_v43 = vmul.f32 %v1796_v51, %v767_v37 }
  0xcf   : > { %v1022_v39 = vmax.f32 %v990_v36, 0.0  ;;  %v717_v40 = vpop.f32.mrf.mxu2  ;;  %v975_v48 = vadd.f32 %v1802_v55, %v941_v43 }
  0xd0   : > { %v806_v41 = vpop.f32.mrf.mxu3 }
  0xd1   : > { %v1519_v42 = vpack.c.bf16 %v1022_v39, %v1021_v38  ;;  %v679_v44 = vpop.f32.mrf.mxu0  ;;  %v807_v46 = vadd.f32 %v806_v41, %v717_v40  ;;  %v1007_v56 = vmax.f32 %v975_v48, 0.0 }
  0xd2   : > { %v768_v45 = vpop.f32.mrf.mxu1 }
  0xd3   : > { %1559 = vst [vmem:[%s1812_s10 + $0x48] sm:$0xff] %v1519_v42   ;;  %v769_v47 = vadd.f32 %v768_v45, %v679_v44  ;;  %v957_v50 = vmul.f32 %v1796_v51, %v807_v46 }
  0xd5   : > { %v942_v49 = vmul.f32 %v1796_v51, %v769_v47  ;;  %v991_v61 = vadd.f32 %v1802_v55, %v957_v50 }
  0xd7   : > { %v976_v52 = vadd.f32 %v1802_v55, %v942_v49  ;;  %v719_v53 = vpop.f32.mrf.mxu2  ;;  %v1023_v2 = vmax.f32 %v991_v61, 0.0 }
  0xd8   : > { %v808_v54 = vpop.f32.mrf.mxu3 }
  0xd9   : > { %v1008_v57 = vmax.f32 %v976_v52, 0.0  ;;  %v809_v58 = vadd.f32 %v808_v54, %v719_v53  ;;  %v682_v59 = vpop.f32.mrf.mxu0 }
  0xda   : > { %v771_v60 = vpop.f32.mrf.mxu1 }
  0xdb   : > { %v1484_v62 = vpack.c.bf16 %v1008_v57, %v1007_v56  ;;  %v958_v63 = vmul.f32 %v1796_v51, %v809_v58  ;;  %v772_v1 = vadd.f32 %v771_v60, %v682_v59 }
  0xdd   : > { %1552 = vst [vmem:[%s1812_s10 + $0x10] sm:$0xff] %v1484_v62   ;;  %v992_v0 = vadd.f32 %v1802_v55, %v958_v63  ;;  %v943_v7 = vmul.f32 %v1796_v51, %v772_v1 }
  0xdf   : > { %v1024_v3 = vmax.f32 %v992_v0, 0.0  ;;  %v722_v4 = vpop.f32.mrf.mxu2  ;;  %v977_v12 = vadd.f32 %v1802_v55, %v943_v7 }
  0xe0   : > { %v811_v5 = vpop.f32.mrf.mxu3 }
  0xe1   : > { %v1524_v6 = vpack.c.bf16 %v1024_v3, %v1023_v2  ;;  %v684_v8 = vpop.f32.mrf.mxu0  ;;  %v812_v10 = vadd.f32 %v811_v5, %v722_v4  ;;  %v1009_v18 = vmax.f32 %v977_v12, 0.0 }
  0xe2   : > { %v773_v9 = vpop.f32.mrf.mxu1 }
  0xe3   : > { %1560 = vst [vmem:[%s1812_s10 + $0x50] sm:$0xff] %v1524_v6   ;;  %v774_v11 = vadd.f32 %v773_v9, %v684_v8  ;;  %v959_v14 = vmul.f32 %v1796_v51, %v812_v10 }
  0xe5   : > { %v944_v13 = vmul.f32 %v1796_v51, %v774_v11  ;;  %v993_v23 = vadd.f32 %v1802_v55, %v959_v14 }
  0xe7   : > { %v978_v15 = vadd.f32 %v1802_v55, %v944_v13  ;;  %v724_v16 = vpop.f32.mrf.mxu2  ;;  %v1025_v28 = vmax.f32 %v993_v23, 0.0 }
  0xe8   : > { %v813_v17 = vpop.f32.mrf.mxu3 }
  0xe9   : > { %v1010_v19 = vmax.f32 %v978_v15, 0.0  ;;  %v814_v20 = vadd.f32 %v813_v17, %v724_v16  ;;  %v687_v21 = vpop.f32.mrf.mxu0 }
  0xea   : > { %v776_v22 = vpop.f32.mrf.mxu1 }
  0xeb   : > { %v1489_v24 = vpack.c.bf16 %v1010_v19, %v1009_v18  ;;  %v960_v25 = vmul.f32 %v1796_v51, %v814_v20  ;;  %v777_v27 = vadd.f32 %v776_v22, %v687_v21 }
  0xed   : > { %1553 = vst [vmem:[%s1812_s10 + $0x18] sm:$0xff] %v1489_v24   ;;  %v994_v26 = vadd.f32 %v1802_v55, %v960_v25  ;;  %v945_v33 = vmul.f32 %v1796_v51, %v777_v27 }
  0xef   : > { %v1026_v29 = vmax.f32 %v994_v26, 0.0  ;;  %v727_v30 = vpop.f32.mrf.mxu2  ;;  %v979_v38 = vadd.f32 %v1802_v55, %v945_v33 }
  0xf0   : > { %v816_v31 = vpop.f32.mrf.mxu3 }
  0xf1   : > { %v1529_v32 = vpack.c.bf16 %v1026_v29, %v1025_v28  ;;  %v689_v34 = vpop.f32.mrf.mxu0  ;;  %v817_v36 = vadd.f32 %v816_v31, %v727_v30  ;;  %v1011_v44 = vmax.f32 %v979_v38, 0.0 }
  0xf2   : > { %v778_v35 = vpop.f32.mrf.mxu1 }
  0xf3   : > { %1561 = vst [vmem:[%s1812_s10 + $0x58] sm:$0xff] %v1529_v32   ;;  %v779_v37 = vadd.f32 %v778_v35, %v689_v34  ;;  %v961_v40 = vmul.f32 %v1796_v51, %v817_v36 }
  0xf5   : > { %v946_v39 = vmul.f32 %v1796_v51, %v779_v37  ;;  %v995_v49 = vadd.f32 %v1802_v55, %v961_v40 }
  0xf7   : > { %v980_v41 = vadd.f32 %v1802_v55, %v946_v39  ;;  %v729_v42 = vpop.f32.mrf.mxu2  ;;  %v1027_v56 = vmax.f32 %v995_v49, 0.0 }
  0xf8   : > { %v818_v43 = vpop.f32.mrf.mxu3 }
  0xf9   : > { %v1012_v45 = vmax.f32 %v980_v41, 0.0  ;;  %v819_v46 = vadd.f32 %v818_v43, %v729_v42  ;;  %v692_v47 = vpop.f32.mrf.mxu0 }
  0xfa   : > { %v781_v48 = vpop.f32.mrf.mxu1 }
  0xfb   : > { %v1494_v50 = vpack.c.bf16 %v1012_v45, %v1011_v44  ;;  %v962_v52 = vmul.f32 %v1796_v51, %v819_v46  ;;  %v782_v54 = vadd.f32 %v781_v48, %v692_v47 }
  0xfd   : > { %1554 = vst [vmem:[%s1812_s10 + $0x20] sm:$0xff] %v1494_v50   ;;  %v996_v53 = vadd.f32 %v1802_v55, %v962_v52  ;;  %v947_v61 = vmul.f32 %v1796_v51, %v782_v54 }
  0xff   : > { %v1028_v57 = vmax.f32 %v996_v53, 0.0  ;;  %v732_v58 = vpop.f32.mrf.mxu2  ;;  %v981_v2 = vadd.f32 %v1802_v55, %v947_v61 }
 0x100   : > { %v821_v59 = vpop.f32.mrf.mxu3 }
 0x101   : > { %v1534_v60 = vpack.c.bf16 %v1028_v57, %v1027_v56  ;;  %v694_v62 = vpop.f32.mrf.mxu0  ;;  %v822_v0 = vadd.f32 %v821_v59, %v732_v58  ;;  %v1013_v8 = vmax.f32 %v981_v2, 0.0 }
 0x102   : > { %v783_v63 = vpop.f32.mrf.mxu1 }
 0x103   : > { %1562 = vst [vmem:[%s1812_s10 + $0x60] sm:$0xff] %v1534_v60   ;;  %v784_v1 = vadd.f32 %v783_v63, %v694_v62  ;;  %v963_v4 = vmul.f32 %v1796_v51, %v822_v0 }
 0x105   : > { %v948_v3 = vmul.f32 %v1796_v51, %v784_v1  ;;  %v997_v13 = vadd.f32 %v1802_v55, %v963_v4 }
 0x107   : > { %v982_v5 = vadd.f32 %v1802_v55, %v948_v3  ;;  %v734_v6 = vpop.f32.mrf.mxu2  ;;  %v1029_v18 = vmax.f32 %v997_v13, 0.0 }
 0x108   : > { %v823_v7 = vpop.f32.mrf.mxu3 }
 0x109   : > { %v1014_v9 = vmax.f32 %v982_v5, 0.0  ;;  %v824_v10 = vadd.f32 %v823_v7, %v734_v6  ;;  %v697_v11 = vpop.f32.mrf.mxu0 }
 0x10a   : > { %v786_v12 = vpop.f32.mrf.mxu1 }
 0x10b   : > { %v1499_v14 = vpack.c.bf16 %v1014_v9, %v1013_v8  ;;  %v964_v15 = vmul.f32 %v1796_v51, %v824_v10  ;;  %v787_v17 = vadd.f32 %v786_v12, %v697_v11 }
 0x10d   : > { %1555 = vst [vmem:[%s1812_s10 + $0x28] sm:$0xff] %v1499_v14   ;;  %v998_v16 = vadd.f32 %v1802_v55, %v964_v15  ;;  %v949_v23 = vmul.f32 %v1796_v51, %v787_v17 }
 0x10f   : > { %v1030_v19 = vmax.f32 %v998_v16, 0.0  ;;  %v737_v20 = vpop.f32.mrf.mxu2  ;;  %v983_v28 = vadd.f32 %v1802_v55, %v949_v23 }
 0x110   : > { %v826_v21 = vpop.f32.mrf.mxu3 }
 0x111   : > { %v1539_v22 = vpack.c.bf16 %v1030_v19, %v1029_v18  ;;  %v699_v24 = vpop.f32.mrf.mxu0  ;;  %v827_v26 = vadd.f32 %v826_v21, %v737_v20  ;;  %v1015_v34 = vmax.f32 %v983_v28, 0.0 }
 0x112   : > { %v788_v25 = vpop.f32.mrf.mxu1 }
 0x113   : > { %1563 = vst [vmem:[%s1812_s10 + $0x68] sm:$0xff] %v1539_v22   ;;  %v789_v27 = vadd.f32 %v788_v25, %v699_v24  ;;  %v965_v30 = vmul.f32 %v1796_v51, %v827_v26 }
 0x115   : > { %v950_v29 = vmul.f32 %v1796_v51, %v789_v27  ;;  %v999_v39 = vadd.f32 %v1802_v55, %v965_v30 }
 0x117   : > { %v984_v31 = vadd.f32 %v1802_v55, %v950_v29  ;;  %v739_v32 = vpop.f32.mrf.mxu2  ;;  %v1031_v44 = vmax.f32 %v999_v39, 0.0 }
 0x118   : > { %v828_v33 = vpop.f32.mrf.mxu3 }
 0x119   : > { %v1016_v35 = vmax.f32 %v984_v31, 0.0  ;;  %v829_v36 = vadd.f32 %v828_v33, %v739_v32  ;;  %v702_v37 = vpop.f32.mrf.mxu0 }
 0x11a   : > { %v791_v38 = vpop.f32.mrf.mxu1 }
 0x11b   : > { %v1504_v40 = vpack.c.bf16 %v1016_v35, %v1015_v34  ;;  %v966_v41 = vmul.f32 %v1796_v51, %v829_v36  ;;  %v792_v43 = vadd.f32 %v791_v38, %v702_v37 }
 0x11d   : > { %1556 = vst [vmem:[%s1812_s10 + $0x30] sm:$0xff] %v1504_v40   ;;  %v1000_v42 = vadd.f32 %v1802_v55, %v966_v41  ;;  %v951_v49 = vmul.f32 %v1796_v51, %v792_v43 }
 0x11f   : > { %v1032_v45 = vmax.f32 %v1000_v42, 0.0  ;;  %v742_v46 = vpop.f32.mrf.mxu2  ;;  %v985_v56 = vadd.f32 %v1802_v55, %v951_v49 }
 0x120   : > { %v831_v47 = vpop.f32.mrf.mxu3 }
 0x121   : > { %v1544_v48 = vpack.c.bf16 %v1032_v45, %v1031_v44  ;;  %v704_v50 = vpop.f32.mrf.mxu0  ;;  %v832_v53 = vadd.f32 %v831_v47, %v742_v46  ;;  %v1017_v62 = vmax.f32 %v985_v56, 0.0 }
 0x122   : > { %v793_v52 = vpop.f32.mrf.mxu1 }
 0x123   : > { %1564 = vst [vmem:[%s1812_s10 + $0x70] sm:$0xff] %v1544_v48   ;;  %v794_v54 = vadd.f32 %v793_v52, %v704_v50  ;;  %v967_v58 = vmul.f32 %v1796_v51, %v832_v53 }
 0x125   : > { %v952_v57 = vmul.f32 %v1796_v51, %v794_v54  ;;  %v1001_v1 = vadd.f32 %v1802_v55, %v967_v58 }
 0x127   : > { %v986_v59 = vadd.f32 %v1802_v55, %v952_v57  ;;  %v744_v60 = vpop.f32.mrf.mxu2  ;;  %v1033_v5 = vmax.f32 %v1001_v1, 0.0 }
 0x128   : > { %v833_v61 = vpop.f32.mrf.mxu3 }
 0x129   : > { %v1018_v63 = vmax.f32 %v986_v59, 0.0  ;;  %v834_v0 = vadd.f32 %v833_v61, %v744_v60 }
 0x12b   : > { %v1509_v2 = vpack.c.bf16 %v1018_v63, %v1017_v62  ;;  %v968_v3 = vmul.f32 %v1796_v51, %v834_v0 }
 0x12d   : > { %1557 = vst [vmem:[%s1812_s10 + $0x38] sm:$0xff] %v1509_v2   ;;  %v1002_v4 = vadd.f32 %v1802_v55, %v968_v3 }
 0x12f   : > { %v1034_v6 = vmax.f32 %v1002_v4, 0.0 }
 0x131   : > { %v1549_v7 = vpack.c.bf16 %v1034_v6, %v1033_v5 }
 0x133   : > { %1565 = vst [vmem:[%s1812_s10 + $0x78] sm:$0xff] %v1549_v7  }
 0x134 PF: > { %s13_s14 = sadd.s32 1, %s1630_s14   ;;  %s1902_s12 = smov %s1626_s13 }
 0x135   : > { %p10_p5 = scmp.ge.s32.totalorder %s13_s14, 4   ;;  %s1903_s13 = smov %s1905_s15 }
 0x137   :  { %12 = sbr.rel (!%p10_p5) target bundleno = 2 (0x2), region = 76 }

// kernel: resnet_forward.23
= control target key start
LH: loop header
LB: loop body
LE: loop exit
PB: predicated region body
PF: predicated region fallthrough
CT: control target
= control target key end

     0   :  { %s478_s0 = inlined_call_operand.vmem [shape: bf16[16,512], index: 0, kind: input, shape index: {}]   ;;  %s479_s1 = inlined_call_operand.vmem [shape: bf16[16,512], index: 1, kind: input, shape index: {}]   ;;  %s480_s2 = inlined_call_operand.vmem [shape: bf16[16,512], index: 2, kind: input, shape index: {}]   ;;  %s481_s3 = inlined_call_operand.vmem [shape: bf16[16,512], index: 3, kind: input, shape index: {}]   ;;  %s482_s4 = inlined_call_operand.vmem [shape: bf16[16,512], index: 4, kind: input, shape index: {}]   ;;  %s483_s5 = inlined_call_operand.vmem [shape: bf16[16,512], index: 5, kind: input, shape index: {}]   ;;  %s484_s6 = inlined_call_operand.vmem [shape: bf16[16,512], index: 6, kind: input, shape index: {}]   ;;  %s485_s7 = inlined_call_operand.vmem [shape: bf16[16,512], index: 7, kind: input, shape index: {}]   ;;  %s486_s8 = inlined_call_operand.vmem [shape: bf16[16,512], index: 8, kind: input, shape index: {}]   ;;  %s487_s9 = inlined_call_operand.vmem [shape: bf16[16,512], index: 9, kind: output, shape index: {}]  }
   0x1   :  { %v32_v0 = vld [vmem:[%s478_s0] sm:$0xff]  ;;  %v33_v20 = vld [vmem:[%s478_s0 + $0x8] sm:$0xff]  ;;  %v34_v61 = vld [vmem:[%s478_s0 + $0x10] sm:$0xff] }
   0x2   :  { %v36_v1 = vld [vmem:[%s479_s1] sm:$0xff]  ;;  %v40_v3 = vunpack.c.l.bf16 %v32_v0  ;;  %v41_v4 = vunpack.c.h.bf16 %v32_v0  ;;  %v37_v25 = vld [vmem:[%s479_s1 + $0x8] sm:$0xff]  ;;  %v42_v34 = vunpack.c.l.bf16 %v33_v20  ;;  %v43_v35 = vunpack.c.h.bf16 %v33_v20 }
   0x3   :  { %v68_v2 = vld [vmem:[%s480_s2] sm:$0xff]  ;;  %v48_v5 = vunpack.c.l.bf16 %v36_v1  ;;  %v49_v6 = vunpack.c.h.bf16 %v36_v1  ;;  %v69_v30 = vld [vmem:[%s480_s2 + $0x8] sm:$0xff]  ;;  %v50_v38 = vunpack.c.l.bf16 %v37_v25  ;;  %v51_v39 = vunpack.c.h.bf16 %v37_v25  ;;  %v134_v25 = vld [vmem:[%s482_s4 + $0x10] sm:$0xff] }
   0x4   :  { %v100_v7 = vld [vmem:[%s481_s3] sm:$0xff]  ;;  %v80_v10 = vunpack.c.l.bf16 %v68_v2  ;;  %v81_v11 = vunpack.c.h.bf16 %v68_v2  ;;  %v101_v31 = vld [vmem:[%s481_s3 + $0x8] sm:$0xff]  ;;  %v82_v42 = vunpack.c.l.bf16 %v69_v30  ;;  %v83_v43 = vunpack.c.h.bf16 %v69_v30  ;;  %v166_v30 = vld [vmem:[%s483_s5 + $0x10] sm:$0xff] }
   0x5   :  { %v132_v8 = vld [vmem:[%s482_s4] sm:$0xff]  ;;  %v112_v12 = vunpack.c.l.bf16 %v100_v7  ;;  %v56_v15 = vmax.f32 %v40_v3, %v48_v5  ;;  %v57_v16 = vmax.f32 %v41_v4, %v49_v6  ;;  %v113_v17 = vunpack.c.h.bf16 %v100_v7  ;;  %v133_v40 = vld [vmem:[%s482_s4 + $0x8] sm:$0xff]  ;;  %v38_v6 = vld [vmem:[%s479_s1 + $0x10] sm:$0xff] }
   0x6   :  { %v164_v9 = vld [vmem:[%s483_s5] sm:$0xff]  ;;  %v144_v18 = vunpack.c.l.bf16 %v132_v8  ;;  %v145_v21 = vunpack.c.h.bf16 %v132_v8  ;;  %v165_v41 = vld [vmem:[%s483_s5 + $0x8] sm:$0xff]  ;;  %v114_v44 = vunpack.c.l.bf16 %v101_v31  ;;  %v115_v45 = vunpack.c.h.bf16 %v101_v31  ;;  %v70_v7 = vld [vmem:[%s480_s2 + $0x10] sm:$0xff] }
   0x7   :  { %v196_v13 = vld [vmem:[%s484_s6] sm:$0xff]  ;;  %v176_v22 = vunpack.c.l.bf16 %v164_v9  ;;  %v177_v23 = vunpack.c.h.bf16 %v164_v9  ;;  %v88_v26 = vmax.f32 %v56_v15, %v80_v10  ;;  %v89_v27 = vmax.f32 %v57_v16, %v81_v11  ;;  %v197_v50 = vld [vmem:[%s484_s6 + $0x8] sm:$0xff]  ;;  %v102_v16 = vld [vmem:[%s481_s3 + $0x10] sm:$0xff] }
   0x8   :  { %v374_v14 = vld [vmem:[%s485_s7] sm:$0xff]  ;;  %v208_v24 = vunpack.c.l.bf16 %v196_v13  ;;  %v209_v28 = vunpack.c.h.bf16 %v196_v13  ;;  %v58_v48 = vmax.f32 %v42_v34, %v50_v38  ;;  %v59_v49 = vmax.f32 %v43_v35, %v51_v39  ;;  %v229_v51 = vld [vmem:[%s485_s7 + $0x8] sm:$0xff] }
   0x9   :  { %v379_v19 = vld [vmem:[%s486_s8] sm:$0xff]  ;;  %v240_v29 = vunpack.c.l.bf16 %v374_v14  ;;  %v241_v32 = vunpack.c.h.bf16 %v374_v14  ;;  %v120_v36 = vmax.f32 %v88_v26, %v112_v12  ;;  %v121_v37 = vmax.f32 %v89_v27, %v113_v17  ;;  %v261_v60 = vld [vmem:[%s486_s8 + $0x8] sm:$0xff] }
   0xa   :  { %v272_v33 = vunpack.c.l.bf16 %v379_v19  ;;  %v273_v52 = vunpack.c.h.bf16 %v379_v19  ;;  %v146_v53 = vunpack.c.l.bf16 %v133_v40  ;;  %v147_v54 = vunpack.c.h.bf16 %v133_v40  ;;  %v230_v40 = vld [vmem:[%s485_s7 + $0x10] sm:$0xff] }
   0xb   :  { %v152_v46 = vmax.f32 %v120_v36, %v144_v18  ;;  %v153_v47 = vmax.f32 %v121_v37, %v145_v21  ;;  %v178_v55 = vunpack.c.l.bf16 %v165_v41  ;;  %v90_v58 = vmax.f32 %v58_v48, %v82_v42 }
   0xc   :  { %v91_v59 = vmax.f32 %v59_v49, %v83_v43  ;;  %v179_v62 = vunpack.c.h.bf16 %v165_v41  ;;  %v210_v63 = vunpack.c.l.bf16 %v197_v50  ;;  %v211_v0 = vunpack.c.h.bf16 %v197_v50  ;;  %v39_v49 = vld [vmem:[%s479_s1 + $0x18] sm:$0xff] }
   0xd   :  { %v184_v56 = vmax.f32 %v152_v46, %v176_v22  ;;  %v185_v57 = vmax.f32 %v153_v47, %v177_v23  ;;  %v242_v1 = vunpack.c.l.bf16 %v229_v51  ;;  %v122_v4 = vmax.f32 %v90_v58, %v114_v44  ;;  %v35_v44 = vld [vmem:[%s478_s0 + $0x18] sm:$0xff] }
   0xe   :  { %v123_v5 = vmax.f32 %v91_v59, %v115_v45  ;;  %v243_v8 = vunpack.c.h.bf16 %v229_v51  ;;  %v274_v9 = vunpack.c.l.bf16 %v261_v60  ;;  %v44_v10 = vunpack.c.l.bf16 %v34_v61  ;;  %v103_v59 = vld [vmem:[%s481_s3 + $0x18] sm:$0xff] }
   0xf   :  { %v216_v2 = vmax.f32 %v184_v56, %v208_v24  ;;  %v217_v3 = vmax.f32 %v185_v57, %v209_v28  ;;  %v45_v11 = vunpack.c.h.bf16 %v34_v61  ;;  %v154_v14 = vmax.f32 %v122_v4, %v146_v53  ;;  %v262_v61 = vld [vmem:[%s486_s8 + $0x10] sm:$0xff] }
  0x10   :  { %v155_v15 = vmax.f32 %v123_v5, %v147_v54  ;;  %v52_v17 = vunpack.c.l.bf16 %v38_v6  ;;  %v53_v18 = vunpack.c.h.bf16 %v38_v6  ;;  %v84_v19 = vunpack.c.l.bf16 %v70_v7  ;;  %v71_v54 = vld [vmem:[%s480_s2 + $0x18] sm:$0xff] }
  0x11   :  { %v248_v12 = vmax.f32 %v216_v2, %v240_v29  ;;  %v249_v13 = vmax.f32 %v217_v3, %v241_v32  ;;  %v85_v20 = vunpack.c.h.bf16 %v70_v7  ;;  %v186_v23 = vmax.f32 %v154_v14, %v178_v55  ;;  %v135_v5 = vld [vmem:[%s482_s4 + $0x18] sm:$0xff] }
  0x12   :  { %v187_v24 = vmax.f32 %v155_v15, %v179_v62  ;;  %v60_v26 = vmax.f32 %v44_v10, %v52_v17  ;;  %v61_v27 = vmax.f32 %v45_v11, %v53_v18  ;;  %v116_v28 = vunpack.c.l.bf16 %v102_v16  ;;  %v167_v14 = vld [vmem:[%s483_s5 + $0x18] sm:$0xff] }
  0x13   :  { %v280_v21 = vmax.f32 %v248_v12, %v272_v33  ;;  %v281_v22 = vmax.f32 %v249_v13, %v273_v52  ;;  %v117_v29 = vunpack.c.h.bf16 %v102_v16  ;;  %v218_v32 = vmax.f32 %v186_v23, %v210_v63  ;;  %v198_v33 = vld [vmem:[%s484_s6 + $0x10] sm:$0xff] }
  0x14   :  { %v219_v34 = vmax.f32 %v187_v24, %v211_v0  ;;  %v275_v35 = vunpack.c.h.bf16 %v261_v60  ;;  %v92_v36 = vmax.f32 %v60_v26, %v84_v19  ;;  %v93_v37 = vmax.f32 %v61_v27, %v85_v20 }
  0x15   :  { %v288_v31 = vpack.c.bf16 %v281_v22, %v280_v21  ;;  %v148_v38 = vunpack.c.l.bf16 %v134_v25  ;;  %v149_v39 = vunpack.c.h.bf16 %v134_v25  ;;  %v250_v41 = vmax.f32 %v218_v32, %v242_v1  ;;  %v199_v21 = vld [vmem:[%s484_s6 + $0x18] sm:$0xff] }
  0x16   :  { %v251_v42 = vmax.f32 %v219_v34, %v243_v8  ;;  %v180_v43 = vunpack.c.l.bf16 %v166_v30  ;;  %v124_v45 = vmax.f32 %v92_v36, %v116_v28  ;;  %v125_v46 = vmax.f32 %v93_v37, %v117_v29  ;;  %v231_v28 = vld [vmem:[%s485_s7 + $0x18] sm:$0xff] }
  0x17   :  { %292 = vst [vmem:[%s487_s9] sm:$0xff] %v288_v31  ;;  %v181_v47 = vunpack.c.h.bf16 %v166_v30  ;;  %v212_v48 = vunpack.c.l.bf16 %v198_v33  ;;  %v282_v50 = vmax.f32 %v250_v41, %v274_v9  ;;  %v213_v52 = vunpack.c.h.bf16 %v198_v33 }
  0x18   :  { %v283_v51 = vmax.f32 %v251_v42, %v275_v35  ;;  %v244_v53 = vunpack.c.l.bf16 %v230_v40  ;;  %v156_v55 = vmax.f32 %v124_v45, %v148_v38  ;;  %v157_v56 = vmax.f32 %v125_v46, %v149_v39  ;;  %v263_v35 = vld [vmem:[%s486_s8 + $0x18] sm:$0xff] }
  0x19   :  { %v245_v57 = vunpack.c.h.bf16 %v230_v40  ;;  %v46_v58 = vunpack.c.l.bf16 %v35_v44  ;;  %v47_v62 = vunpack.c.h.bf16 %v35_v44  ;;  %v54_v63 = vunpack.c.l.bf16 %v39_v49 }
  0x1a   :  { %v289_v60 = vpack.c.bf16 %v283_v51, %v282_v50  ;;  %v55_v0 = vunpack.c.h.bf16 %v39_v49  ;;  %v188_v1 = vmax.f32 %v156_v55, %v180_v43  ;;  %v189_v2 = vmax.f32 %v157_v56, %v181_v47 }
  0x1b   :  { %v86_v3 = vunpack.c.l.bf16 %v71_v54  ;;  %v87_v4 = vunpack.c.h.bf16 %v71_v54  ;;  %v62_v6 = vmax.f32 %v46_v58, %v54_v63  ;;  %v118_v8 = vunpack.c.l.bf16 %v103_v59 }
  0x1c   :  { %293 = vst [vmem:[%s487_s9 + $0x8] sm:$0xff] %v289_v60  ;;  %v63_v7 = vmax.f32 %v47_v62, %v55_v0  ;;  %v119_v9 = vunpack.c.h.bf16 %v103_v59  ;;  %v220_v10 = vmax.f32 %v188_v1, %v212_v48  ;;  %v221_v11 = vmax.f32 %v189_v2, %v213_v52 }
  0x1d   :  { %v276_v12 = vunpack.c.l.bf16 %v262_v61  ;;  %v277_v13 = vunpack.c.h.bf16 %v262_v61  ;;  %v94_v15 = vmax.f32 %v62_v6, %v86_v3  ;;  %v150_v17 = vunpack.c.l.bf16 %v135_v5 }
  0x1e   :  { %v95_v16 = vmax.f32 %v63_v7, %v87_v4  ;;  %v151_v18 = vunpack.c.h.bf16 %v135_v5  ;;  %v252_v19 = vmax.f32 %v220_v10, %v244_v53  ;;  %v253_v20 = vmax.f32 %v221_v11, %v245_v57 }
  0x1f   :  { %v126_v22 = vmax.f32 %v94_v15, %v118_v8  ;;  %v182_v24 = vunpack.c.l.bf16 %v167_v14  ;;  %v183_v25 = vunpack.c.h.bf16 %v167_v14  ;;  %v214_v31 = vunpack.c.l.bf16 %v199_v21 }
  0x20   :  { %v127_v23 = vmax.f32 %v95_v16, %v119_v9  ;;  %v284_v26 = vmax.f32 %v252_v19, %v276_v12  ;;  %v285_v27 = vmax.f32 %v253_v20, %v277_v13  ;;  %v215_v32 = vunpack.c.h.bf16 %v199_v21 }
  0x21   :  { %v158_v29 = vmax.f32 %v126_v22, %v150_v17  ;;  %v246_v37 = vunpack.c.l.bf16 %v231_v28  ;;  %v247_v38 = vunpack.c.h.bf16 %v231_v28  ;;  %v278_v41 = vunpack.c.l.bf16 %v263_v35 }
  0x22   :  { %v159_v30 = vmax.f32 %v127_v23, %v151_v18  ;;  %v290_v34 = vpack.c.bf16 %v285_v27, %v284_v26  ;;  %v279_v42 = vunpack.c.h.bf16 %v263_v35 }
  0x23   :  { %v190_v33 = vmax.f32 %v158_v29, %v182_v24 }
  0x24   :  { %v191_v36 = vmax.f32 %v159_v30, %v183_v25  ;;  %294 = vst [vmem:[%s487_s9 + $0x10] sm:$0xff] %v290_v34 }
  0x25   :  { %v222_v39 = vmax.f32 %v190_v33, %v214_v31 }
  0x26   :  { %v223_v40 = vmax.f32 %v191_v36, %v215_v32 }
  0x27   :  { %v254_v43 = vmax.f32 %v222_v39, %v246_v37 }
  0x28   :  { %v255_v44 = vmax.f32 %v223_v40, %v247_v38 }
  0x29   :  { %v286_v45 = vmax.f32 %v254_v43, %v278_v41 }
  0x2a   :  { %v287_v46 = vmax.f32 %v255_v44, %v279_v42 }
  0x2c   :  { %v291_v47 = vpack.c.bf16 %v287_v46, %v286_v45 }
  0x2e   :  { %295 = vst [vmem:[%s487_s9 + $0x18] sm:$0xff] %v291_v47 }

// kernel: resnet_forward.24
= control target key start
LH: loop header
LB: loop body
LE: loop exit
PB: predicated region body
PF: predicated region fallthrough
CT: control target
= control target key end

     0   :  { %s1091_s12 = smov 0   ;;  %s1093_s13 = smov 0   ;;  %s1244_s0 = inlined_call_operand.vmem [shape: bf16[128,640], index: 0, kind: input, shape index: {}]   ;;  %s1245_s1 = inlined_call_operand.vmem [shape: bf16[640,128], index: 1, kind: input, shape index: {}]   ;;  %s1246_s2 = inlined_call_operand.vmem [shape: f32[2,128], index: 2, kind: input, shape index: {}]   ;;  %s1247_s3 = inlined_call_operand.vmem [shape: bf16[128,128], index: 3, kind: output, shape index: {}]  }
   0x1   :  { %s1095_s14 = smov 0   ;;  %s1097_s15 = smov 0  }
   0x2   :  { %s1099_s16 = smov 0  }
   0x3 LB: > { %s25_s17 = sadd.s32 1, %s1064_s15  ;;  %p48_p1 = scmp.ne.s32.totalorder %s1056_s13, %s1052_s12  ;;  %s1068_s16 = sphi %s1099_s16, %s13_s16   ;;  %s1064_s15 = sphi %s1097_s15, %s1251_s15   ;;  %s1060_s14 = sphi %s1095_s14, %s1250_s14   ;;  %s1056_s13 = sphi %s1093_s13, %s1249_s13   ;;  %s1052_s12 = sphi %s1091_s12, %s1248_s12  }
   0x4   : > { %p26_p0 = scmp.ge.s32.totalorder %s25_s17, 5  ;;  %p49_p2 = scmp.eq.s32.totalorder %s1068_s16, 0 }
   0x5   : > { %s41_s19 = sadd.s32 1, %s1056_s13  ;;  %p823_p5 = scmp.ge.s32.totalorder %s1068_s16, 5 }
   0x6   : > { %s1253_s17 = smov (%p26_p0, %s25_s17), 0  ;;  %p50_p3 = por %p49_p2, %p48_p1 }
   0x7   : > { %s37_s18 = ssub.s32 %s1064_s15, %s1253_s17  ;;  %163 = sbr.rel (%p823_p5) target bundleno = 32 (0x20), region = 20 }
   0x8   : > { %p39_p4 = scmp.eq.s32.totalorder %s37_s18, 0 }
   0xa   : > { %s1126_s20 = scalar_select %p39_p4, %s1056_s13, %s41_s19  }
   0xc   : > { %166 = sbr.rel (!%p50_p3) target bundleno = 32 (0x20), region = 24  ;;  %s168_s21 = sand.u32 (%p50_p3), 1, %s1056_s13  }
   0xd   : > { %s825_s22 = sshll.u32 (%p50_p3), %s1064_s15, 2  ;;  %s824_s23 = sshll.u32 (%p50_p3), %s168_s21, 6 }
   0xe   : > { %s1134_s26 = scalar_lea.vmem (%p50_p3), %s1244_s0, %s825_s22  ;;  %s170_s27 = scalar_lea.vmem (%p50_p3), [#allocation3], %s824_s23 }
   0xf   : > { %v192_v0 = vld [vmem:[%s1134_s26] sm:$0xf] (%p50_p3)  ;;  %v194_v1 = vld [vmem:[%s1134_s26 + $0x14] sm:$0xf] (%p50_p3)  ;;  %v196_v2 = vld [vmem:[%s1134_s26 + $0x28] sm:$0xf] (%p50_p3) }
  0x10   : > { %193 = vst [vmem:[%s170_s27] sm:$0xf] (%p50_p3), %v192_v0  ;;  %v198_v3 = vld [vmem:[%s1134_s26 + $0x3c] sm:$0xf] (%p50_p3)  ;;  %v200_v4 = vld [vmem:[%s1134_s26 + $0x50] sm:$0xf] (%p50_p3) }
  0x11   : > { %195 = vst [vmem:[%s170_s27 + $0x4] sm:$0xf] %v194_v1  ;;  %v202_v5 = vld [vmem:[%s1134_s26 + $0x64] sm:$0xf]  ;;  %v204_v6 = vld [vmem:[%s1134_s26 + $0x78] sm:$0xf] }
  0x12   : > { %197 = vst [vmem:[%s170_s27 + $0x8] sm:$0xf] %v196_v2  ;;  %v206_v7 = vld [vmem:[%s1134_s26 + $0x8c] sm:$0xf]  ;;  %v208_v8 = vld [vmem:[%s1134_s26 + $0xa0] sm:$0xf] }
  0x13   : > { %199 = vst [vmem:[%s170_s27 + $0xc] sm:$0xf] %v198_v3  ;;  %v210_v9 = vld [vmem:[%s1134_s26 + $0xb4] sm:$0xf]  ;;  %v212_v10 = vld [vmem:[%s1134_s26 + $0xc8] sm:$0xf] }
  0x14   : > { %201 = vst [vmem:[%s170_s27 + $0x10] sm:$0xf] %v200_v4  ;;  %v214_v11 = vld [vmem:[%s1134_s26 + $0xdc] sm:$0xf]  ;;  %v216_v12 = vld [vmem:[%s1134_s26 + $0xf0] sm:$0xf] }
  0x15   : > { %203 = vst [vmem:[%s170_s27 + $0x14] sm:$0xf] %v202_v5  ;;  %v218_v13 = vld [vmem:[%s1134_s26 + $0x104] sm:$0xf]  ;;  %v220_v14 = vld [vmem:[%s1134_s26 + $0x118] sm:$0xf] }
  0x16   : > { %205 = vst [vmem:[%s170_s27 + $0x18] sm:$0xf] %v204_v6  ;;  %v222_v15 = vld [vmem:[%s1134_s26 + $0x12c] sm:$0xf] }
  0x17   : > { %207 = vst [vmem:[%s170_s27 + $0x1c] sm:$0xf] %v206_v7 }
  0x18   : > { %209 = vst [vmem:[%s170_s27 + $0x20] sm:$0xf] %v208_v8 }
  0x19   : > { %211 = vst [vmem:[%s170_s27 + $0x24] sm:$0xf] %v210_v9 }
  0x1a   : > { %213 = vst [vmem:[%s170_s27 + $0x28] sm:$0xf] %v212_v10 }
  0x1b   : > { %215 = vst [vmem:[%s170_s27 + $0x2c] sm:$0xf] %v214_v11 }
  0x1c   : > { %217 = vst [vmem:[%s170_s27 + $0x30] sm:$0xf] %v216_v12 }
  0x1d   : > { %219 = vst [vmem:[%s170_s27 + $0x34] sm:$0xf] %v218_v13 }
  0x1e   : > { %221 = vst [vmem:[%s170_s27 + $0x38] sm:$0xf] %v220_v14 }
  0x1f   : > { %223 = vst [vmem:[%s170_s27 + $0x3c] sm:$0xf] %v222_v15 }
  0x20 PF: > { %p826_p6 = scmp.ge.s32.totalorder %s1068_s16, 1  ;;  %p290_p7 = scmp.lt.s32.totalorder %s1068_s16, 6 }
  0x22   : > { %p291_p8 = pnand %p826_p6, %p290_p7 }
  0x23   : > { %s297_s28 = sand.u32 (!%p291_p8), 1, %s1052_s12   ;;  %s828_s29 = sshll.u32 (!%p291_p8), %s1060_s14, 4 }
  0x24   : > { %294 = sbr.rel (%p291_p8) target bundleno = 277 (0x115), region = 69  ;;  %s827_s30 = sshll.u32 (!%p291_p8), %s297_s28, 6 }
  0x25   : > { %p337_p9 = scmp.lt.s32.totalorder (!%p291_p8), %s828_s29, 79  ;;  %s1161_s8 = scalar_lea.vmem (!%p291_p8), [#allocation3], %s827_s30 }
  0x26   : > { %p830_p10 = scmp.ne.s32.totalorder (!%p291_p8), %s1060_s14, 0 }
  0x29   : > { %s1255_s29 = smov (!%p337_p9, %s828_s29), 79  ;;  %361 = sbr.rel (%p830_p10) target bundleno = 63 (0x3f), region = 77 }
  0x2a   : > { %s829_s4 = sshll.u32 %s1255_s29, 2 }
  0x2b   : > { %s1159_s7 = scalar_lea.vmem %s1245_s1, %s829_s4 }
  0x2e   : > { %v1070_v16 = vmov 0.0  }
  0x2f   : > { %362 = vst [vmem:[#allocation2 + $0x30] sm:$0xff] %v1070_v16 }
  0x30   : > { %363 = vst [vmem:[#allocation2] sm:$0xff] %v1070_v16 }
  0x31   : > { %364 = vst [vmem:[#allocation2 + $0x58] sm:$0xff] %v1070_v16 }
  0x32   : > { %365 = vst [vmem:[#allocation2 + $0x18] sm:$0xff] %v1070_v16 }
  0x33   : > { %366 = vst [vmem:[#allocation2 + $0x50] sm:$0xff] %v1070_v16 }
  0x34   : > { %367 = vst [vmem:[#allocation2 + $0x68] sm:$0xff] %v1070_v16 }
  0x35   : > { %368 = vst [vmem:[#allocation2 + $0x8] sm:$0xff] %v1070_v16 }
  0x36   : > { %369 = vst [vmem:[#allocation2 + $0x48] sm:$0xff] %v1070_v16 }
  0x37   : > { %370 = vst [vmem:[#allocation2 + $0x40] sm:$0xff] %v1070_v16 }
  0x38   : > { %371 = vst [vmem:[#allocation2 + $0x20] sm:$0xff] %v1070_v16 }
  0x39   : > { %372 = vst [vmem:[#allocation2 + $0x10] sm:$0xff] %v1070_v16 }
  0x3a   : > { %373 = vst [vmem:[#allocation2 + $0x38] sm:$0xff] %v1070_v16 }
  0x3b   : > { %374 = vst [vmem:[#allocation2 + $0x60] sm:$0xff] %v1070_v16 }
  0x3c   : > { %375 = vst [vmem:[#allocation2 + $0x70] sm:$0xff] %v1070_v16 }
  0x3d   : > { %376 = vst [vmem:[#allocation2 + $0x78] sm:$0xff] %v1070_v16 }
  0x3e   : > { %377 = vst [vmem:[#allocation2 + $0x28] sm:$0xff] %v1070_v16 }
  0x3f PF: > { %v915_v17 = vld [vmem:[%s1159_s7 + $0x38] sm:$0xff]  ;;  %v914_v18 = vld [vmem:[%s1159_s7 + $0x30] sm:$0xff]  ;;  %v913_v19 = vld [vmem:[%s1159_s7 + $0x28] sm:$0xff]  ;;  %p895_p11 = scmp.ne.s32.totalorder %s1060_s14, 4 }
  0x40   : > { %522 = vmatpush.bf16.msra.mxu0 %v915_v17  ;;  %963 = vmatpush.bf16.msra.mxu1 %v915_v17  ;;  %v912_v20 = vld [vmem:[%s1159_s7 + $0x20] sm:$0xff]  ;;  %v911_v21 = vld [vmem:[%s1159_s7 + $0x18] sm:$0xff]  ;;  %v910_v22 = vld [vmem:[%s1159_s7 + $0x10] sm:$0xff] }
  0x41   : > { %964 = vmatpush.bf16.msra.mxu2 %v915_v17  ;;  %965 = vmatpush.bf16.msra.mxu3 %v915_v17  ;;  %v909_v23 = vld [vmem:[%s1159_s7 + $0x8] sm:$0xff]  ;;  %v908_v24 = vld [vmem:[%s1159_s7] sm:$0xff]  ;;  %v902_v26 = vld [vmem:[%s1161_s8 + $0x10] sm:$0xff] }
  0x42   : > { %v900_v25 = vld [vmem:[%s1161_s8] sm:$0xff]  ;;  %v906_v28 = vld [vmem:[%s1161_s8 + $0x30] sm:$0xff]  ;;  %v901_v29 = vld [vmem:[%s1161_s8 + $0x8] sm:$0xff] }
  0x43   : > { %v904_v27 = vld [vmem:[%s1161_s8 + $0x20] sm:$0xff]  ;;  %v903_v30 = vld [vmem:[%s1161_s8 + $0x18] sm:$0xff]  ;;  %v905_v31 = vld [vmem:[%s1161_s8 + $0x28] sm:$0xff] }
  0x44   : > { %523 = vmatpush.bf16.msra.mxu0 %v914_v18  ;;  %966 = vmatpush.bf16.msra.mxu1 %v914_v18  ;;  %v907_v32 = vld [vmem:[%s1161_s8 + $0x38] sm:$0xff]  ;;  %v378_v33 = vld [vmem:[#allocation2 + $0x30] sm:$0xff]  ;;  %v386_v39 = vld [vmem:[#allocation2 + $0x40] sm:$0xff] }
  0x45   : > { %967 = vmatpush.bf16.msra.mxu2 %v914_v18  ;;  %968 = vmatpush.bf16.msra.mxu3 %v914_v18  ;;  %v382_v34 = vld [vmem:[#allocation2 + $0x50] sm:$0xff]  ;;  %v390_v40 = vld [vmem:[#allocation2 + $0x60] sm:$0xff]  ;;  %v383_v42 = vld [vmem:[#allocation2 + $0x68] sm:$0xff] }
  0x46   : > { %v379_v41 = vld [vmem:[#allocation2] sm:$0xff]  ;;  %v391_v52 = vld [vmem:[#allocation2 + $0x70] sm:$0xff]  ;;  %v380_v53 = vld [vmem:[#allocation2 + $0x58] sm:$0xff] }
  0x47   : > { %v387_v51 = vld [vmem:[#allocation2 + $0x20] sm:$0xff]  ;;  %v384_v54 = vld [vmem:[#allocation2 + $0x8] sm:$0xff]  ;;  %v388_v63 = vld [vmem:[#allocation2 + $0x10] sm:$0xff] }
  0x48   : > { %524 = vmatpush.bf16.msra.mxu0 %v913_v19  ;;  %969 = vmatpush.bf16.msra.mxu1 %v913_v19  ;;  %v392_v0 = vld [vmem:[#allocation2 + $0x78] sm:$0xff]  ;;  %v385_v2 = vld [vmem:[#allocation2 + $0x48] sm:$0xff] }
  0x49   : > { %970 = vmatpush.bf16.msra.mxu2 %v913_v19  ;;  %971 = vmatpush.bf16.msra.mxu3 %v913_v19  ;;  %v381_v1 = vld [vmem:[#allocation2 + $0x18] sm:$0xff]  ;;  %v393_v12 = vld [vmem:[#allocation2 + $0x28] sm:$0xff] }
  0x4a   : > { %v389_v11 = vld [vmem:[#allocation2 + $0x38] sm:$0xff] }
  0x4c   : > { %525 = vmatpush.bf16.msra.mxu0 %v912_v20  ;;  %972 = vmatpush.bf16.msra.mxu1 %v912_v20 }
  0x4d   : > { %973 = vmatpush.bf16.msra.mxu2 %v912_v20  ;;  %974 = vmatpush.bf16.msra.mxu3 %v912_v20 }
  0x50   : > { %526 = vmatpush.bf16.msra.mxu0 %v911_v21  ;;  %975 = vmatpush.bf16.msra.mxu1 %v911_v21 }
  0x51   : > { %976 = vmatpush.bf16.msra.mxu2 %v911_v21  ;;  %977 = vmatpush.bf16.msra.mxu3 %v911_v21 }
  0x54   : > { %527 = vmatpush.bf16.msra.mxu0 %v910_v22  ;;  %978 = vmatpush.bf16.msra.mxu1 %v910_v22 }
  0x55   : > { %979 = vmatpush.bf16.msra.mxu2 %v910_v22  ;;  %980 = vmatpush.bf16.msra.mxu3 %v910_v22 }
  0x58   : > { %528 = vmatpush.bf16.msra.mxu0 %v909_v23  ;;  %981 = vmatpush.bf16.msra.mxu1 %v909_v23 }
  0x59   : > { %982 = vmatpush.bf16.msra.mxu2 %v909_v23  ;;  %983 = vmatpush.bf16.msra.mxu3 %v909_v23 }
  0x5c   : > { %529 = vmatpush.bf16.msra.mxu0 %v908_v24  ;;  %984 = vmatpush.bf16.msra.mxu1 %v908_v24 }
  0x5d   : > { %985 = vmatpush.bf16.msra.mxu2 %v908_v24  ;;  %986 = vmatpush.bf16.msra.mxu3 %v908_v24 }
  0x5f   : > { %530 = vmatmul.bf16.vlgmr.msra.gmra.mxu0 %v900_v25  ;;  %540 = vmatmul.bf16.vlgmr.msra.gmra.mxu1 %v902_v26 }
  0x60   : > { %550 = vmatmul.bf16.vlgmr.msra.gmra.mxu2 %v904_v27  ;;  %560 = vmatmul.bf16.vlgmr.msra.gmra.mxu3 %v906_v28 }
  0x6f   : > { %535 = vmatmul.bf16.gmra.mxu0 %v901_v29  ;;  %545 = vmatmul.bf16.gmra.mxu1 %v903_v30 }
  0x70   : > { %555 = vmatmul.bf16.gmra.mxu2 %v905_v31  ;;  %565 = vmatmul.bf16.gmra.mxu3 %v907_v32 }
  0xdc   : > { %v531_v35 = vpop.f32.mrf.mxu0  ;;  %v541_v36 = vpop.f32.mrf.mxu1 }
  0xdd   : > { %v571_v37 = vadd.f32 %v531_v35, %v378_v33  ;;  %v575_v38 = vadd.f32 %v541_v36, %v382_v34 }
  0xdf   : > { %587 = vst [vmem:[#allocation2 + $0x30] sm:$0xff] %v571_v37 }
  0xe0   : > { %591 = vst [vmem:[#allocation2 + $0x50] sm:$0xff] %v575_v38 }
  0xe3   : > { %v551_v43 = vpop.f32.mrf.mxu2  ;;  %v561_v44 = vpop.f32.mrf.mxu3 }
  0xe4   : > { %v579_v45 = vadd.f32 %v551_v43, %v386_v39  ;;  %v583_v46 = vadd.f32 %v561_v44, %v390_v40  ;;  %v533_v47 = vpop.f32.mrf.mxu0  ;;  %v543_v48 = vpop.f32.mrf.mxu1 }
  0xe5   : > { %v572_v49 = vadd.f32 %v533_v47, %v379_v41  ;;  %v576_v50 = vadd.f32 %v543_v48, %v383_v42 }
  0xe6   : > { %595 = vst [vmem:[#allocation2 + $0x40] sm:$0xff] %v579_v45 }
  0xe7   : > { %599 = vst [vmem:[#allocation2 + $0x60] sm:$0xff] %v583_v46 }
  0xe8   : > { %588 = vst [vmem:[#allocation2] sm:$0xff] %v572_v49 }
  0xe9   : > { %592 = vst [vmem:[#allocation2 + $0x68] sm:$0xff] %v576_v50 }
  0xeb   : > { %v553_v55 = vpop.f32.mrf.mxu2  ;;  %v563_v56 = vpop.f32.mrf.mxu3 }
  0xec   : > { %v580_v57 = vadd.f32 %v553_v55, %v387_v51  ;;  %v584_v58 = vadd.f32 %v563_v56, %v391_v52  ;;  %v536_v59 = vpop.f32.mrf.mxu0  ;;  %v546_v60 = vpop.f32.mrf.mxu1 }
  0xed   : > { %v573_v61 = vadd.f32 %v536_v59, %v380_v53  ;;  %v577_v62 = vadd.f32 %v546_v60, %v384_v54 }
  0xee   : > { %596 = vst [vmem:[#allocation2 + $0x20] sm:$0xff] %v580_v57 }
  0xef   : > { %600 = vst [vmem:[#allocation2 + $0x70] sm:$0xff] %v584_v58 }
  0xf0   : > { %589 = vst [vmem:[#allocation2 + $0x58] sm:$0xff] %v573_v61 }
  0xf1   : > { %593 = vst [vmem:[#allocation2 + $0x8] sm:$0xff] %v577_v62 }
  0xf3   : > { %v556_v3 = vpop.f32.mrf.mxu2  ;;  %v566_v4 = vpop.f32.mrf.mxu3 }
  0xf4   : > { %v581_v5 = vadd.f32 %v556_v3, %v388_v63  ;;  %v585_v6 = vadd.f32 %v566_v4, %v392_v0  ;;  %v538_v7 = vpop.f32.mrf.mxu0  ;;  %v548_v8 = vpop.f32.mrf.mxu1 }
  0xf5   : > { %v574_v9 = vadd.f32 %v538_v7, %v381_v1  ;;  %v578_v10 = vadd.f32 %v548_v8, %v385_v2 }
  0xf6   : > { %597 = vst [vmem:[#allocation2 + $0x10] sm:$0xff] %v581_v5 }
  0xf7   : > { %601 = vst [vmem:[#allocation2 + $0x78] sm:$0xff] %v585_v6 }
  0xf8   : > { %590 = vst [vmem:[#allocation2 + $0x18] sm:$0xff] %v574_v9 }
  0xf9   : > { %594 = vst [vmem:[#allocation2 + $0x48] sm:$0xff] %v578_v10 }
  0xfb   : > { %v558_v13 = vpop.f32.mrf.mxu2  ;;  %v568_v14 = vpop.f32.mrf.mxu3  ;;  %606 = sbr.rel (%p895_p11) target bundleno = 277 (0x115), region = 81 }
  0xfc   : > { %v582_v15 = vadd.f32 %v558_v13, %v389_v11  ;;  %v586_v16 = vadd.f32 %v568_v14, %v393_v12 }
  0xfe   : > { %598 = vst [vmem:[#allocation2 + $0x38] sm:$0xff] %v582_v15 }
  0xff   : > { %602 = vst [vmem:[#allocation2 + $0x28] sm:$0xff] %v586_v16 }
 0x100   : > { %v607_v17 = vld [vmem:[#allocation2 + $0x30] sm:$0xff]  ;;  %v608_v18 = vld [vmem:[#allocation2] sm:$0xff]  ;;  %v609_v21 = vld [vmem:[#allocation2 + $0x58] sm:$0xff] }
 0x101   : > { %v1028_v19 = vld [vmem:[%s1246_s2] ss:$0 sm:$0xff]  ;;  %v1187_v20 = vld [vmem:[%s1246_s2 + $0x1] ss:$0 sm:$0xff]  ;;  %v610_v22 = vld [vmem:[#allocation2 + $0x18] sm:$0xff] }
 0x102   : > { %v611_v23 = vld [vmem:[#allocation2 + $0x50] sm:$0xff]  ;;  %v625_v24 = vmul.f32 %v1028_v19, %v607_v17  ;;  %v626_v25 = vmul.f32 %v1028_v19, %v608_v18  ;;  %v627_v26 = vmul.f32 %v1028_v19, %v609_v21  ;;  %v628_v27 = vmul.f32 %v1028_v19, %v610_v22  ;;  %v612_v28 = vld [vmem:[#allocation2 + $0x68] sm:$0xff]  ;;  %v615_v43 = vld [vmem:[#allocation2 + $0x40] sm:$0xff] }
 0x103   : > { %v613_v29 = vld [vmem:[#allocation2 + $0x8] sm:$0xff]  ;;  %v629_v31 = vmul.f32 %v1028_v19, %v611_v23  ;;  %v630_v32 = vmul.f32 %v1028_v19, %v612_v28  ;;  %v616_v44 = vld [vmem:[#allocation2 + $0x20] sm:$0xff]  ;;  %v617_v49 = vld [vmem:[#allocation2 + $0x10] sm:$0xff]  ;;  %v633_v59 = vmul.f32 %v1028_v19, %v615_v43 }
 0x104   : > { %v614_v30 = vld [vmem:[#allocation2 + $0x48] sm:$0xff]  ;;  %v631_v33 = vmul.f32 %v1028_v19, %v613_v29  ;;  %v643_v35 = vadd.f32 %v1187_v20, %v625_v24  ;;  %v644_v36 = vadd.f32 %v1187_v20, %v626_v25  ;;  %v645_v37 = vadd.f32 %v1187_v20, %v627_v26  ;;  %v619_v55 = vld [vmem:[#allocation2 + $0x60] sm:$0xff]  ;;  %v620_v56 = vld [vmem:[#allocation2 + $0x70] sm:$0xff] }
 0x105   : > { %v632_v34 = vmul.f32 %v1028_v19, %v614_v30  ;;  %v646_v38 = vadd.f32 %v1187_v20, %v628_v27  ;;  %v647_v39 = vadd.f32 %v1187_v20, %v629_v31  ;;  %v648_v40 = vadd.f32 %v1187_v20, %v630_v32  ;;  %v618_v50 = vld [vmem:[#allocation2 + $0x38] sm:$0xff] }
 0x106   : > { %v649_v41 = vadd.f32 %v1187_v20, %v631_v33  ;;  %v659_v45 = vmax.f32 %v643_v35, 0.0  ;;  %v660_v46 = vmax.f32 %v644_v36, 0.0  ;;  %v661_v47 = vmax.f32 %v645_v37, 0.0  ;;  %v621_v61 = vld [vmem:[#allocation2 + $0x78] sm:$0xff]  ;;  %v622_v62 = vld [vmem:[#allocation2 + $0x28] sm:$0xff] }
 0x107   : > { %v650_v42 = vadd.f32 %v1187_v20, %v632_v34  ;;  %v662_v48 = vmax.f32 %v646_v38, 0.0  ;;  %v663_v51 = vmax.f32 %v647_v39, 0.0  ;;  %v664_v52 = vmax.f32 %v648_v40, 0.0 }
 0x108   : > { %v665_v53 = vmax.f32 %v649_v41, 0.0  ;;  %v919_v57 = vpack.c.bf16 %v660_v46, %v659_v45  ;;  %v634_v60 = vmul.f32 %v1028_v19, %v616_v44  ;;  %v635_v1 = vmul.f32 %v1028_v19, %v617_v49 }
 0x109   : > { %v666_v54 = vmax.f32 %v650_v42, 0.0  ;;  %v924_v58 = vpack.c.bf16 %v662_v48, %v661_v47  ;;  %v929_v63 = vpack.c.bf16 %v664_v52, %v663_v51  ;;  %v636_v2 = vmul.f32 %v1028_v19, %v618_v50 }
 0x10a   : > { %920 = vst [vmem:[%s1247_s3] sm:$0xff] %v919_v57   ;;  %v651_v3 = vadd.f32 %v1187_v20, %v633_v59  ;;  %v652_v4 = vadd.f32 %v1187_v20, %v634_v60  ;;  %v637_v5 = vmul.f32 %v1028_v19, %v619_v55  ;;  %v638_v6 = vmul.f32 %v1028_v19, %v620_v56 }
 0x10b   : > { %v934_v0 = vpack.c.bf16 %v666_v54, %v665_v53  ;;  %956 = vst [vmem:[%s1247_s3 + $0x8] sm:$0xff] %v924_v58   ;;  %v653_v7 = vadd.f32 %v1187_v20, %v635_v1  ;;  %v654_v8 = vadd.f32 %v1187_v20, %v636_v2  ;;  %v639_v9 = vmul.f32 %v1028_v19, %v621_v61 }
 0x10c   : > { %v640_v10 = vmul.f32 %v1028_v19, %v622_v62  ;;  %957 = vst [vmem:[%s1247_s3 + $0x10] sm:$0xff] %v929_v63   ;;  %v667_v11 = vmax.f32 %v651_v3, 0.0  ;;  %v668_v12 = vmax.f32 %v652_v4, 0.0  ;;  %v655_v13 = vadd.f32 %v1187_v20, %v637_v5 }
 0x10d   : > { %v656_v14 = vadd.f32 %v1187_v20, %v638_v6  ;;  %958 = vst [vmem:[%s1247_s3 + $0x18] sm:$0xff] %v934_v0   ;;  %v669_v15 = vmax.f32 %v653_v7, 0.0  ;;  %v670_v16 = vmax.f32 %v654_v8, 0.0  ;;  %v657_v17 = vadd.f32 %v1187_v20, %v639_v9 }
 0x10e   : > { %v658_v18 = vadd.f32 %v1187_v20, %v640_v10  ;;  %v939_v19 = vpack.c.bf16 %v668_v12, %v667_v11  ;;  %v671_v21 = vmax.f32 %v655_v13, 0.0 }
 0x10f   : > { %v672_v22 = vmax.f32 %v656_v14, 0.0  ;;  %v944_v23 = vpack.c.bf16 %v670_v16, %v669_v15  ;;  %v673_v24 = vmax.f32 %v657_v17, 0.0 }
 0x110   : > { %v674_v25 = vmax.f32 %v658_v18, 0.0  ;;  %959 = vst [vmem:[%s1247_s3 + $0x20] sm:$0xff] %v939_v19  }
 0x111   : > { %v949_v26 = vpack.c.bf16 %v672_v22, %v671_v21  ;;  %960 = vst [vmem:[%s1247_s3 + $0x28] sm:$0xff] %v944_v23  }
 0x112   : > { %v954_v27 = vpack.c.bf16 %v674_v25, %v673_v24 }
 0x113   : > { %961 = vst [vmem:[%s1247_s3 + $0x30] sm:$0xff] %v949_v26  }
 0x114   : > { %962 = vst [vmem:[%s1247_s3 + $0x38] sm:$0xff] %v954_v27  }
 0x115 PF: > { %s13_s16 = sadd.s32 1, %s1068_s16   ;;  %s1248_s12 = smov %s1056_s13 }
 0x116   : > { %p10_p12 = scmp.ge.s32.totalorder %s13_s16, 7   ;;  %s1249_s13 = smov %s1126_s20 }
 0x117   : > { %s1250_s14 = smov %s1064_s15  ;;  %s1251_s15 = smov %s1253_s17 }
 0x118   :  { %12 = sbr.rel (!%p10_p12) target bundleno = 3 (0x3), region = 122 }

// kernel: resnet_forward.25
= control target key start
LH: loop header
LB: loop body
LE: loop exit
PB: predicated region body
PF: predicated region fallthrough
CT: control target
= control target key end

     0   :  { %s1262_s15 = smov 0   ;;  %s1264_s16 = smov 0   ;;  %s1457_s0 = inlined_call_operand.vmem [shape: bf16[128,640], index: 0, kind: input, shape index: {}]   ;;  %s1458_s1 = inlined_call_operand.vmem [shape: bf16[640,128], index: 1, kind: input, shape index: {}]   ;;  %s1459_s2 = inlined_call_operand.vmem [shape: f32[2,128], index: 2, kind: input, shape index: {}]   ;;  %s1460_s3 = inlined_call_operand.vmem [shape: bf16[128,128], index: 3, kind: input, shape index: {}]   ;;  %s1461_s4 = inlined_call_operand.vmem [shape: bf16[128,128], index: 4, kind: output, shape index: {}]  }
   0x1   :  { %s1266_s17 = smov 0   ;;  %s1268_s18 = smov 0  }
   0x2   :  { %s1270_s19 = smov 0  }
   0x3 LB: > { %s26_s20 = sadd.s32 1, %s1230_s18  ;;  %p49_p1 = scmp.ne.s32.totalorder %s1222_s16, %s1218_s15  ;;  %s1234_s19 = sphi %s1270_s19, %s14_s19   ;;  %s1230_s18 = sphi %s1268_s18, %s1465_s18   ;;  %s1226_s17 = sphi %s1266_s17, %s1464_s17   ;;  %s1222_s16 = sphi %s1264_s16, %s1463_s16   ;;  %s1218_s15 = sphi %s1262_s15, %s1462_s15  }
   0x4   : > { %p27_p0 = scmp.ge.s32.totalorder %s26_s20, 5  ;;  %p50_p2 = scmp.eq.s32.totalorder %s1234_s19, 0 }
   0x5   : > { %s42_s22 = sadd.s32 1, %s1222_s16  ;;  %p950_p5 = scmp.ge.s32.totalorder %s1234_s19, 5 }
   0x6   : > { %s1467_s20 = smov (%p27_p0, %s26_s20), 0  ;;  %p51_p3 = por %p50_p2, %p49_p1 }
   0x7   : > { %s38_s21 = ssub.s32 %s1230_s18, %s1467_s20  ;;  %204 = sbr.rel (%p950_p5) target bundleno = 32 (0x20), region = 24 }
   0x8   : > { %p40_p4 = scmp.eq.s32.totalorder %s38_s21, 0 }
   0xa   : > { %s1297_s23 = scalar_select %p40_p4, %s1222_s16, %s42_s22  }
   0xc   : > { %207 = sbr.rel (!%p51_p3) target bundleno = 32 (0x20), region = 28  ;;  %s209_s24 = sand.u32 (%p51_p3), 1, %s1222_s16  }
   0xd   : > { %s952_s25 = sshll.u32 (%p51_p3), %s1230_s18, 2  ;;  %s951_s26 = sshll.u32 (%p51_p3), %s209_s24, 6 }
   0xe   : > { %s1305_s29 = scalar_lea.vmem (%p51_p3), %s1457_s0, %s952_s25  ;;  %s211_s30 = scalar_lea.vmem (%p51_p3), [#allocation3], %s951_s26 }
   0xf   : > { %v233_v0 = vld [vmem:[%s1305_s29] sm:$0xf] (%p51_p3)  ;;  %v235_v1 = vld [vmem:[%s1305_s29 + $0x14] sm:$0xf] (%p51_p3)  ;;  %v237_v2 = vld [vmem:[%s1305_s29 + $0x28] sm:$0xf] (%p51_p3) }
  0x10   : > { %234 = vst [vmem:[%s211_s30] sm:$0xf] (%p51_p3), %v233_v0  ;;  %v239_v3 = vld [vmem:[%s1305_s29 + $0x3c] sm:$0xf] (%p51_p3)  ;;  %v241_v4 = vld [vmem:[%s1305_s29 + $0x50] sm:$0xf] (%p51_p3) }
  0x11   : > { %236 = vst [vmem:[%s211_s30 + $0x4] sm:$0xf] %v235_v1  ;;  %v243_v5 = vld [vmem:[%s1305_s29 + $0x64] sm:$0xf]  ;;  %v245_v6 = vld [vmem:[%s1305_s29 + $0x78] sm:$0xf] }
  0x12   : > { %238 = vst [vmem:[%s211_s30 + $0x8] sm:$0xf] %v237_v2  ;;  %v247_v7 = vld [vmem:[%s1305_s29 + $0x8c] sm:$0xf]  ;;  %v249_v8 = vld [vmem:[%s1305_s29 + $0xa0] sm:$0xf] }
  0x13   : > { %240 = vst [vmem:[%s211_s30 + $0xc] sm:$0xf] %v239_v3  ;;  %v251_v9 = vld [vmem:[%s1305_s29 + $0xb4] sm:$0xf]  ;;  %v253_v10 = vld [vmem:[%s1305_s29 + $0xc8] sm:$0xf] }
  0x14   : > { %242 = vst [vmem:[%s211_s30 + $0x10] sm:$0xf] %v241_v4  ;;  %v255_v11 = vld [vmem:[%s1305_s29 + $0xdc] sm:$0xf]  ;;  %v257_v12 = vld [vmem:[%s1305_s29 + $0xf0] sm:$0xf] }
  0x15   : > { %244 = vst [vmem:[%s211_s30 + $0x14] sm:$0xf] %v243_v5  ;;  %v259_v13 = vld [vmem:[%s1305_s29 + $0x104] sm:$0xf]  ;;  %v261_v14 = vld [vmem:[%s1305_s29 + $0x118] sm:$0xf] }
  0x16   : > { %246 = vst [vmem:[%s211_s30 + $0x18] sm:$0xf] %v245_v6  ;;  %v263_v15 = vld [vmem:[%s1305_s29 + $0x12c] sm:$0xf] }
  0x17   : > { %248 = vst [vmem:[%s211_s30 + $0x1c] sm:$0xf] %v247_v7 }
  0x18   : > { %250 = vst [vmem:[%s211_s30 + $0x20] sm:$0xf] %v249_v8 }
  0x19   : > { %252 = vst [vmem:[%s211_s30 + $0x24] sm:$0xf] %v251_v9 }
  0x1a   : > { %254 = vst [vmem:[%s211_s30 + $0x28] sm:$0xf] %v253_v10 }
  0x1b   : > { %256 = vst [vmem:[%s211_s30 + $0x2c] sm:$0xf] %v255_v11 }
  0x1c   : > { %258 = vst [vmem:[%s211_s30 + $0x30] sm:$0xf] %v257_v12 }
  0x1d   : > { %260 = vst [vmem:[%s211_s30 + $0x34] sm:$0xf] %v259_v13 }
  0x1e   : > { %262 = vst [vmem:[%s211_s30 + $0x38] sm:$0xf] %v261_v14 }
  0x1f   : > { %264 = vst [vmem:[%s211_s30 + $0x3c] sm:$0xf] %v263_v15 }
  0x20 PF: > { %p953_p6 = scmp.ge.s32.totalorder %s1234_s19, 1  ;;  %p331_p7 = scmp.lt.s32.totalorder %s1234_s19, 6 }
  0x22   : > { %p332_p8 = pnand %p953_p6, %p331_p7 }
  0x23   : > { %s338_s5 = sand.u32 (!%p332_p8), 1, %s1218_s15   ;;  %s955_s6 = sshll.u32 (!%p332_p8), %s1226_s17, 4 }
  0x24   : > { %335 = sbr.rel (%p332_p8) target bundleno = 286 (0x11e), region = 73  ;;  %s954_s7 = sshll.u32 (!%p332_p8), %s338_s5, 6 }
  0x25   : > { %p388_p9 = scmp.lt.s32.totalorder (!%p332_p8), %s955_s6, 79  ;;  %s1332_s12 = scalar_lea.vmem (!%p332_p8), [#allocation3], %s954_s7 }
  0x26   : > { %p957_p10 = scmp.ne.s32.totalorder (!%p332_p8), %s1226_s17, 0 }
  0x29   : > { %s1469_s6 = smov (!%p388_p9, %s955_s6), 79  ;;  %421 = sbr.rel (%p957_p10) target bundleno = 63 (0x3f), region = 81 }
  0x2a   : > { %s956_s8 = sshll.u32 %s1469_s6, 2 }
  0x2b   : > { %s1330_s11 = scalar_lea.vmem %s1458_s1, %s956_s8 }
  0x2e   : > { %v1236_v16 = vmov 0.0  }
  0x2f   : > { %422 = vst [vmem:[#allocation2 + $0x30] sm:$0xff] %v1236_v16 }
  0x30   : > { %423 = vst [vmem:[#allocation2] sm:$0xff] %v1236_v16 }
  0x31   : > { %424 = vst [vmem:[#allocation2 + $0x58] sm:$0xff] %v1236_v16 }
  0x32   : > { %425 = vst [vmem:[#allocation2 + $0x18] sm:$0xff] %v1236_v16 }
  0x33   : > { %426 = vst [vmem:[#allocation2 + $0x50] sm:$0xff] %v1236_v16 }
  0x34   : > { %427 = vst [vmem:[#allocation2 + $0x68] sm:$0xff] %v1236_v16 }
  0x35   : > { %428 = vst [vmem:[#allocation2 + $0x8] sm:$0xff] %v1236_v16 }
  0x36   : > { %429 = vst [vmem:[#allocation2 + $0x48] sm:$0xff] %v1236_v16 }
  0x37   : > { %430 = vst [vmem:[#allocation2 + $0x40] sm:$0xff] %v1236_v16 }
  0x38   : > { %431 = vst [vmem:[#allocation2 + $0x20] sm:$0xff] %v1236_v16 }
  0x39   : > { %432 = vst [vmem:[#allocation2 + $0x10] sm:$0xff] %v1236_v16 }
  0x3a   : > { %433 = vst [vmem:[#allocation2 + $0x38] sm:$0xff] %v1236_v16 }
  0x3b   : > { %434 = vst [vmem:[#allocation2 + $0x60] sm:$0xff] %v1236_v16 }
  0x3c   : > { %435 = vst [vmem:[#allocation2 + $0x70] sm:$0xff] %v1236_v16 }
  0x3d   : > { %436 = vst [vmem:[#allocation2 + $0x78] sm:$0xff] %v1236_v16 }
  0x3e   : > { %437 = vst [vmem:[#allocation2 + $0x28] sm:$0xff] %v1236_v16 }
  0x3f PF: > { %v1042_v17 = vld [vmem:[%s1330_s11 + $0x38] sm:$0xff]  ;;  %v1041_v18 = vld [vmem:[%s1330_s11 + $0x30] sm:$0xff]  ;;  %v1040_v19 = vld [vmem:[%s1330_s11 + $0x28] sm:$0xff]  ;;  %p1022_p11 = scmp.ne.s32.totalorder %s1226_s17, 4 }
  0x40   : > { %582 = vmatpush.bf16.msra.mxu0 %v1042_v17  ;;  %1129 = vmatpush.bf16.msra.mxu1 %v1042_v17  ;;  %v1039_v20 = vld [vmem:[%s1330_s11 + $0x20] sm:$0xff]  ;;  %v1038_v21 = vld [vmem:[%s1330_s11 + $0x18] sm:$0xff]  ;;  %v1037_v22 = vld [vmem:[%s1330_s11 + $0x10] sm:$0xff] }
  0x41   : > { %1130 = vmatpush.bf16.msra.mxu2 %v1042_v17  ;;  %1131 = vmatpush.bf16.msra.mxu3 %v1042_v17  ;;  %v1036_v23 = vld [vmem:[%s1330_s11 + $0x8] sm:$0xff]  ;;  %v1035_v24 = vld [vmem:[%s1330_s11] sm:$0xff]  ;;  %v1029_v26 = vld [vmem:[%s1332_s12 + $0x10] sm:$0xff] }
  0x42   : > { %v1027_v25 = vld [vmem:[%s1332_s12] sm:$0xff]  ;;  %v1033_v28 = vld [vmem:[%s1332_s12 + $0x30] sm:$0xff]  ;;  %v1028_v29 = vld [vmem:[%s1332_s12 + $0x8] sm:$0xff] }
  0x43   : > { %v1031_v27 = vld [vmem:[%s1332_s12 + $0x20] sm:$0xff]  ;;  %v1030_v30 = vld [vmem:[%s1332_s12 + $0x18] sm:$0xff]  ;;  %v1032_v31 = vld [vmem:[%s1332_s12 + $0x28] sm:$0xff] }
  0x44   : > { %583 = vmatpush.bf16.msra.mxu0 %v1041_v18  ;;  %1132 = vmatpush.bf16.msra.mxu1 %v1041_v18  ;;  %v1034_v32 = vld [vmem:[%s1332_s12 + $0x38] sm:$0xff]  ;;  %v438_v33 = vld [vmem:[#allocation2 + $0x30] sm:$0xff]  ;;  %v446_v39 = vld [vmem:[#allocation2 + $0x40] sm:$0xff] }
  0x45   : > { %1133 = vmatpush.bf16.msra.mxu2 %v1041_v18  ;;  %1134 = vmatpush.bf16.msra.mxu3 %v1041_v18  ;;  %v442_v34 = vld [vmem:[#allocation2 + $0x50] sm:$0xff]  ;;  %v450_v40 = vld [vmem:[#allocation2 + $0x60] sm:$0xff]  ;;  %v443_v42 = vld [vmem:[#allocation2 + $0x68] sm:$0xff] }
  0x46   : > { %v439_v41 = vld [vmem:[#allocation2] sm:$0xff]  ;;  %v451_v52 = vld [vmem:[#allocation2 + $0x70] sm:$0xff]  ;;  %v440_v53 = vld [vmem:[#allocation2 + $0x58] sm:$0xff] }
  0x47   : > { %v447_v51 = vld [vmem:[#allocation2 + $0x20] sm:$0xff]  ;;  %v444_v54 = vld [vmem:[#allocation2 + $0x8] sm:$0xff]  ;;  %v448_v63 = vld [vmem:[#allocation2 + $0x10] sm:$0xff] }
  0x48   : > { %584 = vmatpush.bf16.msra.mxu0 %v1040_v19  ;;  %1135 = vmatpush.bf16.msra.mxu1 %v1040_v19  ;;  %v452_v0 = vld [vmem:[#allocation2 + $0x78] sm:$0xff]  ;;  %v445_v2 = vld [vmem:[#allocation2 + $0x48] sm:$0xff] }
  0x49   : > { %1136 = vmatpush.bf16.msra.mxu2 %v1040_v19  ;;  %1137 = vmatpush.bf16.msra.mxu3 %v1040_v19  ;;  %v441_v1 = vld [vmem:[#allocation2 + $0x18] sm:$0xff]  ;;  %v453_v12 = vld [vmem:[#allocation2 + $0x28] sm:$0xff] }
  0x4a   : > { %v449_v11 = vld [vmem:[#allocation2 + $0x38] sm:$0xff] }
  0x4c   : > { %585 = vmatpush.bf16.msra.mxu0 %v1039_v20  ;;  %1138 = vmatpush.bf16.msra.mxu1 %v1039_v20 }
  0x4d   : > { %1139 = vmatpush.bf16.msra.mxu2 %v1039_v20  ;;  %1140 = vmatpush.bf16.msra.mxu3 %v1039_v20 }
  0x50   : > { %586 = vmatpush.bf16.msra.mxu0 %v1038_v21  ;;  %1141 = vmatpush.bf16.msra.mxu1 %v1038_v21 }
  0x51   : > { %1142 = vmatpush.bf16.msra.mxu2 %v1038_v21  ;;  %1143 = vmatpush.bf16.msra.mxu3 %v1038_v21 }
  0x54   : > { %587 = vmatpush.bf16.msra.mxu0 %v1037_v22  ;;  %1144 = vmatpush.bf16.msra.mxu1 %v1037_v22 }
  0x55   : > { %1145 = vmatpush.bf16.msra.mxu2 %v1037_v22  ;;  %1146 = vmatpush.bf16.msra.mxu3 %v1037_v22 }
  0x58   : > { %588 = vmatpush.bf16.msra.mxu0 %v1036_v23  ;;  %1147 = vmatpush.bf16.msra.mxu1 %v1036_v23 }
  0x59   : > { %1148 = vmatpush.bf16.msra.mxu2 %v1036_v23  ;;  %1149 = vmatpush.bf16.msra.mxu3 %v1036_v23 }
  0x5c   : > { %589 = vmatpush.bf16.msra.mxu0 %v1035_v24  ;;  %1150 = vmatpush.bf16.msra.mxu1 %v1035_v24 }
  0x5d   : > { %1151 = vmatpush.bf16.msra.mxu2 %v1035_v24  ;;  %1152 = vmatpush.bf16.msra.mxu3 %v1035_v24 }
  0x5f   : > { %590 = vmatmul.bf16.vlgmr.msra.gmra.mxu0 %v1027_v25  ;;  %600 = vmatmul.bf16.vlgmr.msra.gmra.mxu1 %v1029_v26 }
  0x60   : > { %610 = vmatmul.bf16.vlgmr.msra.gmra.mxu2 %v1031_v27  ;;  %620 = vmatmul.bf16.vlgmr.msra.gmra.mxu3 %v1033_v28 }
  0x6f   : > { %595 = vmatmul.bf16.gmra.mxu0 %v1028_v29  ;;  %605 = vmatmul.bf16.gmra.mxu1 %v1030_v30 }
  0x70   : > { %615 = vmatmul.bf16.gmra.mxu2 %v1032_v31  ;;  %625 = vmatmul.bf16.gmra.mxu3 %v1034_v32 }
  0xdc   : > { %v591_v35 = vpop.f32.mrf.mxu0  ;;  %v601_v36 = vpop.f32.mrf.mxu1 }
  0xdd   : > { %v631_v37 = vadd.f32 %v591_v35, %v438_v33  ;;  %v635_v38 = vadd.f32 %v601_v36, %v442_v34 }
  0xdf   : > { %647 = vst [vmem:[#allocation2 + $0x30] sm:$0xff] %v631_v37 }
  0xe0   : > { %651 = vst [vmem:[#allocation2 + $0x50] sm:$0xff] %v635_v38 }
  0xe3   : > { %v611_v43 = vpop.f32.mrf.mxu2  ;;  %v621_v44 = vpop.f32.mrf.mxu3 }
  0xe4   : > { %v639_v45 = vadd.f32 %v611_v43, %v446_v39  ;;  %v643_v46 = vadd.f32 %v621_v44, %v450_v40  ;;  %v593_v47 = vpop.f32.mrf.mxu0  ;;  %v603_v48 = vpop.f32.mrf.mxu1 }
  0xe5   : > { %v632_v49 = vadd.f32 %v593_v47, %v439_v41  ;;  %v636_v50 = vadd.f32 %v603_v48, %v443_v42 }
  0xe6   : > { %655 = vst [vmem:[#allocation2 + $0x40] sm:$0xff] %v639_v45 }
  0xe7   : > { %659 = vst [vmem:[#allocation2 + $0x60] sm:$0xff] %v643_v46 }
  0xe8   : > { %648 = vst [vmem:[#allocation2] sm:$0xff] %v632_v49 }
  0xe9   : > { %652 = vst [vmem:[#allocation2 + $0x68] sm:$0xff] %v636_v50 }
  0xeb   : > { %v613_v55 = vpop.f32.mrf.mxu2  ;;  %v623_v56 = vpop.f32.mrf.mxu3 }
  0xec   : > { %v640_v57 = vadd.f32 %v613_v55, %v447_v51  ;;  %v644_v58 = vadd.f32 %v623_v56, %v451_v52  ;;  %v596_v59 = vpop.f32.mrf.mxu0  ;;  %v606_v60 = vpop.f32.mrf.mxu1 }
  0xed   : > { %v633_v61 = vadd.f32 %v596_v59, %v440_v53  ;;  %v637_v62 = vadd.f32 %v606_v60, %v444_v54 }
  0xee   : > { %656 = vst [vmem:[#allocation2 + $0x20] sm:$0xff] %v640_v57 }
  0xef   : > { %660 = vst [vmem:[#allocation2 + $0x70] sm:$0xff] %v644_v58 }
  0xf0   : > { %649 = vst [vmem:[#allocation2 + $0x58] sm:$0xff] %v633_v61 }
  0xf1   : > { %653 = vst [vmem:[#allocation2 + $0x8] sm:$0xff] %v637_v62 }
  0xf3   : > { %v616_v3 = vpop.f32.mrf.mxu2  ;;  %v626_v4 = vpop.f32.mrf.mxu3 }
  0xf4   : > { %v641_v5 = vadd.f32 %v616_v3, %v448_v63  ;;  %v645_v6 = vadd.f32 %v626_v4, %v452_v0  ;;  %v598_v7 = vpop.f32.mrf.mxu0  ;;  %v608_v8 = vpop.f32.mrf.mxu1 }
  0xf5   : > { %v634_v9 = vadd.f32 %v598_v7, %v441_v1  ;;  %v638_v10 = vadd.f32 %v608_v8, %v445_v2 }
  0xf6   : > { %657 = vst [vmem:[#allocation2 + $0x10] sm:$0xff] %v641_v5 }
  0xf7   : > { %661 = vst [vmem:[#allocation2 + $0x78] sm:$0xff] %v645_v6 }
  0xf8   : > { %650 = vst [vmem:[#allocation2 + $0x18] sm:$0xff] %v634_v9 }
  0xf9   : > { %654 = vst [vmem:[#allocation2 + $0x48] sm:$0xff] %v638_v10 }
  0xfb   : > { %v618_v13 = vpop.f32.mrf.mxu2  ;;  %v628_v14 = vpop.f32.mrf.mxu3  ;;  %666 = sbr.rel (%p1022_p11) target bundleno = 286 (0x11e), region = 85 }
  0xfc   : > { %v642_v15 = vadd.f32 %v618_v13, %v449_v11  ;;  %v646_v16 = vadd.f32 %v628_v14, %v453_v12 }
  0xfe   : > { %658 = vst [vmem:[#allocation2 + $0x38] sm:$0xff] %v642_v15 }
  0xff   : > { %662 = vst [vmem:[#allocation2 + $0x28] sm:$0xff] %v646_v16 }
 0x100   : > { %v667_v17 = vld [vmem:[#allocation2 + $0x30] sm:$0xff]  ;;  %v668_v18 = vld [vmem:[#allocation2] sm:$0xff]  ;;  %v669_v22 = vld [vmem:[#allocation2 + $0x58] sm:$0xff] }
 0x101   : > { %v1355_v19 = vld [vmem:[%s1459_s2] ss:$0 sm:$0xff]  ;;  %v1360_v20 = vld [vmem:[%s1459_s2 + $0x1] ss:$0 sm:$0xff]  ;;  %v670_v23 = vld [vmem:[#allocation2 + $0x18] sm:$0xff] }
 0x102   : > { %v1044_v21 = vld [vmem:[%s1460_s3] sm:$0xff]   ;;  %v685_v24 = vmul.f32 %v1355_v19, %v667_v17  ;;  %v686_v25 = vmul.f32 %v1355_v19, %v668_v18  ;;  %v1115_v28 = vld [vmem:[%s1460_s3 + $0x8] sm:$0xff]   ;;  %v671_v29 = vld [vmem:[#allocation2 + $0x50] sm:$0xff]  ;;  %v687_v31 = vmul.f32 %v1355_v19, %v669_v22  ;;  %v688_v32 = vmul.f32 %v1355_v19, %v670_v23 }
 0x103   : > { %v1045_v26 = vunpack.c.l.bf16 %v1044_v21  ;;  %v1046_v27 = vunpack.c.h.bf16 %v1044_v21  ;;  %v672_v30 = vld [vmem:[#allocation2 + $0x68] sm:$0xff]  ;;  %v1049_v33 = vunpack.c.l.bf16 %v1115_v28  ;;  %v1050_v34 = vunpack.c.h.bf16 %v1115_v28  ;;  %v1116_v35 = vld [vmem:[%s1460_s3 + $0x10] sm:$0xff]   ;;  %v1117_v54 = vld [vmem:[%s1460_s3 + $0x18] sm:$0xff]  }
 0x104   : > { %v703_v36 = vadd.f32 %v1360_v20, %v685_v24  ;;  %v704_v37 = vadd.f32 %v1360_v20, %v686_v25  ;;  %v689_v38 = vmul.f32 %v1355_v19, %v671_v29  ;;  %v690_v39 = vmul.f32 %v1355_v19, %v672_v30  ;;  %v673_v40 = vld [vmem:[#allocation2 + $0x8] sm:$0xff]  ;;  %v675_v59 = vld [vmem:[#allocation2 + $0x40] sm:$0xff]  ;;  %v677_v6 = vld [vmem:[#allocation2 + $0x10] sm:$0xff] }
 0x105   : > { %v674_v41 = vld [vmem:[#allocation2 + $0x48] sm:$0xff]  ;;  %v705_v42 = vadd.f32 %v1360_v20, %v687_v31  ;;  %v706_v43 = vadd.f32 %v1360_v20, %v688_v32  ;;  %v1053_v44 = vunpack.c.l.bf16 %v1116_v35  ;;  %v1054_v45 = vunpack.c.h.bf16 %v1116_v35  ;;  %v676_v60 = vld [vmem:[#allocation2 + $0x20] sm:$0xff]  ;;  %v678_v11 = vld [vmem:[#allocation2 + $0x38] sm:$0xff] }
 0x106   : > { %v751_v46 = vadd.f32 %v1045_v26, %v703_v36  ;;  %v752_v47 = vadd.f32 %v1046_v27, %v704_v37  ;;  %v707_v48 = vadd.f32 %v1360_v20, %v689_v38  ;;  %v708_v49 = vadd.f32 %v1360_v20, %v690_v39  ;;  %v1118_v1 = vld [vmem:[%s1460_s3 + $0x20] sm:$0xff]   ;;  %v1119_v12 = vld [vmem:[%s1460_s3 + $0x28] sm:$0xff]   ;;  %v680_v24 = vld [vmem:[#allocation2 + $0x70] sm:$0xff] }
 0x107   : > { %v753_v50 = vadd.f32 %v1049_v33, %v705_v42  ;;  %v754_v51 = vadd.f32 %v1050_v34, %v706_v43  ;;  %v691_v52 = vmul.f32 %v1355_v19, %v673_v40  ;;  %v692_v53 = vmul.f32 %v1355_v19, %v674_v41  ;;  %v679_v23 = vld [vmem:[#allocation2 + $0x60] sm:$0xff]  ;;  %v1120_v25 = vld [vmem:[%s1460_s3 + $0x30] sm:$0xff]   ;;  %v681_v38 = vld [vmem:[#allocation2 + $0x78] sm:$0xff] }
 0x108   : > { %v767_v55 = vmax.f32 %v751_v46, 0.0  ;;  %v768_v56 = vmax.f32 %v752_v47, 0.0  ;;  %v755_v57 = vadd.f32 %v1053_v44, %v707_v48  ;;  %v756_v58 = vadd.f32 %v1054_v45, %v708_v49  ;;  %v682_v39 = vld [vmem:[#allocation2 + $0x28] sm:$0xff]  ;;  %v1121_v44 = vld [vmem:[%s1460_s3 + $0x38] sm:$0xff]  }
 0x109   : > { %v769_v61 = vmax.f32 %v753_v50, 0.0  ;;  %v770_v62 = vmax.f32 %v754_v51, 0.0  ;;  %v709_v63 = vadd.f32 %v1360_v20, %v691_v52  ;;  %v710_v0 = vadd.f32 %v1360_v20, %v692_v53 }
 0x10a   : > { %v1078_v2 = vpack.c.bf16 %v768_v56, %v767_v55  ;;  %v771_v3 = vmax.f32 %v755_v57, 0.0  ;;  %v772_v4 = vmax.f32 %v756_v58, 0.0  ;;  %v1057_v5 = vunpack.c.l.bf16 %v1117_v54 }
 0x10b   : > { %v1083_v7 = vpack.c.bf16 %v770_v62, %v769_v61  ;;  %v1058_v8 = vunpack.c.h.bf16 %v1117_v54  ;;  %v693_v9 = vmul.f32 %v1355_v19, %v675_v59  ;;  %v694_v10 = vmul.f32 %v1355_v19, %v676_v60 }
 0x10c   : > { %1079 = vst [vmem:[%s1461_s4] sm:$0xff] %v1078_v2   ;;  %v1088_v13 = vpack.c.bf16 %v772_v4, %v771_v3  ;;  %v757_v14 = vadd.f32 %v1057_v5, %v709_v63  ;;  %v1061_v15 = vunpack.c.l.bf16 %v1118_v1  ;;  %v1062_v16 = vunpack.c.h.bf16 %v1118_v1 }
 0x10d   : > { %1122 = vst [vmem:[%s1461_s4 + $0x8] sm:$0xff] %v1083_v7   ;;  %v758_v17 = vadd.f32 %v1058_v8, %v710_v0  ;;  %v711_v18 = vadd.f32 %v1360_v20, %v693_v9  ;;  %v712_v21 = vadd.f32 %v1360_v20, %v694_v10  ;;  %v695_v22 = vmul.f32 %v1355_v19, %v677_v6 }
 0x10e   : > { %1123 = vst [vmem:[%s1461_s4 + $0x10] sm:$0xff] %v1088_v13   ;;  %v773_v26 = vmax.f32 %v757_v14, 0.0  ;;  %v696_v27 = vmul.f32 %v1355_v19, %v678_v11  ;;  %v1065_v28 = vunpack.c.l.bf16 %v1119_v12  ;;  %v1066_v29 = vunpack.c.h.bf16 %v1119_v12 }
 0x10f   : > { %v774_v30 = vmax.f32 %v758_v17, 0.0  ;;  %v759_v31 = vadd.f32 %v1061_v15, %v711_v18  ;;  %v760_v32 = vadd.f32 %v1062_v16, %v712_v21  ;;  %v713_v33 = vadd.f32 %v1360_v20, %v695_v22 }
 0x110   : > { %v714_v34 = vadd.f32 %v1360_v20, %v696_v27  ;;  %v697_v35 = vmul.f32 %v1355_v19, %v679_v23  ;;  %v698_v36 = vmul.f32 %v1355_v19, %v680_v24  ;;  %v1069_v37 = vunpack.c.l.bf16 %v1120_v25 }
 0x111   : > { %v1093_v40 = vpack.c.bf16 %v774_v30, %v773_v26  ;;  %v775_v41 = vmax.f32 %v759_v31, 0.0  ;;  %v776_v42 = vmax.f32 %v760_v32, 0.0  ;;  %v761_v43 = vadd.f32 %v1065_v28, %v713_v33 }
 0x112   : > { %v762_v45 = vadd.f32 %v1066_v29, %v714_v34  ;;  %v715_v46 = vadd.f32 %v1360_v20, %v697_v35  ;;  %v716_v47 = vadd.f32 %v1360_v20, %v698_v36  ;;  %v1070_v48 = vunpack.c.h.bf16 %v1120_v25 }
 0x113   : > { %1124 = vst [vmem:[%s1461_s4 + $0x18] sm:$0xff] %v1093_v40   ;;  %v1098_v49 = vpack.c.bf16 %v776_v42, %v775_v41  ;;  %v777_v50 = vmax.f32 %v761_v43, 0.0  ;;  %v699_v51 = vmul.f32 %v1355_v19, %v681_v38  ;;  %v700_v52 = vmul.f32 %v1355_v19, %v682_v39 }
 0x114   : > { %v778_v53 = vmax.f32 %v762_v45, 0.0  ;;  %v763_v54 = vadd.f32 %v1069_v37, %v715_v46  ;;  %v764_v55 = vadd.f32 %v1070_v48, %v716_v47  ;;  %v1073_v56 = vunpack.c.l.bf16 %v1121_v44 }
 0x115   : > { %1125 = vst [vmem:[%s1461_s4 + $0x20] sm:$0xff] %v1098_v49   ;;  %v717_v57 = vadd.f32 %v1360_v20, %v699_v51  ;;  %v718_v58 = vadd.f32 %v1360_v20, %v700_v52  ;;  %v1074_v59 = vunpack.c.h.bf16 %v1121_v44 }
 0x116   : > { %v1103_v60 = vpack.c.bf16 %v778_v53, %v777_v50  ;;  %v779_v61 = vmax.f32 %v763_v54, 0.0  ;;  %v780_v62 = vmax.f32 %v764_v55, 0.0 }
 0x117   : > { %v765_v63 = vadd.f32 %v1073_v56, %v717_v57  ;;  %v766_v0 = vadd.f32 %v1074_v59, %v718_v58 }
 0x118   : > { %1126 = vst [vmem:[%s1461_s4 + $0x28] sm:$0xff] %v1103_v60   ;;  %v1108_v19 = vpack.c.bf16 %v780_v62, %v779_v61 }
 0x119   : > { %v781_v1 = vmax.f32 %v765_v63, 0.0  ;;  %v782_v2 = vmax.f32 %v766_v0, 0.0 }
 0x11a   : > { %1127 = vst [vmem:[%s1461_s4 + $0x30] sm:$0xff] %v1108_v19  }
 0x11b   : > { %v1113_v3 = vpack.c.bf16 %v782_v2, %v781_v1 }
 0x11d   : > { %1128 = vst [vmem:[%s1461_s4 + $0x38] sm:$0xff] %v1113_v3  }
 0x11e PF: > { %s14_s19 = sadd.s32 1, %s1234_s19   ;;  %s1462_s15 = smov %s1222_s16 }
 0x11f   : > { %p11_p12 = scmp.ge.s32.totalorder %s14_s19, 7   ;;  %s1463_s16 = smov %s1297_s23 }
 0x120   : > { %s1464_s17 = smov %s1230_s18  ;;  %s1465_s18 = smov %s1467_s20 }
 0x121   :  { %13 = sbr.rel (!%p11_p12) target bundleno = 3 (0x3), region = 129 }

// kernel: resnet_forward.29
= control target key start
LH: loop header
LB: loop body
LE: loop exit
PB: predicated region body
PF: predicated region fallthrough
CT: control target
= control target key end

     0   :  { %s763_s12 = smov 0   ;;  %s765_s13 = smov 0   ;;  %s859_s0 = inlined_call_operand.vmem [shape: bf16[32,640], index: 0, kind: input, shape index: {}]   ;;  %s860_s1 = inlined_call_operand.vmem [shape: bf16[640,128], index: 1, kind: input, shape index: {}]   ;;  %s861_s2 = inlined_call_operand.vmem [shape: f32[2,128], index: 2, kind: input, shape index: {}]   ;;  %s862_s3 = inlined_call_operand.vmem [shape: bf16[32,128], index: 3, kind: output, shape index: {}]  }
   0x1   :  { %s767_s14 = smov 0   ;;  %s769_s15 = smov 0  }
   0x2   :  { %s771_s16 = smov 0  }
   0x3 LB: > { %s25_s17 = sadd.s32 1, %s736_s15  ;;  %p48_p1 = scmp.ne.s32.totalorder %s728_s13, %s724_s12  ;;  %s740_s16 = sphi %s771_s16, %s13_s16   ;;  %s736_s15 = sphi %s769_s15, %s866_s15   ;;  %s732_s14 = sphi %s767_s14, %s865_s14   ;;  %s728_s13 = sphi %s765_s13, %s864_s13   ;;  %s724_s12 = sphi %s763_s12, %s863_s12  }
   0x4   : > { %p26_p0 = scmp.ge.s32.totalorder %s25_s17, 5  ;;  %p49_p2 = scmp.eq.s32.totalorder %s740_s16, 0 }
   0x5   : > { %s41_s19 = sadd.s32 1, %s728_s13  ;;  %p577_p5 = scmp.ge.s32.totalorder %s740_s16, 5 }
   0x6   : > { %s868_s17 = smov (%p26_p0, %s25_s17), 0  ;;  %p50_p3 = por %p49_p2, %p48_p1 }
   0x7   : > { %s37_s18 = ssub.s32 %s736_s15, %s868_s17  ;;  %163 = sbr.rel (%p577_p5) target bundleno = 20 (0x14), region = 20 }
   0x8   : > { %p39_p4 = scmp.eq.s32.totalorder %s37_s18, 0 }
   0xa   : > { %s798_s20 = scalar_select %p39_p4, %s728_s13, %s41_s19  }
   0xc   : > { %166 = sbr.rel (!%p50_p3) target bundleno = 20 (0x14), region = 24  ;;  %s168_s21 = sand.u32 (%p50_p3), 1, %s728_s13  }
   0xd   : > { %s579_s22 = sshll.u32 (%p50_p3), %s736_s15, 2  ;;  %s578_s23 = sshll.u32 (%p50_p3), %s168_s21, 4 }
   0xe   : > { %s175_s26 = scalar_lea.vmem (%p50_p3), %s859_s0, %s579_s22  ;;  %s170_s27 = scalar_lea.vmem (%p50_p3), [#allocation3], %s578_s23 }
   0xf   : > { %v192_v0 = vld [vmem:[%s175_s26] sm:$0xf] (%p50_p3)  ;;  %v194_v1 = vld [vmem:[%s175_s26 + $0x14] sm:$0xf] (%p50_p3)  ;;  %v196_v2 = vld [vmem:[%s175_s26 + $0x28] sm:$0xf] (%p50_p3) }
  0x10   : > { %193 = vst [vmem:[%s170_s27] sm:$0xf] (%p50_p3), %v192_v0  ;;  %v198_v3 = vld [vmem:[%s175_s26 + $0x3c] sm:$0xf] (%p50_p3) }
  0x11   : > { %195 = vst [vmem:[%s170_s27 + $0x4] sm:$0xf] %v194_v1 }
  0x12   : > { %197 = vst [vmem:[%s170_s27 + $0x8] sm:$0xf] %v196_v2 }
  0x13   : > { %199 = vst [vmem:[%s170_s27 + $0xc] sm:$0xf] %v198_v3 }
  0x14 PF: > { %p580_p6 = scmp.ge.s32.totalorder %s740_s16, 1  ;;  %p242_p7 = scmp.lt.s32.totalorder %s740_s16, 6 }
  0x16   : > { %p243_p8 = pnand %p580_p6, %p242_p7 }
  0x17   : > { %s249_s28 = sand.u32 (!%p243_p8), 1, %s724_s12   ;;  %s582_s29 = sshll.u32 (!%p243_p8), %s732_s14, 4 }
  0x18   : > { %246 = sbr.rel (%p243_p8) target bundleno = 225 (0xe1), region = 69  ;;  %s810_s30 = sshll.u32 (!%p243_p8), %s249_s28, 4 }
  0x19   : > { %p289_p9 = scmp.lt.s32.totalorder (!%p243_p8), %s582_s29, 79  ;;  %s251_s8 = scalar_lea.vmem (!%p243_p8), [#allocation3], %s810_s30 }
  0x1a   : > { %p584_p10 = scmp.ne.s32.totalorder (!%p243_p8), %s732_s14, 0 }
  0x1d   : > { %s870_s29 = smov (!%p289_p9, %s582_s29), 79  ;;  %313 = sbr.rel (%p584_p10) target bundleno = 39 (0x27), region = 77 }
  0x1e   : > { %s583_s4 = sshll.u32 %s870_s29, 2 }
  0x1f   : > { %s815_s7 = scalar_lea.vmem %s860_s1, %s583_s4 }
  0x22   : > { %v742_v4 = vmov 0.0  }
  0x23   : > { %314 = vst [vmem:[#allocation2 + $0x10] sm:$0xff] %v742_v4 }
  0x24   : > { %315 = vst [vmem:[#allocation2] sm:$0xff] %v742_v4 }
  0x25   : > { %316 = vst [vmem:[#allocation2 + $0x18] sm:$0xff] %v742_v4 }
  0x26   : > { %317 = vst [vmem:[#allocation2 + $0x8] sm:$0xff] %v742_v4 }
  0x27 PF: > { %v639_v5 = vld [vmem:[%s815_s7 + $0x38] sm:$0xff]  ;;  %v638_v6 = vld [vmem:[%s815_s7 + $0x30] sm:$0xff]  ;;  %v637_v7 = vld [vmem:[%s815_s7 + $0x28] sm:$0xff]  ;;  %p625_p11 = scmp.ne.s32.totalorder %s732_s14, 4 }
  0x28   : > { %402 = vmatpush.bf16.msra.mxu0 %v639_v5  ;;  %651 = vmatpush.bf16.msra.mxu1 %v639_v5  ;;  %v636_v8 = vld [vmem:[%s815_s7 + $0x20] sm:$0xff]  ;;  %v635_v9 = vld [vmem:[%s815_s7 + $0x18] sm:$0xff]  ;;  %v634_v10 = vld [vmem:[%s815_s7 + $0x10] sm:$0xff] }
  0x29   : > { %v633_v11 = vld [vmem:[%s815_s7 + $0x8] sm:$0xff]  ;;  %v632_v12 = vld [vmem:[%s815_s7] sm:$0xff] }
  0x2a   : > { %v630_v13 = vld [vmem:[%s251_s8] sm:$0xff]  ;;  %v631_v14 = vld [vmem:[%s251_s8 + $0x8] sm:$0xff] }
  0x2b   : > { %v318_v15 = vld [vmem:[#allocation2 + $0x10] sm:$0xff]  ;;  %v319_v21 = vld [vmem:[#allocation2] sm:$0xff] }
  0x2c   : > { %403 = vmatpush.bf16.msra.mxu0 %v638_v6  ;;  %652 = vmatpush.bf16.msra.mxu1 %v638_v6  ;;  %v320_v16 = vld [vmem:[#allocation2 + $0x18] sm:$0xff] }
  0x2d   : > { %v321_v22 = vld [vmem:[#allocation2 + $0x8] sm:$0xff] }
  0x30   : > { %404 = vmatpush.bf16.msra.mxu0 %v637_v7  ;;  %653 = vmatpush.bf16.msra.mxu1 %v637_v7 }
  0x34   : > { %405 = vmatpush.bf16.msra.mxu0 %v636_v8  ;;  %654 = vmatpush.bf16.msra.mxu1 %v636_v8 }
  0x38   : > { %406 = vmatpush.bf16.msra.mxu0 %v635_v9  ;;  %655 = vmatpush.bf16.msra.mxu1 %v635_v9 }
  0x3c   : > { %407 = vmatpush.bf16.msra.mxu0 %v634_v10  ;;  %656 = vmatpush.bf16.msra.mxu1 %v634_v10 }
  0x40   : > { %408 = vmatpush.bf16.msra.mxu0 %v633_v11  ;;  %657 = vmatpush.bf16.msra.mxu1 %v633_v11 }
  0x44   : > { %409 = vmatpush.bf16.msra.mxu0 %v632_v12  ;;  %658 = vmatpush.bf16.msra.mxu1 %v632_v12 }
  0x47   : > { %410 = vmatmul.bf16.vlgmr.msra.gmra.mxu0 %v630_v13  ;;  %415 = vmatmul.bf16.vlgmr.msra.gmra.mxu1 %v631_v14 }
  0xc4   : > { %v411_v17 = vpop.f32.mrf.mxu0  ;;  %v416_v18 = vpop.f32.mrf.mxu1 }
  0xc5   : > { %v421_v19 = vadd.f32 %v411_v17, %v318_v15  ;;  %v423_v20 = vadd.f32 %v416_v18, %v320_v16 }
  0xc7   : > { %425 = vst [vmem:[#allocation2 + $0x10] sm:$0xff] %v421_v19 }
  0xc8   : > { %427 = vst [vmem:[#allocation2 + $0x18] sm:$0xff] %v423_v20 }
  0xcc   : > { %v413_v23 = vpop.f32.mrf.mxu0  ;;  %v418_v24 = vpop.f32.mrf.mxu1  ;;  %432 = sbr.rel (%p625_p11) target bundleno = 225 (0xe1), region = 81 }
  0xcd   : > { %v422_v25 = vadd.f32 %v413_v23, %v319_v21  ;;  %v424_v26 = vadd.f32 %v418_v24, %v321_v22 }
  0xcf   : > { %426 = vst [vmem:[#allocation2] sm:$0xff] %v422_v25 }
  0xd0   : > { %428 = vst [vmem:[#allocation2 + $0x8] sm:$0xff] %v424_v26 }
  0xd1   : > { %v433_v27 = vld [vmem:[#allocation2 + $0x10] sm:$0xff]  ;;  %v700_v29 = vld [vmem:[%s861_s2] ss:$0 sm:$0xff]  ;;  %v701_v30 = vld [vmem:[%s861_s2 + $0x1] ss:$0 sm:$0xff] }
  0xd2   : > { %v435_v31 = vld [vmem:[#allocation2 + $0x18] sm:$0xff]  ;;  %v439_v33 = vmul.f32 %v700_v29, %v433_v27 }
  0xd3   : > { %v441_v35 = vmul.f32 %v700_v29, %v435_v31 }
  0xd4   : > { %v445_v37 = vadd.f32 %v701_v30, %v439_v33 }
  0xd5   : > { %v447_v39 = vadd.f32 %v701_v30, %v441_v35 }
  0xd6   : > { %v434_v28 = vld [vmem:[#allocation2] sm:$0xff]  ;;  %v449_v41 = vmax.f32 %v445_v37, 0.0 }
  0xd7   : > { %v436_v32 = vld [vmem:[#allocation2 + $0x8] sm:$0xff]  ;;  %v440_v34 = vmul.f32 %v700_v29, %v434_v28  ;;  %v451_v43 = vmax.f32 %v447_v39, 0.0 }
  0xd8   : > { %v442_v36 = vmul.f32 %v700_v29, %v436_v32 }
  0xd9   : > { %v446_v38 = vadd.f32 %v701_v30, %v440_v34 }
  0xda   : > { %v448_v40 = vadd.f32 %v701_v30, %v442_v36 }
  0xdb   : > { %v450_v42 = vmax.f32 %v446_v38, 0.0 }
  0xdc   : > { %v452_v44 = vmax.f32 %v448_v40, 0.0 }
  0xdd   : > { %v643_v45 = vpack.c.bf16 %v450_v42, %v449_v41 }
  0xde   : > { %v648_v46 = vpack.c.bf16 %v452_v44, %v451_v43 }
  0xdf   : > { %644 = vst [vmem:[%s862_s3] sm:$0xff] %v643_v45  }
  0xe0   : > { %650 = vst [vmem:[%s862_s3 + $0x8] sm:$0xff] %v648_v46  }
  0xe1 PF: > { %s13_s16 = sadd.s32 1, %s740_s16   ;;  %s863_s12 = smov %s728_s13 }
  0xe2   : > { %p10_p12 = scmp.ge.s32.totalorder %s13_s16, 7   ;;  %s864_s13 = smov %s798_s20 }
  0xe3   : > { %s865_s14 = smov %s736_s15  ;;  %s866_s15 = smov %s868_s17 }
  0xe4   :  { %12 = sbr.rel (!%p10_p12) target bundleno = 3 (0x3), region = 122 }

// kernel: resnet_forward.30
= control target key start
LH: loop header
LB: loop body
LE: loop exit
PB: predicated region body
PF: predicated region fallthrough
CT: control target
= control target key end

     0   :  { %s1161_s15 = smov 0   ;;  %s1163_s16 = smov 0   ;;  %s1286_s0 = inlined_call_operand.vmem [shape: bf16[32,1152], index: 0, kind: input, shape index: {}]   ;;  %s1287_s1 = inlined_call_operand.vmem [shape: bf16[1152,128], index: 1, kind: input, shape index: {}]   ;;  %s1288_s2 = inlined_call_operand.vmem [shape: f32[2,128], index: 2, kind: input, shape index: {}]   ;;  %s1289_s3 = inlined_call_operand.vmem [shape: bf16[32,128], index: 3, kind: input, shape index: {}]   ;;  %s1290_s4 = inlined_call_operand.vmem [shape: bf16[32,128], index: 4, kind: output, shape index: {}]  }
   0x1   :  { %s1165_s17 = smov 0   ;;  %s1167_s18 = smov 0  }
   0x2   :  { %s1169_s19 = smov 0  }
   0x3 LB: > { %s26_s20 = sadd.s32 1, %s1129_s18  ;;  %p49_p1 = scmp.ne.s32.totalorder %s1121_s16, %s1117_s15  ;;  %s1133_s19 = sphi %s1169_s19, %s14_s19   ;;  %s1129_s18 = sphi %s1167_s18, %s1294_s18   ;;  %s1125_s17 = sphi %s1165_s17, %s1293_s17   ;;  %s1121_s16 = sphi %s1163_s16, %s1292_s16   ;;  %s1117_s15 = sphi %s1161_s15, %s1291_s15  }
   0x4   : > { %p27_p0 = scmp.ge.s32.totalorder %s26_s20, 3  ;;  %p50_p2 = scmp.eq.s32.totalorder %s1133_s19, 0 }
   0x5   : > { %s42_s22 = sadd.s32 1, %s1121_s16  ;;  %p853_p5 = scmp.ge.s32.totalorder %s1133_s19, 3 }
   0x6   : > { %s1296_s20 = smov (%p27_p0, %s26_s20), 0  ;;  %p51_p3 = por %p50_p2, %p49_p1 }
   0x7   : > { %s38_s21 = ssub.s32 %s1129_s18, %s1296_s20  ;;  %204 = sbr.rel (%p853_p5) target bundleno = 25 (0x19), region = 24 }
   0x8   : > { %p40_p4 = scmp.eq.s32.totalorder %s38_s21, 0 }
   0xa   : > { %s1196_s23 = scalar_select %p40_p4, %s1121_s16, %s42_s22  }
   0xc   : > { %207 = sbr.rel (!%p51_p3) target bundleno = 25 (0x19), region = 28  ;;  %s209_s24 = sand.u32 (%p51_p3), 1, %s1121_s16  }
   0xd   : > { %s991_s25 = smul.u32 (%p51_p3), 12, %s1129_s18 }
   0xe   : > { %s1050_s26 = smul.u32 (%p51_p3), 48, %s209_s24 }
   0xf   : > { %s217_s29 = scalar_lea.vmem (%p51_p3), %s1286_s0, %s991_s25 }
  0x10   : > { %v232_v0 = vld [vmem:[%s217_s29] sm:$0xff] (%p51_p3)  ;;  %v236_v2 = vld [vmem:[%s217_s29 + $0x48] sm:$0xff] (%p51_p3)  ;;  %s211_s30 = scalar_lea.vmem (%p51_p3), [#allocation3], %s1050_s26  ;;  %v859_v6 = vld [vmem:[%s217_s29 + $0x50] sm:$0xf] (%p51_p3) }
  0x11   : > { %v234_v1 = vld [vmem:[%s217_s29 + $0x24] sm:$0xff]  ;;  %233 = vst [vmem:[%s211_s30] sm:$0xff] %v232_v0  ;;  %v238_v3 = vld [vmem:[%s217_s29 + $0x6c] sm:$0xff]  ;;  %v861_v7 = vld [vmem:[%s217_s29 + $0x74] sm:$0xf] }
  0x12   : > { %235 = vst [vmem:[%s211_s30 + $0xc] sm:$0xff] %v234_v1  ;;  %v855_v4 = vld [vmem:[%s217_s29 + $0x8] sm:$0xf]  ;;  %v857_v5 = vld [vmem:[%s217_s29 + $0x2c] sm:$0xf] }
  0x13   : > { %237 = vst [vmem:[%s211_s30 + $0x18] sm:$0xff] %v236_v2 }
  0x14   : > { %239 = vst [vmem:[%s211_s30 + $0x24] sm:$0xff] %v238_v3 }
  0x15   : > { %856 = vst [vmem:[%s211_s30 + $0x8] sm:$0xf] %v855_v4 }
  0x16   : > { %858 = vst [vmem:[%s211_s30 + $0x14] sm:$0xf] %v857_v5 }
  0x17   : > { %860 = vst [vmem:[%s211_s30 + $0x20] sm:$0xf] %v859_v6 }
  0x18   : > { %862 = vst [vmem:[%s211_s30 + $0x2c] sm:$0xf] %v861_v7 }
  0x19 PF: > { %p863_p6 = scmp.ge.s32.totalorder %s1133_s19, 1  ;;  %p272_p7 = scmp.lt.s32.totalorder %s1133_s19, 4 }
  0x1b   : > { %p273_p8 = pnand %p863_p6, %p272_p7 }
  0x1c   : > { %s279_s5 = sand.u32 (!%p273_p8), 1, %s1117_s15   ;;  %s329_s6 = smul.u32 (!%p273_p8), 48, %s1125_s17 }
  0x1d   : > { %276 = sbr.rel (%p273_p8) target bundleno = 257 (0x101), region = 58  ;;  %p865_p10 = scmp.ne.s32.totalorder (!%p273_p8), %s1125_s17, 0 }
  0x1e   : > { %s1051_s7 = smul.u32 (!%p273_p8), 48, %s279_s5  ;;  %p330_p9 = scmp.lt.s32.totalorder (!%p273_p8), %s329_s6, 143 }
  0x20   : > { %s1213_s12 = scalar_lea.vmem (!%p273_p8), [#allocation3], %s1051_s7 }
  0x22   : > { %s1298_s6 = smov (!%p330_p9, %s329_s6), 143  ;;  %363 = sbr.rel (%p865_p10) target bundleno = 44 (0x2c), region = 66 }
  0x23   : > { %s864_s8 = sshll.u32 %s1298_s6, 2 }
  0x24   : > { %s1211_s11 = scalar_lea.vmem %s1287_s1, %s864_s8 }
  0x27   : > { %v1135_v8 = vmov 0.0  }
  0x28   : > { %364 = vst [vmem:[#allocation2 + $0x10] sm:$0xff] %v1135_v8 }
  0x29   : > { %365 = vst [vmem:[#allocation2] sm:$0xff] %v1135_v8 }
  0x2a   : > { %366 = vst [vmem:[#allocation2 + $0x18] sm:$0xff] %v1135_v8 }
  0x2b   : > { %367 = vst [vmem:[#allocation2 + $0x8] sm:$0xff] %v1135_v8 }
  0x2c PF: > { %v1005_v9 = vld [vmem:[%s1211_s11 + $0x38] sm:$0xff]  ;;  %v1004_v12 = vld [vmem:[%s1211_s11 + $0x30] sm:$0xff]  ;;  %v1003_v15 = vld [vmem:[%s1211_s11 + $0x28] sm:$0xff]  ;;  %p986_p11 = scmp.ne.s32.totalorder %s1125_s17, 2 }
  0x2d   : > { %v1013_v10 = vld [vmem:[%s1211_s11 + $0x78] sm:$0xff]  ;;  %604 = vmatpush.bf16.msra.mxu0 %v1005_v9  ;;  %v1012_v13 = vld [vmem:[%s1211_s11 + $0x70] sm:$0xff]  ;;  %1042 = vmatpush.bf16.msra.mxu3 %v1005_v9  ;;  %v1011_v16 = vld [vmem:[%s1211_s11 + $0x68] sm:$0xff] }
  0x2e   : > { %v1021_v11 = vld [vmem:[%s1211_s11 + $0xb8] sm:$0xff]  ;;  %623 = vmatpush.bf16.msra.mxu1 %v1013_v10  ;;  %v1020_v14 = vld [vmem:[%s1211_s11 + $0xb0] sm:$0xff]  ;;  %v1019_v17 = vld [vmem:[%s1211_s11 + $0xa8] sm:$0xff] }
  0x2f   : > { %642 = vmatpush.bf16.msra.mxu2 %v1021_v11  ;;  %v1002_v18 = vld [vmem:[%s1211_s11 + $0x20] sm:$0xff]  ;;  %v1001_v21 = vld [vmem:[%s1211_s11 + $0x18] sm:$0xff]  ;;  %v1000_v24 = vld [vmem:[%s1211_s11 + $0x10] sm:$0xff] }
  0x30   : > { %v1010_v19 = vld [vmem:[%s1211_s11 + $0x60] sm:$0xff]  ;;  %v1009_v22 = vld [vmem:[%s1211_s11 + $0x58] sm:$0xff]  ;;  %v1008_v25 = vld [vmem:[%s1211_s11 + $0x50] sm:$0xff] }
  0x31   : > { %605 = vmatpush.bf16.msra.mxu0 %v1004_v12  ;;  %1043 = vmatpush.bf16.msra.mxu3 %v1004_v12  ;;  %v1018_v20 = vld [vmem:[%s1211_s11 + $0xa0] sm:$0xff]  ;;  %v1017_v23 = vld [vmem:[%s1211_s11 + $0x98] sm:$0xff]  ;;  %v1016_v26 = vld [vmem:[%s1211_s11 + $0x90] sm:$0xff] }
  0x32   : > { %624 = vmatpush.bf16.msra.mxu1 %v1012_v13  ;;  %v999_v27 = vld [vmem:[%s1211_s11 + $0x8] sm:$0xff]  ;;  %v998_v30 = vld [vmem:[%s1211_s11] sm:$0xff]  ;;  %v368_v54 = vld [vmem:[#allocation2 + $0x10] sm:$0xff] }
  0x33   : > { %643 = vmatpush.bf16.msra.mxu2 %v1020_v14  ;;  %v1007_v28 = vld [vmem:[%s1211_s11 + $0x48] sm:$0xff]  ;;  %v1006_v31 = vld [vmem:[%s1211_s11 + $0x40] sm:$0xff]  ;;  %v370_v4 = vld [vmem:[#allocation2 + $0x18] sm:$0xff] }
  0x34   : > { %v1015_v29 = vld [vmem:[%s1211_s11 + $0x88] sm:$0xff]  ;;  %v1014_v32 = vld [vmem:[%s1211_s11 + $0x80] sm:$0xff] }
  0x35   : > { %606 = vmatpush.bf16.msra.mxu0 %v1003_v15  ;;  %1044 = vmatpush.bf16.msra.mxu3 %v1003_v15  ;;  %v868_v33 = vld [vmem:[%s1213_s12] sm:$0xf]  ;;  %v993_v34 = vld [vmem:[%s1213_s12 + $0x8] sm:$0xf0]  ;;  %v992_v35 = vld [vmem:[%s1213_s12 + $0x4] sm:$0xf] }
  0x36   : > { %625 = vmatpush.bf16.msra.mxu1 %v1011_v16  ;;  %v870_v36 = vld [vmem:[%s1213_s12 + $0xc] sm:$0xf0]  ;;  %v876_v37 = vld [vmem:[%s1213_s12 + $0x8] sm:$0xf]  ;;  %v994_v38 = vld [vmem:[%s1213_s12 + $0x10] sm:$0xf0]  ;;  %v869_v41 = vor.u32 %v993_v34, %v868_v33 }
  0x37   : > { %644 = vmatpush.bf16.msra.mxu2 %v1019_v17  ;;  %v880_v39 = vld [vmem:[%s1213_s12 + $0x18] sm:$0xf]  ;;  %v996_v40 = vld [vmem:[%s1213_s12 + $0x20] sm:$0xf0]  ;;  %v873_v42 = vor.u32 %v992_v35, %v870_v36  ;;  %v877_v43 = vor.u32 %v994_v38, %v876_v37  ;;  %v995_v45 = vld [vmem:[%s1213_s12 + $0x1c] sm:$0xf] }
  0x38   : > { %v881_v44 = vor.u32 %v996_v40, %v880_v39  ;;  %v882_v46 = vld [vmem:[%s1213_s12 + $0x24] sm:$0xf0]  ;;  %v888_v47 = vld [vmem:[%s1213_s12 + $0x20] sm:$0xf]  ;;  %v997_v48 = vld [vmem:[%s1213_s12 + $0x28] sm:$0xf0] }
  0x39   : > { %607 = vmatpush.bf16.msra.mxu0 %v1002_v18  ;;  %1045 = vmatpush.bf16.msra.mxu3 %v1002_v18  ;;  %v885_v49 = vor.u32 %v995_v45, %v882_v46  ;;  %v889_v50 = vor.u32 %v997_v48, %v888_v47  ;;  %v369_v61 = vld [vmem:[#allocation2] sm:$0xff]  ;;  %v371_v11 = vld [vmem:[#allocation2 + $0x8] sm:$0xff] }
  0x3a   : > { %626 = vmatpush.bf16.msra.mxu1 %v1010_v19 }
  0x3b   : > { %645 = vmatpush.bf16.msra.mxu2 %v1018_v20 }
  0x3d   : > { %608 = vmatpush.bf16.msra.mxu0 %v1001_v21  ;;  %1046 = vmatpush.bf16.msra.mxu3 %v1001_v21 }
  0x3e   : > { %627 = vmatpush.bf16.msra.mxu1 %v1009_v22 }
  0x3f   : > { %646 = vmatpush.bf16.msra.mxu2 %v1017_v23 }
  0x41   : > { %609 = vmatpush.bf16.msra.mxu0 %v1000_v24  ;;  %1047 = vmatpush.bf16.msra.mxu3 %v1000_v24 }
  0x42   : > { %628 = vmatpush.bf16.msra.mxu1 %v1008_v25 }
  0x43   : > { %647 = vmatpush.bf16.msra.mxu2 %v1016_v26 }
  0x45   : > { %610 = vmatpush.bf16.msra.mxu0 %v999_v27  ;;  %1048 = vmatpush.bf16.msra.mxu3 %v999_v27 }
  0x46   : > { %629 = vmatpush.bf16.msra.mxu1 %v1007_v28 }
  0x47   : > { %648 = vmatpush.bf16.msra.mxu2 %v1015_v29 }
  0x49   : > { %611 = vmatpush.bf16.msra.mxu0 %v998_v30  ;;  %1049 = vmatpush.bf16.msra.mxu3 %v998_v30 }
  0x4a   : > { %630 = vmatpush.bf16.msra.mxu1 %v1006_v31 }
  0x4b   : > { %649 = vmatpush.bf16.msra.mxu2 %v1014_v32 }
  0x4c   : > { %612 = vmatmul.bf16.vlgmr.msra.gmra.mxu0 %v869_v41  ;;  %617 = vmatmul.bf16.vlgmr.msra.gmra.mxu3 %v881_v44 }
  0x4d   : > { %631 = vmatmul.bf16.vlgmr.msra.gmra.mxu1 %v873_v42 }
  0x4e   : > { %650 = vmatmul.bf16.vlgmr.msra.gmra.mxu2 %v877_v43 }
  0x5d   : > { %636 = vmatmul.bf16.gmra.mxu1 %v885_v49 }
  0x5e   : > { %655 = vmatmul.bf16.gmra.mxu2 %v889_v50 }
  0xc9   : > { %v613_v52 = vpop.f32.mrf.mxu0 }
  0xca   : > { %v632_v51 = vpop.f32.mrf.mxu1 }
  0xcb   : > { %v633_v53 = vadd.f32 %v632_v51, %v613_v52 }
  0xcf   : > { %v618_v2 = vpop.f32.mrf.mxu3 }
  0xd1   : > { %v651_v55 = vpop.f32.mrf.mxu2  ;;  %v615_v59 = vpop.f32.mrf.mxu0 }
  0xd2   : > { %v652_v56 = vadd.f32 %v651_v55, %v633_v53  ;;  %v634_v57 = vpop.f32.mrf.mxu1 }
  0xd3   : > { %v635_v60 = vadd.f32 %v634_v57, %v615_v59 }
  0xd4   : > { %v661_v58 = vadd.f32 %v652_v56, %v368_v54 }
  0xd6   : > { %665 = vst [vmem:[#allocation2 + $0x10] sm:$0xff] %v661_v58 }
  0xd7   : > { %v620_v9 = vpop.f32.mrf.mxu3 }
  0xd9   : > { %v653_v62 = vpop.f32.mrf.mxu2 }
  0xda   : > { %v654_v63 = vadd.f32 %v653_v62, %v635_v60  ;;  %v637_v0 = vpop.f32.mrf.mxu1 }
  0xdb   : > { %v638_v3 = vadd.f32 %v637_v0, %v618_v2 }
  0xdc   : > { %v662_v1 = vadd.f32 %v654_v63, %v369_v61 }
  0xde   : > { %666 = vst [vmem:[#allocation2] sm:$0xff] %v662_v1 }
  0xe1   : > { %v656_v5 = vpop.f32.mrf.mxu2 }
  0xe2   : > { %v657_v6 = vadd.f32 %v656_v5, %v638_v3  ;;  %v639_v8 = vpop.f32.mrf.mxu1 }
  0xe3   : > { %v640_v10 = vadd.f32 %v639_v8, %v620_v9 }
  0xe4   : > { %v663_v7 = vadd.f32 %v657_v6, %v370_v4 }
  0xe6   : > { %667 = vst [vmem:[#allocation2 + $0x18] sm:$0xff] %v663_v7 }
  0xe9   : > { %v658_v12 = vpop.f32.mrf.mxu2 }
  0xea   : > { %v659_v13 = vadd.f32 %v658_v12, %v640_v10  ;;  %672 = sbr.rel (%p986_p11) target bundleno = 257 (0x101), region = 70 }
  0xec   : > { %v664_v14 = vadd.f32 %v659_v13, %v371_v11 }
  0xee   : > { %668 = vst [vmem:[#allocation2 + $0x8] sm:$0xff] %v664_v14 }
  0xef   : > { %v673_v15 = vld [vmem:[#allocation2 + $0x10] sm:$0xff]  ;;  %v674_v16 = vld [vmem:[#allocation2] sm:$0xff]  ;;  %v675_v20 = vld [vmem:[#allocation2 + $0x18] sm:$0xff] }
  0xf0   : > { %v1093_v17 = vld [vmem:[%s1288_s2] ss:$0 sm:$0xff]  ;;  %v1094_v18 = vld [vmem:[%s1288_s2 + $0x1] ss:$0 sm:$0xff]  ;;  %v1040_v26 = vld [vmem:[%s1289_s3 + $0x8] sm:$0xff]  }
  0xf1   : > { %v1023_v19 = vld [vmem:[%s1289_s3] sm:$0xff]   ;;  %v679_v22 = vmul.f32 %v1093_v17, %v673_v15  ;;  %v680_v23 = vmul.f32 %v1093_v17, %v674_v16  ;;  %v681_v27 = vmul.f32 %v1093_v17, %v675_v20  ;;  %v1028_v29 = vunpack.c.l.bf16 %v1040_v26 }
  0xf2   : > { %v1024_v24 = vunpack.c.l.bf16 %v1023_v19  ;;  %v1025_v25 = vunpack.c.h.bf16 %v1023_v19  ;;  %v1029_v30 = vunpack.c.h.bf16 %v1040_v26 }
  0xf3   : > { %v685_v31 = vadd.f32 %v1094_v18, %v679_v22  ;;  %v686_v32 = vadd.f32 %v1094_v18, %v680_v23  ;;  %v687_v33 = vadd.f32 %v1094_v18, %v681_v27 }
  0xf5   : > { %v676_v21 = vld [vmem:[#allocation2 + $0x8] sm:$0xff]  ;;  %v697_v35 = vadd.f32 %v1024_v24, %v685_v31  ;;  %v698_v36 = vadd.f32 %v1025_v25, %v686_v32  ;;  %v699_v37 = vadd.f32 %v1028_v29, %v687_v33 }
  0xf6   : > { %v682_v28 = vmul.f32 %v1093_v17, %v676_v21 }
  0xf7   : > { %v701_v39 = vmax.f32 %v697_v35, 0.0  ;;  %v702_v40 = vmax.f32 %v698_v36, 0.0  ;;  %v703_v41 = vmax.f32 %v699_v37, 0.0 }
  0xf8   : > { %v688_v34 = vadd.f32 %v1094_v18, %v682_v28 }
  0xf9   : > { %v1033_v43 = vpack.c.bf16 %v702_v40, %v701_v39 }
  0xfa   : > { %v700_v38 = vadd.f32 %v1029_v30, %v688_v34 }
  0xfb   : > { %1034 = vst [vmem:[%s1290_s4] sm:$0xff] %v1033_v43  }
  0xfc   : > { %v704_v42 = vmax.f32 %v700_v38, 0.0 }
  0xfe   : > { %v1038_v44 = vpack.c.bf16 %v704_v42, %v703_v41 }
 0x100   : > { %1041 = vst [vmem:[%s1290_s4 + $0x8] sm:$0xff] %v1038_v44  }
 0x101 PF: > { %s14_s19 = sadd.s32 1, %s1133_s19   ;;  %s1291_s15 = smov %s1121_s16 }
 0x102   : > { %p11_p12 = scmp.ge.s32.totalorder %s14_s19, 5   ;;  %s1292_s16 = smov %s1196_s23 }
 0x103   : > { %s1293_s17 = smov %s1129_s18  ;;  %s1294_s18 = smov %s1296_s20 }
 0x104   :  { %13 = sbr.rel (!%p11_p12) target bundleno = 3 (0x3), region = 120 }

// kernel: resnet_forward.28
= control target key start
LH: loop header
LB: loop body
LE: loop exit
PB: predicated region body
PF: predicated region fallthrough
CT: control target
= control target key end

     0   :  { %s297_s1 = inlined_call_operand.vmem [shape: bf16[128,128], index: 1, kind: input, shape index: {}]   ;;  %s298_s2 = inlined_call_operand.vmem [shape: f32[2,128], index: 2, kind: input, shape index: {}]   ;;  %s299_s0 = inlined_call_operand.vmem [shape: bf16[32,128], index: 0, kind: input, shape index: {}]   ;;  %s300_s3 = inlined_call_operand.vmem [shape: bf16[32,128], index: 3, kind: output, shape index: {}]  }
   0x1   :  { %v213_v0 = vld [vmem:[%s297_s1 + $0x38] sm:$0xff]  ;;  %v212_v1 = vld [vmem:[%s297_s1 + $0x30] sm:$0xff]  ;;  %v211_v2 = vld [vmem:[%s297_s1 + $0x28] sm:$0xff] }
   0x2   :  { %106 = vmatpush.bf16.msra.mxu0 %v213_v0  ;;  %225 = vmatpush.bf16.msra.mxu1 %v213_v0  ;;  %v210_v3 = vld [vmem:[%s297_s1 + $0x20] sm:$0xff]  ;;  %v209_v4 = vld [vmem:[%s297_s1 + $0x18] sm:$0xff]  ;;  %v208_v5 = vld [vmem:[%s297_s1 + $0x10] sm:$0xff] }
   0x3   :  { %v207_v6 = vld [vmem:[%s297_s1 + $0x8] sm:$0xff]  ;;  %v206_v7 = vld [vmem:[%s297_s1] sm:$0xff] }
   0x4   :  { %v204_v8 = vld [vmem:[%s299_s0] sm:$0xff]  ;;  %v205_v9 = vld [vmem:[%s299_s0 + $0x8] sm:$0xff] }
   0x5   :  { %v233_v12 = vld [vmem:[%s298_s2] ss:$0 sm:$0xff]  ;;  %v234_v14 = vld [vmem:[%s298_s2 + $0x1] ss:$0 sm:$0xff] }
   0x6   :  { %107 = vmatpush.bf16.msra.mxu0 %v212_v1  ;;  %226 = vmatpush.bf16.msra.mxu1 %v212_v1 }
   0xa   :  { %108 = vmatpush.bf16.msra.mxu0 %v211_v2  ;;  %227 = vmatpush.bf16.msra.mxu1 %v211_v2 }
   0xe   :  { %109 = vmatpush.bf16.msra.mxu0 %v210_v3  ;;  %228 = vmatpush.bf16.msra.mxu1 %v210_v3 }
  0x12   :  { %110 = vmatpush.bf16.msra.mxu0 %v209_v4  ;;  %229 = vmatpush.bf16.msra.mxu1 %v209_v4 }
  0x16   :  { %111 = vmatpush.bf16.msra.mxu0 %v208_v5  ;;  %230 = vmatpush.bf16.msra.mxu1 %v208_v5 }
  0x1a   :  { %112 = vmatpush.bf16.msra.mxu0 %v207_v6  ;;  %231 = vmatpush.bf16.msra.mxu1 %v207_v6 }
  0x1e   :  { %113 = vmatpush.bf16.msra.mxu0 %v206_v7  ;;  %232 = vmatpush.bf16.msra.mxu1 %v206_v7 }
  0x21   :  { %114 = vmatmul.bf16.vlgmr.msra.gmra.mxu0 %v204_v8  ;;  %119 = vmatmul.bf16.vlgmr.msra.gmra.mxu1 %v205_v9 }
  0x9e   :  { %v115_v10 = vpop.f32.mrf.mxu0  ;;  %v120_v11 = vpop.f32.mrf.mxu1 }
  0x9f   :  { %v142_v13 = vmul.f32 %v233_v12, %v115_v10  ;;  %v144_v15 = vmul.f32 %v233_v12, %v120_v11 }
  0xa1   :  { %v148_v20 = vadd.f32 %v234_v14, %v142_v13  ;;  %v150_v21 = vadd.f32 %v234_v14, %v144_v15 }
  0xa6   :  { %v117_v16 = vpop.f32.mrf.mxu0  ;;  %v122_v17 = vpop.f32.mrf.mxu1 }
  0xa7   :  { %v143_v18 = vmul.f32 %v233_v12, %v117_v16  ;;  %v145_v19 = vmul.f32 %v233_v12, %v122_v17 }
  0xa9   :  { %v149_v22 = vadd.f32 %v234_v14, %v143_v18  ;;  %v151_v23 = vadd.f32 %v234_v14, %v145_v19 }
  0xab   :  { %v217_v24 = vpack.c.bf16 %v149_v22, %v148_v20  ;;  %v222_v25 = vpack.c.bf16 %v151_v23, %v150_v21 }
  0xad   :  { %218 = vst [vmem:[%s300_s3] sm:$0xff] %v217_v24  }
  0xae   :  { %224 = vst [vmem:[%s300_s3 + $0x8] sm:$0xff] %v222_v25  }

// kernel: resnet_forward.31
= control target key start
LH: loop header
LB: loop body
LE: loop exit
PB: predicated region body
PF: predicated region fallthrough
CT: control target
= control target key end

     0   :  { %s1056_s12 = smov 0   ;;  %s1058_s13 = smov 0   ;;  %s1175_s0 = inlined_call_operand.vmem [shape: bf16[32,1152], index: 0, kind: input, shape index: {}]   ;;  %s1176_s1 = inlined_call_operand.vmem [shape: bf16[1152,128], index: 1, kind: input, shape index: {}]   ;;  %s1177_s2 = inlined_call_operand.vmem [shape: f32[2,128], index: 2, kind: input, shape index: {}]   ;;  %s1178_s3 = inlined_call_operand.vmem [shape: bf16[32,128], index: 3, kind: output, shape index: {}]  }
   0x1   :  { %s1060_s14 = smov 0   ;;  %s1062_s15 = smov 0  }
   0x2   :  { %s1064_s16 = smov 0  }
   0x3 LB: > { %s25_s17 = sadd.s32 1, %s1029_s15  ;;  %p48_p1 = scmp.ne.s32.totalorder %s1021_s13, %s1017_s12  ;;  %s1033_s16 = sphi %s1064_s16, %s13_s16   ;;  %s1029_s15 = sphi %s1062_s15, %s1182_s15   ;;  %s1025_s14 = sphi %s1060_s14, %s1181_s14   ;;  %s1021_s13 = sphi %s1058_s13, %s1180_s13   ;;  %s1017_s12 = sphi %s1056_s12, %s1179_s12  }
   0x4   : > { %p26_p0 = scmp.ge.s32.totalorder %s25_s17, 3  ;;  %p49_p2 = scmp.eq.s32.totalorder %s1033_s16, 0 }
   0x5   : > { %s41_s19 = sadd.s32 1, %s1021_s13  ;;  %p762_p5 = scmp.ge.s32.totalorder %s1033_s16, 3 }
   0x6   : > { %s1184_s17 = smov (%p26_p0, %s25_s17), 0  ;;  %p50_p3 = por %p49_p2, %p48_p1 }
   0x7   : > { %s37_s18 = ssub.s32 %s1029_s15, %s1184_s17  ;;  %163 = sbr.rel (%p762_p5) target bundleno = 25 (0x19), region = 20 }
   0x8   : > { %p39_p4 = scmp.eq.s32.totalorder %s37_s18, 0 }
   0xa   : > { %s1091_s20 = scalar_select %p39_p4, %s1021_s13, %s41_s19  }
   0xc   : > { %166 = sbr.rel (!%p50_p3) target bundleno = 25 (0x19), region = 24  ;;  %s168_s21 = sand.u32 (%p50_p3), 1, %s1021_s13  }
   0xd   : > { %s900_s22 = smul.u32 (%p50_p3), 12, %s1029_s15 }
   0xe   : > { %s950_s23 = smul.u32 (%p50_p3), 48, %s168_s21 }
   0xf   : > { %s176_s26 = scalar_lea.vmem (%p50_p3), %s1175_s0, %s900_s22 }
  0x10   : > { %v191_v0 = vld [vmem:[%s176_s26] sm:$0xff] (%p50_p3)  ;;  %v195_v2 = vld [vmem:[%s176_s26 + $0x48] sm:$0xff] (%p50_p3)  ;;  %s170_s27 = scalar_lea.vmem (%p50_p3), [#allocation3], %s950_s23  ;;  %v768_v6 = vld [vmem:[%s176_s26 + $0x50] sm:$0xf] (%p50_p3) }
  0x11   : > { %v193_v1 = vld [vmem:[%s176_s26 + $0x24] sm:$0xff]  ;;  %192 = vst [vmem:[%s170_s27] sm:$0xff] %v191_v0  ;;  %v197_v3 = vld [vmem:[%s176_s26 + $0x6c] sm:$0xff]  ;;  %v770_v7 = vld [vmem:[%s176_s26 + $0x74] sm:$0xf] }
  0x12   : > { %194 = vst [vmem:[%s170_s27 + $0xc] sm:$0xff] %v193_v1  ;;  %v764_v4 = vld [vmem:[%s176_s26 + $0x8] sm:$0xf]  ;;  %v766_v5 = vld [vmem:[%s176_s26 + $0x2c] sm:$0xf] }
  0x13   : > { %196 = vst [vmem:[%s170_s27 + $0x18] sm:$0xff] %v195_v2 }
  0x14   : > { %198 = vst [vmem:[%s170_s27 + $0x24] sm:$0xff] %v197_v3 }
  0x15   : > { %765 = vst [vmem:[%s170_s27 + $0x8] sm:$0xf] %v764_v4 }
  0x16   : > { %767 = vst [vmem:[%s170_s27 + $0x14] sm:$0xf] %v766_v5 }
  0x17   : > { %769 = vst [vmem:[%s170_s27 + $0x20] sm:$0xf] %v768_v6 }
  0x18   : > { %771 = vst [vmem:[%s170_s27 + $0x2c] sm:$0xf] %v770_v7 }
  0x19 PF: > { %p772_p6 = scmp.ge.s32.totalorder %s1033_s16, 1  ;;  %p231_p7 = scmp.lt.s32.totalorder %s1033_s16, 4 }
  0x1b   : > { %p232_p8 = pnand %p772_p6, %p231_p7 }
  0x1c   : > { %s238_s28 = sand.u32 (!%p232_p8), 1, %s1017_s12   ;;  %s278_s29 = smul.u32 (!%p232_p8), 48, %s1025_s14 }
  0x1d   : > { %235 = sbr.rel (%p232_p8) target bundleno = 255 (0xff), region = 54  ;;  %p774_p10 = scmp.ne.s32.totalorder (!%p232_p8), %s1025_s14, 0 }
  0x1e   : > { %s951_s30 = smul.u32 (!%p232_p8), 48, %s238_s28  ;;  %p279_p9 = scmp.lt.s32.totalorder (!%p232_p8), %s278_s29, 143 }
  0x20   : > { %s1108_s8 = scalar_lea.vmem (!%p232_p8), [#allocation3], %s951_s30 }
  0x22   : > { %s1186_s29 = smov (!%p279_p9, %s278_s29), 143  ;;  %303 = sbr.rel (%p774_p10) target bundleno = 44 (0x2c), region = 62 }
  0x23   : > { %s773_s4 = sshll.u32 %s1186_s29, 2 }
  0x24   : > { %s1106_s7 = scalar_lea.vmem %s1176_s1, %s773_s4 }
  0x27   : > { %v1035_v8 = vmov 0.0  }
  0x28   : > { %304 = vst [vmem:[#allocation2 + $0x10] sm:$0xff] %v1035_v8 }
  0x29   : > { %305 = vst [vmem:[#allocation2] sm:$0xff] %v1035_v8 }
  0x2a   : > { %306 = vst [vmem:[#allocation2 + $0x18] sm:$0xff] %v1035_v8 }
  0x2b   : > { %307 = vst [vmem:[#allocation2 + $0x8] sm:$0xff] %v1035_v8 }
  0x2c PF: > { %v914_v9 = vld [vmem:[%s1106_s7 + $0x38] sm:$0xff]  ;;  %v913_v12 = vld [vmem:[%s1106_s7 + $0x30] sm:$0xff]  ;;  %v912_v15 = vld [vmem:[%s1106_s7 + $0x28] sm:$0xff]  ;;  %p895_p11 = scmp.ne.s32.totalorder %s1025_s14, 2 }
  0x2d   : > { %v922_v10 = vld [vmem:[%s1106_s7 + $0x78] sm:$0xff]  ;;  %544 = vmatpush.bf16.msra.mxu0 %v914_v9  ;;  %v921_v13 = vld [vmem:[%s1106_s7 + $0x70] sm:$0xff]  ;;  %942 = vmatpush.bf16.msra.mxu3 %v914_v9  ;;  %v920_v16 = vld [vmem:[%s1106_s7 + $0x68] sm:$0xff] }
  0x2e   : > { %v930_v11 = vld [vmem:[%s1106_s7 + $0xb8] sm:$0xff]  ;;  %563 = vmatpush.bf16.msra.mxu1 %v922_v10  ;;  %v929_v14 = vld [vmem:[%s1106_s7 + $0xb0] sm:$0xff]  ;;  %v928_v17 = vld [vmem:[%s1106_s7 + $0xa8] sm:$0xff] }
  0x2f   : > { %582 = vmatpush.bf16.msra.mxu2 %v930_v11  ;;  %v911_v18 = vld [vmem:[%s1106_s7 + $0x20] sm:$0xff]  ;;  %v910_v21 = vld [vmem:[%s1106_s7 + $0x18] sm:$0xff]  ;;  %v909_v24 = vld [vmem:[%s1106_s7 + $0x10] sm:$0xff] }
  0x30   : > { %v919_v19 = vld [vmem:[%s1106_s7 + $0x60] sm:$0xff]  ;;  %v918_v22 = vld [vmem:[%s1106_s7 + $0x58] sm:$0xff]  ;;  %v917_v25 = vld [vmem:[%s1106_s7 + $0x50] sm:$0xff] }
  0x31   : > { %545 = vmatpush.bf16.msra.mxu0 %v913_v12  ;;  %943 = vmatpush.bf16.msra.mxu3 %v913_v12  ;;  %v927_v20 = vld [vmem:[%s1106_s7 + $0xa0] sm:$0xff]  ;;  %v926_v23 = vld [vmem:[%s1106_s7 + $0x98] sm:$0xff]  ;;  %v925_v26 = vld [vmem:[%s1106_s7 + $0x90] sm:$0xff] }
  0x32   : > { %564 = vmatpush.bf16.msra.mxu1 %v921_v13  ;;  %v908_v27 = vld [vmem:[%s1106_s7 + $0x8] sm:$0xff]  ;;  %v907_v30 = vld [vmem:[%s1106_s7] sm:$0xff]  ;;  %v308_v54 = vld [vmem:[#allocation2 + $0x10] sm:$0xff] }
  0x33   : > { %583 = vmatpush.bf16.msra.mxu2 %v929_v14  ;;  %v916_v28 = vld [vmem:[%s1106_s7 + $0x48] sm:$0xff]  ;;  %v915_v31 = vld [vmem:[%s1106_s7 + $0x40] sm:$0xff]  ;;  %v310_v4 = vld [vmem:[#allocation2 + $0x18] sm:$0xff] }
  0x34   : > { %v924_v29 = vld [vmem:[%s1106_s7 + $0x88] sm:$0xff]  ;;  %v923_v32 = vld [vmem:[%s1106_s7 + $0x80] sm:$0xff] }
  0x35   : > { %546 = vmatpush.bf16.msra.mxu0 %v912_v15  ;;  %944 = vmatpush.bf16.msra.mxu3 %v912_v15  ;;  %v777_v33 = vld [vmem:[%s1108_s8] sm:$0xf]  ;;  %v902_v34 = vld [vmem:[%s1108_s8 + $0x8] sm:$0xf0]  ;;  %v901_v35 = vld [vmem:[%s1108_s8 + $0x4] sm:$0xf] }
  0x36   : > { %565 = vmatpush.bf16.msra.mxu1 %v920_v16  ;;  %v779_v36 = vld [vmem:[%s1108_s8 + $0xc] sm:$0xf0]  ;;  %v785_v37 = vld [vmem:[%s1108_s8 + $0x8] sm:$0xf]  ;;  %v903_v38 = vld [vmem:[%s1108_s8 + $0x10] sm:$0xf0]  ;;  %v778_v41 = vor.u32 %v902_v34, %v777_v33 }
  0x37   : > { %584 = vmatpush.bf16.msra.mxu2 %v928_v17  ;;  %v789_v39 = vld [vmem:[%s1108_s8 + $0x18] sm:$0xf]  ;;  %v905_v40 = vld [vmem:[%s1108_s8 + $0x20] sm:$0xf0]  ;;  %v782_v42 = vor.u32 %v901_v35, %v779_v36  ;;  %v786_v43 = vor.u32 %v903_v38, %v785_v37  ;;  %v904_v45 = vld [vmem:[%s1108_s8 + $0x1c] sm:$0xf] }
  0x38   : > { %v790_v44 = vor.u32 %v905_v40, %v789_v39  ;;  %v791_v46 = vld [vmem:[%s1108_s8 + $0x24] sm:$0xf0]  ;;  %v797_v47 = vld [vmem:[%s1108_s8 + $0x20] sm:$0xf]  ;;  %v906_v48 = vld [vmem:[%s1108_s8 + $0x28] sm:$0xf0] }
  0x39   : > { %547 = vmatpush.bf16.msra.mxu0 %v911_v18  ;;  %945 = vmatpush.bf16.msra.mxu3 %v911_v18  ;;  %v794_v49 = vor.u32 %v904_v45, %v791_v46  ;;  %v798_v50 = vor.u32 %v906_v48, %v797_v47  ;;  %v309_v61 = vld [vmem:[#allocation2] sm:$0xff]  ;;  %v311_v11 = vld [vmem:[#allocation2 + $0x8] sm:$0xff] }
  0x3a   : > { %566 = vmatpush.bf16.msra.mxu1 %v919_v19 }
  0x3b   : > { %585 = vmatpush.bf16.msra.mxu2 %v927_v20 }
  0x3d   : > { %548 = vmatpush.bf16.msra.mxu0 %v910_v21  ;;  %946 = vmatpush.bf16.msra.mxu3 %v910_v21 }
  0x3e   : > { %567 = vmatpush.bf16.msra.mxu1 %v918_v22 }
  0x3f   : > { %586 = vmatpush.bf16.msra.mxu2 %v926_v23 }
  0x41   : > { %549 = vmatpush.bf16.msra.mxu0 %v909_v24  ;;  %947 = vmatpush.bf16.msra.mxu3 %v909_v24 }
  0x42   : > { %568 = vmatpush.bf16.msra.mxu1 %v917_v25 }
  0x43   : > { %587 = vmatpush.bf16.msra.mxu2 %v925_v26 }
  0x45   : > { %550 = vmatpush.bf16.msra.mxu0 %v908_v27  ;;  %948 = vmatpush.bf16.msra.mxu3 %v908_v27 }
  0x46   : > { %569 = vmatpush.bf16.msra.mxu1 %v916_v28 }
  0x47   : > { %588 = vmatpush.bf16.msra.mxu2 %v924_v29 }
  0x49   : > { %551 = vmatpush.bf16.msra.mxu0 %v907_v30  ;;  %949 = vmatpush.bf16.msra.mxu3 %v907_v30 }
  0x4a   : > { %570 = vmatpush.bf16.msra.mxu1 %v915_v31 }
  0x4b   : > { %589 = vmatpush.bf16.msra.mxu2 %v923_v32 }
  0x4c   : > { %552 = vmatmul.bf16.vlgmr.msra.gmra.mxu0 %v778_v41  ;;  %557 = vmatmul.bf16.vlgmr.msra.gmra.mxu3 %v790_v44 }
  0x4d   : > { %571 = vmatmul.bf16.vlgmr.msra.gmra.mxu1 %v782_v42 }
  0x4e   : > { %590 = vmatmul.bf16.vlgmr.msra.gmra.mxu2 %v786_v43 }
  0x5d   : > { %576 = vmatmul.bf16.gmra.mxu1 %v794_v49 }
  0x5e   : > { %595 = vmatmul.bf16.gmra.mxu2 %v798_v50 }
  0xc9   : > { %v553_v52 = vpop.f32.mrf.mxu0 }
  0xca   : > { %v572_v51 = vpop.f32.mrf.mxu1 }
  0xcb   : > { %v573_v53 = vadd.f32 %v572_v51, %v553_v52 }
  0xcf   : > { %v558_v2 = vpop.f32.mrf.mxu3 }
  0xd1   : > { %v591_v55 = vpop.f32.mrf.mxu2  ;;  %v555_v59 = vpop.f32.mrf.mxu0 }
  0xd2   : > { %v592_v56 = vadd.f32 %v591_v55, %v573_v53  ;;  %v574_v57 = vpop.f32.mrf.mxu1 }
  0xd3   : > { %v575_v60 = vadd.f32 %v574_v57, %v555_v59 }
  0xd4   : > { %v601_v58 = vadd.f32 %v592_v56, %v308_v54 }
  0xd6   : > { %605 = vst [vmem:[#allocation2 + $0x10] sm:$0xff] %v601_v58 }
  0xd7   : > { %v560_v9 = vpop.f32.mrf.mxu3 }
  0xd9   : > { %v593_v62 = vpop.f32.mrf.mxu2 }
  0xda   : > { %v594_v63 = vadd.f32 %v593_v62, %v575_v60  ;;  %v577_v0 = vpop.f32.mrf.mxu1 }
  0xdb   : > { %v578_v3 = vadd.f32 %v577_v0, %v558_v2 }
  0xdc   : > { %v602_v1 = vadd.f32 %v594_v63, %v309_v61 }
  0xde   : > { %606 = vst [vmem:[#allocation2] sm:$0xff] %v602_v1 }
  0xe1   : > { %v596_v5 = vpop.f32.mrf.mxu2 }
  0xe2   : > { %v597_v6 = vadd.f32 %v596_v5, %v578_v3  ;;  %v579_v8 = vpop.f32.mrf.mxu1 }
  0xe3   : > { %v580_v10 = vadd.f32 %v579_v8, %v560_v9 }
  0xe4   : > { %v603_v7 = vadd.f32 %v597_v6, %v310_v4 }
  0xe6   : > { %607 = vst [vmem:[#allocation2 + $0x18] sm:$0xff] %v603_v7 }
  0xe9   : > { %v598_v12 = vpop.f32.mrf.mxu2 }
  0xea   : > { %v599_v13 = vadd.f32 %v598_v12, %v580_v10  ;;  %612 = sbr.rel (%p895_p11) target bundleno = 255 (0xff), region = 66 }
  0xec   : > { %v604_v14 = vadd.f32 %v599_v13, %v311_v11 }
  0xee   : > { %608 = vst [vmem:[#allocation2 + $0x8] sm:$0xff] %v604_v14 }
  0xef   : > { %v613_v15 = vld [vmem:[#allocation2 + $0x10] sm:$0xff]  ;;  %v614_v16 = vld [vmem:[#allocation2] sm:$0xff]  ;;  %v615_v19 = vld [vmem:[#allocation2 + $0x18] sm:$0xff] }
  0xf0   : > { %v993_v17 = vld [vmem:[%s1177_s2] ss:$0 sm:$0xff]  ;;  %v994_v18 = vld [vmem:[%s1177_s2 + $0x1] ss:$0 sm:$0xff] }
  0xf1   : > { %v619_v21 = vmul.f32 %v993_v17, %v613_v15  ;;  %v620_v22 = vmul.f32 %v993_v17, %v614_v16  ;;  %v621_v23 = vmul.f32 %v993_v17, %v615_v19 }
  0xf3   : > { %v625_v25 = vadd.f32 %v994_v18, %v619_v21  ;;  %v626_v26 = vadd.f32 %v994_v18, %v620_v22  ;;  %v627_v27 = vadd.f32 %v994_v18, %v621_v23 }
  0xf5   : > { %v616_v20 = vld [vmem:[#allocation2 + $0x8] sm:$0xff]  ;;  %v629_v29 = vmax.f32 %v625_v25, 0.0  ;;  %v630_v30 = vmax.f32 %v626_v26, 0.0  ;;  %v631_v31 = vmax.f32 %v627_v27, 0.0 }
  0xf6   : > { %v622_v24 = vmul.f32 %v993_v17, %v616_v20 }
  0xf7   : > { %v934_v33 = vpack.c.bf16 %v630_v30, %v629_v29 }
  0xf8   : > { %v628_v28 = vadd.f32 %v994_v18, %v622_v24 }
  0xf9   : > { %935 = vst [vmem:[%s1178_s3] sm:$0xff] %v934_v33  }
  0xfa   : > { %v632_v32 = vmax.f32 %v628_v28, 0.0 }
  0xfc   : > { %v939_v34 = vpack.c.bf16 %v632_v32, %v631_v31 }
  0xfe   : > { %941 = vst [vmem:[%s1178_s3 + $0x8] sm:$0xff] %v939_v34  }
  0xff PF: > { %s13_s16 = sadd.s32 1, %s1033_s16   ;;  %s1179_s12 = smov %s1021_s13 }
 0x100   : > { %p10_p12 = scmp.ge.s32.totalorder %s13_s16, 5   ;;  %s1180_s13 = smov %s1091_s20 }
 0x101   : > { %s1181_s14 = smov %s1029_s15  ;;  %s1182_s15 = smov %s1184_s17 }
 0x102   :  { %12 = sbr.rel (!%p10_p12) target bundleno = 3 (0x3), region = 113 }

// kernel: resnet_forward.34
= control target key start
LH: loop header
LB: loop body
LE: loop exit
PB: predicated region body
PF: predicated region fallthrough
CT: control target
= control target key end

     0   :  { %s1269_s12 = smov 0   ;;  %s1271_s13 = smov 0   ;;  %s1462_s0 = inlined_call_operand.vmem [shape: bf16[16,1152], index: 0, kind: input, shape index: {}]   ;;  %s1463_s1 = inlined_call_operand.vmem [shape: bf16[1152,256], index: 1, kind: input, shape index: {}]   ;;  %s1464_s2 = inlined_call_operand.vmem [shape: f32[2,256], index: 2, kind: input, shape index: {}]   ;;  %s1465_s3 = inlined_call_operand.vmem [shape: bf16[16,256], index: 3, kind: output, shape index: {}]  }
   0x1   :  { %s1273_s14 = smov 0   ;;  %s1275_s15 = smov 0  }
   0x2   :  { %s1277_s16 = smov 0  }
   0x3 LB: > { %s25_s17 = sadd.s32 1, %s1242_s15  ;;  %p48_p1 = scmp.ne.s32.totalorder %s1234_s13, %s1230_s12  ;;  %s1246_s16 = sphi %s1277_s16, %s13_s16   ;;  %s1242_s15 = sphi %s1275_s15, %s1469_s15   ;;  %s1238_s14 = sphi %s1273_s14, %s1468_s14   ;;  %s1234_s13 = sphi %s1271_s13, %s1467_s13   ;;  %s1230_s12 = sphi %s1269_s12, %s1466_s12  }
   0x4   : > { %p26_p0 = scmp.ge.s32.totalorder %s25_s17, 3  ;;  %p49_p2 = scmp.eq.s32.totalorder %s1246_s16, 0 }
   0x5   : > { %s41_s19 = sadd.s32 1, %s1234_s13  ;;  %p892_p5 = scmp.ge.s32.totalorder %s1246_s16, 3 }
   0x6   : > { %s1471_s17 = smov (%p26_p0, %s25_s17), 0  ;;  %p50_p3 = por %p49_p2, %p48_p1 }
   0x7   : > { %s37_s18 = ssub.s32 %s1242_s15, %s1471_s17  ;;  %165 = sbr.rel (%p892_p5) target bundleno = 21 (0x15), region = 20 }
   0x8   : > { %p39_p4 = scmp.eq.s32.totalorder %s37_s18, 0 }
   0xa   : > { %s1304_s20 = scalar_select %p39_p4, %s1234_s13, %s41_s19  }
   0xc   : > { %168 = sbr.rel (!%p50_p3) target bundleno = 21 (0x15), region = 24  ;;  %s170_s21 = sand.u32 (%p50_p3), 1, %s1234_s13  }
   0xd   : > { %s1112_s22 = smul.u32 (%p50_p3), 12, %s1242_s15 }
   0xe   : > { %s1165_s23 = smul.u32 (%p50_p3), 24, %s170_s21 }
   0xf   : > { %s178_s26 = scalar_lea.vmem (%p50_p3), %s1462_s0, %s1112_s22 }
  0x10   : > { %v193_v0 = vld [vmem:[%s178_s26] sm:$0xff] (%p50_p3)  ;;  %v894_v2 = vld [vmem:[%s178_s26 + $0x8] sm:$0xf] (%p50_p3)  ;;  %s172_s27 = scalar_lea.vmem (%p50_p3), [#allocation3], %s1165_s23  ;;  %v896_v3 = vld [vmem:[%s178_s26 + $0x2c] sm:$0xf] (%p50_p3) }
  0x11   : > { %v195_v1 = vld [vmem:[%s178_s26 + $0x24] sm:$0xff]  ;;  %194 = vst [vmem:[%s172_s27] sm:$0xff] %v193_v0 }
  0x12   : > { %196 = vst [vmem:[%s172_s27 + $0xc] sm:$0xff] %v195_v1 }
  0x13   : > { %895 = vst [vmem:[%s172_s27 + $0x8] sm:$0xf] %v894_v2 }
  0x14   : > { %897 = vst [vmem:[%s172_s27 + $0x14] sm:$0xf] %v896_v3 }
  0x15 PF: > { %p898_p6 = scmp.ge.s32.totalorder %s1246_s16, 1  ;;  %p228_p7 = scmp.lt.s32.totalorder %s1246_s16, 4 }
  0x17   : > { %p229_p8 = pnand %p898_p6, %p228_p7 }
  0x18   : > { %s235_s28 = sand.u32 (!%p229_p8), 1, %s1230_s12   ;;  %s280_s29 = smul.u32 (!%p229_p8), 48, %s1238_s14 }
  0x19   : > { %232 = sbr.rel (%p229_p8) target bundleno = 263 (0x107), region = 54  ;;  %p901_p10 = scmp.ne.s32.totalorder (!%p229_p8), %s1238_s14, 0 }
  0x1a   : > { %s1166_s30 = smul.u32 (!%p229_p8), 24, %s235_s28  ;;  %p282_p9 = scmp.lt.s32.totalorder (!%p229_p8), %s280_s29, 143 }
  0x1c   : > { %s1321_s8 = scalar_lea.vmem (!%p229_p8), [#allocation3], %s1166_s30 }
  0x1e   : > { %s1473_s29 = smov (!%p282_p9, %s280_s29), 143  ;;  %313 = sbr.rel (%p901_p10) target bundleno = 40 (0x28), region = 62 }
  0x1f   : > { %s1113_s4 = sshll.u32 %s1473_s29, 3 }
  0x20   : > { %s1319_s7 = scalar_lea.vmem %s1463_s1, %s1113_s4 }
  0x23   : > { %v1248_v4 = vmov 0.0  }
  0x24   : > { %314 = vst [vmem:[#allocation2 + $0x10] sm:$0xff] %v1248_v4 }
  0x25   : > { %315 = vst [vmem:[#allocation2] sm:$0xff] %v1248_v4 }
  0x26   : > { %316 = vst [vmem:[#allocation2 + $0x18] sm:$0xff] %v1248_v4 }
  0x27   : > { %317 = vst [vmem:[#allocation2 + $0x8] sm:$0xff] %v1248_v4 }
  0x28 PF: > { %v972_v5 = vld [vmem:[%s1319_s7 + $0x70] sm:$0xf]  ;;  %v1132_v6 = vld [vmem:[%s1319_s7 + $0x74] sm:$0xf0]  ;;  %v964_v14 = vld [vmem:[%s1319_s7 + $0x60] sm:$0xf] }
  0x29   : > { %v1036_v7 = vld [vmem:[%s1319_s7 + $0xf0] sm:$0xf]  ;;  %v973_v8 = vor.u32 %v1132_v6, %v972_v5  ;;  %v1148_v9 = vld [vmem:[%s1319_s7 + $0xf4] sm:$0xf0]  ;;  %v1130_v15 = vld [vmem:[%s1319_s7 + $0x64] sm:$0xf0] }
  0x2a   : > { %v1100_v10 = vld [vmem:[%s1319_s7 + $0x170] sm:$0xf]  ;;  %v1164_v11 = vld [vmem:[%s1319_s7 + $0x174] sm:$0xf0]  ;;  %v1037_v12 = vor.u32 %v1148_v9, %v1036_v7  ;;  %v1028_v16 = vld [vmem:[%s1319_s7 + $0xe0] sm:$0xf]  ;;  %v965_v17 = vor.u32 %v1130_v15, %v964_v14 }
  0x2b   : > { %v1101_v13 = vor.u32 %v1164_v11, %v1100_v10  ;;  %630 = vmatpush.bf16.msra.mxu0 %v973_v8  ;;  %v1146_v18 = vld [vmem:[%s1319_s7 + $0xe4] sm:$0xf0]  ;;  %v1092_v19 = vld [vmem:[%s1319_s7 + $0x160] sm:$0xf]  ;;  %v956_v23 = vld [vmem:[%s1319_s7 + $0x50] sm:$0xf] }
  0x2c   : > { %v1162_v20 = vld [vmem:[%s1319_s7 + $0x164] sm:$0xf0]  ;;  %644 = vmatpush.bf16.msra.mxu1 %v1037_v12  ;;  %v1029_v21 = vor.u32 %v1146_v18, %v1028_v16  ;;  %v1128_v24 = vld [vmem:[%s1319_s7 + $0x54] sm:$0xf0]  ;;  %v1020_v25 = vld [vmem:[%s1319_s7 + $0xd0] sm:$0xf] }
  0x2d   : > { %658 = vmatpush.bf16.msra.mxu2 %v1101_v13  ;;  %v1093_v22 = vor.u32 %v1162_v20, %v1092_v19  ;;  %v1144_v26 = vld [vmem:[%s1319_s7 + $0xd4] sm:$0xf0]  ;;  %v1084_v27 = vld [vmem:[%s1319_s7 + $0x150] sm:$0xf]  ;;  %v957_v29 = vor.u32 %v1128_v24, %v956_v23  ;;  %v948_v30 = vld [vmem:[%s1319_s7 + $0x40] sm:$0xf] }
  0x2e   : > { %v1160_v28 = vld [vmem:[%s1319_s7 + $0x154] sm:$0xf0]  ;;  %v1126_v31 = vld [vmem:[%s1319_s7 + $0x44] sm:$0xf0]  ;;  %v1021_v32 = vor.u32 %v1144_v26, %v1020_v25  ;;  %v1012_v34 = vld [vmem:[%s1319_s7 + $0xc0] sm:$0xf] }
  0x2f   : > { %631 = vmatpush.bf16.msra.mxu0 %v965_v17  ;;  %v1085_v33 = vor.u32 %v1160_v28, %v1084_v27  ;;  %v1131_v35 = vld [vmem:[%s1319_s7 + $0x74] sm:$0xf]  ;;  %v974_v36 = vld [vmem:[%s1319_s7 + $0x78] sm:$0xf0]  ;;  %v1142_v37 = vld [vmem:[%s1319_s7 + $0xc4] sm:$0xf0]  ;;  %v949_v42 = vor.u32 %v1126_v31, %v948_v30 }
  0x30   : > { %645 = vmatpush.bf16.msra.mxu1 %v1029_v21  ;;  %v1076_v38 = vld [vmem:[%s1319_s7 + $0x140] sm:$0xf]  ;;  %v1158_v39 = vld [vmem:[%s1319_s7 + $0x144] sm:$0xf0]  ;;  %v977_v40 = vor.u32 %v1131_v35, %v974_v36  ;;  %v1129_v41 = vld [vmem:[%s1319_s7 + $0x64] sm:$0xf]  ;;  %v1013_v46 = vor.u32 %v1142_v37, %v1012_v34 }
  0x31   : > { %659 = vmatpush.bf16.msra.mxu2 %v1093_v22  ;;  %v940_v43 = vld [vmem:[%s1319_s7 + $0x30] sm:$0xf]  ;;  %v1124_v44 = vld [vmem:[%s1319_s7 + $0x34] sm:$0xf0]  ;;  %v966_v45 = vld [vmem:[%s1319_s7 + $0x68] sm:$0xf0]  ;;  %v1077_v47 = vor.u32 %v1158_v39, %v1076_v38 }
  0x32   : > { %672 = vmatpush.bf16.msra.mxu3 %v977_v40  ;;  %v1004_v48 = vld [vmem:[%s1319_s7 + $0xb0] sm:$0xf]  ;;  %v1140_v49 = vld [vmem:[%s1319_s7 + $0xb4] sm:$0xf0]  ;;  %v969_v51 = vor.u32 %v1129_v41, %v966_v45  ;;  %v1127_v53 = vld [vmem:[%s1319_s7 + $0x54] sm:$0xf]  ;;  %v941_v55 = vor.u32 %v1124_v44, %v940_v43 }
  0x33   : > { %632 = vmatpush.bf16.msra.mxu0 %v957_v29  ;;  %v1068_v50 = vld [vmem:[%s1319_s7 + $0x130] sm:$0xf]  ;;  %v1156_v52 = vld [vmem:[%s1319_s7 + $0x134] sm:$0xf0]  ;;  %v958_v54 = vld [vmem:[%s1319_s7 + $0x58] sm:$0xf0]  ;;  %v1005_v59 = vor.u32 %v1140_v49, %v1004_v48 }
  0x34   : > { %646 = vmatpush.bf16.msra.mxu1 %v1021_v32  ;;  %v932_v56 = vld [vmem:[%s1319_s7 + $0x20] sm:$0xf]  ;;  %v1122_v57 = vld [vmem:[%s1319_s7 + $0x24] sm:$0xf0]  ;;  %v961_v58 = vor.u32 %v1127_v53, %v958_v54  ;;  %v1069_v60 = vor.u32 %v1156_v52, %v1068_v50  ;;  %v1125_v62 = vld [vmem:[%s1319_s7 + $0x44] sm:$0xf] }
  0x35   : > { %660 = vmatpush.bf16.msra.mxu2 %v1085_v33  ;;  %v996_v61 = vld [vmem:[%s1319_s7 + $0xa0] sm:$0xf]  ;;  %v950_v63 = vld [vmem:[%s1319_s7 + $0x48] sm:$0xf0]  ;;  %v1138_v0 = vld [vmem:[%s1319_s7 + $0xa4] sm:$0xf0]  ;;  %v933_v3 = vor.u32 %v1122_v57, %v932_v56 }
  0x36   : > { %673 = vmatpush.bf16.msra.mxu3 %v969_v51  ;;  %v1060_v1 = vld [vmem:[%s1319_s7 + $0x120] sm:$0xf]  ;;  %v1154_v2 = vld [vmem:[%s1319_s7 + $0x124] sm:$0xf0]  ;;  %v924_v4 = vld [vmem:[%s1319_s7 + $0x10] sm:$0xf]  ;;  %v953_v6 = vor.u32 %v1125_v62, %v950_v63  ;;  %v997_v7 = vor.u32 %v1138_v0, %v996_v61 }
  0x37   : > { %633 = vmatpush.bf16.msra.mxu0 %v949_v42  ;;  %v1120_v5 = vld [vmem:[%s1319_s7 + $0x14] sm:$0xf0]  ;;  %v1061_v8 = vor.u32 %v1154_v2, %v1060_v1  ;;  %v988_v9 = vld [vmem:[%s1319_s7 + $0x90] sm:$0xf]  ;;  %v1123_v10 = vld [vmem:[%s1319_s7 + $0x34] sm:$0xf] }
  0x38   : > { %647 = vmatpush.bf16.msra.mxu1 %v1013_v46  ;;  %v942_v11 = vld [vmem:[%s1319_s7 + $0x38] sm:$0xf0]  ;;  %v1136_v12 = vld [vmem:[%s1319_s7 + $0x94] sm:$0xf0]  ;;  %v1052_v13 = vld [vmem:[%s1319_s7 + $0x110] sm:$0xf]  ;;  %v925_v15 = vor.u32 %v1120_v5, %v924_v4 }
  0x39   : > { %661 = vmatpush.bf16.msra.mxu2 %v1077_v47  ;;  %v1152_v14 = vld [vmem:[%s1319_s7 + $0x114] sm:$0xf0]  ;;  %v916_v16 = vld [vmem:[%s1319_s7] sm:$0xf]  ;;  %v1118_v17 = vld [vmem:[%s1319_s7 + $0x4] sm:$0xf0]  ;;  %v945_v19 = vor.u32 %v1123_v10, %v942_v11  ;;  %v989_v20 = vor.u32 %v1136_v12, %v988_v9 }
  0x3a   : > { %674 = vmatpush.bf16.msra.mxu3 %v961_v58  ;;  %v980_v18 = vld [vmem:[%s1319_s7 + $0x80] sm:$0xf]  ;;  %v1053_v21 = vor.u32 %v1152_v14, %v1052_v13  ;;  %v1134_v22 = vld [vmem:[%s1319_s7 + $0x84] sm:$0xf0]  ;;  %v1121_v23 = vld [vmem:[%s1319_s7 + $0x24] sm:$0xf]  ;;  %v917_v31 = vor.u32 %v1118_v17, %v916_v16 }
  0x3b   : > { %634 = vmatpush.bf16.msra.mxu0 %v941_v55  ;;  %v934_v24 = vld [vmem:[%s1319_s7 + $0x28] sm:$0xf0]  ;;  %v1044_v25 = vld [vmem:[%s1319_s7 + $0x100] sm:$0xf]  ;;  %v1150_v26 = vld [vmem:[%s1319_s7 + $0x104] sm:$0xf0]  ;;  %v981_v36 = vor.u32 %v1134_v22, %v980_v18 }
  0x3c   : > { %648 = vmatpush.bf16.msra.mxu1 %v1005_v59  ;;  %v1147_v27 = vld [vmem:[%s1319_s7 + $0xf4] sm:$0xf]  ;;  %v1038_v28 = vld [vmem:[%s1319_s7 + $0xf8] sm:$0xf0]  ;;  %v912_v32 = vld [vmem:[%s1321_s8 + $0x8] sm:$0xf]  ;;  %v937_v33 = vor.u32 %v1121_v23, %v934_v24  ;;  %v1045_v37 = vor.u32 %v1150_v26, %v1044_v25 }
  0x3d   : > { %662 = vmatpush.bf16.msra.mxu2 %v1069_v60  ;;  %v1163_v29 = vld [vmem:[%s1319_s7 + $0x174] sm:$0xf]  ;;  %v1102_v30 = vld [vmem:[%s1319_s7 + $0x178] sm:$0xf0]  ;;  %v904_v34 = vld [vmem:[%s1321_s8] sm:$0xf]  ;;  %v1041_v41 = vor.u32 %v1147_v27, %v1038_v28 }
  0x3e   : > { %675 = vmatpush.bf16.msra.mxu3 %v953_v6  ;;  %v1115_v35 = vld [vmem:[%s1321_s8 + $0x8] sm:$0xf0]  ;;  %v1116_v38 = vld [vmem:[%s1321_s8 + $0x10] sm:$0xf0]  ;;  %v1114_v39 = vld [vmem:[%s1321_s8 + $0x4] sm:$0xf]  ;;  %v1105_v42 = vor.u32 %v1163_v29, %v1102_v30 }
  0x3f   : > { %635 = vmatpush.bf16.msra.mxu0 %v933_v3  ;;  %v906_v40 = vld [vmem:[%s1321_s8 + $0xc] sm:$0xf0]  ;;  %v1145_v43 = vld [vmem:[%s1319_s7 + $0xe4] sm:$0xf]  ;;  %v1119_v44 = vld [vmem:[%s1319_s7 + $0x14] sm:$0xf]  ;;  %v905_v49 = vor.u32 %v1115_v35, %v904_v34  ;;  %v1400_v50 = vor.u32 %v1116_v38, %v912_v32 }
  0x40   : > { %649 = vmatpush.bf16.msra.mxu1 %v997_v7  ;;  %v926_v45 = vld [vmem:[%s1319_s7 + $0x18] sm:$0xf0]  ;;  %v1030_v46 = vld [vmem:[%s1319_s7 + $0xe8] sm:$0xf0]  ;;  %v1161_v47 = vld [vmem:[%s1319_s7 + $0x164] sm:$0xf]  ;;  %v1402_v51 = vor.u32 %v1114_v39, %v906_v40 }
  0x41   : > { %663 = vmatpush.bf16.msra.mxu2 %v1061_v8  ;;  %v1094_v48 = vld [vmem:[%s1319_s7 + $0x168] sm:$0xf0]  ;;  %v929_v52 = vor.u32 %v1119_v44, %v926_v45  ;;  %v1033_v53 = vor.u32 %v1145_v43, %v1030_v46  ;;  %v1143_v55 = vld [vmem:[%s1319_s7 + $0xd4] sm:$0xf]  ;;  %v1117_v56 = vld [vmem:[%s1319_s7 + $0x4] sm:$0xf] }
  0x42   : > { %676 = vmatpush.bf16.msra.mxu3 %v945_v19  ;;  %v1097_v54 = vor.u32 %v1161_v47, %v1094_v48  ;;  %v918_v57 = vld [vmem:[%s1319_s7 + $0x8] sm:$0xf0]  ;;  %v1022_v58 = vld [vmem:[%s1319_s7 + $0xd8] sm:$0xf0]  ;;  %v1159_v59 = vld [vmem:[%s1319_s7 + $0x154] sm:$0xf] }
  0x43   : > { %636 = vmatpush.bf16.msra.mxu0 %v925_v15  ;;  %v1086_v60 = vld [vmem:[%s1319_s7 + $0x158] sm:$0xf0]  ;;  %v921_v61 = vor.u32 %v1117_v56, %v918_v57  ;;  %v1025_v62 = vor.u32 %v1143_v55, %v1022_v58  ;;  %v1141_v0 = vld [vmem:[%s1319_s7 + $0xc4] sm:$0xf]  ;;  %v1014_v1 = vld [vmem:[%s1319_s7 + $0xc8] sm:$0xf0] }
  0x44   : > { %650 = vmatpush.bf16.msra.mxu1 %v989_v20  ;;  %v1089_v63 = vor.u32 %v1159_v59, %v1086_v60  ;;  %v1157_v2 = vld [vmem:[%s1319_s7 + $0x144] sm:$0xf]  ;;  %v1078_v3 = vld [vmem:[%s1319_s7 + $0x148] sm:$0xf0]  ;;  %v1017_v4 = vor.u32 %v1141_v0, %v1014_v1  ;;  %v1139_v6 = vld [vmem:[%s1319_s7 + $0xb4] sm:$0xf] }
  0x45   : > { %664 = vmatpush.bf16.msra.mxu2 %v1053_v21  ;;  %v1081_v5 = vor.u32 %v1157_v2, %v1078_v3  ;;  %v1006_v7 = vld [vmem:[%s1319_s7 + $0xb8] sm:$0xf0]  ;;  %v1155_v8 = vld [vmem:[%s1319_s7 + $0x134] sm:$0xf]  ;;  %v1137_v12 = vld [vmem:[%s1319_s7 + $0xa4] sm:$0xf] }
  0x46   : > { %677 = vmatpush.bf16.msra.mxu3 %v937_v33  ;;  %v1070_v9 = vld [vmem:[%s1319_s7 + $0x138] sm:$0xf0]  ;;  %v1009_v10 = vor.u32 %v1139_v6, %v1006_v7  ;;  %v998_v13 = vld [vmem:[%s1319_s7 + $0xa8] sm:$0xf0]  ;;  %v1153_v14 = vld [vmem:[%s1319_s7 + $0x124] sm:$0xf] }
  0x47   : > { %637 = vmatpush.bf16.msra.mxu0 %v917_v31  ;;  %v1073_v11 = vor.u32 %v1155_v8, %v1070_v9  ;;  %v1062_v15 = vld [vmem:[%s1319_s7 + $0x128] sm:$0xf0]  ;;  %v1001_v16 = vor.u32 %v1137_v12, %v998_v13  ;;  %v1135_v18 = vld [vmem:[%s1319_s7 + $0x94] sm:$0xf]  ;;  %v990_v19 = vld [vmem:[%s1319_s7 + $0x98] sm:$0xf0] }
  0x48   : > { %651 = vmatpush.bf16.msra.mxu1 %v981_v36  ;;  %v1065_v17 = vor.u32 %v1153_v14, %v1062_v15  ;;  %v1151_v20 = vld [vmem:[%s1319_s7 + $0x114] sm:$0xf]  ;;  %v1054_v21 = vld [vmem:[%s1319_s7 + $0x118] sm:$0xf0]  ;;  %v993_v22 = vor.u32 %v1135_v18, %v990_v19  ;;  %v1133_v24 = vld [vmem:[%s1319_s7 + $0x84] sm:$0xf] }
  0x49   : > { %665 = vmatpush.bf16.msra.mxu2 %v1045_v37  ;;  %v1057_v23 = vor.u32 %v1151_v20, %v1054_v21  ;;  %v982_v25 = vld [vmem:[%s1319_s7 + $0x88] sm:$0xf0]  ;;  %v1149_v26 = vld [vmem:[%s1319_s7 + $0x104] sm:$0xf]  ;;  %v318_v33 = vld [vmem:[#allocation2 + $0x10] sm:$0xff]  ;;  %p1106_p11 = scmp.ne.s32.totalorder %s1238_s14, 2 }
  0x4a   : > { %638 = vmatmul.bf16.vlgmr.msra.gmra.mxu0 %v905_v49  ;;  %678 = vmatpush.bf16.msra.mxu3 %v929_v52  ;;  %v1046_v27 = vld [vmem:[%s1319_s7 + $0x108] sm:$0xf0]  ;;  %v985_v28 = vor.u32 %v1133_v24, %v982_v25  ;;  %v320_v40 = vld [vmem:[#allocation2 + $0x18] sm:$0xff]  ;;  %v319_v48 = vld [vmem:[#allocation2] sm:$0xff] }
  0x4b   : > { %686 = vmatpush.bf16.msrb.mxu0 %v1041_v41  ;;  %652 = vmatmul.bf16.vlgmr.msra.gmra.mxu1 %v1402_v51  ;;  %v1049_v29 = vor.u32 %v1149_v26, %v1046_v27 }
  0x4c   : > { %700 = vmatpush.bf16.msrb.mxu1 %v1105_v42  ;;  %666 = vmatmul.bf16.vlgmr.msra.gmra.mxu2 %v1400_v50 }
  0x4e   : > { %679 = vmatpush.bf16.msra.mxu3 %v921_v61 }
  0x4f   : > { %687 = vmatpush.bf16.msrb.mxu0 %v1033_v53 }
  0x50   : > { %701 = vmatpush.bf16.msrb.mxu1 %v1097_v54  ;;  %v321_v54 = vld [vmem:[#allocation2 + $0x8] sm:$0xff] }
  0x51   : > { %680 = vmatmul.bf16.vlgmr.msra.gmra.mxu3 %v905_v49 }
  0x53   : > { %688 = vmatpush.bf16.msrb.mxu0 %v1025_v62 }
  0x54   : > { %702 = vmatpush.bf16.msrb.mxu1 %v1089_v63 }
  0x57   : > { %689 = vmatpush.bf16.msrb.mxu0 %v1017_v4 }
  0x58   : > { %703 = vmatpush.bf16.msrb.mxu1 %v1081_v5 }
  0x5b   : > { %690 = vmatpush.bf16.msrb.mxu0 %v1009_v10 }
  0x5c   : > { %704 = vmatpush.bf16.msrb.mxu1 %v1073_v11 }
  0x5f   : > { %691 = vmatpush.bf16.msrb.mxu0 %v1001_v16 }
  0x60   : > { %705 = vmatpush.bf16.msrb.mxu1 %v1065_v17 }
  0x63   : > { %692 = vmatpush.bf16.msrb.mxu0 %v993_v22 }
  0x64   : > { %706 = vmatpush.bf16.msrb.mxu1 %v1057_v23 }
  0x67   : > { %693 = vmatpush.bf16.msrb.mxu0 %v985_v28 }
  0x68   : > { %707 = vmatpush.bf16.msrb.mxu1 %v1049_v29 }
  0x6a   : > { %694 = vmatmul.bf16.vlgmr.msrb.gmra.mxu0 %v1402_v51 }
  0x6b   : > { %708 = vmatmul.bf16.vlgmr.msrb.gmra.mxu1 %v1400_v50 }
  0xc7   : > { %v639_v30 = vpop.f32.mrf.mxu0 }
  0xc8   : > { %v653_v31 = vpop.f32.mrf.mxu1 }
  0xc9   : > { %v654_v32 = vadd.f32 %v653_v31, %v639_v30 }
  0xcf   : > { %v667_v34 = vpop.f32.mrf.mxu2  ;;  %v641_v36 = vpop.f32.mrf.mxu0 }
  0xd0   : > { %v668_v35 = vadd.f32 %v667_v34, %v654_v32  ;;  %v655_v37 = vpop.f32.mrf.mxu1 }
  0xd1   : > { %v656_v39 = vadd.f32 %v655_v37, %v641_v36 }
  0xd2   : > { %v714_v38 = vadd.f32 %v668_v35, %v318_v33 }
  0xd4   : > { %718 = vst [vmem:[#allocation2 + $0x10] sm:$0xff] %v714_v38  ;;  %v681_v44 = vpop.f32.mrf.mxu3 }
  0xd7   : > { %v669_v41 = vpop.f32.mrf.mxu2 }
  0xd8   : > { %v670_v42 = vadd.f32 %v669_v41, %v656_v39 }
  0xda   : > { %v716_v43 = vadd.f32 %v670_v42, %v320_v40 }
  0xdc   : > { %720 = vst [vmem:[#allocation2 + $0x18] sm:$0xff] %v716_v43  ;;  %v683_v51 = vpop.f32.mrf.mxu3 }
  0xe7   : > { %v695_v45 = vpop.f32.mrf.mxu0 }
  0xe8   : > { %v709_v46 = vpop.f32.mrf.mxu1  ;;  %v696_v47 = vadd.f32 %v695_v45, %v681_v44 }
  0xea   : > { %v710_v49 = vadd.f32 %v709_v46, %v696_v47 }
  0xec   : > { %v715_v50 = vadd.f32 %v710_v49, %v319_v48 }
  0xee   : > { %719 = vst [vmem:[#allocation2] sm:$0xff] %v715_v50 }
  0xef   : > { %v697_v52 = vpop.f32.mrf.mxu0 }
  0xf0   : > { %v698_v53 = vadd.f32 %v697_v52, %v683_v51  ;;  %v711_v55 = vpop.f32.mrf.mxu1 }
  0xf2   : > { %v712_v56 = vadd.f32 %v711_v55, %v698_v53  ;;  %725 = sbr.rel (%p1106_p11) target bundleno = 263 (0x107), region = 66 }
  0xf4   : > { %v717_v57 = vadd.f32 %v712_v56, %v321_v54 }
  0xf6   : > { %721 = vst [vmem:[#allocation2 + $0x8] sm:$0xff] %v717_v57 }
  0xf7   : > { %v726_v58 = vld [vmem:[#allocation2 + $0x10] sm:$0xff]  ;;  %v727_v59 = vld [vmem:[#allocation2] sm:$0xff]  ;;  %v728_v0 = vld [vmem:[#allocation2 + $0x18] sm:$0xff] }
  0xf8   : > { %v730_v60 = vld [vmem:[%s1464_s2] ss:$2 sm:$0x3]  ;;  %v1107_v63 = vld [vmem:[%s1464_s2 + $0x1] ss:$2 sm:$0x3] }
  0xf9   : > { %v732_v61 = vperm.slane %v730_v60, 0  ;;  %v733_v62 = vperm.slane %v730_v60, 1  ;;  %v743_v1 = vperm.slane %v1107_v63, 0  ;;  %v744_v2 = vperm.slane %v1107_v63, 1 }
  0xfb   : > { %v736_v4 = vmul.f32 %v732_v61, %v726_v58  ;;  %v737_v5 = vmul.f32 %v733_v62, %v727_v59  ;;  %v738_v6 = vmul.f32 %v732_v61, %v728_v0 }
  0xfd   : > { %v729_v3 = vld [vmem:[#allocation2 + $0x8] sm:$0xff]  ;;  %v747_v8 = vadd.f32 %v743_v1, %v736_v4  ;;  %v748_v9 = vadd.f32 %v744_v2, %v737_v5  ;;  %v749_v10 = vadd.f32 %v743_v1, %v738_v6 }
  0xfe   : > { %v739_v7 = vmul.f32 %v733_v62, %v729_v3 }
  0xff   : > { %v751_v12 = vmax.f32 %v747_v8, 0.0  ;;  %v752_v13 = vmax.f32 %v748_v9, 0.0  ;;  %v753_v14 = vmax.f32 %v749_v10, 0.0 }
 0x100   : > { %v750_v11 = vadd.f32 %v744_v2, %v739_v7 }
 0x101   : > { %v755_v16 = vpack.c.bf16 %v752_v13, %v751_v12 }
 0x102   : > { %v754_v15 = vmax.f32 %v750_v11, 0.0 }
 0x103   : > { %757 = vst [vmem:[%s1465_s3] sm:$0xff] %v755_v16 }
 0x104   : > { %v756_v17 = vpack.c.bf16 %v754_v15, %v753_v14 }
 0x106   : > { %758 = vst [vmem:[%s1465_s3 + $0x8] sm:$0xff] %v756_v17 }
 0x107 PF: > { %s13_s16 = sadd.s32 1, %s1246_s16   ;;  %s1466_s12 = smov %s1234_s13 }
 0x108   : > { %p10_p12 = scmp.ge.s32.totalorder %s13_s16, 5   ;;  %s1467_s13 = smov %s1304_s20 }
 0x109   : > { %s1468_s14 = smov %s1242_s15  ;;  %s1469_s15 = smov %s1471_s17 }
 0x10a   :  { %12 = sbr.rel (!%p10_p12) target bundleno = 3 (0x3), region = 114 }

// kernel: resnet_forward.33
= control target key start
LH: loop header
LB: loop body
LE: loop exit
PB: predicated region body
PF: predicated region fallthrough
CT: control target
= control target key end

     0   :  { %s419_s1 = inlined_call_operand.vmem [shape: bf16[128,256], index: 1, kind: input, shape index: {}]   ;;  %s420_s0 = inlined_call_operand.vmem [shape: bf16[16,128], index: 0, kind: input, shape index: {}]   ;;  %s421_s2 = inlined_call_operand.vmem [shape: f32[2,256], index: 2, kind: input, shape index: {}]   ;;  %s422_s3 = inlined_call_operand.vmem [shape: bf16[16,256], index: 3, kind: output, shape index: {}]  }
   0x1   :  { %v264_v0 = vld [vmem:[%s419_s1 + $0x70] sm:$0xf]  ;;  %v287_v1 = vld [vmem:[%s419_s1 + $0x74] sm:$0xf0]  ;;  %v286_v2 = vld [vmem:[%s419_s1 + $0x74] sm:$0xf] }
   0x2   :  { %v265_v3 = vor.u32 %v287_v1, %v264_v0  ;;  %v266_v4 = vld [vmem:[%s419_s1 + $0x78] sm:$0xf0]  ;;  %v256_v5 = vld [vmem:[%s419_s1 + $0x60] sm:$0xf]  ;;  %v285_v6 = vld [vmem:[%s419_s1 + $0x64] sm:$0xf0] }
   0x3   :  { %v269_v7 = vor.u32 %v286_v2, %v266_v4  ;;  %v284_v8 = vld [vmem:[%s419_s1 + $0x64] sm:$0xf]  ;;  %v258_v9 = vld [vmem:[%s419_s1 + $0x68] sm:$0xf0]  ;;  %v257_v10 = vor.u32 %v285_v6, %v256_v5  ;;  %v248_v12 = vld [vmem:[%s419_s1 + $0x50] sm:$0xf] }
   0x4   :  { %130 = vmatpush.bf16.msra.mxu0 %v265_v3  ;;  %v261_v11 = vor.u32 %v284_v8, %v258_v9  ;;  %v283_v13 = vld [vmem:[%s419_s1 + $0x54] sm:$0xf0]  ;;  %v282_v14 = vld [vmem:[%s419_s1 + $0x54] sm:$0xf]  ;;  %v250_v15 = vld [vmem:[%s419_s1 + $0x58] sm:$0xf0] }
   0x5   :  { %144 = vmatpush.bf16.msra.mxu1 %v269_v7  ;;  %v249_v16 = vor.u32 %v283_v13, %v248_v12  ;;  %v253_v17 = vor.u32 %v282_v14, %v250_v15  ;;  %v240_v18 = vld [vmem:[%s419_s1 + $0x40] sm:$0xf]  ;;  %v281_v19 = vld [vmem:[%s419_s1 + $0x44] sm:$0xf0]  ;;  %v280_v20 = vld [vmem:[%s419_s1 + $0x44] sm:$0xf] }
   0x6   :  { %v242_v21 = vld [vmem:[%s419_s1 + $0x48] sm:$0xf0]  ;;  %v241_v22 = vor.u32 %v281_v19, %v240_v18  ;;  %v232_v24 = vld [vmem:[%s419_s1 + $0x30] sm:$0xf]  ;;  %v279_v25 = vld [vmem:[%s419_s1 + $0x34] sm:$0xf0] }
   0x7   :  { %v245_v23 = vor.u32 %v280_v20, %v242_v21  ;;  %v278_v26 = vld [vmem:[%s419_s1 + $0x34] sm:$0xf]  ;;  %v234_v27 = vld [vmem:[%s419_s1 + $0x38] sm:$0xf0]  ;;  %v233_v28 = vor.u32 %v279_v25, %v232_v24  ;;  %v224_v30 = vld [vmem:[%s419_s1 + $0x20] sm:$0xf] }
   0x8   :  { %131 = vmatpush.bf16.msra.mxu0 %v257_v10  ;;  %v237_v29 = vor.u32 %v278_v26, %v234_v27  ;;  %v277_v31 = vld [vmem:[%s419_s1 + $0x24] sm:$0xf0]  ;;  %v276_v32 = vld [vmem:[%s419_s1 + $0x24] sm:$0xf]  ;;  %v226_v33 = vld [vmem:[%s419_s1 + $0x28] sm:$0xf0] }
   0x9   :  { %145 = vmatpush.bf16.msra.mxu1 %v261_v11  ;;  %v225_v34 = vor.u32 %v277_v31, %v224_v30  ;;  %v229_v35 = vor.u32 %v276_v32, %v226_v33  ;;  %v216_v36 = vld [vmem:[%s419_s1 + $0x10] sm:$0xf]  ;;  %v275_v37 = vld [vmem:[%s419_s1 + $0x14] sm:$0xf0]  ;;  %v274_v38 = vld [vmem:[%s419_s1 + $0x14] sm:$0xf] }
   0xa   :  { %v218_v39 = vld [vmem:[%s419_s1 + $0x18] sm:$0xf0]  ;;  %v217_v40 = vor.u32 %v275_v37, %v216_v36  ;;  %v208_v42 = vld [vmem:[%s419_s1] sm:$0xf]  ;;  %v273_v43 = vld [vmem:[%s419_s1 + $0x4] sm:$0xf0] }
   0xb   :  { %v221_v41 = vor.u32 %v274_v38, %v218_v39  ;;  %v272_v44 = vld [vmem:[%s419_s1 + $0x4] sm:$0xf]  ;;  %v210_v45 = vld [vmem:[%s419_s1 + $0x8] sm:$0xf0]  ;;  %v209_v46 = vor.u32 %v273_v43, %v208_v42 }
   0xc   :  { %132 = vmatpush.bf16.msra.mxu0 %v249_v16  ;;  %v213_v47 = vor.u32 %v272_v44, %v210_v45  ;;  %v271_v48 = vld [vmem:[%s420_s0] sm:$0xff] }
   0xd   :  { %146 = vmatpush.bf16.msra.mxu1 %v253_v17  ;;  %v173_v49 = vld [vmem:[%s421_s2] ss:$2 sm:$0x3]  ;;  %v270_v50 = vld [vmem:[%s421_s2 + $0x1] ss:$2 sm:$0x3] }
   0xe   :  { %v175_v51 = vperm.slane %v173_v49, 0  ;;  %v176_v52 = vperm.slane %v173_v49, 1  ;;  %v186_v53 = vperm.slane %v270_v50, 0  ;;  %v187_v55 = vperm.slane %v270_v50, 1 }
  0x10   :  { %133 = vmatpush.bf16.msra.mxu0 %v241_v22 }
  0x11   :  { %147 = vmatpush.bf16.msra.mxu1 %v245_v23 }
  0x14   :  { %134 = vmatpush.bf16.msra.mxu0 %v233_v28 }
  0x15   :  { %148 = vmatpush.bf16.msra.mxu1 %v237_v29 }
  0x18   :  { %135 = vmatpush.bf16.msra.mxu0 %v225_v34 }
  0x19   :  { %149 = vmatpush.bf16.msra.mxu1 %v229_v35 }
  0x1c   :  { %136 = vmatpush.bf16.msra.mxu0 %v217_v40 }
  0x1d   :  { %150 = vmatpush.bf16.msra.mxu1 %v221_v41 }
  0x20   :  { %137 = vmatpush.bf16.msra.mxu0 %v209_v46 }
  0x21   :  { %151 = vmatpush.bf16.msra.mxu1 %v213_v47 }
  0x23   :  { %138 = vmatmul.bf16.vlgmr.msra.gmra.mxu0 %v271_v48 }
  0x24   :  { %152 = vmatmul.bf16.vlgmr.msra.gmra.mxu1 %v271_v48 }
  0xa0   :  { %v139_v54 = vpop.f32.mrf.mxu0 }
  0xa1   :  { %v179_v56 = vmul.f32 %v175_v51, %v139_v54  ;;  %v153_v57 = vpop.f32.mrf.mxu1 }
  0xa2   :  { %v180_v58 = vmul.f32 %v176_v52, %v153_v57 }
  0xa3   :  { %v190_v59 = vadd.f32 %v186_v53, %v179_v56 }
  0xa4   :  { %v191_v60 = vadd.f32 %v187_v55, %v180_v58 }
  0xa6   :  { %v194_v61 = vpack.c.bf16 %v191_v60, %v190_v59 }
  0xa8   :  { %196 = vst [vmem:[%s422_s3] sm:$0xff] %v194_v61  ;;  %v141_v62 = vpop.f32.mrf.mxu0 }
  0xa9   :  { %v181_v63 = vmul.f32 %v175_v51, %v141_v62  ;;  %v155_v0 = vpop.f32.mrf.mxu1 }
  0xaa   :  { %v182_v1 = vmul.f32 %v176_v52, %v155_v0 }
  0xab   :  { %v192_v2 = vadd.f32 %v186_v53, %v181_v63 }
  0xac   :  { %v193_v3 = vadd.f32 %v187_v55, %v182_v1 }
  0xae   :  { %v195_v4 = vpack.c.bf16 %v193_v3, %v192_v2 }
  0xb0   :  { %197 = vst [vmem:[%s422_s3 + $0x8] sm:$0xff] %v195_v4 }

// kernel: resnet_forward.36
= control target key start
LH: loop header
LB: loop body
LE: loop exit
PB: predicated region body
PF: predicated region fallthrough
CT: control target
= control target key end

     0   :  { %s1269_s12 = smov 0   ;;  %s1271_s13 = smov 0   ;;  %s1462_s0 = inlined_call_operand.vmem [shape: bf16[16,2304], index: 0, kind: input, shape index: {}]   ;;  %s1463_s1 = inlined_call_operand.vmem [shape: bf16[2304,256], index: 1, kind: input, shape index: {}]   ;;  %s1464_s2 = inlined_call_operand.vmem [shape: f32[2,256], index: 2, kind: input, shape index: {}]   ;;  %s1465_s3 = inlined_call_operand.vmem [shape: bf16[16,256], index: 3, kind: output, shape index: {}]  }
   0x1   :  { %s1273_s14 = smov 0   ;;  %s1275_s15 = smov 0  }
   0x2   :  { %s1277_s16 = smov 0  }
   0x3 LB: > { %s25_s17 = sadd.s32 1, %s1242_s15  ;;  %p48_p1 = scmp.ne.s32.totalorder %s1234_s13, %s1230_s12  ;;  %s1246_s16 = sphi %s1277_s16, %s13_s16   ;;  %s1242_s15 = sphi %s1275_s15, %s1469_s15   ;;  %s1238_s14 = sphi %s1273_s14, %s1468_s14   ;;  %s1234_s13 = sphi %s1271_s13, %s1467_s13   ;;  %s1230_s12 = sphi %s1269_s12, %s1466_s12  }
   0x4   : > { %p26_p0 = scmp.ge.s32.totalorder %s25_s17, 6  ;;  %p49_p2 = scmp.eq.s32.totalorder %s1246_s16, 0 }
   0x5   : > { %s41_s19 = sadd.s32 1, %s1234_s13  ;;  %p892_p5 = scmp.ge.s32.totalorder %s1246_s16, 6 }
   0x6   : > { %s1471_s17 = smov (%p26_p0, %s25_s17), 0  ;;  %p50_p3 = por %p49_p2, %p48_p1 }
   0x7   : > { %s37_s18 = ssub.s32 %s1242_s15, %s1471_s17  ;;  %165 = sbr.rel (%p892_p5) target bundleno = 21 (0x15), region = 20 }
   0x8   : > { %p39_p4 = scmp.eq.s32.totalorder %s37_s18, 0 }
   0xa   : > { %s1304_s20 = scalar_select %p39_p4, %s1234_s13, %s41_s19  }
   0xc   : > { %168 = sbr.rel (!%p50_p3) target bundleno = 21 (0x15), region = 24  ;;  %s170_s21 = sand.u32 (%p50_p3), 1, %s1234_s13  }
   0xd   : > { %s1112_s22 = smul.u32 (%p50_p3), 12, %s1242_s15 }
   0xe   : > { %s1165_s23 = smul.u32 (%p50_p3), 24, %s170_s21 }
   0xf   : > { %s178_s26 = scalar_lea.vmem (%p50_p3), %s1462_s0, %s1112_s22 }
  0x10   : > { %v193_v0 = vld [vmem:[%s178_s26] sm:$0xff] (%p50_p3)  ;;  %v195_v1 = vld [vmem:[%s178_s26 + $0x48] sm:$0xff] (%p50_p3)  ;;  %s172_s27 = scalar_lea.vmem (%p50_p3), [#allocation3], %s1165_s23  ;;  %v896_v3 = vld [vmem:[%s178_s26 + $0x50] sm:$0xf] (%p50_p3) }
  0x11   : > { %v894_v2 = vld [vmem:[%s178_s26 + $0x8] sm:$0xf]  ;;  %194 = vst [vmem:[%s172_s27] sm:$0xff] %v193_v0 }
  0x12   : > { %196 = vst [vmem:[%s172_s27 + $0xc] sm:$0xff] %v195_v1 }
  0x13   : > { %895 = vst [vmem:[%s172_s27 + $0x8] sm:$0xf] %v894_v2 }
  0x14   : > { %897 = vst [vmem:[%s172_s27 + $0x14] sm:$0xf] %v896_v3 }
  0x15 PF: > { %p898_p6 = scmp.ge.s32.totalorder %s1246_s16, 1  ;;  %p228_p7 = scmp.lt.s32.totalorder %s1246_s16, 7 }
  0x17   : > { %p229_p8 = pnand %p898_p6, %p228_p7 }
  0x18   : > { %s235_s28 = sand.u32 (!%p229_p8), 1, %s1230_s12   ;;  %s280_s29 = smul.u32 (!%p229_p8), 48, %s1238_s14 }
  0x19   : > { %232 = sbr.rel (%p229_p8) target bundleno = 263 (0x107), region = 54  ;;  %p901_p10 = scmp.ne.s32.totalorder (!%p229_p8), %s1238_s14, 0 }
  0x1a   : > { %s1166_s30 = smul.u32 (!%p229_p8), 24, %s235_s28  ;;  %p282_p9 = scmp.lt.s32.totalorder (!%p229_p8), %s280_s29, 287 }
  0x1c   : > { %s1321_s8 = scalar_lea.vmem (!%p229_p8), [#allocation3], %s1166_s30 }
  0x1e   : > { %s1473_s29 = smov (!%p282_p9, %s280_s29), 287  ;;  %313 = sbr.rel (%p901_p10) target bundleno = 40 (0x28), region = 62 }
  0x1f   : > { %s1113_s4 = sshll.u32 %s1473_s29, 3 }
  0x20   : > { %s1319_s7 = scalar_lea.vmem %s1463_s1, %s1113_s4 }
  0x23   : > { %v1248_v4 = vmov 0.0  }
  0x24   : > { %314 = vst [vmem:[#allocation2 + $0x10] sm:$0xff] %v1248_v4 }
  0x25   : > { %315 = vst [vmem:[#allocation2] sm:$0xff] %v1248_v4 }
  0x26   : > { %316 = vst [vmem:[#allocation2 + $0x18] sm:$0xff] %v1248_v4 }
  0x27   : > { %317 = vst [vmem:[#allocation2 + $0x8] sm:$0xff] %v1248_v4 }
  0x28 PF: > { %v972_v5 = vld [vmem:[%s1319_s7 + $0x70] sm:$0xf]  ;;  %v1132_v6 = vld [vmem:[%s1319_s7 + $0x74] sm:$0xf0]  ;;  %v964_v14 = vld [vmem:[%s1319_s7 + $0x60] sm:$0xf] }
  0x29   : > { %v1036_v7 = vld [vmem:[%s1319_s7 + $0xf0] sm:$0xf]  ;;  %v973_v8 = vor.u32 %v1132_v6, %v972_v5  ;;  %v1148_v9 = vld [vmem:[%s1319_s7 + $0xf4] sm:$0xf0]  ;;  %v1130_v15 = vld [vmem:[%s1319_s7 + $0x64] sm:$0xf0] }
  0x2a   : > { %v1100_v10 = vld [vmem:[%s1319_s7 + $0x170] sm:$0xf]  ;;  %v1164_v11 = vld [vmem:[%s1319_s7 + $0x174] sm:$0xf0]  ;;  %v1037_v12 = vor.u32 %v1148_v9, %v1036_v7  ;;  %v1028_v16 = vld [vmem:[%s1319_s7 + $0xe0] sm:$0xf]  ;;  %v965_v17 = vor.u32 %v1130_v15, %v964_v14 }
  0x2b   : > { %v1101_v13 = vor.u32 %v1164_v11, %v1100_v10  ;;  %630 = vmatpush.bf16.msra.mxu0 %v973_v8  ;;  %v1146_v18 = vld [vmem:[%s1319_s7 + $0xe4] sm:$0xf0]  ;;  %v1092_v19 = vld [vmem:[%s1319_s7 + $0x160] sm:$0xf]  ;;  %v956_v23 = vld [vmem:[%s1319_s7 + $0x50] sm:$0xf] }
  0x2c   : > { %v1162_v20 = vld [vmem:[%s1319_s7 + $0x164] sm:$0xf0]  ;;  %644 = vmatpush.bf16.msra.mxu1 %v1037_v12  ;;  %v1029_v21 = vor.u32 %v1146_v18, %v1028_v16  ;;  %v1128_v24 = vld [vmem:[%s1319_s7 + $0x54] sm:$0xf0]  ;;  %v1020_v25 = vld [vmem:[%s1319_s7 + $0xd0] sm:$0xf] }
  0x2d   : > { %658 = vmatpush.bf16.msra.mxu2 %v1101_v13  ;;  %v1093_v22 = vor.u32 %v1162_v20, %v1092_v19  ;;  %v1144_v26 = vld [vmem:[%s1319_s7 + $0xd4] sm:$0xf0]  ;;  %v1084_v27 = vld [vmem:[%s1319_s7 + $0x150] sm:$0xf]  ;;  %v957_v29 = vor.u32 %v1128_v24, %v956_v23  ;;  %v948_v30 = vld [vmem:[%s1319_s7 + $0x40] sm:$0xf] }
  0x2e   : > { %v1160_v28 = vld [vmem:[%s1319_s7 + $0x154] sm:$0xf0]  ;;  %v1126_v31 = vld [vmem:[%s1319_s7 + $0x44] sm:$0xf0]  ;;  %v1021_v32 = vor.u32 %v1144_v26, %v1020_v25  ;;  %v1012_v34 = vld [vmem:[%s1319_s7 + $0xc0] sm:$0xf] }
  0x2f   : > { %631 = vmatpush.bf16.msra.mxu0 %v965_v17  ;;  %v1085_v33 = vor.u32 %v1160_v28, %v1084_v27  ;;  %v1131_v35 = vld [vmem:[%s1319_s7 + $0x74] sm:$0xf]  ;;  %v974_v36 = vld [vmem:[%s1319_s7 + $0x78] sm:$0xf0]  ;;  %v1142_v37 = vld [vmem:[%s1319_s7 + $0xc4] sm:$0xf0]  ;;  %v949_v42 = vor.u32 %v1126_v31, %v948_v30 }
  0x30   : > { %645 = vmatpush.bf16.msra.mxu1 %v1029_v21  ;;  %v1076_v38 = vld [vmem:[%s1319_s7 + $0x140] sm:$0xf]  ;;  %v1158_v39 = vld [vmem:[%s1319_s7 + $0x144] sm:$0xf0]  ;;  %v977_v40 = vor.u32 %v1131_v35, %v974_v36  ;;  %v1129_v41 = vld [vmem:[%s1319_s7 + $0x64] sm:$0xf]  ;;  %v1013_v46 = vor.u32 %v1142_v37, %v1012_v34 }
  0x31   : > { %659 = vmatpush.bf16.msra.mxu2 %v1093_v22  ;;  %v940_v43 = vld [vmem:[%s1319_s7 + $0x30] sm:$0xf]  ;;  %v1124_v44 = vld [vmem:[%s1319_s7 + $0x34] sm:$0xf0]  ;;  %v966_v45 = vld [vmem:[%s1319_s7 + $0x68] sm:$0xf0]  ;;  %v1077_v47 = vor.u32 %v1158_v39, %v1076_v38 }
  0x32   : > { %672 = vmatpush.bf16.msra.mxu3 %v977_v40  ;;  %v1004_v48 = vld [vmem:[%s1319_s7 + $0xb0] sm:$0xf]  ;;  %v1140_v49 = vld [vmem:[%s1319_s7 + $0xb4] sm:$0xf0]  ;;  %v969_v51 = vor.u32 %v1129_v41, %v966_v45  ;;  %v1127_v53 = vld [vmem:[%s1319_s7 + $0x54] sm:$0xf]  ;;  %v941_v55 = vor.u32 %v1124_v44, %v940_v43 }
  0x33   : > { %632 = vmatpush.bf16.msra.mxu0 %v957_v29  ;;  %v1068_v50 = vld [vmem:[%s1319_s7 + $0x130] sm:$0xf]  ;;  %v1156_v52 = vld [vmem:[%s1319_s7 + $0x134] sm:$0xf0]  ;;  %v958_v54 = vld [vmem:[%s1319_s7 + $0x58] sm:$0xf0]  ;;  %v1005_v59 = vor.u32 %v1140_v49, %v1004_v48 }
  0x34   : > { %646 = vmatpush.bf16.msra.mxu1 %v1021_v32  ;;  %v932_v56 = vld [vmem:[%s1319_s7 + $0x20] sm:$0xf]  ;;  %v1122_v57 = vld [vmem:[%s1319_s7 + $0x24] sm:$0xf0]  ;;  %v961_v58 = vor.u32 %v1127_v53, %v958_v54  ;;  %v1069_v60 = vor.u32 %v1156_v52, %v1068_v50  ;;  %v1125_v62 = vld [vmem:[%s1319_s7 + $0x44] sm:$0xf] }
  0x35   : > { %660 = vmatpush.bf16.msra.mxu2 %v1085_v33  ;;  %v996_v61 = vld [vmem:[%s1319_s7 + $0xa0] sm:$0xf]  ;;  %v950_v63 = vld [vmem:[%s1319_s7 + $0x48] sm:$0xf0]  ;;  %v1138_v0 = vld [vmem:[%s1319_s7 + $0xa4] sm:$0xf0]  ;;  %v933_v3 = vor.u32 %v1122_v57, %v932_v56 }
  0x36   : > { %673 = vmatpush.bf16.msra.mxu3 %v969_v51  ;;  %v1060_v1 = vld [vmem:[%s1319_s7 + $0x120] sm:$0xf]  ;;  %v1154_v2 = vld [vmem:[%s1319_s7 + $0x124] sm:$0xf0]  ;;  %v924_v4 = vld [vmem:[%s1319_s7 + $0x10] sm:$0xf]  ;;  %v953_v6 = vor.u32 %v1125_v62, %v950_v63  ;;  %v997_v7 = vor.u32 %v1138_v0, %v996_v61 }
  0x37   : > { %633 = vmatpush.bf16.msra.mxu0 %v949_v42  ;;  %v1120_v5 = vld [vmem:[%s1319_s7 + $0x14] sm:$0xf0]  ;;  %v1061_v8 = vor.u32 %v1154_v2, %v1060_v1  ;;  %v988_v9 = vld [vmem:[%s1319_s7 + $0x90] sm:$0xf]  ;;  %v1123_v10 = vld [vmem:[%s1319_s7 + $0x34] sm:$0xf] }
  0x38   : > { %647 = vmatpush.bf16.msra.mxu1 %v1013_v46  ;;  %v942_v11 = vld [vmem:[%s1319_s7 + $0x38] sm:$0xf0]  ;;  %v1136_v12 = vld [vmem:[%s1319_s7 + $0x94] sm:$0xf0]  ;;  %v1052_v13 = vld [vmem:[%s1319_s7 + $0x110] sm:$0xf]  ;;  %v925_v15 = vor.u32 %v1120_v5, %v924_v4 }
  0x39   : > { %661 = vmatpush.bf16.msra.mxu2 %v1077_v47  ;;  %v1152_v14 = vld [vmem:[%s1319_s7 + $0x114] sm:$0xf0]  ;;  %v916_v16 = vld [vmem:[%s1319_s7] sm:$0xf]  ;;  %v1118_v17 = vld [vmem:[%s1319_s7 + $0x4] sm:$0xf0]  ;;  %v945_v19 = vor.u32 %v1123_v10, %v942_v11  ;;  %v989_v20 = vor.u32 %v1136_v12, %v988_v9 }
  0x3a   : > { %674 = vmatpush.bf16.msra.mxu3 %v961_v58  ;;  %v980_v18 = vld [vmem:[%s1319_s7 + $0x80] sm:$0xf]  ;;  %v1053_v21 = vor.u32 %v1152_v14, %v1052_v13  ;;  %v1134_v22 = vld [vmem:[%s1319_s7 + $0x84] sm:$0xf0]  ;;  %v1121_v23 = vld [vmem:[%s1319_s7 + $0x24] sm:$0xf]  ;;  %v917_v31 = vor.u32 %v1118_v17, %v916_v16 }
  0x3b   : > { %634 = vmatpush.bf16.msra.mxu0 %v941_v55  ;;  %v934_v24 = vld [vmem:[%s1319_s7 + $0x28] sm:$0xf0]  ;;  %v1044_v25 = vld [vmem:[%s1319_s7 + $0x100] sm:$0xf]  ;;  %v1150_v26 = vld [vmem:[%s1319_s7 + $0x104] sm:$0xf0]  ;;  %v981_v36 = vor.u32 %v1134_v22, %v980_v18 }
  0x3c   : > { %648 = vmatpush.bf16.msra.mxu1 %v1005_v59  ;;  %v1147_v27 = vld [vmem:[%s1319_s7 + $0xf4] sm:$0xf]  ;;  %v1038_v28 = vld [vmem:[%s1319_s7 + $0xf8] sm:$0xf0]  ;;  %v912_v32 = vld [vmem:[%s1321_s8 + $0x8] sm:$0xf]  ;;  %v937_v33 = vor.u32 %v1121_v23, %v934_v24  ;;  %v1045_v37 = vor.u32 %v1150_v26, %v1044_v25 }
  0x3d   : > { %662 = vmatpush.bf16.msra.mxu2 %v1069_v60  ;;  %v1163_v29 = vld [vmem:[%s1319_s7 + $0x174] sm:$0xf]  ;;  %v1102_v30 = vld [vmem:[%s1319_s7 + $0x178] sm:$0xf0]  ;;  %v904_v34 = vld [vmem:[%s1321_s8] sm:$0xf]  ;;  %v1041_v41 = vor.u32 %v1147_v27, %v1038_v28 }
  0x3e   : > { %675 = vmatpush.bf16.msra.mxu3 %v953_v6  ;;  %v1115_v35 = vld [vmem:[%s1321_s8 + $0x8] sm:$0xf0]  ;;  %v1116_v38 = vld [vmem:[%s1321_s8 + $0x10] sm:$0xf0]  ;;  %v1114_v39 = vld [vmem:[%s1321_s8 + $0x4] sm:$0xf]  ;;  %v1105_v42 = vor.u32 %v1163_v29, %v1102_v30 }
  0x3f   : > { %635 = vmatpush.bf16.msra.mxu0 %v933_v3  ;;  %v906_v40 = vld [vmem:[%s1321_s8 + $0xc] sm:$0xf0]  ;;  %v1145_v43 = vld [vmem:[%s1319_s7 + $0xe4] sm:$0xf]  ;;  %v1119_v44 = vld [vmem:[%s1319_s7 + $0x14] sm:$0xf]  ;;  %v905_v49 = vor.u32 %v1115_v35, %v904_v34  ;;  %v1400_v50 = vor.u32 %v1116_v38, %v912_v32 }
  0x40   : > { %649 = vmatpush.bf16.msra.mxu1 %v997_v7  ;;  %v926_v45 = vld [vmem:[%s1319_s7 + $0x18] sm:$0xf0]  ;;  %v1030_v46 = vld [vmem:[%s1319_s7 + $0xe8] sm:$0xf0]  ;;  %v1161_v47 = vld [vmem:[%s1319_s7 + $0x164] sm:$0xf]  ;;  %v1402_v51 = vor.u32 %v1114_v39, %v906_v40 }
  0x41   : > { %663 = vmatpush.bf16.msra.mxu2 %v1061_v8  ;;  %v1094_v48 = vld [vmem:[%s1319_s7 + $0x168] sm:$0xf0]  ;;  %v929_v52 = vor.u32 %v1119_v44, %v926_v45  ;;  %v1033_v53 = vor.u32 %v1145_v43, %v1030_v46  ;;  %v1143_v55 = vld [vmem:[%s1319_s7 + $0xd4] sm:$0xf]  ;;  %v1117_v56 = vld [vmem:[%s1319_s7 + $0x4] sm:$0xf] }
  0x42   : > { %676 = vmatpush.bf16.msra.mxu3 %v945_v19  ;;  %v1097_v54 = vor.u32 %v1161_v47, %v1094_v48  ;;  %v918_v57 = vld [vmem:[%s1319_s7 + $0x8] sm:$0xf0]  ;;  %v1022_v58 = vld [vmem:[%s1319_s7 + $0xd8] sm:$0xf0]  ;;  %v1159_v59 = vld [vmem:[%s1319_s7 + $0x154] sm:$0xf] }
  0x43   : > { %636 = vmatpush.bf16.msra.mxu0 %v925_v15  ;;  %v1086_v60 = vld [vmem:[%s1319_s7 + $0x158] sm:$0xf0]  ;;  %v921_v61 = vor.u32 %v1117_v56, %v918_v57  ;;  %v1025_v62 = vor.u32 %v1143_v55, %v1022_v58  ;;  %v1141_v0 = vld [vmem:[%s1319_s7 + $0xc4] sm:$0xf]  ;;  %v1014_v1 = vld [vmem:[%s1319_s7 + $0xc8] sm:$0xf0] }
  0x44   : > { %650 = vmatpush.bf16.msra.mxu1 %v989_v20  ;;  %v1089_v63 = vor.u32 %v1159_v59, %v1086_v60  ;;  %v1157_v2 = vld [vmem:[%s1319_s7 + $0x144] sm:$0xf]  ;;  %v1078_v3 = vld [vmem:[%s1319_s7 + $0x148] sm:$0xf0]  ;;  %v1017_v4 = vor.u32 %v1141_v0, %v1014_v1  ;;  %v1139_v6 = vld [vmem:[%s1319_s7 + $0xb4] sm:$0xf] }
  0x45   : > { %664 = vmatpush.bf16.msra.mxu2 %v1053_v21  ;;  %v1081_v5 = vor.u32 %v1157_v2, %v1078_v3  ;;  %v1006_v7 = vld [vmem:[%s1319_s7 + $0xb8] sm:$0xf0]  ;;  %v1155_v8 = vld [vmem:[%s1319_s7 + $0x134] sm:$0xf]  ;;  %v1137_v12 = vld [vmem:[%s1319_s7 + $0xa4] sm:$0xf] }
  0x46   : > { %677 = vmatpush.bf16.msra.mxu3 %v937_v33  ;;  %v1070_v9 = vld [vmem:[%s1319_s7 + $0x138] sm:$0xf0]  ;;  %v1009_v10 = vor.u32 %v1139_v6, %v1006_v7  ;;  %v998_v13 = vld [vmem:[%s1319_s7 + $0xa8] sm:$0xf0]  ;;  %v1153_v14 = vld [vmem:[%s1319_s7 + $0x124] sm:$0xf] }
  0x47   : > { %637 = vmatpush.bf16.msra.mxu0 %v917_v31  ;;  %v1073_v11 = vor.u32 %v1155_v8, %v1070_v9  ;;  %v1062_v15 = vld [vmem:[%s1319_s7 + $0x128] sm:$0xf0]  ;;  %v1001_v16 = vor.u32 %v1137_v12, %v998_v13  ;;  %v1135_v18 = vld [vmem:[%s1319_s7 + $0x94] sm:$0xf]  ;;  %v990_v19 = vld [vmem:[%s1319_s7 + $0x98] sm:$0xf0] }
  0x48   : > { %651 = vmatpush.bf16.msra.mxu1 %v981_v36  ;;  %v1065_v17 = vor.u32 %v1153_v14, %v1062_v15  ;;  %v1151_v20 = vld [vmem:[%s1319_s7 + $0x114] sm:$0xf]  ;;  %v1054_v21 = vld [vmem:[%s1319_s7 + $0x118] sm:$0xf0]  ;;  %v993_v22 = vor.u32 %v1135_v18, %v990_v19  ;;  %v1133_v24 = vld [vmem:[%s1319_s7 + $0x84] sm:$0xf] }
  0x49   : > { %665 = vmatpush.bf16.msra.mxu2 %v1045_v37  ;;  %v1057_v23 = vor.u32 %v1151_v20, %v1054_v21  ;;  %v982_v25 = vld [vmem:[%s1319_s7 + $0x88] sm:$0xf0]  ;;  %v1149_v26 = vld [vmem:[%s1319_s7 + $0x104] sm:$0xf]  ;;  %v318_v33 = vld [vmem:[#allocation2 + $0x10] sm:$0xff]  ;;  %p1106_p11 = scmp.ne.s32.totalorder %s1238_s14, 5 }
  0x4a   : > { %638 = vmatmul.bf16.vlgmr.msra.gmra.mxu0 %v905_v49  ;;  %678 = vmatpush.bf16.msra.mxu3 %v929_v52  ;;  %v1046_v27 = vld [vmem:[%s1319_s7 + $0x108] sm:$0xf0]  ;;  %v985_v28 = vor.u32 %v1133_v24, %v982_v25  ;;  %v320_v40 = vld [vmem:[#allocation2 + $0x18] sm:$0xff]  ;;  %v319_v48 = vld [vmem:[#allocation2] sm:$0xff] }
  0x4b   : > { %686 = vmatpush.bf16.msrb.mxu0 %v1041_v41  ;;  %652 = vmatmul.bf16.vlgmr.msra.gmra.mxu1 %v1402_v51  ;;  %v1049_v29 = vor.u32 %v1149_v26, %v1046_v27 }
  0x4c   : > { %700 = vmatpush.bf16.msrb.mxu1 %v1105_v42  ;;  %666 = vmatmul.bf16.vlgmr.msra.gmra.mxu2 %v1400_v50 }
  0x4e   : > { %679 = vmatpush.bf16.msra.mxu3 %v921_v61 }
  0x4f   : > { %687 = vmatpush.bf16.msrb.mxu0 %v1033_v53 }
  0x50   : > { %701 = vmatpush.bf16.msrb.mxu1 %v1097_v54  ;;  %v321_v54 = vld [vmem:[#allocation2 + $0x8] sm:$0xff] }
  0x51   : > { %680 = vmatmul.bf16.vlgmr.msra.gmra.mxu3 %v905_v49 }
  0x53   : > { %688 = vmatpush.bf16.msrb.mxu0 %v1025_v62 }
  0x54   : > { %702 = vmatpush.bf16.msrb.mxu1 %v1089_v63 }
  0x57   : > { %689 = vmatpush.bf16.msrb.mxu0 %v1017_v4 }
  0x58   : > { %703 = vmatpush.bf16.msrb.mxu1 %v1081_v5 }
  0x5b   : > { %690 = vmatpush.bf16.msrb.mxu0 %v1009_v10 }
  0x5c   : > { %704 = vmatpush.bf16.msrb.mxu1 %v1073_v11 }
  0x5f   : > { %691 = vmatpush.bf16.msrb.mxu0 %v1001_v16 }
  0x60   : > { %705 = vmatpush.bf16.msrb.mxu1 %v1065_v17 }
  0x63   : > { %692 = vmatpush.bf16.msrb.mxu0 %v993_v22 }
  0x64   : > { %706 = vmatpush.bf16.msrb.mxu1 %v1057_v23 }
  0x67   : > { %693 = vmatpush.bf16.msrb.mxu0 %v985_v28 }
  0x68   : > { %707 = vmatpush.bf16.msrb.mxu1 %v1049_v29 }
  0x6a   : > { %694 = vmatmul.bf16.vlgmr.msrb.gmra.mxu0 %v1402_v51 }
  0x6b   : > { %708 = vmatmul.bf16.vlgmr.msrb.gmra.mxu1 %v1400_v50 }
  0xc7   : > { %v639_v30 = vpop.f32.mrf.mxu0 }
  0xc8   : > { %v653_v31 = vpop.f32.mrf.mxu1 }
  0xc9   : > { %v654_v32 = vadd.f32 %v653_v31, %v639_v30 }
  0xcf   : > { %v667_v34 = vpop.f32.mrf.mxu2  ;;  %v641_v36 = vpop.f32.mrf.mxu0 }
  0xd0   : > { %v668_v35 = vadd.f32 %v667_v34, %v654_v32  ;;  %v655_v37 = vpop.f32.mrf.mxu1 }
  0xd1   : > { %v656_v39 = vadd.f32 %v655_v37, %v641_v36 }
  0xd2   : > { %v714_v38 = vadd.f32 %v668_v35, %v318_v33 }
  0xd4   : > { %718 = vst [vmem:[#allocation2 + $0x10] sm:$0xff] %v714_v38  ;;  %v681_v44 = vpop.f32.mrf.mxu3 }
  0xd7   : > { %v669_v41 = vpop.f32.mrf.mxu2 }
  0xd8   : > { %v670_v42 = vadd.f32 %v669_v41, %v656_v39 }
  0xda   : > { %v716_v43 = vadd.f32 %v670_v42, %v320_v40 }
  0xdc   : > { %720 = vst [vmem:[#allocation2 + $0x18] sm:$0xff] %v716_v43  ;;  %v683_v51 = vpop.f32.mrf.mxu3 }
  0xe7   : > { %v695_v45 = vpop.f32.mrf.mxu0 }
  0xe8   : > { %v709_v46 = vpop.f32.mrf.mxu1  ;;  %v696_v47 = vadd.f32 %v695_v45, %v681_v44 }
  0xea   : > { %v710_v49 = vadd.f32 %v709_v46, %v696_v47 }
  0xec   : > { %v715_v50 = vadd.f32 %v710_v49, %v319_v48 }
  0xee   : > { %719 = vst [vmem:[#allocation2] sm:$0xff] %v715_v50 }
  0xef   : > { %v697_v52 = vpop.f32.mrf.mxu0 }
  0xf0   : > { %v698_v53 = vadd.f32 %v697_v52, %v683_v51  ;;  %v711_v55 = vpop.f32.mrf.mxu1 }
  0xf2   : > { %v712_v56 = vadd.f32 %v711_v55, %v698_v53  ;;  %725 = sbr.rel (%p1106_p11) target bundleno = 263 (0x107), region = 66 }
  0xf4   : > { %v717_v57 = vadd.f32 %v712_v56, %v321_v54 }
  0xf6   : > { %721 = vst [vmem:[#allocation2 + $0x8] sm:$0xff] %v717_v57 }
  0xf7   : > { %v726_v58 = vld [vmem:[#allocation2 + $0x10] sm:$0xff]  ;;  %v727_v59 = vld [vmem:[#allocation2] sm:$0xff]  ;;  %v728_v0 = vld [vmem:[#allocation2 + $0x18] sm:$0xff] }
  0xf8   : > { %v730_v60 = vld [vmem:[%s1464_s2] ss:$2 sm:$0x3]  ;;  %v1107_v63 = vld [vmem:[%s1464_s2 + $0x1] ss:$2 sm:$0x3] }
  0xf9   : > { %v732_v61 = vperm.slane %v730_v60, 0  ;;  %v733_v62 = vperm.slane %v730_v60, 1  ;;  %v743_v1 = vperm.slane %v1107_v63, 0  ;;  %v744_v2 = vperm.slane %v1107_v63, 1 }
  0xfb   : > { %v736_v4 = vmul.f32 %v732_v61, %v726_v58  ;;  %v737_v5 = vmul.f32 %v733_v62, %v727_v59  ;;  %v738_v6 = vmul.f32 %v732_v61, %v728_v0 }
  0xfd   : > { %v729_v3 = vld [vmem:[#allocation2 + $0x8] sm:$0xff]  ;;  %v747_v8 = vadd.f32 %v743_v1, %v736_v4  ;;  %v748_v9 = vadd.f32 %v744_v2, %v737_v5  ;;  %v749_v10 = vadd.f32 %v743_v1, %v738_v6 }
  0xfe   : > { %v739_v7 = vmul.f32 %v733_v62, %v729_v3 }
  0xff   : > { %v751_v12 = vmax.f32 %v747_v8, 0.0  ;;  %v752_v13 = vmax.f32 %v748_v9, 0.0  ;;  %v753_v14 = vmax.f32 %v749_v10, 0.0 }
 0x100   : > { %v750_v11 = vadd.f32 %v744_v2, %v739_v7 }
 0x101   : > { %v755_v16 = vpack.c.bf16 %v752_v13, %v751_v12 }
 0x102   : > { %v754_v15 = vmax.f32 %v750_v11, 0.0 }
 0x103   : > { %757 = vst [vmem:[%s1465_s3] sm:$0xff] %v755_v16 }
 0x104   : > { %v756_v17 = vpack.c.bf16 %v754_v15, %v753_v14 }
 0x106   : > { %758 = vst [vmem:[%s1465_s3 + $0x8] sm:$0xff] %v756_v17 }
 0x107 PF: > { %s13_s16 = sadd.s32 1, %s1246_s16   ;;  %s1466_s12 = smov %s1234_s13 }
 0x108   : > { %p10_p12 = scmp.ge.s32.totalorder %s13_s16, 8   ;;  %s1467_s13 = smov %s1304_s20 }
 0x109   : > { %s1468_s14 = smov %s1242_s15  ;;  %s1469_s15 = smov %s1471_s17 }
 0x10a   :  { %12 = sbr.rel (!%p10_p12) target bundleno = 3 (0x3), region = 114 }

// kernel: resnet_forward.35
= control target key start
LH: loop header
LB: loop body
LE: loop exit
PB: predicated region body
PF: predicated region fallthrough
CT: control target
= control target key end

     0   :  { %s1374_s15 = smov 0   ;;  %s1376_s16 = smov 0   ;;  %s1573_s0 = inlined_call_operand.vmem [shape: bf16[16,2304], index: 0, kind: input, shape index: {}]   ;;  %s1574_s1 = inlined_call_operand.vmem [shape: bf16[2304,256], index: 1, kind: input, shape index: {}]   ;;  %s1575_s2 = inlined_call_operand.vmem [shape: f32[2,256], index: 2, kind: input, shape index: {}]   ;;  %s1576_s3 = inlined_call_operand.vmem [shape: bf16[16,256], index: 3, kind: input, shape index: {}]   ;;  %s1577_s4 = inlined_call_operand.vmem [shape: bf16[16,256], index: 4, kind: output, shape index: {}]  }
   0x1   :  { %s1378_s17 = smov 0   ;;  %s1380_s18 = smov 0  }
   0x2   :  { %s1382_s19 = smov 0  }
   0x3 LB: > { %s26_s20 = sadd.s32 1, %s1342_s18  ;;  %p49_p1 = scmp.ne.s32.totalorder %s1334_s16, %s1330_s15  ;;  %s1346_s19 = sphi %s1382_s19, %s14_s19   ;;  %s1342_s18 = sphi %s1380_s18, %s1581_s18   ;;  %s1338_s17 = sphi %s1378_s17, %s1580_s17   ;;  %s1334_s16 = sphi %s1376_s16, %s1579_s16   ;;  %s1330_s15 = sphi %s1374_s15, %s1578_s15  }
   0x4   : > { %p27_p0 = scmp.ge.s32.totalorder %s26_s20, 6  ;;  %p50_p2 = scmp.eq.s32.totalorder %s1346_s19, 0 }
   0x5   : > { %s42_s22 = sadd.s32 1, %s1334_s16  ;;  %p992_p5 = scmp.ge.s32.totalorder %s1346_s19, 6 }
   0x6   : > { %s1583_s20 = smov (%p27_p0, %s26_s20), 0  ;;  %p51_p3 = por %p50_p2, %p49_p1 }
   0x7   : > { %s38_s21 = ssub.s32 %s1342_s18, %s1583_s20  ;;  %209 = sbr.rel (%p992_p5) target bundleno = 21 (0x15), region = 24 }
   0x8   : > { %p40_p4 = scmp.eq.s32.totalorder %s38_s21, 0 }
   0xa   : > { %s1409_s23 = scalar_select %p40_p4, %s1334_s16, %s42_s22  }
   0xc   : > { %212 = sbr.rel (!%p51_p3) target bundleno = 21 (0x15), region = 28  ;;  %s214_s24 = sand.u32 (%p51_p3), 1, %s1334_s16  }
   0xd   : > { %s1212_s25 = smul.u32 (%p51_p3), 12, %s1342_s18 }
   0xe   : > { %s1265_s26 = smul.u32 (%p51_p3), 24, %s214_s24 }
   0xf   : > { %s222_s29 = scalar_lea.vmem (%p51_p3), %s1573_s0, %s1212_s25 }
  0x10   : > { %v237_v0 = vld [vmem:[%s222_s29] sm:$0xff] (%p51_p3)  ;;  %v239_v1 = vld [vmem:[%s222_s29 + $0x48] sm:$0xff] (%p51_p3)  ;;  %s216_s30 = scalar_lea.vmem (%p51_p3), [#allocation3], %s1265_s26  ;;  %v996_v3 = vld [vmem:[%s222_s29 + $0x50] sm:$0xf] (%p51_p3) }
  0x11   : > { %v994_v2 = vld [vmem:[%s222_s29 + $0x8] sm:$0xf]  ;;  %238 = vst [vmem:[%s216_s30] sm:$0xff] %v237_v0 }
  0x12   : > { %240 = vst [vmem:[%s216_s30 + $0xc] sm:$0xff] %v239_v1 }
  0x13   : > { %995 = vst [vmem:[%s216_s30 + $0x8] sm:$0xf] %v994_v2 }
  0x14   : > { %997 = vst [vmem:[%s216_s30 + $0x14] sm:$0xf] %v996_v3 }
  0x15 PF: > { %p998_p6 = scmp.ge.s32.totalorder %s1346_s19, 1  ;;  %p272_p7 = scmp.lt.s32.totalorder %s1346_s19, 7 }
  0x17   : > { %p273_p8 = pnand %p998_p6, %p272_p7 }
  0x18   : > { %s279_s5 = sand.u32 (!%p273_p8), 1, %s1330_s15   ;;  %s336_s6 = smul.u32 (!%p273_p8), 48, %s1338_s17 }
  0x19   : > { %276 = sbr.rel (%p273_p8) target bundleno = 265 (0x109), region = 58  ;;  %p1001_p10 = scmp.ne.s32.totalorder (!%p273_p8), %s1338_s17, 0 }
  0x1a   : > { %s1266_s7 = smul.u32 (!%p273_p8), 24, %s279_s5  ;;  %p338_p9 = scmp.lt.s32.totalorder (!%p273_p8), %s336_s6, 287 }
  0x1c   : > { %s1426_s12 = scalar_lea.vmem (!%p273_p8), [#allocation3], %s1266_s7 }
  0x1e   : > { %s1585_s6 = smov (!%p338_p9, %s336_s6), 287  ;;  %381 = sbr.rel (%p1001_p10) target bundleno = 40 (0x28), region = 66 }
  0x1f   : > { %s1213_s8 = sshll.u32 %s1585_s6, 3 }
  0x20   : > { %s1424_s11 = scalar_lea.vmem %s1574_s1, %s1213_s8 }
  0x23   : > { %v1348_v4 = vmov 0.0  }
  0x24   : > { %382 = vst [vmem:[#allocation2 + $0x10] sm:$0xff] %v1348_v4 }
  0x25   : > { %383 = vst [vmem:[#allocation2] sm:$0xff] %v1348_v4 }
  0x26   : > { %384 = vst [vmem:[#allocation2 + $0x18] sm:$0xff] %v1348_v4 }
  0x27   : > { %385 = vst [vmem:[#allocation2 + $0x8] sm:$0xff] %v1348_v4 }
  0x28 PF: > { %v1072_v5 = vld [vmem:[%s1424_s11 + $0x70] sm:$0xf]  ;;  %v1232_v6 = vld [vmem:[%s1424_s11 + $0x74] sm:$0xf0]  ;;  %v1064_v14 = vld [vmem:[%s1424_s11 + $0x60] sm:$0xf] }
  0x29   : > { %v1136_v7 = vld [vmem:[%s1424_s11 + $0xf0] sm:$0xf]  ;;  %v1073_v8 = vor.u32 %v1232_v6, %v1072_v5  ;;  %v1248_v9 = vld [vmem:[%s1424_s11 + $0xf4] sm:$0xf0]  ;;  %v1230_v15 = vld [vmem:[%s1424_s11 + $0x64] sm:$0xf0] }
  0x2a   : > { %v1200_v10 = vld [vmem:[%s1424_s11 + $0x170] sm:$0xf]  ;;  %v1264_v11 = vld [vmem:[%s1424_s11 + $0x174] sm:$0xf0]  ;;  %v1137_v12 = vor.u32 %v1248_v9, %v1136_v7  ;;  %v1128_v16 = vld [vmem:[%s1424_s11 + $0xe0] sm:$0xf]  ;;  %v1065_v17 = vor.u32 %v1230_v15, %v1064_v14 }
  0x2b   : > { %v1201_v13 = vor.u32 %v1264_v11, %v1200_v10  ;;  %698 = vmatpush.bf16.msra.mxu0 %v1073_v8  ;;  %v1246_v18 = vld [vmem:[%s1424_s11 + $0xe4] sm:$0xf0]  ;;  %v1192_v19 = vld [vmem:[%s1424_s11 + $0x160] sm:$0xf]  ;;  %v1056_v23 = vld [vmem:[%s1424_s11 + $0x50] sm:$0xf] }
  0x2c   : > { %v1262_v20 = vld [vmem:[%s1424_s11 + $0x164] sm:$0xf0]  ;;  %712 = vmatpush.bf16.msra.mxu1 %v1137_v12  ;;  %v1129_v21 = vor.u32 %v1246_v18, %v1128_v16  ;;  %v1228_v24 = vld [vmem:[%s1424_s11 + $0x54] sm:$0xf0]  ;;  %v1120_v25 = vld [vmem:[%s1424_s11 + $0xd0] sm:$0xf] }
  0x2d   : > { %726 = vmatpush.bf16.msra.mxu2 %v1201_v13  ;;  %v1193_v22 = vor.u32 %v1262_v20, %v1192_v19  ;;  %v1244_v26 = vld [vmem:[%s1424_s11 + $0xd4] sm:$0xf0]  ;;  %v1184_v27 = vld [vmem:[%s1424_s11 + $0x150] sm:$0xf]  ;;  %v1057_v29 = vor.u32 %v1228_v24, %v1056_v23  ;;  %v1048_v30 = vld [vmem:[%s1424_s11 + $0x40] sm:$0xf] }
  0x2e   : > { %v1260_v28 = vld [vmem:[%s1424_s11 + $0x154] sm:$0xf0]  ;;  %v1226_v31 = vld [vmem:[%s1424_s11 + $0x44] sm:$0xf0]  ;;  %v1121_v32 = vor.u32 %v1244_v26, %v1120_v25  ;;  %v1112_v34 = vld [vmem:[%s1424_s11 + $0xc0] sm:$0xf] }
  0x2f   : > { %699 = vmatpush.bf16.msra.mxu0 %v1065_v17  ;;  %v1185_v33 = vor.u32 %v1260_v28, %v1184_v27  ;;  %v1231_v35 = vld [vmem:[%s1424_s11 + $0x74] sm:$0xf]  ;;  %v1074_v36 = vld [vmem:[%s1424_s11 + $0x78] sm:$0xf0]  ;;  %v1242_v37 = vld [vmem:[%s1424_s11 + $0xc4] sm:$0xf0]  ;;  %v1049_v42 = vor.u32 %v1226_v31, %v1048_v30 }
  0x30   : > { %713 = vmatpush.bf16.msra.mxu1 %v1129_v21  ;;  %v1176_v38 = vld [vmem:[%s1424_s11 + $0x140] sm:$0xf]  ;;  %v1258_v39 = vld [vmem:[%s1424_s11 + $0x144] sm:$0xf0]  ;;  %v1077_v40 = vor.u32 %v1231_v35, %v1074_v36  ;;  %v1229_v41 = vld [vmem:[%s1424_s11 + $0x64] sm:$0xf]  ;;  %v1113_v46 = vor.u32 %v1242_v37, %v1112_v34 }
  0x31   : > { %727 = vmatpush.bf16.msra.mxu2 %v1193_v22  ;;  %v1040_v43 = vld [vmem:[%s1424_s11 + $0x30] sm:$0xf]  ;;  %v1224_v44 = vld [vmem:[%s1424_s11 + $0x34] sm:$0xf0]  ;;  %v1066_v45 = vld [vmem:[%s1424_s11 + $0x68] sm:$0xf0]  ;;  %v1177_v47 = vor.u32 %v1258_v39, %v1176_v38 }
  0x32   : > { %740 = vmatpush.bf16.msra.mxu3 %v1077_v40  ;;  %v1104_v48 = vld [vmem:[%s1424_s11 + $0xb0] sm:$0xf]  ;;  %v1240_v49 = vld [vmem:[%s1424_s11 + $0xb4] sm:$0xf0]  ;;  %v1069_v51 = vor.u32 %v1229_v41, %v1066_v45  ;;  %v1227_v53 = vld [vmem:[%s1424_s11 + $0x54] sm:$0xf]  ;;  %v1041_v55 = vor.u32 %v1224_v44, %v1040_v43 }
  0x33   : > { %700 = vmatpush.bf16.msra.mxu0 %v1057_v29  ;;  %v1168_v50 = vld [vmem:[%s1424_s11 + $0x130] sm:$0xf]  ;;  %v1256_v52 = vld [vmem:[%s1424_s11 + $0x134] sm:$0xf0]  ;;  %v1058_v54 = vld [vmem:[%s1424_s11 + $0x58] sm:$0xf0]  ;;  %v1105_v59 = vor.u32 %v1240_v49, %v1104_v48 }
  0x34   : > { %714 = vmatpush.bf16.msra.mxu1 %v1121_v32  ;;  %v1032_v56 = vld [vmem:[%s1424_s11 + $0x20] sm:$0xf]  ;;  %v1222_v57 = vld [vmem:[%s1424_s11 + $0x24] sm:$0xf0]  ;;  %v1061_v58 = vor.u32 %v1227_v53, %v1058_v54  ;;  %v1169_v60 = vor.u32 %v1256_v52, %v1168_v50  ;;  %v1225_v62 = vld [vmem:[%s1424_s11 + $0x44] sm:$0xf] }
  0x35   : > { %728 = vmatpush.bf16.msra.mxu2 %v1185_v33  ;;  %v1096_v61 = vld [vmem:[%s1424_s11 + $0xa0] sm:$0xf]  ;;  %v1050_v63 = vld [vmem:[%s1424_s11 + $0x48] sm:$0xf0]  ;;  %v1238_v0 = vld [vmem:[%s1424_s11 + $0xa4] sm:$0xf0]  ;;  %v1033_v3 = vor.u32 %v1222_v57, %v1032_v56 }
  0x36   : > { %741 = vmatpush.bf16.msra.mxu3 %v1069_v51  ;;  %v1160_v1 = vld [vmem:[%s1424_s11 + $0x120] sm:$0xf]  ;;  %v1254_v2 = vld [vmem:[%s1424_s11 + $0x124] sm:$0xf0]  ;;  %v1024_v4 = vld [vmem:[%s1424_s11 + $0x10] sm:$0xf]  ;;  %v1053_v6 = vor.u32 %v1225_v62, %v1050_v63  ;;  %v1097_v7 = vor.u32 %v1238_v0, %v1096_v61 }
  0x37   : > { %701 = vmatpush.bf16.msra.mxu0 %v1049_v42  ;;  %v1220_v5 = vld [vmem:[%s1424_s11 + $0x14] sm:$0xf0]  ;;  %v1161_v8 = vor.u32 %v1254_v2, %v1160_v1  ;;  %v1088_v9 = vld [vmem:[%s1424_s11 + $0x90] sm:$0xf]  ;;  %v1223_v10 = vld [vmem:[%s1424_s11 + $0x34] sm:$0xf] }
  0x38   : > { %715 = vmatpush.bf16.msra.mxu1 %v1113_v46  ;;  %v1042_v11 = vld [vmem:[%s1424_s11 + $0x38] sm:$0xf0]  ;;  %v1236_v12 = vld [vmem:[%s1424_s11 + $0x94] sm:$0xf0]  ;;  %v1152_v13 = vld [vmem:[%s1424_s11 + $0x110] sm:$0xf]  ;;  %v1025_v15 = vor.u32 %v1220_v5, %v1024_v4 }
  0x39   : > { %729 = vmatpush.bf16.msra.mxu2 %v1177_v47  ;;  %v1252_v14 = vld [vmem:[%s1424_s11 + $0x114] sm:$0xf0]  ;;  %v1016_v16 = vld [vmem:[%s1424_s11] sm:$0xf]  ;;  %v1218_v17 = vld [vmem:[%s1424_s11 + $0x4] sm:$0xf0]  ;;  %v1045_v19 = vor.u32 %v1223_v10, %v1042_v11  ;;  %v1089_v20 = vor.u32 %v1236_v12, %v1088_v9 }
  0x3a   : > { %742 = vmatpush.bf16.msra.mxu3 %v1061_v58  ;;  %v1080_v18 = vld [vmem:[%s1424_s11 + $0x80] sm:$0xf]  ;;  %v1153_v21 = vor.u32 %v1252_v14, %v1152_v13  ;;  %v1234_v22 = vld [vmem:[%s1424_s11 + $0x84] sm:$0xf0]  ;;  %v1221_v23 = vld [vmem:[%s1424_s11 + $0x24] sm:$0xf]  ;;  %v1017_v31 = vor.u32 %v1218_v17, %v1016_v16 }
  0x3b   : > { %702 = vmatpush.bf16.msra.mxu0 %v1041_v55  ;;  %v1034_v24 = vld [vmem:[%s1424_s11 + $0x28] sm:$0xf0]  ;;  %v1144_v25 = vld [vmem:[%s1424_s11 + $0x100] sm:$0xf]  ;;  %v1250_v26 = vld [vmem:[%s1424_s11 + $0x104] sm:$0xf0]  ;;  %v1081_v36 = vor.u32 %v1234_v22, %v1080_v18 }
  0x3c   : > { %716 = vmatpush.bf16.msra.mxu1 %v1105_v59  ;;  %v1247_v27 = vld [vmem:[%s1424_s11 + $0xf4] sm:$0xf]  ;;  %v1138_v28 = vld [vmem:[%s1424_s11 + $0xf8] sm:$0xf0]  ;;  %v1012_v32 = vld [vmem:[%s1426_s12 + $0x8] sm:$0xf]  ;;  %v1037_v33 = vor.u32 %v1221_v23, %v1034_v24  ;;  %v1145_v37 = vor.u32 %v1250_v26, %v1144_v25 }
  0x3d   : > { %730 = vmatpush.bf16.msra.mxu2 %v1169_v60  ;;  %v1263_v29 = vld [vmem:[%s1424_s11 + $0x174] sm:$0xf]  ;;  %v1202_v30 = vld [vmem:[%s1424_s11 + $0x178] sm:$0xf0]  ;;  %v1004_v34 = vld [vmem:[%s1426_s12] sm:$0xf]  ;;  %v1141_v41 = vor.u32 %v1247_v27, %v1138_v28 }
  0x3e   : > { %743 = vmatpush.bf16.msra.mxu3 %v1053_v6  ;;  %v1215_v35 = vld [vmem:[%s1426_s12 + $0x8] sm:$0xf0]  ;;  %v1216_v38 = vld [vmem:[%s1426_s12 + $0x10] sm:$0xf0]  ;;  %v1214_v39 = vld [vmem:[%s1426_s12 + $0x4] sm:$0xf]  ;;  %v1205_v42 = vor.u32 %v1263_v29, %v1202_v30 }
  0x3f   : > { %703 = vmatpush.bf16.msra.mxu0 %v1033_v3  ;;  %v1006_v40 = vld [vmem:[%s1426_s12 + $0xc] sm:$0xf0]  ;;  %v1245_v43 = vld [vmem:[%s1424_s11 + $0xe4] sm:$0xf]  ;;  %v1219_v44 = vld [vmem:[%s1424_s11 + $0x14] sm:$0xf]  ;;  %v1005_v49 = vor.u32 %v1215_v35, %v1004_v34  ;;  %v1505_v50 = vor.u32 %v1216_v38, %v1012_v32 }
  0x40   : > { %717 = vmatpush.bf16.msra.mxu1 %v1097_v7  ;;  %v1026_v45 = vld [vmem:[%s1424_s11 + $0x18] sm:$0xf0]  ;;  %v1130_v46 = vld [vmem:[%s1424_s11 + $0xe8] sm:$0xf0]  ;;  %v1261_v47 = vld [vmem:[%s1424_s11 + $0x164] sm:$0xf]  ;;  %v1507_v51 = vor.u32 %v1214_v39, %v1006_v40 }
  0x41   : > { %731 = vmatpush.bf16.msra.mxu2 %v1161_v8  ;;  %v1194_v48 = vld [vmem:[%s1424_s11 + $0x168] sm:$0xf0]  ;;  %v1029_v52 = vor.u32 %v1219_v44, %v1026_v45  ;;  %v1133_v53 = vor.u32 %v1245_v43, %v1130_v46  ;;  %v1243_v55 = vld [vmem:[%s1424_s11 + $0xd4] sm:$0xf]  ;;  %v1217_v56 = vld [vmem:[%s1424_s11 + $0x4] sm:$0xf] }
  0x42   : > { %744 = vmatpush.bf16.msra.mxu3 %v1045_v19  ;;  %v1197_v54 = vor.u32 %v1261_v47, %v1194_v48  ;;  %v1018_v57 = vld [vmem:[%s1424_s11 + $0x8] sm:$0xf0]  ;;  %v1122_v58 = vld [vmem:[%s1424_s11 + $0xd8] sm:$0xf0]  ;;  %v1259_v59 = vld [vmem:[%s1424_s11 + $0x154] sm:$0xf] }
  0x43   : > { %704 = vmatpush.bf16.msra.mxu0 %v1025_v15  ;;  %v1186_v60 = vld [vmem:[%s1424_s11 + $0x158] sm:$0xf0]  ;;  %v1021_v61 = vor.u32 %v1217_v56, %v1018_v57  ;;  %v1125_v62 = vor.u32 %v1243_v55, %v1122_v58  ;;  %v1241_v0 = vld [vmem:[%s1424_s11 + $0xc4] sm:$0xf]  ;;  %v1114_v1 = vld [vmem:[%s1424_s11 + $0xc8] sm:$0xf0] }
  0x44   : > { %718 = vmatpush.bf16.msra.mxu1 %v1089_v20  ;;  %v1189_v63 = vor.u32 %v1259_v59, %v1186_v60  ;;  %v1257_v2 = vld [vmem:[%s1424_s11 + $0x144] sm:$0xf]  ;;  %v1178_v3 = vld [vmem:[%s1424_s11 + $0x148] sm:$0xf0]  ;;  %v1117_v4 = vor.u32 %v1241_v0, %v1114_v1  ;;  %v1239_v6 = vld [vmem:[%s1424_s11 + $0xb4] sm:$0xf] }
  0x45   : > { %732 = vmatpush.bf16.msra.mxu2 %v1153_v21  ;;  %v1181_v5 = vor.u32 %v1257_v2, %v1178_v3  ;;  %v1106_v7 = vld [vmem:[%s1424_s11 + $0xb8] sm:$0xf0]  ;;  %v1255_v8 = vld [vmem:[%s1424_s11 + $0x134] sm:$0xf]  ;;  %v1237_v12 = vld [vmem:[%s1424_s11 + $0xa4] sm:$0xf] }
  0x46   : > { %745 = vmatpush.bf16.msra.mxu3 %v1037_v33  ;;  %v1170_v9 = vld [vmem:[%s1424_s11 + $0x138] sm:$0xf0]  ;;  %v1109_v10 = vor.u32 %v1239_v6, %v1106_v7  ;;  %v1098_v13 = vld [vmem:[%s1424_s11 + $0xa8] sm:$0xf0]  ;;  %v1253_v14 = vld [vmem:[%s1424_s11 + $0x124] sm:$0xf] }
  0x47   : > { %705 = vmatpush.bf16.msra.mxu0 %v1017_v31  ;;  %v1173_v11 = vor.u32 %v1255_v8, %v1170_v9  ;;  %v1162_v15 = vld [vmem:[%s1424_s11 + $0x128] sm:$0xf0]  ;;  %v1101_v16 = vor.u32 %v1237_v12, %v1098_v13  ;;  %v1235_v18 = vld [vmem:[%s1424_s11 + $0x94] sm:$0xf]  ;;  %v1090_v19 = vld [vmem:[%s1424_s11 + $0x98] sm:$0xf0] }
  0x48   : > { %719 = vmatpush.bf16.msra.mxu1 %v1081_v36  ;;  %v1165_v17 = vor.u32 %v1253_v14, %v1162_v15  ;;  %v1251_v20 = vld [vmem:[%s1424_s11 + $0x114] sm:$0xf]  ;;  %v1154_v21 = vld [vmem:[%s1424_s11 + $0x118] sm:$0xf0]  ;;  %v1093_v22 = vor.u32 %v1235_v18, %v1090_v19  ;;  %v1233_v24 = vld [vmem:[%s1424_s11 + $0x84] sm:$0xf] }
  0x49   : > { %733 = vmatpush.bf16.msra.mxu2 %v1145_v37  ;;  %v1157_v23 = vor.u32 %v1251_v20, %v1154_v21  ;;  %v1082_v25 = vld [vmem:[%s1424_s11 + $0x88] sm:$0xf0]  ;;  %v1249_v26 = vld [vmem:[%s1424_s11 + $0x104] sm:$0xf]  ;;  %v386_v33 = vld [vmem:[#allocation2 + $0x10] sm:$0xff]  ;;  %p1206_p11 = scmp.ne.s32.totalorder %s1338_s17, 5 }
  0x4a   : > { %706 = vmatmul.bf16.vlgmr.msra.gmra.mxu0 %v1005_v49  ;;  %746 = vmatpush.bf16.msra.mxu3 %v1029_v52  ;;  %v1146_v27 = vld [vmem:[%s1424_s11 + $0x108] sm:$0xf0]  ;;  %v1085_v28 = vor.u32 %v1233_v24, %v1082_v25  ;;  %v388_v40 = vld [vmem:[#allocation2 + $0x18] sm:$0xff]  ;;  %v387_v48 = vld [vmem:[#allocation2] sm:$0xff] }
  0x4b   : > { %754 = vmatpush.bf16.msrb.mxu0 %v1141_v41  ;;  %720 = vmatmul.bf16.vlgmr.msra.gmra.mxu1 %v1507_v51  ;;  %v1149_v29 = vor.u32 %v1249_v26, %v1146_v27 }
  0x4c   : > { %768 = vmatpush.bf16.msrb.mxu1 %v1205_v42  ;;  %734 = vmatmul.bf16.vlgmr.msra.gmra.mxu2 %v1505_v50 }
  0x4e   : > { %747 = vmatpush.bf16.msra.mxu3 %v1021_v61 }
  0x4f   : > { %755 = vmatpush.bf16.msrb.mxu0 %v1133_v53 }
  0x50   : > { %769 = vmatpush.bf16.msrb.mxu1 %v1197_v54  ;;  %v389_v54 = vld [vmem:[#allocation2 + $0x8] sm:$0xff] }
  0x51   : > { %748 = vmatmul.bf16.vlgmr.msra.gmra.mxu3 %v1005_v49 }
  0x53   : > { %756 = vmatpush.bf16.msrb.mxu0 %v1125_v62 }
  0x54   : > { %770 = vmatpush.bf16.msrb.mxu1 %v1189_v63 }
  0x57   : > { %757 = vmatpush.bf16.msrb.mxu0 %v1117_v4 }
  0x58   : > { %771 = vmatpush.bf16.msrb.mxu1 %v1181_v5 }
  0x5b   : > { %758 = vmatpush.bf16.msrb.mxu0 %v1109_v10 }
  0x5c   : > { %772 = vmatpush.bf16.msrb.mxu1 %v1173_v11 }
  0x5f   : > { %759 = vmatpush.bf16.msrb.mxu0 %v1101_v16 }
  0x60   : > { %773 = vmatpush.bf16.msrb.mxu1 %v1165_v17 }
  0x63   : > { %760 = vmatpush.bf16.msrb.mxu0 %v1093_v22 }
  0x64   : > { %774 = vmatpush.bf16.msrb.mxu1 %v1157_v23 }
  0x67   : > { %761 = vmatpush.bf16.msrb.mxu0 %v1085_v28 }
  0x68   : > { %775 = vmatpush.bf16.msrb.mxu1 %v1149_v29 }
  0x6a   : > { %762 = vmatmul.bf16.vlgmr.msrb.gmra.mxu0 %v1507_v51 }
  0x6b   : > { %776 = vmatmul.bf16.vlgmr.msrb.gmra.mxu1 %v1505_v50 }
  0xc7   : > { %v707_v30 = vpop.f32.mrf.mxu0 }
  0xc8   : > { %v721_v31 = vpop.f32.mrf.mxu1 }
  0xc9   : > { %v722_v32 = vadd.f32 %v721_v31, %v707_v30 }
  0xcf   : > { %v735_v34 = vpop.f32.mrf.mxu2  ;;  %v709_v36 = vpop.f32.mrf.mxu0 }
  0xd0   : > { %v736_v35 = vadd.f32 %v735_v34, %v722_v32  ;;  %v723_v37 = vpop.f32.mrf.mxu1 }
  0xd1   : > { %v724_v39 = vadd.f32 %v723_v37, %v709_v36 }
  0xd2   : > { %v782_v38 = vadd.f32 %v736_v35, %v386_v33 }
  0xd4   : > { %786 = vst [vmem:[#allocation2 + $0x10] sm:$0xff] %v782_v38  ;;  %v749_v44 = vpop.f32.mrf.mxu3 }
  0xd7   : > { %v737_v41 = vpop.f32.mrf.mxu2 }
  0xd8   : > { %v738_v42 = vadd.f32 %v737_v41, %v724_v39 }
  0xda   : > { %v784_v43 = vadd.f32 %v738_v42, %v388_v40 }
  0xdc   : > { %788 = vst [vmem:[#allocation2 + $0x18] sm:$0xff] %v784_v43  ;;  %v751_v51 = vpop.f32.mrf.mxu3 }
  0xe7   : > { %v763_v45 = vpop.f32.mrf.mxu0 }
  0xe8   : > { %v777_v46 = vpop.f32.mrf.mxu1  ;;  %v764_v47 = vadd.f32 %v763_v45, %v749_v44 }
  0xea   : > { %v778_v49 = vadd.f32 %v777_v46, %v764_v47 }
  0xec   : > { %v783_v50 = vadd.f32 %v778_v49, %v387_v48 }
  0xee   : > { %787 = vst [vmem:[#allocation2] sm:$0xff] %v783_v50 }
  0xef   : > { %v765_v52 = vpop.f32.mrf.mxu0 }
  0xf0   : > { %v766_v53 = vadd.f32 %v765_v52, %v751_v51  ;;  %v779_v55 = vpop.f32.mrf.mxu1 }
  0xf2   : > { %v780_v56 = vadd.f32 %v779_v55, %v766_v53  ;;  %793 = sbr.rel (%p1206_p11) target bundleno = 265 (0x109), region = 70 }
  0xf4   : > { %v785_v57 = vadd.f32 %v780_v56, %v389_v54 }
  0xf6   : > { %789 = vst [vmem:[#allocation2 + $0x8] sm:$0xff] %v785_v57 }
  0xf7   : > { %v794_v58 = vld [vmem:[#allocation2 + $0x10] sm:$0xff]  ;;  %v795_v59 = vld [vmem:[#allocation2] sm:$0xff]  ;;  %v796_v5 = vld [vmem:[#allocation2 + $0x18] sm:$0xff] }
  0xf8   : > { %v798_v60 = vld [vmem:[%s1575_s2] ss:$2 sm:$0x3]  ;;  %v1207_v63 = vld [vmem:[%s1575_s2 + $0x1] ss:$2 sm:$0x3] }
  0xf9   : > { %v800_v61 = vperm.slane %v798_v60, 0  ;;  %v801_v62 = vperm.slane %v798_v60, 1  ;;  %v819_v0 = vld [vmem:[%s1576_s3] sm:$0xff]  ;;  %v811_v1 = vperm.slane %v1207_v63, 0  ;;  %v812_v2 = vperm.slane %v1207_v63, 1  ;;  %v820_v7 = vld [vmem:[%s1576_s3 + $0x8] sm:$0xff] }
  0xfa   : > { %v821_v3 = vunpack.c.l.bf16 %v819_v0  ;;  %v822_v4 = vunpack.c.h.bf16 %v819_v0  ;;  %v823_v12 = vunpack.c.l.bf16 %v820_v7  ;;  %v824_v13 = vunpack.c.h.bf16 %v820_v7 }
  0xfb   : > { %v804_v8 = vmul.f32 %v800_v61, %v794_v58  ;;  %v805_v9 = vmul.f32 %v801_v62, %v795_v59  ;;  %v806_v10 = vmul.f32 %v800_v61, %v796_v5 }
  0xfd   : > { %v797_v6 = vld [vmem:[#allocation2 + $0x8] sm:$0xff]  ;;  %v815_v14 = vadd.f32 %v811_v1, %v804_v8  ;;  %v816_v15 = vadd.f32 %v812_v2, %v805_v9  ;;  %v817_v16 = vadd.f32 %v811_v1, %v806_v10 }
  0xfe   : > { %v807_v11 = vmul.f32 %v801_v62, %v797_v6 }
  0xff   : > { %v825_v18 = vadd.f32 %v821_v3, %v815_v14  ;;  %v826_v19 = vadd.f32 %v822_v4, %v816_v15  ;;  %v827_v20 = vadd.f32 %v823_v12, %v817_v16 }
 0x100   : > { %v818_v17 = vadd.f32 %v812_v2, %v807_v11 }
 0x101   : > { %v829_v22 = vmax.f32 %v825_v18, 0.0  ;;  %v830_v23 = vmax.f32 %v826_v19, 0.0  ;;  %v831_v24 = vmax.f32 %v827_v20, 0.0 }
 0x102   : > { %v828_v21 = vadd.f32 %v824_v13, %v818_v17 }
 0x103   : > { %v833_v26 = vpack.c.bf16 %v830_v23, %v829_v22 }
 0x104   : > { %v832_v25 = vmax.f32 %v828_v21, 0.0 }
 0x105   : > { %835 = vst [vmem:[%s1577_s4] sm:$0xff] %v833_v26 }
 0x106   : > { %v834_v27 = vpack.c.bf16 %v832_v25, %v831_v24 }
 0x108   : > { %836 = vst [vmem:[%s1577_s4 + $0x8] sm:$0xff] %v834_v27 }
 0x109 PF: > { %s14_s19 = sadd.s32 1, %s1346_s19   ;;  %s1578_s15 = smov %s1334_s16 }
 0x10a   : > { %p11_p12 = scmp.ge.s32.totalorder %s14_s19, 8   ;;  %s1579_s16 = smov %s1409_s23 }
 0x10b   : > { %s1580_s17 = smov %s1342_s18  ;;  %s1581_s18 = smov %s1583_s20 }
 0x10c   :  { %13 = sbr.rel (!%p11_p12) target bundleno = 3 (0x3), region = 121 }

// kernel: resnet_forward.39
= control target key start
LH: loop header
LB: loop body
LE: loop exit
PB: predicated region body
PF: predicated region fallthrough
CT: control target
= control target key end

     0   :  { %s1989_s0 = inlined_call_operand.vmem [shape: bf16[16,2304], index: 0, kind: input, shape index: {}]   ;;  %s1990_s1 = inlined_call_operand.vmem [shape: bf16[2304,512], index: 1, kind: input, shape index: {}]   ;;  %s1991_s2 = inlined_call_operand.vmem [shape: f32[2,512], index: 2, kind: input, shape index: {}]   ;;  %s1992_s3 = inlined_call_operand.vmem [shape: bf16[16,512], index: 3, kind: output, shape index: {}]  }
   0x1   :  { %1995 = sst [smem:[#allocation8_spill]] %s1989_s0 }
   0x2   :  { %1996 = sst [smem:[#allocation9_spill]] %s1990_s1 }
   0x3   :  { %s1601_s12 = smov 0   ;;  %s1603_s13 = smov 0  }
   0x4   :  { %s1605_s14 = smov 0   ;;  %s1607_s15 = smov 0  }
   0x5   :  { %s1609_s16 = smov 0   ;;  %s1611_s17 = smov 0  }
   0x6   :  { %s1613_s18 = smov 0   ;;  %s1615_s19 = smov 0  }
   0x7   :  { %s1617_s20 = smov 0   ;;  %s1619_s21 = smov 0  }
   0x8   :  { %s1621_s22 = smov 0  }
   0x9 LB: > { %s1117_s23 = sadd.s32 4294967295, %s1578_s22   ;;  %s25_s24 = sadd.s32 1, %s1570_s20  ;;  %s1578_s22 = sphi %s1621_s22, %s13_s22   ;;  %s1574_s21 = sphi %s1619_s21, %s2015_s21   ;;  %s1570_s20 = sphi %s1617_s20, %s2014_s20   ;;  %s1566_s19 = sphi %s1615_s19, %s2013_s19   ;;  %s1562_s18 = sphi %s1613_s18, %s2012_s18   ;;  %s1558_s17 = sphi %s1611_s17, %s2011_s17   ;;  %s1554_s16 = sphi %s1609_s16, %s2010_s16   ;;  %s1550_s15 = sphi %s1607_s15, %s2009_s15   ;;  %s1546_s14 = sphi %s1605_s14, %s2008_s14   ;;  %s1542_s13 = sphi %s1603_s13, %s2007_s13   ;;  %s1538_s12 = sphi %s1601_s12, %s2006_s12  }
   0xa   : > { %p26_p0 = scmp.ge.s32.totalorder %s25_s24, 6  ;;  %s28_s25 = sadd.s32 1, %s1574_s21 }
   0xb   : > { %s41_s26 = sadd.s32 1, %s1558_s17  ;;  %p48_p1 = scmp.ne.s32.totalorder %s1558_s17, %s1554_s16 }
   0xc   : > { %s2017_s24 = smov (%p26_p0, %s25_s24), 0  ;;  %s2019_s25 = smov (!%p26_p0, %s28_s25), %s1574_s21 }
   0xd   : > { %1997 = sst [smem:[#allocation6_spill]] %s2017_s24  ;;  %s37_s27 = ssub.s32 %s1570_s20, %s2017_s24 }
   0xe   : > { %p49_p2 = scmp.eq.s32.totalorder %s1578_s22, 0  ;;  %p30_p3 = scmp.ge.s32.totalorder %s2019_s25, 2 }
   0xf   : > { %p39_p4 = scmp.eq.s32.totalorder %s37_s27, 0  ;;  %s69_s29 = sadd.s32 1, %s1550_s15 }
  0x10   : > { %p1668_p5 = por %p49_p2, %p48_p1  ;;  %s2021_s25 = smov (%p30_p3, %s2019_s25), 0 }
  0x11   : > { %1999 = sst [smem:[#allocation7_spill]] %s2021_s25  ;;  %s65_s4 = ssub.s32 %s1574_s21, %s2021_s25 }
  0x12   : > { %s1676_s30 = scalar_select %p39_p4, %s1558_s17, %s41_s26  }
  0x13   : > { %p76_p6 = scmp.ne.s32.totalorder %s1550_s15, %s1546_s14  ;;  %s66_s5 = sor.u32 %s65_s4, %s37_s27 }
  0x14   : > { %p121_p7 = scmp.eq.s32.totalorder %s65_s4, 0  ;;  %p67_p8 = scmp.eq.s32.totalorder %s66_s5, 0 }
  0x15   : > { %p1682_p9 = por %p76_p6, %p49_p2  ;;  %s123_s7 = sadd.s32 1, %s1542_s13 }
  0x16   : > { %p133_p10 = scmp.ne.s32.totalorder %s1542_s13, %s1538_s12  ;;  %p134_p11 = scmp.eq.s32.totalorder %s1117_s23, 11 }
  0x17   : > { %s1690_s8 = scalar_select %p67_p8, %s1550_s15, %s69_s29  }
  0x18   : > { %s1693_s9 = scalar_select %p121_p7, %s1542_s13, %s123_s7  }
  0x19   : > { %p1695_p12 = por %p134_p11, %p133_p10  ;;  %p1120_p13 = scmp.ge.s32.totalorder %s1578_s22, 12 }
  0x1b   : > { %156 = sbr.rel (%p1120_p13) target bundleno = 103 (0x67), region = 16 }
  0x20   : > { %159 = sbr.rel (!%p1668_p5) target bundleno = 45 (0x2d), region = 20  ;;  %s161_s11 = sand.u32 (%p1668_p5), 1, %s1558_s17  }
  0x21   : > { %s1345_s26 = smul.u32 (%p1668_p5), 12, %s1570_s20  ;;  %s2002_s0 = sld [smem:[#allocation8_spill]] (%p1668_p5) }
  0x22   : > { %s1399_s27 = smul.u32 (%p1668_p5), 24, %s161_s11 }
  0x24   : > { %s163_s23 = scalar_lea.vmem (%p1668_p5), [#allocation3], %s1399_s27 }
  0x27   : > { %s169_s5 = scalar_lea.vmem %s2002_s0, %s1345_s26 }
  0x28   : > { %v184_v0 = vld [vmem:[%s169_s5] sm:$0xff]  ;;  %v186_v1 = vld [vmem:[%s169_s5 + $0x48] sm:$0xff]  ;;  %v1124_v3 = vld [vmem:[%s169_s5 + $0x50] sm:$0xf] }
  0x29   : > { %v1122_v2 = vld [vmem:[%s169_s5 + $0x8] sm:$0xf]  ;;  %185 = vst [vmem:[%s163_s23] sm:$0xff] %v184_v0 }
  0x2a   : > { %187 = vst [vmem:[%s163_s23 + $0xc] sm:$0xff] %v186_v1 }
  0x2b   : > { %1123 = vst [vmem:[%s163_s23 + $0x8] sm:$0xf] %v1122_v2 }
  0x2c   : > { %1125 = vst [vmem:[%s163_s23 + $0x14] sm:$0xf] %v1124_v3 }
  0x2d PF: > { %205 = sbr.rel (!%p1682_p9) target bundleno = 103 (0x67), region = 46  ;;  %s207_s28 = sand.u32 (%p1682_p9), 1, %s1550_s15  }
  0x2e   : > { %s1400_s7 = smul.u32 (%p1682_p9), 384, %s207_s28  ;;  %s1126_s11 = sshll.u32 (%p1682_p9), %s1574_s21, 1 }
  0x2f   : > { %s1346_s26 = smul.u32 (%p1682_p9), 192, %s1570_s20  ;;  %s2003_s1 = sld [smem:[#allocation9_spill]] (%p1682_p9) }
  0x30   : > { %s1720_s6 = scalar_lea.vmem (%p1682_p9), [#allocation4], %s1400_s7 }
  0x31   : > { %s213_s29 = sadd.s32 (%p1682_p9), %s1346_s26, %s1126_s11 }
  0x32   : > { %s1128_s4 = sshll.u32 %s213_s29, 2 }
  0x35   : > { %s1715_s5 = scalar_lea.vmem %s2003_s1, %s1128_s4 }
  0x36   : > { %v338_v4 = vld [vmem:[%s1715_s5] sm:$0xff]  ;;  %v340_v5 = vld [vmem:[%s1715_s5 + $0x10] sm:$0xff] }
  0x37   : > { %v342_v6 = vld [vmem:[%s1715_s5 + $0x20] sm:$0xff]  ;;  %339 = vst [vmem:[%s1720_s6] sm:$0xff] %v338_v4  ;;  %v344_v7 = vld [vmem:[%s1715_s5 + $0x30] sm:$0xff] }
  0x38   : > { %341 = vst [vmem:[%s1720_s6 + $0x8] sm:$0xff] %v340_v5  ;;  %v346_v8 = vld [vmem:[%s1715_s5 + $0x40] sm:$0xff]  ;;  %v348_v9 = vld [vmem:[%s1715_s5 + $0x50] sm:$0xff] }
  0x39   : > { %343 = vst [vmem:[%s1720_s6 + $0x10] sm:$0xff] %v342_v6  ;;  %v350_v10 = vld [vmem:[%s1715_s5 + $0x60] sm:$0xff]  ;;  %v352_v11 = vld [vmem:[%s1715_s5 + $0x70] sm:$0xff] }
  0x3a   : > { %345 = vst [vmem:[%s1720_s6 + $0x18] sm:$0xff] %v344_v7  ;;  %v354_v12 = vld [vmem:[%s1715_s5 + $0x80] sm:$0xff]  ;;  %v356_v13 = vld [vmem:[%s1715_s5 + $0x90] sm:$0xff] }
  0x3b   : > { %347 = vst [vmem:[%s1720_s6 + $0x20] sm:$0xff] %v346_v8  ;;  %v358_v14 = vld [vmem:[%s1715_s5 + $0xa0] sm:$0xff]  ;;  %v360_v15 = vld [vmem:[%s1715_s5 + $0xb0] sm:$0xff] }
  0x3c   : > { %349 = vst [vmem:[%s1720_s6 + $0x28] sm:$0xff] %v348_v9  ;;  %v362_v16 = vld [vmem:[%s1715_s5 + $0xc0] sm:$0xff]  ;;  %v364_v17 = vld [vmem:[%s1715_s5 + $0xd0] sm:$0xff] }
  0x3d   : > { %351 = vst [vmem:[%s1720_s6 + $0x30] sm:$0xff] %v350_v10  ;;  %v366_v18 = vld [vmem:[%s1715_s5 + $0xe0] sm:$0xff]  ;;  %v368_v19 = vld [vmem:[%s1715_s5 + $0xf0] sm:$0xff] }
  0x3e   : > { %353 = vst [vmem:[%s1720_s6 + $0x38] sm:$0xff] %v352_v11  ;;  %v370_v20 = vld [vmem:[%s1715_s5 + $0x100] sm:$0xff]  ;;  %v372_v21 = vld [vmem:[%s1715_s5 + $0x110] sm:$0xff] }
  0x3f   : > { %355 = vst [vmem:[%s1720_s6 + $0x40] sm:$0xff] %v354_v12  ;;  %v374_v22 = vld [vmem:[%s1715_s5 + $0x120] sm:$0xff]  ;;  %v376_v23 = vld [vmem:[%s1715_s5 + $0x130] sm:$0xff] }
  0x40   : > { %357 = vst [vmem:[%s1720_s6 + $0x48] sm:$0xff] %v356_v13  ;;  %v378_v24 = vld [vmem:[%s1715_s5 + $0x140] sm:$0xff]  ;;  %v380_v25 = vld [vmem:[%s1715_s5 + $0x150] sm:$0xff] }
  0x41   : > { %359 = vst [vmem:[%s1720_s6 + $0x50] sm:$0xff] %v358_v14  ;;  %v382_v26 = vld [vmem:[%s1715_s5 + $0x160] sm:$0xff]  ;;  %v384_v27 = vld [vmem:[%s1715_s5 + $0x170] sm:$0xff] }
  0x42   : > { %361 = vst [vmem:[%s1720_s6 + $0x58] sm:$0xff] %v360_v15  ;;  %v386_v28 = vld [vmem:[%s1715_s5 + $0x180] sm:$0xff]  ;;  %v388_v29 = vld [vmem:[%s1715_s5 + $0x190] sm:$0xff] }
  0x43   : > { %363 = vst [vmem:[%s1720_s6 + $0x60] sm:$0xff] %v362_v16  ;;  %v390_v30 = vld [vmem:[%s1715_s5 + $0x1a0] sm:$0xff]  ;;  %v392_v31 = vld [vmem:[%s1715_s5 + $0x1b0] sm:$0xff] }
  0x44   : > { %365 = vst [vmem:[%s1720_s6 + $0x68] sm:$0xff] %v364_v17  ;;  %v394_v32 = vld [vmem:[%s1715_s5 + $0x1c0] sm:$0xff]  ;;  %v396_v33 = vld [vmem:[%s1715_s5 + $0x1d0] sm:$0xff] }
  0x45   : > { %367 = vst [vmem:[%s1720_s6 + $0x70] sm:$0xff] %v366_v18  ;;  %v398_v34 = vld [vmem:[%s1715_s5 + $0x1e0] sm:$0xff]  ;;  %v400_v35 = vld [vmem:[%s1715_s5 + $0x1f0] sm:$0xff] }
  0x46   : > { %369 = vst [vmem:[%s1720_s6 + $0x78] sm:$0xff] %v368_v19  ;;  %v402_v36 = vld [vmem:[%s1715_s5 + $0x200] sm:$0xff]  ;;  %v404_v37 = vld [vmem:[%s1715_s5 + $0x210] sm:$0xff] }
  0x47   : > { %371 = vst [vmem:[%s1720_s6 + $0x80] sm:$0xff] %v370_v20  ;;  %v406_v38 = vld [vmem:[%s1715_s5 + $0x220] sm:$0xff]  ;;  %v408_v39 = vld [vmem:[%s1715_s5 + $0x230] sm:$0xff] }
  0x48   : > { %373 = vst [vmem:[%s1720_s6 + $0x88] sm:$0xff] %v372_v21  ;;  %v410_v40 = vld [vmem:[%s1715_s5 + $0x240] sm:$0xff]  ;;  %v412_v41 = vld [vmem:[%s1715_s5 + $0x250] sm:$0xff] }
  0x49   : > { %375 = vst [vmem:[%s1720_s6 + $0x90] sm:$0xff] %v374_v22  ;;  %v414_v42 = vld [vmem:[%s1715_s5 + $0x260] sm:$0xff]  ;;  %v416_v43 = vld [vmem:[%s1715_s5 + $0x270] sm:$0xff] }
  0x4a   : > { %377 = vst [vmem:[%s1720_s6 + $0x98] sm:$0xff] %v376_v23  ;;  %v418_v44 = vld [vmem:[%s1715_s5 + $0x280] sm:$0xff]  ;;  %v420_v45 = vld [vmem:[%s1715_s5 + $0x290] sm:$0xff] }
  0x4b   : > { %379 = vst [vmem:[%s1720_s6 + $0xa0] sm:$0xff] %v378_v24  ;;  %v422_v46 = vld [vmem:[%s1715_s5 + $0x2a0] sm:$0xff]  ;;  %v424_v47 = vld [vmem:[%s1715_s5 + $0x2b0] sm:$0xff] }
  0x4c   : > { %381 = vst [vmem:[%s1720_s6 + $0xa8] sm:$0xff] %v380_v25  ;;  %v426_v48 = vld [vmem:[%s1715_s5 + $0x2c0] sm:$0xff]  ;;  %v428_v49 = vld [vmem:[%s1715_s5 + $0x2d0] sm:$0xff] }
  0x4d   : > { %383 = vst [vmem:[%s1720_s6 + $0xb0] sm:$0xff] %v382_v26  ;;  %v430_v50 = vld [vmem:[%s1715_s5 + $0x2e0] sm:$0xff]  ;;  %v432_v51 = vld [vmem:[%s1715_s5 + $0x2f0] sm:$0xff] }
  0x4e   : > { %385 = vst [vmem:[%s1720_s6 + $0xb8] sm:$0xff] %v384_v27 }
  0x4f   : > { %387 = vst [vmem:[%s1720_s6 + $0xc0] sm:$0xff] %v386_v28 }
  0x50   : > { %389 = vst [vmem:[%s1720_s6 + $0xc8] sm:$0xff] %v388_v29 }
  0x51   : > { %391 = vst [vmem:[%s1720_s6 + $0xd0] sm:$0xff] %v390_v30 }
  0x52   : > { %393 = vst [vmem:[%s1720_s6 + $0xd8] sm:$0xff] %v392_v31 }
  0x53   : > { %395 = vst [vmem:[%s1720_s6 + $0xe0] sm:$0xff] %v394_v32 }
  0x54   : > { %397 = vst [vmem:[%s1720_s6 + $0xe8] sm:$0xff] %v396_v33 }
  0x55   : > { %399 = vst [vmem:[%s1720_s6 + $0xf0] sm:$0xff] %v398_v34 }
  0x56   : > { %401 = vst [vmem:[%s1720_s6 + $0xf8] sm:$0xff] %v400_v35 }
  0x57   : > { %403 = vst [vmem:[%s1720_s6 + $0x100] sm:$0xff] %v402_v36 }
  0x58   : > { %405 = vst [vmem:[%s1720_s6 + $0x108] sm:$0xff] %v404_v37 }
  0x59   : > { %407 = vst [vmem:[%s1720_s6 + $0x110] sm:$0xff] %v406_v38 }
  0x5a   : > { %409 = vst [vmem:[%s1720_s6 + $0x118] sm:$0xff] %v408_v39 }
  0x5b   : > { %411 = vst [vmem:[%s1720_s6 + $0x120] sm:$0xff] %v410_v40 }
  0x5c   : > { %413 = vst [vmem:[%s1720_s6 + $0x128] sm:$0xff] %v412_v41 }
  0x5d   : > { %415 = vst [vmem:[%s1720_s6 + $0x130] sm:$0xff] %v414_v42 }
  0x5e   : > { %417 = vst [vmem:[%s1720_s6 + $0x138] sm:$0xff] %v416_v43 }
  0x5f   : > { %419 = vst [vmem:[%s1720_s6 + $0x140] sm:$0xff] %v418_v44 }
  0x60   : > { %421 = vst [vmem:[%s1720_s6 + $0x148] sm:$0xff] %v420_v45 }
  0x61   : > { %423 = vst [vmem:[%s1720_s6 + $0x150] sm:$0xff] %v422_v46 }
  0x62   : > { %425 = vst [vmem:[%s1720_s6 + $0x158] sm:$0xff] %v424_v47 }
  0x63   : > { %427 = vst [vmem:[%s1720_s6 + $0x160] sm:$0xff] %v426_v48 }
  0x64   : > { %429 = vst [vmem:[%s1720_s6 + $0x168] sm:$0xff] %v428_v49 }
  0x65   : > { %431 = vst [vmem:[%s1720_s6 + $0x170] sm:$0xff] %v430_v50 }
  0x66   : > { %433 = vst [vmem:[%s1720_s6 + $0x178] sm:$0xff] %v432_v51 }
  0x67 PF: > { %p1129_p0 = scmp.ge.s32.totalorder %s1578_s22, 1  ;;  %p447_p1 = scmp.lt.s32.totalorder %s1578_s22, 13 }
  0x69   : > { %p448_p2 = pnand %p1129_p0, %p447_p1 }
  0x6a   : > { %s454_s0 = sand.u32 (!%p448_p2), 1, %s1554_s16   ;;  %s461_s23 = sand.u32 (!%p448_p2), 1, %s1546_s14  }
  0x6b   : > { %451 = sbr.rel (%p448_p2) target bundleno = 355 (0x163), region = 88  ;;  %s489_s7 = sand.u32 (!%p448_p2), 1, %s1538_s12  }
  0x6c   : > { %s1401_s28 = smul.u32 (!%p448_p2), 24, %s454_s0  ;;  %s1130_s26 = sshll.u32 (!%p448_p2), %s489_s7, 4 }
  0x6d   : > { %s1402_s11 = smul.u32 (!%p448_p2), 384, %s461_s23  ;;  %s1131_s29 = sshll.u32 (!%p448_p2), %s1566_s19, 1 }
  0x6e   : > { %p497_p3 = scmp.lt.s32.totalorder (!%p448_p2), %s1131_s29, 3  ;;  %s1826_s1 = scalar_lea.vmem (!%p448_p2), [#allocation3], %s1401_s28 }
  0x6f   : > { %s1828_s25 = scalar_lea.vmem (!%p448_p2), [#allocation4], %s1402_s11  ;;  %s1830_s24 = scalar_lea.vmem (!%p448_p2), [#allocation5], %s1130_s26 }
  0x70   : > { %s2023_s29 = smov (!%p497_p3, %s1131_s29), 3  ;;  %p1133_p4 = scmp.ne.s32.totalorder %s1562_s18, 0 }
  0x71   : > { %s1132_s4 = sshll.u32 %s2023_s29, 1 }
  0x72   : > { %s1824_s6 = scalar_lea.vmem %s1991_s2, %s1132_s4  ;;  %507 = sbr.rel (%p1133_p4) target bundleno = 124 (0x7c), region = 100 }
  0x77   : > { %v1580_v52 = vmov 0.0  }
  0x78   : > { %508 = vst [vmem:[#allocation2 + $0x10] sm:$0xff] %v1580_v52 }
  0x79   : > { %509 = vst [vmem:[#allocation2] sm:$0xff] %v1580_v52 }
  0x7a   : > { %510 = vst [vmem:[#allocation2 + $0x18] sm:$0xff] %v1580_v52 }
  0x7b   : > { %511 = vst [vmem:[#allocation2 + $0x8] sm:$0xff] %v1580_v52 }
  0x7c PF: > { %v1204_v53 = vld [vmem:[%s1828_s25 + $0x70] sm:$0xf]  ;;  %v1365_v54 = vld [vmem:[%s1828_s25 + $0x74] sm:$0xf0]  ;;  %v1196_v62 = vld [vmem:[%s1828_s25 + $0x60] sm:$0xf] }
  0x7d   : > { %v1268_v55 = vld [vmem:[%s1828_s25 + $0xf0] sm:$0xf]  ;;  %v1205_v56 = vor.u32 %v1365_v54, %v1204_v53  ;;  %v1381_v57 = vld [vmem:[%s1828_s25 + $0xf4] sm:$0xf0]  ;;  %v1363_v63 = vld [vmem:[%s1828_s25 + $0x64] sm:$0xf0] }
  0x7e   : > { %v1332_v58 = vld [vmem:[%s1828_s25 + $0x170] sm:$0xf]  ;;  %v1397_v59 = vld [vmem:[%s1828_s25 + $0x174] sm:$0xf0]  ;;  %v1269_v60 = vor.u32 %v1381_v57, %v1268_v55  ;;  %v1260_v0 = vld [vmem:[%s1828_s25 + $0xe0] sm:$0xf]  ;;  %v1197_v1 = vor.u32 %v1363_v63, %v1196_v62 }
  0x7f   : > { %v1333_v61 = vor.u32 %v1397_v59, %v1332_v58  ;;  %824 = vmatpush.bf16.msra.mxu0 %v1205_v56  ;;  %v1379_v2 = vld [vmem:[%s1828_s25 + $0xe4] sm:$0xf0]  ;;  %v1324_v3 = vld [vmem:[%s1828_s25 + $0x160] sm:$0xf]  ;;  %v1188_v7 = vld [vmem:[%s1828_s25 + $0x50] sm:$0xf] }
  0x80   : > { %v1395_v4 = vld [vmem:[%s1828_s25 + $0x164] sm:$0xf0]  ;;  %838 = vmatpush.bf16.msra.mxu1 %v1269_v60  ;;  %v1261_v5 = vor.u32 %v1379_v2, %v1260_v0  ;;  %v1361_v8 = vld [vmem:[%s1828_s25 + $0x54] sm:$0xf0]  ;;  %v1252_v9 = vld [vmem:[%s1828_s25 + $0xd0] sm:$0xf] }
  0x81   : > { %852 = vmatpush.bf16.msra.mxu2 %v1333_v61  ;;  %v1325_v6 = vor.u32 %v1395_v4, %v1324_v3  ;;  %v1377_v10 = vld [vmem:[%s1828_s25 + $0xd4] sm:$0xf0]  ;;  %v1316_v11 = vld [vmem:[%s1828_s25 + $0x150] sm:$0xf]  ;;  %v1189_v13 = vor.u32 %v1361_v8, %v1188_v7  ;;  %v1180_v14 = vld [vmem:[%s1828_s25 + $0x40] sm:$0xf] }
  0x82   : > { %v1393_v12 = vld [vmem:[%s1828_s25 + $0x154] sm:$0xf0]  ;;  %v1359_v15 = vld [vmem:[%s1828_s25 + $0x44] sm:$0xf0]  ;;  %v1253_v16 = vor.u32 %v1377_v10, %v1252_v9  ;;  %v1244_v18 = vld [vmem:[%s1828_s25 + $0xc0] sm:$0xf] }
  0x83   : > { %825 = vmatpush.bf16.msra.mxu0 %v1197_v1  ;;  %v1317_v17 = vor.u32 %v1393_v12, %v1316_v11  ;;  %v1364_v19 = vld [vmem:[%s1828_s25 + $0x74] sm:$0xf]  ;;  %v1206_v20 = vld [vmem:[%s1828_s25 + $0x78] sm:$0xf0]  ;;  %v1375_v21 = vld [vmem:[%s1828_s25 + $0xc4] sm:$0xf0]  ;;  %v1181_v26 = vor.u32 %v1359_v15, %v1180_v14 }
  0x84   : > { %839 = vmatpush.bf16.msra.mxu1 %v1261_v5  ;;  %v1308_v22 = vld [vmem:[%s1828_s25 + $0x140] sm:$0xf]  ;;  %v1391_v23 = vld [vmem:[%s1828_s25 + $0x144] sm:$0xf0]  ;;  %v1209_v24 = vor.u32 %v1364_v19, %v1206_v20  ;;  %v1362_v25 = vld [vmem:[%s1828_s25 + $0x64] sm:$0xf]  ;;  %v1245_v30 = vor.u32 %v1375_v21, %v1244_v18 }
  0x85   : > { %853 = vmatpush.bf16.msra.mxu2 %v1325_v6  ;;  %v1172_v27 = vld [vmem:[%s1828_s25 + $0x30] sm:$0xf]  ;;  %v1357_v28 = vld [vmem:[%s1828_s25 + $0x34] sm:$0xf0]  ;;  %v1198_v29 = vld [vmem:[%s1828_s25 + $0x68] sm:$0xf0]  ;;  %v1309_v31 = vor.u32 %v1391_v23, %v1308_v22 }
  0x86   : > { %866 = vmatpush.bf16.msra.mxu3 %v1209_v24  ;;  %v1236_v32 = vld [vmem:[%s1828_s25 + $0xb0] sm:$0xf]  ;;  %v1373_v33 = vld [vmem:[%s1828_s25 + $0xb4] sm:$0xf0]  ;;  %v1201_v35 = vor.u32 %v1362_v25, %v1198_v29  ;;  %v1360_v37 = vld [vmem:[%s1828_s25 + $0x54] sm:$0xf]  ;;  %v1173_v39 = vor.u32 %v1357_v28, %v1172_v27 }
  0x87   : > { %826 = vmatpush.bf16.msra.mxu0 %v1189_v13  ;;  %v1300_v34 = vld [vmem:[%s1828_s25 + $0x130] sm:$0xf]  ;;  %v1389_v36 = vld [vmem:[%s1828_s25 + $0x134] sm:$0xf0]  ;;  %v1190_v38 = vld [vmem:[%s1828_s25 + $0x58] sm:$0xf0]  ;;  %v1237_v43 = vor.u32 %v1373_v33, %v1236_v32 }
  0x88   : > { %840 = vmatpush.bf16.msra.mxu1 %v1253_v16  ;;  %v1164_v40 = vld [vmem:[%s1828_s25 + $0x20] sm:$0xf]  ;;  %v1355_v41 = vld [vmem:[%s1828_s25 + $0x24] sm:$0xf0]  ;;  %v1193_v42 = vor.u32 %v1360_v37, %v1190_v38  ;;  %v1301_v44 = vor.u32 %v1389_v36, %v1300_v34  ;;  %v1358_v46 = vld [vmem:[%s1828_s25 + $0x44] sm:$0xf] }
  0x89   : > { %854 = vmatpush.bf16.msra.mxu2 %v1317_v17  ;;  %v1228_v45 = vld [vmem:[%s1828_s25 + $0xa0] sm:$0xf]  ;;  %v1182_v47 = vld [vmem:[%s1828_s25 + $0x48] sm:$0xf0]  ;;  %v1371_v48 = vld [vmem:[%s1828_s25 + $0xa4] sm:$0xf0]  ;;  %v1165_v51 = vor.u32 %v1355_v41, %v1164_v40 }
  0x8a   : > { %867 = vmatpush.bf16.msra.mxu3 %v1201_v35  ;;  %v1292_v49 = vld [vmem:[%s1828_s25 + $0x120] sm:$0xf]  ;;  %v1387_v50 = vld [vmem:[%s1828_s25 + $0x124] sm:$0xf0]  ;;  %v1156_v52 = vld [vmem:[%s1828_s25 + $0x10] sm:$0xf]  ;;  %v1185_v54 = vor.u32 %v1358_v46, %v1182_v47  ;;  %v1229_v55 = vor.u32 %v1371_v48, %v1228_v45 }
  0x8b   : > { %827 = vmatpush.bf16.msra.mxu0 %v1181_v26  ;;  %v1353_v53 = vld [vmem:[%s1828_s25 + $0x14] sm:$0xf0]  ;;  %v1293_v56 = vor.u32 %v1387_v50, %v1292_v49  ;;  %v1220_v57 = vld [vmem:[%s1828_s25 + $0x90] sm:$0xf]  ;;  %v1356_v58 = vld [vmem:[%s1828_s25 + $0x34] sm:$0xf] }
  0x8c   : > { %841 = vmatpush.bf16.msra.mxu1 %v1245_v30  ;;  %v1174_v59 = vld [vmem:[%s1828_s25 + $0x38] sm:$0xf0]  ;;  %v1369_v60 = vld [vmem:[%s1828_s25 + $0x94] sm:$0xf0]  ;;  %v1284_v61 = vld [vmem:[%s1828_s25 + $0x110] sm:$0xf]  ;;  %v1157_v63 = vor.u32 %v1353_v53, %v1156_v52 }
  0x8d   : > { %855 = vmatpush.bf16.msra.mxu2 %v1309_v31  ;;  %v1385_v62 = vld [vmem:[%s1828_s25 + $0x114] sm:$0xf0]  ;;  %v1148_v0 = vld [vmem:[%s1828_s25] sm:$0xf]  ;;  %v1351_v1 = vld [vmem:[%s1828_s25 + $0x4] sm:$0xf0]  ;;  %v1177_v3 = vor.u32 %v1356_v58, %v1174_v59  ;;  %v1221_v4 = vor.u32 %v1369_v60, %v1220_v57 }
  0x8e   : > { %868 = vmatpush.bf16.msra.mxu3 %v1193_v42  ;;  %v1212_v2 = vld [vmem:[%s1828_s25 + $0x80] sm:$0xf]  ;;  %v1285_v5 = vor.u32 %v1385_v62, %v1284_v61  ;;  %v1367_v6 = vld [vmem:[%s1828_s25 + $0x84] sm:$0xf0]  ;;  %v1354_v7 = vld [vmem:[%s1828_s25 + $0x24] sm:$0xf]  ;;  %v1149_v15 = vor.u32 %v1351_v1, %v1148_v0 }
  0x8f   : > { %828 = vmatpush.bf16.msra.mxu0 %v1173_v39  ;;  %v1166_v8 = vld [vmem:[%s1828_s25 + $0x28] sm:$0xf0]  ;;  %v1276_v9 = vld [vmem:[%s1828_s25 + $0x100] sm:$0xf]  ;;  %v1383_v10 = vld [vmem:[%s1828_s25 + $0x104] sm:$0xf0]  ;;  %v1213_v20 = vor.u32 %v1367_v6, %v1212_v2 }
  0x90   : > { %842 = vmatpush.bf16.msra.mxu1 %v1237_v43  ;;  %v1380_v11 = vld [vmem:[%s1828_s25 + $0xf4] sm:$0xf]  ;;  %v1270_v12 = vld [vmem:[%s1828_s25 + $0xf8] sm:$0xf0]  ;;  %v1144_v16 = vld [vmem:[%s1826_s1 + $0x8] sm:$0xf]  ;;  %v1169_v17 = vor.u32 %v1354_v7, %v1166_v8  ;;  %v1277_v21 = vor.u32 %v1383_v10, %v1276_v9 }
  0x91   : > { %856 = vmatpush.bf16.msra.mxu2 %v1301_v44  ;;  %v1396_v13 = vld [vmem:[%s1828_s25 + $0x174] sm:$0xf]  ;;  %v1334_v14 = vld [vmem:[%s1828_s25 + $0x178] sm:$0xf0]  ;;  %v1136_v18 = vld [vmem:[%s1826_s1] sm:$0xf]  ;;  %v1273_v25 = vor.u32 %v1380_v11, %v1270_v12 }
  0x92   : > { %869 = vmatpush.bf16.msra.mxu3 %v1185_v54  ;;  %v1348_v19 = vld [vmem:[%s1826_s1 + $0x8] sm:$0xf0]  ;;  %v1349_v22 = vld [vmem:[%s1826_s1 + $0x10] sm:$0xf0]  ;;  %v1347_v23 = vld [vmem:[%s1826_s1 + $0x4] sm:$0xf]  ;;  %v1337_v26 = vor.u32 %v1396_v13, %v1334_v14 }
  0x93   : > { %829 = vmatpush.bf16.msra.mxu0 %v1165_v51  ;;  %v1138_v24 = vld [vmem:[%s1826_s1 + $0xc] sm:$0xf0]  ;;  %v1378_v27 = vld [vmem:[%s1828_s25 + $0xe4] sm:$0xf]  ;;  %v1352_v28 = vld [vmem:[%s1828_s25 + $0x14] sm:$0xf]  ;;  %v1137_v33 = vor.u32 %v1348_v19, %v1136_v18  ;;  %v1909_v34 = vor.u32 %v1349_v22, %v1144_v16 }
  0x94   : > { %843 = vmatpush.bf16.msra.mxu1 %v1229_v55  ;;  %v1158_v29 = vld [vmem:[%s1828_s25 + $0x18] sm:$0xf0]  ;;  %v1262_v30 = vld [vmem:[%s1828_s25 + $0xe8] sm:$0xf0]  ;;  %v1394_v31 = vld [vmem:[%s1828_s25 + $0x164] sm:$0xf]  ;;  %v1911_v35 = vor.u32 %v1347_v23, %v1138_v24 }
  0x95   : > { %857 = vmatpush.bf16.msra.mxu2 %v1293_v56  ;;  %v1326_v32 = vld [vmem:[%s1828_s25 + $0x168] sm:$0xf0]  ;;  %v1161_v36 = vor.u32 %v1352_v28, %v1158_v29  ;;  %v1265_v37 = vor.u32 %v1378_v27, %v1262_v30  ;;  %v1376_v39 = vld [vmem:[%s1828_s25 + $0xd4] sm:$0xf]  ;;  %v1350_v40 = vld [vmem:[%s1828_s25 + $0x4] sm:$0xf] }
  0x96   : > { %870 = vmatpush.bf16.msra.mxu3 %v1177_v3  ;;  %v1329_v38 = vor.u32 %v1394_v31, %v1326_v32  ;;  %v1150_v41 = vld [vmem:[%s1828_s25 + $0x8] sm:$0xf0]  ;;  %v1254_v42 = vld [vmem:[%s1828_s25 + $0xd8] sm:$0xf0]  ;;  %v1392_v43 = vld [vmem:[%s1828_s25 + $0x154] sm:$0xf] }
  0x97   : > { %830 = vmatpush.bf16.msra.mxu0 %v1157_v63  ;;  %v1318_v44 = vld [vmem:[%s1828_s25 + $0x158] sm:$0xf0]  ;;  %v1153_v45 = vor.u32 %v1350_v40, %v1150_v41  ;;  %v1257_v46 = vor.u32 %v1376_v39, %v1254_v42  ;;  %v1374_v48 = vld [vmem:[%s1828_s25 + $0xc4] sm:$0xf]  ;;  %v1246_v49 = vld [vmem:[%s1828_s25 + $0xc8] sm:$0xf0] }
  0x98   : > { %844 = vmatpush.bf16.msra.mxu1 %v1221_v4  ;;  %v1321_v47 = vor.u32 %v1392_v43, %v1318_v44  ;;  %v1390_v50 = vld [vmem:[%s1828_s25 + $0x144] sm:$0xf]  ;;  %v1310_v51 = vld [vmem:[%s1828_s25 + $0x148] sm:$0xf0]  ;;  %v1249_v52 = vor.u32 %v1374_v48, %v1246_v49  ;;  %v1372_v54 = vld [vmem:[%s1828_s25 + $0xb4] sm:$0xf] }
  0x99   : > { %858 = vmatpush.bf16.msra.mxu2 %v1285_v5  ;;  %v1313_v53 = vor.u32 %v1390_v50, %v1310_v51  ;;  %v1238_v55 = vld [vmem:[%s1828_s25 + $0xb8] sm:$0xf0]  ;;  %v1388_v56 = vld [vmem:[%s1828_s25 + $0x134] sm:$0xf]  ;;  %v1370_v60 = vld [vmem:[%s1828_s25 + $0xa4] sm:$0xf] }
  0x9a   : > { %871 = vmatpush.bf16.msra.mxu3 %v1169_v17  ;;  %v1302_v57 = vld [vmem:[%s1828_s25 + $0x138] sm:$0xf0]  ;;  %v1241_v58 = vor.u32 %v1372_v54, %v1238_v55  ;;  %v1230_v61 = vld [vmem:[%s1828_s25 + $0xa8] sm:$0xf0]  ;;  %v1386_v62 = vld [vmem:[%s1828_s25 + $0x124] sm:$0xf] }
  0x9b   : > { %831 = vmatpush.bf16.msra.mxu0 %v1149_v15  ;;  %v1305_v59 = vor.u32 %v1388_v56, %v1302_v57  ;;  %v1294_v63 = vld [vmem:[%s1828_s25 + $0x128] sm:$0xf0]  ;;  %v1233_v0 = vor.u32 %v1370_v60, %v1230_v61  ;;  %v1368_v2 = vld [vmem:[%s1828_s25 + $0x94] sm:$0xf]  ;;  %v1222_v3 = vld [vmem:[%s1828_s25 + $0x98] sm:$0xf0] }
  0x9c   : > { %845 = vmatpush.bf16.msra.mxu1 %v1213_v20  ;;  %v1297_v1 = vor.u32 %v1386_v62, %v1294_v63  ;;  %v1384_v4 = vld [vmem:[%s1828_s25 + $0x114] sm:$0xf]  ;;  %v1286_v5 = vld [vmem:[%s1828_s25 + $0x118] sm:$0xf0]  ;;  %v1225_v6 = vor.u32 %v1368_v2, %v1222_v3  ;;  %v1366_v8 = vld [vmem:[%s1828_s25 + $0x84] sm:$0xf] }
  0x9d   : > { %859 = vmatpush.bf16.msra.mxu2 %v1277_v21  ;;  %v1289_v7 = vor.u32 %v1384_v4, %v1286_v5  ;;  %v1214_v9 = vld [vmem:[%s1828_s25 + $0x88] sm:$0xf0]  ;;  %v1382_v10 = vld [vmem:[%s1828_s25 + $0x104] sm:$0xf]  ;;  %v513_v32 = vld [vmem:[#allocation2] sm:$0xff]  ;;  %p1338_p5 = scmp.ne.s32.totalorder %s1562_s18, 5 }
  0x9e   : > { %832 = vmatmul.bf16.vlgmr.msra.gmra.mxu0 %v1137_v33  ;;  %872 = vmatpush.bf16.msra.mxu3 %v1161_v36  ;;  %v1278_v11 = vld [vmem:[%s1828_s25 + $0x108] sm:$0xf0]  ;;  %v1217_v12 = vor.u32 %v1366_v8, %v1214_v9  ;;  %v512_v17 = vld [vmem:[#allocation2 + $0x10] sm:$0xff] }
  0x9f   : > { %880 = vmatpush.bf16.msrb.mxu0 %v1273_v25  ;;  %846 = vmatmul.bf16.vlgmr.msra.gmra.mxu1 %v1911_v35  ;;  %v1281_v13 = vor.u32 %v1382_v10, %v1278_v11  ;;  %v514_v24 = vld [vmem:[#allocation2 + $0x18] sm:$0xff] }
  0xa0   : > { %894 = vmatpush.bf16.msrb.mxu1 %v1337_v26  ;;  %860 = vmatmul.bf16.vlgmr.msra.gmra.mxu2 %v1909_v34 }
  0xa2   : > { %873 = vmatpush.bf16.msra.mxu3 %v1153_v45 }
  0xa3   : > { %881 = vmatpush.bf16.msrb.mxu0 %v1265_v37 }
  0xa4   : > { %895 = vmatpush.bf16.msrb.mxu1 %v1329_v38  ;;  %v515_v38 = vld [vmem:[#allocation2 + $0x8] sm:$0xff] }
  0xa5   : > { %874 = vmatmul.bf16.vlgmr.msra.gmra.mxu3 %v1137_v33 }
  0xa7   : > { %882 = vmatpush.bf16.msrb.mxu0 %v1257_v46 }
  0xa8   : > { %896 = vmatpush.bf16.msrb.mxu1 %v1321_v47 }
  0xab   : > { %883 = vmatpush.bf16.msrb.mxu0 %v1249_v52 }
  0xac   : > { %897 = vmatpush.bf16.msrb.mxu1 %v1313_v53 }
  0xaf   : > { %884 = vmatpush.bf16.msrb.mxu0 %v1241_v58 }
  0xb0   : > { %898 = vmatpush.bf16.msrb.mxu1 %v1305_v59 }
  0xb3   : > { %885 = vmatpush.bf16.msrb.mxu0 %v1233_v0 }
  0xb4   : > { %899 = vmatpush.bf16.msrb.mxu1 %v1297_v1 }
  0xb7   : > { %886 = vmatpush.bf16.msrb.mxu0 %v1225_v6 }
  0xb8   : > { %900 = vmatpush.bf16.msrb.mxu1 %v1289_v7 }
  0xbb   : > { %887 = vmatpush.bf16.msrb.mxu0 %v1217_v12 }
  0xbc   : > { %901 = vmatpush.bf16.msrb.mxu1 %v1281_v13 }
  0xbe   : > { %888 = vmatmul.bf16.vlgmr.msrb.gmra.mxu0 %v1911_v35 }
  0xbf   : > { %902 = vmatmul.bf16.vlgmr.msrb.gmra.mxu1 %v1909_v34 }
 0x11b   : > { %v833_v14 = vpop.f32.mrf.mxu0 }
 0x11c   : > { %v847_v15 = vpop.f32.mrf.mxu1 }
 0x11d   : > { %v848_v16 = vadd.f32 %v847_v15, %v833_v14 }
 0x123   : > { %v861_v18 = vpop.f32.mrf.mxu2  ;;  %v835_v20 = vpop.f32.mrf.mxu0 }
 0x124   : > { %v862_v19 = vadd.f32 %v861_v18, %v848_v16  ;;  %v849_v21 = vpop.f32.mrf.mxu1 }
 0x125   : > { %v850_v23 = vadd.f32 %v849_v21, %v835_v20 }
 0x126   : > { %v908_v22 = vadd.f32 %v862_v19, %v512_v17 }
 0x128   : > { %912 = vst [vmem:[#allocation2 + $0x10] sm:$0xff] %v908_v22  ;;  %v875_v28 = vpop.f32.mrf.mxu3 }
 0x12b   : > { %v863_v25 = vpop.f32.mrf.mxu2 }
 0x12c   : > { %v864_v26 = vadd.f32 %v863_v25, %v850_v23 }
 0x12e   : > { %v910_v27 = vadd.f32 %v864_v26, %v514_v24 }
 0x130   : > { %914 = vst [vmem:[#allocation2 + $0x18] sm:$0xff] %v910_v27  ;;  %v877_v35 = vpop.f32.mrf.mxu3 }
 0x13b   : > { %v889_v29 = vpop.f32.mrf.mxu0 }
 0x13c   : > { %v903_v30 = vpop.f32.mrf.mxu1  ;;  %v890_v31 = vadd.f32 %v889_v29, %v875_v28 }
 0x13e   : > { %v904_v33 = vadd.f32 %v903_v30, %v890_v31 }
 0x140   : > { %v909_v34 = vadd.f32 %v904_v33, %v513_v32 }
 0x142   : > { %913 = vst [vmem:[#allocation2] sm:$0xff] %v909_v34 }
 0x143   : > { %v891_v36 = vpop.f32.mrf.mxu0 }
 0x144   : > { %v892_v37 = vadd.f32 %v891_v36, %v877_v35  ;;  %v905_v39 = vpop.f32.mrf.mxu1 }
 0x146   : > { %v906_v40 = vadd.f32 %v905_v39, %v892_v37  ;;  %919 = sbr.rel (%p1338_p5) target bundleno = 347 (0x15b), region = 104 }
 0x148   : > { %v911_v41 = vadd.f32 %v906_v40, %v515_v38 }
 0x14a   : > { %915 = vst [vmem:[#allocation2 + $0x8] sm:$0xff] %v911_v41 }
 0x14b   : > { %v920_v42 = vld [vmem:[#allocation2 + $0x10] sm:$0xff]  ;;  %v921_v43 = vld [vmem:[#allocation2] sm:$0xff]  ;;  %v922_v48 = vld [vmem:[#allocation2 + $0x18] sm:$0xff] }
 0x14c   : > { %v924_v44 = vld [vmem:[%s1824_s6] ss:$2 sm:$0x3]  ;;  %v1339_v47 = vld [vmem:[%s1824_s6 + $0x1] ss:$2 sm:$0x3] }
 0x14d   : > { %v926_v45 = vperm.slane %v924_v44, 0  ;;  %v927_v46 = vperm.slane %v924_v44, 1  ;;  %v937_v49 = vperm.slane %v1339_v47, 0  ;;  %v938_v50 = vperm.slane %v1339_v47, 1 }
 0x14f   : > { %v930_v52 = vmul.f32 %v926_v45, %v920_v42  ;;  %v931_v53 = vmul.f32 %v927_v46, %v921_v43  ;;  %v932_v54 = vmul.f32 %v926_v45, %v922_v48 }
 0x151   : > { %v923_v51 = vld [vmem:[#allocation2 + $0x8] sm:$0xff]  ;;  %v941_v56 = vadd.f32 %v937_v49, %v930_v52  ;;  %v942_v57 = vadd.f32 %v938_v50, %v931_v53  ;;  %v943_v58 = vadd.f32 %v937_v49, %v932_v54 }
 0x152   : > { %v933_v55 = vmul.f32 %v927_v46, %v923_v51 }
 0x153   : > { %v945_v60 = vmax.f32 %v941_v56, 0.0  ;;  %v946_v61 = vmax.f32 %v942_v57, 0.0  ;;  %v947_v62 = vmax.f32 %v943_v58, 0.0 }
 0x154   : > { %v944_v59 = vadd.f32 %v938_v50, %v933_v55 }
 0x155   : > { %v949_v0 = vpack.c.bf16 %v946_v61, %v945_v60 }
 0x156   : > { %v948_v63 = vmax.f32 %v944_v59, 0.0 }
 0x157   : > { %951 = vst [vmem:[%s1830_s24] sm:$0xff] %v949_v0 }
 0x158   : > { %v950_v1 = vpack.c.bf16 %v948_v63, %v947_v62 }
 0x15a   : > { %952 = vst [vmem:[%s1830_s24 + $0x8] sm:$0xff] %v950_v1 }
 0x15b PF: > { %959 = sbr.rel (!%p1695_p12) target bundleno = 355 (0x163), region = 108  ;;  %s1398_s1 = sshll.u32 (%p1695_p12), %s1566_s19, 3 }
 0x15c   : > { %s965_s16 = scalar_lea.vmem (%p1695_p12), %s1992_s3, %s1398_s1 }
 0x15e   : > { %v996_v2 = vld [vmem:[%s1830_s24] sm:$0xff] (%p1695_p12) }
 0x15f   : > { %997 = vst [vmem:[%s965_s16] sm:$0xff] (%p1695_p12), %v996_v2 }
 0x161   : > { %v998_v3 = vld [vmem:[%s1830_s24 + $0x8] sm:$0xff] }
 0x162   : > { %999 = vst [vmem:[%s965_s16 + $0x10] sm:$0xff] %v998_v3 }
 0x163 PF: > { %s13_s22 = sadd.s32 1, %s1578_s22   ;;  %s2004_s24 = sld [smem:[#allocation6_spill]] }
 0x164   : > { %p10_p6 = scmp.ge.s32.totalorder %s13_s22, 14   ;;  %s2005_s25 = sld [smem:[#allocation7_spill]] }
 0x165   : > { %s2006_s12 = smov %s1542_s13  ;;  %s2007_s13 = smov %s1693_s9 }
 0x166   : > { %s2008_s14 = smov %s1550_s15  ;;  %s2009_s15 = smov %s1690_s8 }
 0x167   : > { %s2010_s16 = smov %s1558_s17  ;;  %s2011_s17 = smov %s1676_s30 }
 0x168   : > { %s2012_s18 = smov %s1570_s20  ;;  %s2013_s19 = smov %s1574_s21 }
 0x169   : > { %s2014_s20 = smov %s2004_s24  ;;  %12 = sbr.rel (!%p10_p6) target bundleno = 9 (0x9), region = 195 }
 0x16a   : > { %s2015_s21 = smov %s2005_s25 }

// kernel: resnet_forward.38
= control target key start
LH: loop header
LB: loop body
LE: loop exit
PB: predicated region body
PF: predicated region fallthrough
CT: control target
= control target key end

     0   :  { %s1178_s12 = smov 0   ;;  %s1180_s13 = smov 0   ;;  %s1404_s0 = inlined_call_operand.vmem [shape: bf16[16,256], index: 0, kind: input, shape index: {}]   ;;  %s1405_s1 = inlined_call_operand.vmem [shape: bf16[256,512], index: 1, kind: input, shape index: {}]   ;;  %s1406_s2 = inlined_call_operand.vmem [shape: f32[2,512], index: 2, kind: input, shape index: {}]   ;;  %s1407_s3 = inlined_call_operand.vmem [shape: bf16[16,512], index: 3, kind: output, shape index: {}]  }
   0x1   :  { %s1182_s14 = smov 0   ;;  %s1184_s15 = smov 0  }
   0x2   :  { %s1186_s16 = smov 0  }
   0x3 LB: > { %s28_s17 = sadd.s32 1, %s1152_s15  ;;  %s887_s18 = sadd.s32 4294967295, %s1156_s16   ;;  %s1156_s16 = sphi %s1186_s16, %s13_s16   ;;  %s1152_s15 = sphi %s1184_s15, %s1412_s15   ;;  %s1148_s14 = sphi %s1182_s14, %s1411_s14   ;;  %s1144_s13 = sphi %s1180_s13, %s1410_s13   ;;  %s1140_s12 = sphi %s1178_s12, %s1409_s12  }
   0x4   : > { %p30_p0 = scmp.ge.s32.totalorder %s28_s17, 2  ;;  %p76_p1 = scmp.ne.s32.totalorder %s1144_s13, %s1140_s12 }
   0x5   : > { %p77_p2 = scmp.eq.s32.totalorder %s1156_s16, 0  ;;  %p134_p4 = scmp.eq.s32.totalorder %s887_s18, 1 }
   0x6   : > { %s1414_s17 = smov (%p30_p0, %s28_s17), 0  ;;  %s69_s20 = sadd.s32 1, %s1144_s13 }
   0x7   : > { %p78_p3 = por %p77_p2, %p76_p1  ;;  %s65_s19 = ssub.s32 %s1152_s15, %s1414_s17 }
   0x8   : > { %p67_p5 = scmp.eq.s32.totalorder %s65_s19, 0  ;;  %p1213_p6 = por %p134_p4, %p76_p1 }
   0x9   : > { %p891_p7 = scmp.ge.s32.totalorder %s1156_s16, 2 }
   0xa   : > { %s1218_s22 = scalar_select %p67_p5, %s1144_s13, %s69_s20  }
   0xb   : > { %171 = sbr.rel (%p891_p7) target bundleno = 52 (0x34), region = 20 }
  0x10   : > { %174 = sbr.rel (!%p78_p3) target bundleno = 52 (0x34), region = 24  ;;  %s176_s23 = sand.u32 (%p78_p3), 1, %s1144_s13  }
  0x11   : > { %s1042_s24 = sshll.u32 (%p78_p3), %s1152_s15, 3  ;;  %s892_s25 = sshll.u32 (%p78_p3), %s176_s23, 8 }
  0x12   : > { %s1226_s28 = scalar_lea.vmem (%p78_p3), %s1405_s1, %s1042_s24  ;;  %s1231_s29 = scalar_lea.vmem (%p78_p3), [#allocation3], %s892_s25 }
  0x13   : > { %v275_v0 = vld [vmem:[%s1226_s28] sm:$0xff] (%p78_p3)  ;;  %v277_v1 = vld [vmem:[%s1226_s28 + $0x10] sm:$0xff] (%p78_p3) }
  0x14   : > { %v279_v2 = vld [vmem:[%s1226_s28 + $0x20] sm:$0xff] (%p78_p3)  ;;  %276 = vst [vmem:[%s1231_s29] sm:$0xff] (%p78_p3), %v275_v0  ;;  %v281_v3 = vld [vmem:[%s1226_s28 + $0x30] sm:$0xff] (%p78_p3) }
  0x15   : > { %278 = vst [vmem:[%s1231_s29 + $0x8] sm:$0xff] %v277_v1  ;;  %v283_v4 = vld [vmem:[%s1226_s28 + $0x40] sm:$0xff]  ;;  %v285_v5 = vld [vmem:[%s1226_s28 + $0x50] sm:$0xff] }
  0x16   : > { %280 = vst [vmem:[%s1231_s29 + $0x10] sm:$0xff] %v279_v2  ;;  %v287_v6 = vld [vmem:[%s1226_s28 + $0x60] sm:$0xff]  ;;  %v289_v7 = vld [vmem:[%s1226_s28 + $0x70] sm:$0xff] }
  0x17   : > { %282 = vst [vmem:[%s1231_s29 + $0x18] sm:$0xff] %v281_v3  ;;  %v291_v8 = vld [vmem:[%s1226_s28 + $0x80] sm:$0xff]  ;;  %v293_v9 = vld [vmem:[%s1226_s28 + $0x90] sm:$0xff] }
  0x18   : > { %284 = vst [vmem:[%s1231_s29 + $0x20] sm:$0xff] %v283_v4  ;;  %v295_v10 = vld [vmem:[%s1226_s28 + $0xa0] sm:$0xff]  ;;  %v297_v11 = vld [vmem:[%s1226_s28 + $0xb0] sm:$0xff] }
  0x19   : > { %286 = vst [vmem:[%s1231_s29 + $0x28] sm:$0xff] %v285_v5  ;;  %v299_v12 = vld [vmem:[%s1226_s28 + $0xc0] sm:$0xff]  ;;  %v301_v13 = vld [vmem:[%s1226_s28 + $0xd0] sm:$0xff] }
  0x1a   : > { %288 = vst [vmem:[%s1231_s29 + $0x30] sm:$0xff] %v287_v6  ;;  %v303_v14 = vld [vmem:[%s1226_s28 + $0xe0] sm:$0xff]  ;;  %v305_v15 = vld [vmem:[%s1226_s28 + $0xf0] sm:$0xff] }
  0x1b   : > { %290 = vst [vmem:[%s1231_s29 + $0x38] sm:$0xff] %v289_v7  ;;  %v307_v16 = vld [vmem:[%s1226_s28 + $0x100] sm:$0xff]  ;;  %v309_v17 = vld [vmem:[%s1226_s28 + $0x110] sm:$0xff] }
  0x1c   : > { %292 = vst [vmem:[%s1231_s29 + $0x40] sm:$0xff] %v291_v8  ;;  %v311_v18 = vld [vmem:[%s1226_s28 + $0x120] sm:$0xff]  ;;  %v313_v19 = vld [vmem:[%s1226_s28 + $0x130] sm:$0xff] }
  0x1d   : > { %294 = vst [vmem:[%s1231_s29 + $0x48] sm:$0xff] %v293_v9  ;;  %v315_v20 = vld [vmem:[%s1226_s28 + $0x140] sm:$0xff]  ;;  %v317_v21 = vld [vmem:[%s1226_s28 + $0x150] sm:$0xff] }
  0x1e   : > { %296 = vst [vmem:[%s1231_s29 + $0x50] sm:$0xff] %v295_v10  ;;  %v319_v22 = vld [vmem:[%s1226_s28 + $0x160] sm:$0xff]  ;;  %v321_v23 = vld [vmem:[%s1226_s28 + $0x170] sm:$0xff] }
  0x1f   : > { %298 = vst [vmem:[%s1231_s29 + $0x58] sm:$0xff] %v297_v11  ;;  %v323_v24 = vld [vmem:[%s1226_s28 + $0x180] sm:$0xff]  ;;  %v325_v25 = vld [vmem:[%s1226_s28 + $0x190] sm:$0xff] }
  0x20   : > { %300 = vst [vmem:[%s1231_s29 + $0x60] sm:$0xff] %v299_v12  ;;  %v327_v26 = vld [vmem:[%s1226_s28 + $0x1a0] sm:$0xff]  ;;  %v329_v27 = vld [vmem:[%s1226_s28 + $0x1b0] sm:$0xff] }
  0x21   : > { %302 = vst [vmem:[%s1231_s29 + $0x68] sm:$0xff] %v301_v13  ;;  %v331_v28 = vld [vmem:[%s1226_s28 + $0x1c0] sm:$0xff]  ;;  %v333_v29 = vld [vmem:[%s1226_s28 + $0x1d0] sm:$0xff] }
  0x22   : > { %304 = vst [vmem:[%s1231_s29 + $0x70] sm:$0xff] %v303_v14  ;;  %v335_v30 = vld [vmem:[%s1226_s28 + $0x1e0] sm:$0xff]  ;;  %v337_v31 = vld [vmem:[%s1226_s28 + $0x1f0] sm:$0xff] }
  0x23   : > { %306 = vst [vmem:[%s1231_s29 + $0x78] sm:$0xff] %v305_v15 }
  0x24   : > { %308 = vst [vmem:[%s1231_s29 + $0x80] sm:$0xff] %v307_v16 }
  0x25   : > { %310 = vst [vmem:[%s1231_s29 + $0x88] sm:$0xff] %v309_v17 }
  0x26   : > { %312 = vst [vmem:[%s1231_s29 + $0x90] sm:$0xff] %v311_v18 }
  0x27   : > { %314 = vst [vmem:[%s1231_s29 + $0x98] sm:$0xff] %v313_v19 }
  0x28   : > { %316 = vst [vmem:[%s1231_s29 + $0xa0] sm:$0xff] %v315_v20 }
  0x29   : > { %318 = vst [vmem:[%s1231_s29 + $0xa8] sm:$0xff] %v317_v21 }
  0x2a   : > { %320 = vst [vmem:[%s1231_s29 + $0xb0] sm:$0xff] %v319_v22 }
  0x2b   : > { %322 = vst [vmem:[%s1231_s29 + $0xb8] sm:$0xff] %v321_v23 }
  0x2c   : > { %324 = vst [vmem:[%s1231_s29 + $0xc0] sm:$0xff] %v323_v24 }
  0x2d   : > { %326 = vst [vmem:[%s1231_s29 + $0xc8] sm:$0xff] %v325_v25 }
  0x2e   : > { %328 = vst [vmem:[%s1231_s29 + $0xd0] sm:$0xff] %v327_v26 }
  0x2f   : > { %330 = vst [vmem:[%s1231_s29 + $0xd8] sm:$0xff] %v329_v27 }
  0x30   : > { %332 = vst [vmem:[%s1231_s29 + $0xe0] sm:$0xff] %v331_v28 }
  0x31   : > { %334 = vst [vmem:[%s1231_s29 + $0xe8] sm:$0xff] %v333_v29 }
  0x32   : > { %336 = vst [vmem:[%s1231_s29 + $0xf0] sm:$0xff] %v335_v30 }
  0x33   : > { %338 = vst [vmem:[%s1231_s29 + $0xf8] sm:$0xff] %v337_v31 }
  0x34 PF: > { %p895_p8 = scmp.ge.s32.totalorder %s1156_s16, 1  ;;  %p352_p9 = scmp.lt.s32.totalorder %s1156_s16, 3 }
  0x36   : > { %p353_p10 = pnand %p895_p8, %p352_p9 }
  0x37   : > { %s359_s30 = sand.u32 (!%p353_p10), 1, %s1140_s12   ;;  %s898_s20 = sshll.u32 (!%p353_p10), %s1148_s14, 1 }
  0x38   : > { %356 = sbr.rel (%p353_p10) target bundleno = 254 (0xfe), region = 66  ;;  %s896_s4 = sshll.u32 (!%p353_p10), %s359_s30, 8 }
  0x39   : > { %s1299_s5 = scalar_lea.vmem (!%p353_p10), [#allocation3], %s896_s4  ;;  %p411_p11 = scmp.lt.s32.totalorder (!%p353_p10), %s898_s20, 3 }
  0x3a   : > { %s897_s27 = sshll.u32 (!%p353_p10), %s359_s30, 4 }
  0x3b   : > { %s395_s28 = scalar_lea.vmem (!%p353_p10), [#allocation4], %s897_s27 }
  0x3d   : > { %v966_v32 = vld [vmem:[%s1299_s5 + $0x70] sm:$0xf]  ;;  %v1060_v33 = vld [vmem:[%s1299_s5 + $0x74] sm:$0xf0]  ;;  %v1059_v37 = vld [vmem:[%s1299_s5 + $0x74] sm:$0xf] }
  0x3e   : > { %v1030_v34 = vld [vmem:[%s1299_s5 + $0xf0] sm:$0xf]  ;;  %v967_v35 = vor.u32 %v1060_v33, %v966_v32  ;;  %v1076_v36 = vld [vmem:[%s1299_s5 + $0xf4] sm:$0xf0]  ;;  %v968_v38 = vld [vmem:[%s1299_s5 + $0x78] sm:$0xf0] }
  0x3f   : > { %v1031_v39 = vor.u32 %v1076_v36, %v1030_v34  ;;  %v971_v40 = vor.u32 %v1059_v37, %v968_v38  ;;  %v1075_v41 = vld [vmem:[%s1299_s5 + $0xf4] sm:$0xf]  ;;  %v1032_v42 = vld [vmem:[%s1299_s5 + $0xf8] sm:$0xf0]  ;;  %v958_v43 = vld [vmem:[%s1299_s5 + $0x60] sm:$0xf] }
  0x40   : > { %634 = vmatpush.bf16.msra.mxu0 %v967_v35  ;;  %v1035_v44 = vor.u32 %v1075_v41, %v1032_v42  ;;  %v1058_v45 = vld [vmem:[%s1299_s5 + $0x64] sm:$0xf0]  ;;  %v1022_v46 = vld [vmem:[%s1299_s5 + $0xe0] sm:$0xf]  ;;  %v1057_v50 = vld [vmem:[%s1299_s5 + $0x64] sm:$0xf] }
  0x41   : > { %v1074_v47 = vld [vmem:[%s1299_s5 + $0xe4] sm:$0xf0]  ;;  %648 = vmatpush.bf16.msra.mxu1 %v1031_v39  ;;  %662 = vmatpush.bf16.msra.mxu2 %v971_v40  ;;  %v959_v48 = vor.u32 %v1058_v45, %v958_v43  ;;  %v960_v51 = vld [vmem:[%s1299_s5 + $0x68] sm:$0xf0]  ;;  %v1073_v52 = vld [vmem:[%s1299_s5 + $0xe4] sm:$0xf] }
  0x42   : > { %v1023_v49 = vor.u32 %v1074_v47, %v1022_v46  ;;  %676 = vmatpush.bf16.msra.mxu3 %v1035_v44  ;;  %v963_v53 = vor.u32 %v1057_v50, %v960_v51  ;;  %v1024_v54 = vld [vmem:[%s1299_s5 + $0xe8] sm:$0xf0]  ;;  %v950_v55 = vld [vmem:[%s1299_s5 + $0x50] sm:$0xf]  ;;  %v1056_v56 = vld [vmem:[%s1299_s5 + $0x54] sm:$0xf0] }
  0x43   : > { %v1027_v57 = vor.u32 %v1073_v52, %v1024_v54  ;;  %v1014_v58 = vld [vmem:[%s1299_s5 + $0xd0] sm:$0xf]  ;;  %v1072_v59 = vld [vmem:[%s1299_s5 + $0xd4] sm:$0xf0]  ;;  %v1055_v60 = vld [vmem:[%s1299_s5 + $0x54] sm:$0xf]  ;;  %v951_v61 = vor.u32 %v1056_v56, %v950_v55 }
  0x44   : > { %635 = vmatpush.bf16.msra.mxu0 %v959_v48  ;;  %v952_v62 = vld [vmem:[%s1299_s5 + $0x58] sm:$0xf0]  ;;  %v1071_v63 = vld [vmem:[%s1299_s5 + $0xd4] sm:$0xf]  ;;  %v1015_v1 = vor.u32 %v1072_v59, %v1014_v58  ;;  %v942_v3 = vld [vmem:[%s1299_s5 + $0x40] sm:$0xf] }
  0x45   : > { %v1016_v0 = vld [vmem:[%s1299_s5 + $0xd8] sm:$0xf0]  ;;  %649 = vmatpush.bf16.msra.mxu1 %v1023_v49  ;;  %663 = vmatpush.bf16.msra.mxu2 %v963_v53  ;;  %v955_v2 = vor.u32 %v1055_v60, %v952_v62  ;;  %v1054_v4 = vld [vmem:[%s1299_s5 + $0x44] sm:$0xf0]  ;;  %v1006_v5 = vld [vmem:[%s1299_s5 + $0xc0] sm:$0xf] }
  0x46   : > { %677 = vmatpush.bf16.msra.mxu3 %v1027_v57  ;;  %v1019_v6 = vor.u32 %v1071_v63, %v1016_v0  ;;  %v1070_v7 = vld [vmem:[%s1299_s5 + $0xc4] sm:$0xf0]  ;;  %v1053_v8 = vld [vmem:[%s1299_s5 + $0x44] sm:$0xf]  ;;  %v944_v9 = vld [vmem:[%s1299_s5 + $0x48] sm:$0xf0]  ;;  %v943_v12 = vor.u32 %v1054_v4, %v942_v3 }
  0x47   : > { %v1069_v10 = vld [vmem:[%s1299_s5 + $0xc4] sm:$0xf]  ;;  %v1008_v11 = vld [vmem:[%s1299_s5 + $0xc8] sm:$0xf0]  ;;  %v1007_v13 = vor.u32 %v1070_v7, %v1006_v5  ;;  %v947_v14 = vor.u32 %v1053_v8, %v944_v9  ;;  %v934_v15 = vld [vmem:[%s1299_s5 + $0x30] sm:$0xf] }
  0x48   : > { %636 = vmatpush.bf16.msra.mxu0 %v951_v61  ;;  %v1052_v16 = vld [vmem:[%s1299_s5 + $0x34] sm:$0xf0]  ;;  %v998_v17 = vld [vmem:[%s1299_s5 + $0xb0] sm:$0xf]  ;;  %v1011_v18 = vor.u32 %v1069_v10, %v1008_v11  ;;  %v1051_v20 = vld [vmem:[%s1299_s5 + $0x34] sm:$0xf] }
  0x49   : > { %650 = vmatpush.bf16.msra.mxu1 %v1015_v1  ;;  %664 = vmatpush.bf16.msra.mxu2 %v955_v2  ;;  %v1068_v19 = vld [vmem:[%s1299_s5 + $0xb4] sm:$0xf0]  ;;  %v936_v21 = vld [vmem:[%s1299_s5 + $0x38] sm:$0xf0]  ;;  %v1067_v22 = vld [vmem:[%s1299_s5 + $0xb4] sm:$0xf]  ;;  %v935_v24 = vor.u32 %v1052_v16, %v934_v15 }
  0x4a   : > { %678 = vmatpush.bf16.msra.mxu3 %v1019_v6  ;;  %v1000_v23 = vld [vmem:[%s1299_s5 + $0xb8] sm:$0xf0]  ;;  %v999_v25 = vor.u32 %v1068_v19, %v998_v17  ;;  %v939_v26 = vor.u32 %v1051_v20, %v936_v21  ;;  %v926_v27 = vld [vmem:[%s1299_s5 + $0x20] sm:$0xf]  ;;  %v1050_v28 = vld [vmem:[%s1299_s5 + $0x24] sm:$0xf0] }
  0x4b   : > { %v990_v29 = vld [vmem:[%s1299_s5 + $0xa0] sm:$0xf]  ;;  %v1003_v30 = vor.u32 %v1067_v22, %v1000_v23  ;;  %v1066_v31 = vld [vmem:[%s1299_s5 + $0xa4] sm:$0xf0]  ;;  %v1049_v32 = vld [vmem:[%s1299_s5 + $0x24] sm:$0xf]  ;;  %v927_v36 = vor.u32 %v1050_v28, %v926_v27 }
  0x4c   : > { %637 = vmatpush.bf16.msra.mxu0 %v943_v12  ;;  %v928_v33 = vld [vmem:[%s1299_s5 + $0x28] sm:$0xf0]  ;;  %v1065_v34 = vld [vmem:[%s1299_s5 + $0xa4] sm:$0xf]  ;;  %v991_v37 = vor.u32 %v1066_v31, %v990_v29  ;;  %v918_v39 = vld [vmem:[%s1299_s5 + $0x10] sm:$0xf] }
  0x4d   : > { %651 = vmatpush.bf16.msra.mxu1 %v1007_v13  ;;  %665 = vmatpush.bf16.msra.mxu2 %v947_v14  ;;  %v992_v35 = vld [vmem:[%s1299_s5 + $0xa8] sm:$0xf0]  ;;  %v931_v38 = vor.u32 %v1049_v32, %v928_v33  ;;  %v1048_v40 = vld [vmem:[%s1299_s5 + $0x14] sm:$0xf0]  ;;  %v982_v41 = vld [vmem:[%s1299_s5 + $0x90] sm:$0xf] }
  0x4e   : > { %679 = vmatpush.bf16.msra.mxu3 %v1011_v18  ;;  %v995_v42 = vor.u32 %v1065_v34, %v992_v35  ;;  %v1064_v43 = vld [vmem:[%s1299_s5 + $0x94] sm:$0xf0]  ;;  %v1047_v44 = vld [vmem:[%s1299_s5 + $0x14] sm:$0xf]  ;;  %v920_v45 = vld [vmem:[%s1299_s5 + $0x18] sm:$0xf0]  ;;  %v919_v48 = vor.u32 %v1048_v40, %v918_v39 }
  0x4f   : > { %v1063_v46 = vld [vmem:[%s1299_s5 + $0x94] sm:$0xf]  ;;  %v984_v47 = vld [vmem:[%s1299_s5 + $0x98] sm:$0xf0]  ;;  %v983_v49 = vor.u32 %v1064_v43, %v982_v41  ;;  %v923_v50 = vor.u32 %v1047_v44, %v920_v45  ;;  %v910_v51 = vld [vmem:[%s1299_s5] sm:$0xf] }
  0x50   : > { %638 = vmatpush.bf16.msra.mxu0 %v935_v24  ;;  %v1046_v52 = vld [vmem:[%s1299_s5 + $0x4] sm:$0xf0]  ;;  %v974_v53 = vld [vmem:[%s1299_s5 + $0x80] sm:$0xf]  ;;  %v987_v54 = vor.u32 %v1063_v46, %v984_v47  ;;  %v1045_v56 = vld [vmem:[%s1299_s5 + $0x4] sm:$0xf] }
  0x51   : > { %652 = vmatpush.bf16.msra.mxu1 %v999_v25  ;;  %666 = vmatpush.bf16.msra.mxu2 %v939_v26  ;;  %v1062_v55 = vld [vmem:[%s1299_s5 + $0x84] sm:$0xf0]  ;;  %v912_v57 = vld [vmem:[%s1299_s5 + $0x8] sm:$0xf0]  ;;  %v1061_v58 = vld [vmem:[%s1299_s5 + $0x84] sm:$0xf]  ;;  %v911_v60 = vor.u32 %v1046_v52, %v910_v51 }
  0x52   : > { %680 = vmatpush.bf16.msra.mxu3 %v1003_v30  ;;  %v976_v59 = vld [vmem:[%s1299_s5 + $0x88] sm:$0xf0]  ;;  %v902_v61 = vld [vmem:[%s1404_s0] sm:$0xf]  ;;  %v1044_v62 = vld [vmem:[%s1404_s0 + $0x4] sm:$0xf0]  ;;  %v975_v63 = vor.u32 %v1062_v55, %v974_v53  ;;  %v915_v0 = vor.u32 %v1045_v56, %v912_v57 }
  0x53   : > { %v1043_v1 = vld [vmem:[%s1404_s0 + $0x4] sm:$0xf]  ;;  %v904_v2 = vld [vmem:[%s1404_s0 + $0x8] sm:$0xf0]  ;;  %v979_v3 = vor.u32 %v1061_v58, %v976_v59  ;;  %v903_v4 = vor.u32 %v1044_v62, %v902_v61  ;;  %s1416_s20 = smov (!%p411_p11, %s898_s20), 3  ;;  %s1077_s12 = sshll.u32 (%p1213_p6), %s1148_s14, 3 }
  0x54   : > { %639 = vmatpush.bf16.msra.mxu0 %v927_v36  ;;  %v907_v5 = vor.u32 %v1043_v1, %v904_v2  ;;  %s899_s23 = sshll.u32 %s1416_s20, 1  ;;  %s742_s4 = scalar_lea.vmem (%p1213_p6), %s1407_s3, %s1077_s12 }
  0x55   : > { %653 = vmatpush.bf16.msra.mxu1 %v991_v37  ;;  %667 = vmatpush.bf16.msra.mxu2 %v931_v38  ;;  %s414_s26 = scalar_lea.vmem %s1406_s2, %s899_s23 }
  0x56   : > { %681 = vmatpush.bf16.msra.mxu3 %v995_v42  ;;  %v705_v7 = vld [vmem:[%s414_s26] ss:$2 sm:$0x3]  ;;  %v1036_v11 = vld [vmem:[%s414_s26 + $0x1] ss:$2 sm:$0x3] }
  0x57   : > { %v707_v10 = vperm.slane %v705_v7, 0  ;;  %v718_v13 = vperm.slane %v1036_v11, 0  ;;  %v708_v15 = vperm.slane %v705_v7, 1  ;;  %v719_v18 = vperm.slane %v1036_v11, 1 }
  0x58   : > { %640 = vmatpush.bf16.msra.mxu0 %v919_v48 }
  0x59   : > { %654 = vmatpush.bf16.msra.mxu1 %v983_v49  ;;  %668 = vmatpush.bf16.msra.mxu2 %v923_v50 }
  0x5a   : > { %682 = vmatpush.bf16.msra.mxu3 %v987_v54 }
  0x5c   : > { %641 = vmatpush.bf16.msra.mxu0 %v911_v60 }
  0x5d   : > { %655 = vmatpush.bf16.msra.mxu1 %v975_v63  ;;  %669 = vmatpush.bf16.msra.mxu2 %v915_v0 }
  0x5e   : > { %683 = vmatpush.bf16.msra.mxu3 %v979_v3 }
  0x5f   : > { %642 = vmatmul.bf16.vlgmr.msra.gmra.mxu0 %v903_v4 }
  0x60   : > { %656 = vmatmul.bf16.vlgmr.msra.gmra.mxu1 %v907_v5  ;;  %670 = vmatmul.bf16.vlgmr.msra.gmra.mxu2 %v903_v4 }
  0x61   : > { %684 = vmatmul.bf16.vlgmr.msra.gmra.mxu3 %v907_v5 }
  0xdc   : > { %v643_v6 = vpop.f32.mrf.mxu0 }
  0xdd   : > { %v657_v8 = vpop.f32.mrf.mxu1 }
  0xde   : > { %v658_v9 = vadd.f32 %v657_v8, %v643_v6 }
  0xe0   : > { %v711_v12 = vmul.f32 %v707_v10, %v658_v9 }
  0xe2   : > { %v722_v21 = vadd.f32 %v718_v13, %v711_v12 }
  0xe3   : > { %v671_v14 = vpop.f32.mrf.mxu2 }
  0xe4   : > { %v685_v16 = vpop.f32.mrf.mxu3  ;;  %v645_v19 = vpop.f32.mrf.mxu0 }
  0xe5   : > { %v686_v17 = vadd.f32 %v685_v16, %v671_v14  ;;  %v659_v20 = vpop.f32.mrf.mxu1 }
  0xe6   : > { %v660_v24 = vadd.f32 %v659_v20, %v645_v19 }
  0xe7   : > { %v712_v22 = vmul.f32 %v708_v15, %v686_v17 }
  0xe8   : > { %v713_v28 = vmul.f32 %v707_v10, %v660_v24 }
  0xe9   : > { %v723_v23 = vadd.f32 %v719_v18, %v712_v22 }
  0xea   : > { %v724_v31 = vadd.f32 %v718_v13, %v713_v28 }
  0xeb   : > { %v726_v25 = vpack.c.bf16 %v723_v23, %v722_v21  ;;  %v673_v26 = vpop.f32.mrf.mxu2 }
  0xec   : > { %v687_v27 = vpop.f32.mrf.mxu3 }
  0xed   : > { %728 = vst [vmem:[%s395_s28] sm:$0xff] %v726_v25  ;;  %v688_v29 = vadd.f32 %v687_v27, %v673_v26 }
  0xef   : > { %v714_v30 = vmul.f32 %v708_v15, %v688_v29 }
  0xf1   : > { %v725_v32 = vadd.f32 %v719_v18, %v714_v30  ;;  %736 = sbr.rel (!%p1213_p6) target bundleno = 254 (0xfe), region = 82 }
  0xf3   : > { %v727_v33 = vpack.c.bf16 %v725_v32, %v724_v31 }
  0xf4   : > { %v773_v34 = vld [vmem:[%s395_s28] sm:$0xff] (%p1213_p6) }
  0xf5   : > { %729 = vst [vmem:[%s395_s28 + $0x8] sm:$0xff] %v727_v33 }
  0xf6   : > { %774 = vst [vmem:[%s742_s4] sm:$0xff] %v773_v34 }
  0xfc   : > { %v775_v35 = vld [vmem:[%s395_s28 + $0x8] sm:$0xff] }
  0xfd   : > { %776 = vst [vmem:[%s742_s4 + $0x10] sm:$0xff] %v775_v35 }
  0xfe PF: > { %s13_s16 = sadd.s32 1, %s1156_s16   ;;  %s1409_s12 = smov %s1144_s13 }
  0xff   : > { %p10_p12 = scmp.ge.s32.totalorder %s13_s16, 4   ;;  %s1410_s13 = smov %s1218_s22 }
 0x100   : > { %s1411_s14 = smov %s1152_s15  ;;  %s1412_s15 = smov %s1414_s17 }
 0x101   :  { %12 = sbr.rel (!%p10_p12) target bundleno = 3 (0x3), region = 158 }

// kernel: resnet_forward.41
= control target key start
LH: loop header
LB: loop body
LE: loop exit
PB: predicated region body
PF: predicated region fallthrough
CT: control target
= control target key end

     0   :  { %s2324_s0 = inlined_call_operand.vmem [shape: bf16[16,4608], index: 0, kind: input, shape index: {}]   ;;  %s2325_s1 = inlined_call_operand.vmem [shape: bf16[4608,512], index: 1, kind: input, shape index: {}]   ;;  %s2326_s2 = inlined_call_operand.vmem [shape: f32[2,512], index: 2, kind: input, shape index: {}]   ;;  %s2327_s3 = inlined_call_operand.vmem [shape: bf16[16,512], index: 3, kind: output, shape index: {}]  }
   0x1   :  { %2330 = sst [smem:[#allocation8_spill]] %s2324_s0 }
   0x2   :  { %2331 = sst [smem:[#allocation9_spill]] %s2325_s1 }
   0x3   :  { %s1862_s12 = smov 0   ;;  %s1864_s13 = smov 0  }
   0x4   :  { %s1866_s14 = smov 0   ;;  %s1868_s15 = smov 0  }
   0x5   :  { %s1870_s16 = smov 0   ;;  %s1872_s17 = smov 0  }
   0x6   :  { %s1874_s18 = smov 0   ;;  %s1876_s19 = smov 0  }
   0x7   :  { %s1878_s20 = smov 0   ;;  %s1880_s21 = smov 0  }
   0x8   :  { %s1882_s22 = smov 0  }
   0x9 LB: > { %s1295_s23 = sadd.s32 4294967295, %s1839_s22   ;;  %s25_s24 = sadd.s32 1, %s1831_s20  ;;  %s1839_s22 = sphi %s1882_s22, %s13_s22   ;;  %s1835_s21 = sphi %s1880_s21, %s2350_s21   ;;  %s1831_s20 = sphi %s1878_s20, %s2349_s20   ;;  %s1827_s19 = sphi %s1876_s19, %s2348_s19   ;;  %s1823_s18 = sphi %s1874_s18, %s2347_s18   ;;  %s1819_s17 = sphi %s1872_s17, %s2346_s17   ;;  %s1815_s16 = sphi %s1870_s16, %s2345_s16   ;;  %s1811_s15 = sphi %s1868_s15, %s2344_s15   ;;  %s1807_s14 = sphi %s1866_s14, %s2343_s14   ;;  %s1803_s13 = sphi %s1864_s13, %s2342_s13   ;;  %s1799_s12 = sphi %s1862_s12, %s2341_s12  }
   0xa   : > { %p26_p0 = scmp.ge.s32.totalorder %s25_s24, 9  ;;  %s28_s25 = sadd.s32 1, %s1835_s21 }
   0xb   : > { %s41_s26 = sadd.s32 1, %s1819_s17  ;;  %p48_p1 = scmp.ne.s32.totalorder %s1819_s17, %s1815_s16 }
   0xc   : > { %s2352_s24 = smov (%p26_p0, %s25_s24), 0  ;;  %s2354_s25 = smov (!%p26_p0, %s28_s25), %s1835_s21 }
   0xd   : > { %2332 = sst [smem:[#allocation6_spill]] %s2352_s24  ;;  %s37_s27 = ssub.s32 %s1831_s20, %s2352_s24 }
   0xe   : > { %p49_p2 = scmp.eq.s32.totalorder %s1839_s22, 0  ;;  %p30_p3 = scmp.ge.s32.totalorder %s2354_s25, 2 }
   0xf   : > { %p39_p4 = scmp.eq.s32.totalorder %s37_s27, 0  ;;  %s69_s29 = sadd.s32 1, %s1811_s15 }
  0x10   : > { %p1929_p5 = por %p49_p2, %p48_p1  ;;  %s2356_s25 = smov (%p30_p3, %s2354_s25), 0 }
  0x11   : > { %2334 = sst [smem:[#allocation7_spill]] %s2356_s25  ;;  %s65_s4 = ssub.s32 %s1835_s21, %s2356_s25 }
  0x12   : > { %s1937_s30 = scalar_select %p39_p4, %s1819_s17, %s41_s26  }
  0x13   : > { %p76_p6 = scmp.ne.s32.totalorder %s1811_s15, %s1807_s14  ;;  %s66_s5 = sor.u32 %s65_s4, %s37_s27 }
  0x14   : > { %p121_p7 = scmp.eq.s32.totalorder %s65_s4, 0  ;;  %p67_p8 = scmp.eq.s32.totalorder %s66_s5, 0 }
  0x15   : > { %p1943_p9 = por %p76_p6, %p49_p2  ;;  %s123_s7 = sadd.s32 1, %s1803_s13 }
  0x16   : > { %p133_p10 = scmp.ne.s32.totalorder %s1803_s13, %s1799_s12  ;;  %p134_p11 = scmp.eq.s32.totalorder %s1295_s23, 17 }
  0x17   : > { %s1951_s8 = scalar_select %p67_p8, %s1811_s15, %s69_s29  }
  0x18   : > { %s1954_s9 = scalar_select %p121_p7, %s1803_s13, %s123_s7  }
  0x19   : > { %p1956_p12 = por %p134_p11, %p133_p10  ;;  %p1298_p13 = scmp.ge.s32.totalorder %s1839_s22, 18 }
  0x1b   : > { %156 = sbr.rel (%p1298_p13) target bundleno = 120 (0x78), region = 16 }
  0x20   : > { %159 = sbr.rel (!%p1929_p5) target bundleno = 46 (0x2e), region = 20  ;;  %s161_s11 = sand.u32 (%p1929_p5), 1, %s1819_s17  }
  0x21   : > { %s1593_s26 = sshll.u32 (%p1929_p5), %s1831_s20, 4  ;;  %s1299_s27 = sshll.u32 (%p1929_p5), %s161_s11, 5 }
  0x22   : > { %s2337_s0 = sld [smem:[#allocation8_spill]] (%p1929_p5)  ;;  %s163_s23 = scalar_lea.vmem (%p1929_p5), [#allocation3], %s1299_s27 }
  0x28   : > { %s169_s5 = scalar_lea.vmem %s2337_s0, %s1593_s26 }
  0x29   : > { %v182_v0 = vld [vmem:[%s169_s5] sm:$0xff]  ;;  %v184_v1 = vld [vmem:[%s169_s5 + $0x8] sm:$0xff]  ;;  %v186_v2 = vld [vmem:[%s169_s5 + $0x90] sm:$0xff] }
  0x2a   : > { %183 = vst [vmem:[%s163_s23] sm:$0xff] %v182_v0  ;;  %v188_v3 = vld [vmem:[%s169_s5 + $0x98] sm:$0xff] }
  0x2b   : > { %185 = vst [vmem:[%s163_s23 + $0x8] sm:$0xff] %v184_v1 }
  0x2c   : > { %187 = vst [vmem:[%s163_s23 + $0x10] sm:$0xff] %v186_v2 }
  0x2d   : > { %189 = vst [vmem:[%s163_s23 + $0x18] sm:$0xff] %v188_v3 }
  0x2e PF: > { %195 = sbr.rel (!%p1943_p9) target bundleno = 120 (0x78), region = 43  ;;  %s197_s28 = sand.u32 (%p1943_p9), 1, %s1811_s15  }
  0x2f   : > { %s1304_s7 = sshll.u32 (%p1943_p9), %s1835_s21, 1  ;;  %s1302_s11 = sshll.u32 (%p1943_p9), %s197_s28, 9 }
  0x30   : > { %s1594_s26 = sshll.u32 (%p1943_p9), %s1831_s20, 8  ;;  %s2338_s1 = sld [smem:[#allocation9_spill]] (%p1943_p9) }
  0x31   : > { %s203_s29 = sadd.s32 (%p1943_p9), %s1594_s26, %s1304_s7  ;;  %s1981_s6 = scalar_lea.vmem (%p1943_p9), [#allocation4], %s1302_s11 }
  0x32   : > { %s1306_s4 = sshll.u32 (%p1943_p9), %s203_s29, 2 }
  0x36   : > { %s1976_s5 = scalar_lea.vmem %s2338_s1, %s1306_s4 }
  0x37   : > { %v360_v4 = vld [vmem:[%s1976_s5] sm:$0xff]  ;;  %v362_v5 = vld [vmem:[%s1976_s5 + $0x10] sm:$0xff] }
  0x38   : > { %v364_v6 = vld [vmem:[%s1976_s5 + $0x20] sm:$0xff]  ;;  %361 = vst [vmem:[%s1981_s6] sm:$0xff] %v360_v4  ;;  %v366_v7 = vld [vmem:[%s1976_s5 + $0x30] sm:$0xff] }
  0x39   : > { %363 = vst [vmem:[%s1981_s6 + $0x8] sm:$0xff] %v362_v5  ;;  %v368_v8 = vld [vmem:[%s1976_s5 + $0x40] sm:$0xff]  ;;  %v370_v9 = vld [vmem:[%s1976_s5 + $0x50] sm:$0xff] }
  0x3a   : > { %365 = vst [vmem:[%s1981_s6 + $0x10] sm:$0xff] %v364_v6  ;;  %v372_v10 = vld [vmem:[%s1976_s5 + $0x60] sm:$0xff]  ;;  %v374_v11 = vld [vmem:[%s1976_s5 + $0x70] sm:$0xff] }
  0x3b   : > { %367 = vst [vmem:[%s1981_s6 + $0x18] sm:$0xff] %v366_v7  ;;  %v376_v12 = vld [vmem:[%s1976_s5 + $0x80] sm:$0xff]  ;;  %v378_v13 = vld [vmem:[%s1976_s5 + $0x90] sm:$0xff] }
  0x3c   : > { %369 = vst [vmem:[%s1981_s6 + $0x20] sm:$0xff] %v368_v8  ;;  %v380_v14 = vld [vmem:[%s1976_s5 + $0xa0] sm:$0xff]  ;;  %v382_v15 = vld [vmem:[%s1976_s5 + $0xb0] sm:$0xff] }
  0x3d   : > { %371 = vst [vmem:[%s1981_s6 + $0x28] sm:$0xff] %v370_v9  ;;  %v384_v16 = vld [vmem:[%s1976_s5 + $0xc0] sm:$0xff]  ;;  %v386_v17 = vld [vmem:[%s1976_s5 + $0xd0] sm:$0xff] }
  0x3e   : > { %373 = vst [vmem:[%s1981_s6 + $0x30] sm:$0xff] %v372_v10  ;;  %v388_v18 = vld [vmem:[%s1976_s5 + $0xe0] sm:$0xff]  ;;  %v390_v19 = vld [vmem:[%s1976_s5 + $0xf0] sm:$0xff] }
  0x3f   : > { %375 = vst [vmem:[%s1981_s6 + $0x38] sm:$0xff] %v374_v11  ;;  %v392_v20 = vld [vmem:[%s1976_s5 + $0x100] sm:$0xff]  ;;  %v394_v21 = vld [vmem:[%s1976_s5 + $0x110] sm:$0xff] }
  0x40   : > { %377 = vst [vmem:[%s1981_s6 + $0x40] sm:$0xff] %v376_v12  ;;  %v396_v22 = vld [vmem:[%s1976_s5 + $0x120] sm:$0xff]  ;;  %v398_v23 = vld [vmem:[%s1976_s5 + $0x130] sm:$0xff] }
  0x41   : > { %379 = vst [vmem:[%s1981_s6 + $0x48] sm:$0xff] %v378_v13  ;;  %v400_v24 = vld [vmem:[%s1976_s5 + $0x140] sm:$0xff]  ;;  %v402_v25 = vld [vmem:[%s1976_s5 + $0x150] sm:$0xff] }
  0x42   : > { %381 = vst [vmem:[%s1981_s6 + $0x50] sm:$0xff] %v380_v14  ;;  %v404_v26 = vld [vmem:[%s1976_s5 + $0x160] sm:$0xff]  ;;  %v406_v27 = vld [vmem:[%s1976_s5 + $0x170] sm:$0xff] }
  0x43   : > { %383 = vst [vmem:[%s1981_s6 + $0x58] sm:$0xff] %v382_v15  ;;  %v408_v28 = vld [vmem:[%s1976_s5 + $0x180] sm:$0xff]  ;;  %v410_v29 = vld [vmem:[%s1976_s5 + $0x190] sm:$0xff] }
  0x44   : > { %385 = vst [vmem:[%s1981_s6 + $0x60] sm:$0xff] %v384_v16  ;;  %v412_v30 = vld [vmem:[%s1976_s5 + $0x1a0] sm:$0xff]  ;;  %v414_v31 = vld [vmem:[%s1976_s5 + $0x1b0] sm:$0xff] }
  0x45   : > { %387 = vst [vmem:[%s1981_s6 + $0x68] sm:$0xff] %v386_v17  ;;  %v416_v32 = vld [vmem:[%s1976_s5 + $0x1c0] sm:$0xff]  ;;  %v418_v33 = vld [vmem:[%s1976_s5 + $0x1d0] sm:$0xff] }
  0x46   : > { %389 = vst [vmem:[%s1981_s6 + $0x70] sm:$0xff] %v388_v18  ;;  %v420_v34 = vld [vmem:[%s1976_s5 + $0x1e0] sm:$0xff]  ;;  %v422_v35 = vld [vmem:[%s1976_s5 + $0x1f0] sm:$0xff] }
  0x47   : > { %391 = vst [vmem:[%s1981_s6 + $0x78] sm:$0xff] %v390_v19  ;;  %v424_v36 = vld [vmem:[%s1976_s5 + $0x200] sm:$0xff]  ;;  %v426_v37 = vld [vmem:[%s1976_s5 + $0x210] sm:$0xff] }
  0x48   : > { %393 = vst [vmem:[%s1981_s6 + $0x80] sm:$0xff] %v392_v20  ;;  %v428_v38 = vld [vmem:[%s1976_s5 + $0x220] sm:$0xff]  ;;  %v430_v39 = vld [vmem:[%s1976_s5 + $0x230] sm:$0xff] }
  0x49   : > { %395 = vst [vmem:[%s1981_s6 + $0x88] sm:$0xff] %v394_v21  ;;  %v432_v40 = vld [vmem:[%s1976_s5 + $0x240] sm:$0xff]  ;;  %v434_v41 = vld [vmem:[%s1976_s5 + $0x250] sm:$0xff] }
  0x4a   : > { %397 = vst [vmem:[%s1981_s6 + $0x90] sm:$0xff] %v396_v22  ;;  %v436_v42 = vld [vmem:[%s1976_s5 + $0x260] sm:$0xff]  ;;  %v438_v43 = vld [vmem:[%s1976_s5 + $0x270] sm:$0xff] }
  0x4b   : > { %399 = vst [vmem:[%s1981_s6 + $0x98] sm:$0xff] %v398_v23  ;;  %v440_v44 = vld [vmem:[%s1976_s5 + $0x280] sm:$0xff]  ;;  %v442_v45 = vld [vmem:[%s1976_s5 + $0x290] sm:$0xff] }
  0x4c   : > { %401 = vst [vmem:[%s1981_s6 + $0xa0] sm:$0xff] %v400_v24  ;;  %v444_v46 = vld [vmem:[%s1976_s5 + $0x2a0] sm:$0xff]  ;;  %v446_v47 = vld [vmem:[%s1976_s5 + $0x2b0] sm:$0xff] }
  0x4d   : > { %403 = vst [vmem:[%s1981_s6 + $0xa8] sm:$0xff] %v402_v25  ;;  %v448_v48 = vld [vmem:[%s1976_s5 + $0x2c0] sm:$0xff]  ;;  %v450_v49 = vld [vmem:[%s1976_s5 + $0x2d0] sm:$0xff] }
  0x4e   : > { %405 = vst [vmem:[%s1981_s6 + $0xb0] sm:$0xff] %v404_v26  ;;  %v452_v50 = vld [vmem:[%s1976_s5 + $0x2e0] sm:$0xff]  ;;  %v454_v51 = vld [vmem:[%s1976_s5 + $0x2f0] sm:$0xff] }
  0x4f   : > { %407 = vst [vmem:[%s1981_s6 + $0xb8] sm:$0xff] %v406_v27  ;;  %v456_v52 = vld [vmem:[%s1976_s5 + $0x300] sm:$0xff]  ;;  %v458_v53 = vld [vmem:[%s1976_s5 + $0x310] sm:$0xff] }
  0x50   : > { %409 = vst [vmem:[%s1981_s6 + $0xc0] sm:$0xff] %v408_v28  ;;  %v460_v54 = vld [vmem:[%s1976_s5 + $0x320] sm:$0xff]  ;;  %v462_v55 = vld [vmem:[%s1976_s5 + $0x330] sm:$0xff] }
  0x51   : > { %411 = vst [vmem:[%s1981_s6 + $0xc8] sm:$0xff] %v410_v29  ;;  %v464_v56 = vld [vmem:[%s1976_s5 + $0x340] sm:$0xff]  ;;  %v466_v57 = vld [vmem:[%s1976_s5 + $0x350] sm:$0xff] }
  0x52   : > { %413 = vst [vmem:[%s1981_s6 + $0xd0] sm:$0xff] %v412_v30  ;;  %v468_v58 = vld [vmem:[%s1976_s5 + $0x360] sm:$0xff]  ;;  %v470_v59 = vld [vmem:[%s1976_s5 + $0x370] sm:$0xff] }
  0x53   : > { %415 = vst [vmem:[%s1981_s6 + $0xd8] sm:$0xff] %v414_v31  ;;  %v472_v60 = vld [vmem:[%s1976_s5 + $0x380] sm:$0xff]  ;;  %v474_v61 = vld [vmem:[%s1976_s5 + $0x390] sm:$0xff] }
  0x54   : > { %417 = vst [vmem:[%s1981_s6 + $0xe0] sm:$0xff] %v416_v32  ;;  %v476_v62 = vld [vmem:[%s1976_s5 + $0x3a0] sm:$0xff]  ;;  %v478_v63 = vld [vmem:[%s1976_s5 + $0x3b0] sm:$0xff] }
  0x55   : > { %419 = vst [vmem:[%s1981_s6 + $0xe8] sm:$0xff] %v418_v33  ;;  %v480_v0 = vld [vmem:[%s1976_s5 + $0x3c0] sm:$0xff]  ;;  %v482_v1 = vld [vmem:[%s1976_s5 + $0x3d0] sm:$0xff] }
  0x56   : > { %421 = vst [vmem:[%s1981_s6 + $0xf0] sm:$0xff] %v420_v34  ;;  %v484_v2 = vld [vmem:[%s1976_s5 + $0x3e0] sm:$0xff]  ;;  %v486_v3 = vld [vmem:[%s1976_s5 + $0x3f0] sm:$0xff] }
  0x57   : > { %423 = vst [vmem:[%s1981_s6 + $0xf8] sm:$0xff] %v422_v35 }
  0x58   : > { %425 = vst [vmem:[%s1981_s6 + $0x100] sm:$0xff] %v424_v36 }
  0x59   : > { %427 = vst [vmem:[%s1981_s6 + $0x108] sm:$0xff] %v426_v37 }
  0x5a   : > { %429 = vst [vmem:[%s1981_s6 + $0x110] sm:$0xff] %v428_v38 }
  0x5b   : > { %431 = vst [vmem:[%s1981_s6 + $0x118] sm:$0xff] %v430_v39 }
  0x5c   : > { %433 = vst [vmem:[%s1981_s6 + $0x120] sm:$0xff] %v432_v40 }
  0x5d   : > { %435 = vst [vmem:[%s1981_s6 + $0x128] sm:$0xff] %v434_v41 }
  0x5e   : > { %437 = vst [vmem:[%s1981_s6 + $0x130] sm:$0xff] %v436_v42 }
  0x5f   : > { %439 = vst [vmem:[%s1981_s6 + $0x138] sm:$0xff] %v438_v43 }
  0x60   : > { %441 = vst [vmem:[%s1981_s6 + $0x140] sm:$0xff] %v440_v44 }
  0x61   : > { %443 = vst [vmem:[%s1981_s6 + $0x148] sm:$0xff] %v442_v45 }
  0x62   : > { %445 = vst [vmem:[%s1981_s6 + $0x150] sm:$0xff] %v444_v46 }
  0x63   : > { %447 = vst [vmem:[%s1981_s6 + $0x158] sm:$0xff] %v446_v47 }
  0x64   : > { %449 = vst [vmem:[%s1981_s6 + $0x160] sm:$0xff] %v448_v48 }
  0x65   : > { %451 = vst [vmem:[%s1981_s6 + $0x168] sm:$0xff] %v450_v49 }
  0x66   : > { %453 = vst [vmem:[%s1981_s6 + $0x170] sm:$0xff] %v452_v50 }
  0x67   : > { %455 = vst [vmem:[%s1981_s6 + $0x178] sm:$0xff] %v454_v51 }
  0x68   : > { %457 = vst [vmem:[%s1981_s6 + $0x180] sm:$0xff] %v456_v52 }
  0x69   : > { %459 = vst [vmem:[%s1981_s6 + $0x188] sm:$0xff] %v458_v53 }
  0x6a   : > { %461 = vst [vmem:[%s1981_s6 + $0x190] sm:$0xff] %v460_v54 }
  0x6b   : > { %463 = vst [vmem:[%s1981_s6 + $0x198] sm:$0xff] %v462_v55 }
  0x6c   : > { %465 = vst [vmem:[%s1981_s6 + $0x1a0] sm:$0xff] %v464_v56 }
  0x6d   : > { %467 = vst [vmem:[%s1981_s6 + $0x1a8] sm:$0xff] %v466_v57 }
  0x6e   : > { %469 = vst [vmem:[%s1981_s6 + $0x1b0] sm:$0xff] %v468_v58 }
  0x6f   : > { %471 = vst [vmem:[%s1981_s6 + $0x1b8] sm:$0xff] %v470_v59 }
  0x70   : > { %473 = vst [vmem:[%s1981_s6 + $0x1c0] sm:$0xff] %v472_v60 }
  0x71   : > { %475 = vst [vmem:[%s1981_s6 + $0x1c8] sm:$0xff] %v474_v61 }
  0x72   : > { %477 = vst [vmem:[%s1981_s6 + $0x1d0] sm:$0xff] %v476_v62 }
  0x73   : > { %479 = vst [vmem:[%s1981_s6 + $0x1d8] sm:$0xff] %v478_v63 }
  0x74   : > { %481 = vst [vmem:[%s1981_s6 + $0x1e0] sm:$0xff] %v480_v0 }
  0x75   : > { %483 = vst [vmem:[%s1981_s6 + $0x1e8] sm:$0xff] %v482_v1 }
  0x76   : > { %485 = vst [vmem:[%s1981_s6 + $0x1f0] sm:$0xff] %v484_v2 }
  0x77   : > { %487 = vst [vmem:[%s1981_s6 + $0x1f8] sm:$0xff] %v486_v3 }
  0x78 PF: > { %p1307_p0 = scmp.ge.s32.totalorder %s1839_s22, 1  ;;  %p501_p1 = scmp.lt.s32.totalorder %s1839_s22, 19 }
  0x7a   : > { %p502_p2 = pnand %p1307_p0, %p501_p1 }
  0x7b   : > { %s508_s0 = sand.u32 (!%p502_p2), 1, %s1815_s16   ;;  %s515_s23 = sand.u32 (!%p502_p2), 1, %s1807_s14  }
  0x7c   : > { %505 = sbr.rel (%p502_p2) target bundleno = 380 (0x17c), region = 85  ;;  %s1308_s28 = sshll.u32 (!%p502_p2), %s508_s0, 5 }
  0x7d   : > { %s1309_s7 = sshll.u32 (!%p502_p2), %s515_s23, 9  ;;  %s543_s11 = sand.u32 (!%p502_p2), 1, %s1799_s12  }
  0x7e   : > { %s1311_s26 = sshll.u32 (!%p502_p2), %s1827_s19, 1  ;;  %s1310_s29 = sshll.u32 (!%p502_p2), %s543_s11, 4 }
  0x7f   : > { %p551_p3 = scmp.lt.s32.totalorder (!%p502_p2), %s1311_s26, 3  ;;  %s2119_s1 = scalar_lea.vmem (!%p502_p2), [#allocation3], %s1308_s28 }
  0x80   : > { %s2121_s25 = scalar_lea.vmem (!%p502_p2), [#allocation4], %s1309_s7  ;;  %s2123_s24 = scalar_lea.vmem (!%p502_p2), [#allocation5], %s1310_s29 }
  0x81   : > { %s2358_s26 = smov (!%p551_p3, %s1311_s26), 3  ;;  %p1313_p4 = scmp.ne.s32.totalorder %s1823_s18, 0 }
  0x82   : > { %s1312_s4 = sshll.u32 %s2358_s26, 1 }
  0x83   : > { %s2117_s6 = scalar_lea.vmem %s2326_s2, %s1312_s4  ;;  %561 = sbr.rel (%p1313_p4) target bundleno = 141 (0x8d), region = 97 }
  0x88   : > { %v1841_v4 = vmov 0.0  }
  0x89   : > { %562 = vst [vmem:[#allocation2 + $0x10] sm:$0xff] %v1841_v4 }
  0x8a   : > { %563 = vst [vmem:[#allocation2] sm:$0xff] %v1841_v4 }
  0x8b   : > { %564 = vst [vmem:[#allocation2 + $0x18] sm:$0xff] %v1841_v4 }
  0x8c   : > { %565 = vst [vmem:[#allocation2 + $0x8] sm:$0xff] %v1841_v4 }
  0x8d PF: > { %v1388_v5 = vld [vmem:[%s2121_s25 + $0x70] sm:$0xf]  ;;  %v1614_v6 = vld [vmem:[%s2121_s25 + $0x74] sm:$0xf0]  ;;  %v1380_v16 = vld [vmem:[%s2121_s25 + $0x60] sm:$0xf] }
  0x8e   : > { %v1452_v7 = vld [vmem:[%s2121_s25 + $0xf0] sm:$0xf]  ;;  %v1389_v8 = vor.u32 %v1614_v6, %v1388_v5  ;;  %v1630_v9 = vld [vmem:[%s2121_s25 + $0xf4] sm:$0xf0]  ;;  %v1612_v18 = vld [vmem:[%s2121_s25 + $0x64] sm:$0xf0] }
  0x8f   : > { %v1516_v10 = vld [vmem:[%s2121_s25 + $0x170] sm:$0xf]  ;;  %v1646_v11 = vld [vmem:[%s2121_s25 + $0x174] sm:$0xf0]  ;;  %v1453_v12 = vor.u32 %v1630_v9, %v1452_v7  ;;  %v1444_v19 = vld [vmem:[%s2121_s25 + $0xe0] sm:$0xf]  ;;  %v1381_v21 = vor.u32 %v1612_v18, %v1380_v16 }
  0x90   : > { %v1517_v13 = vor.u32 %v1646_v11, %v1516_v10  ;;  %v1580_v14 = vld [vmem:[%s2121_s25 + $0x1f0] sm:$0xf]  ;;  %v1662_v15 = vld [vmem:[%s2121_s25 + $0x1f4] sm:$0xf0]  ;;  %978 = vmatpush.bf16.msra.mxu0 %v1389_v8  ;;  %v1628_v20 = vld [vmem:[%s2121_s25 + $0xe4] sm:$0xf0] }
  0x91   : > { %v1581_v17 = vor.u32 %v1662_v15, %v1580_v14  ;;  %992 = vmatpush.bf16.msra.mxu1 %v1453_v12  ;;  %v1445_v22 = vor.u32 %v1628_v20, %v1444_v19  ;;  %v1508_v23 = vld [vmem:[%s2121_s25 + $0x160] sm:$0xf]  ;;  %v1644_v24 = vld [vmem:[%s2121_s25 + $0x164] sm:$0xf0]  ;;  %v1372_v28 = vld [vmem:[%s2121_s25 + $0x50] sm:$0xf] }
  0x92   : > { %1006 = vmatpush.bf16.msra.mxu2 %v1517_v13  ;;  %v1572_v25 = vld [vmem:[%s2121_s25 + $0x1e0] sm:$0xf]  ;;  %v1509_v26 = vor.u32 %v1644_v24, %v1508_v23  ;;  %v1660_v27 = vld [vmem:[%s2121_s25 + $0x1e4] sm:$0xf0]  ;;  %v1610_v29 = vld [vmem:[%s2121_s25 + $0x54] sm:$0xf0] }
  0x93   : > { %1020 = vmatpush.bf16.msra.mxu3 %v1581_v17  ;;  %v1573_v30 = vor.u32 %v1660_v27, %v1572_v25  ;;  %v1436_v31 = vld [vmem:[%s2121_s25 + $0xd0] sm:$0xf]  ;;  %v1626_v32 = vld [vmem:[%s2121_s25 + $0xd4] sm:$0xf0]  ;;  %v1373_v34 = vor.u32 %v1610_v29, %v1372_v28  ;;  %v1364_v40 = vld [vmem:[%s2121_s25 + $0x40] sm:$0xf] }
  0x94   : > { %v1500_v33 = vld [vmem:[%s2121_s25 + $0x150] sm:$0xf]  ;;  %979 = vmatpush.bf16.msra.mxu0 %v1381_v21  ;;  %v1642_v35 = vld [vmem:[%s2121_s25 + $0x154] sm:$0xf0]  ;;  %v1437_v38 = vor.u32 %v1626_v32, %v1436_v31  ;;  %v1608_v41 = vld [vmem:[%s2121_s25 + $0x44] sm:$0xf0] }
  0x95   : > { %v1564_v36 = vld [vmem:[%s2121_s25 + $0x1d0] sm:$0xf]  ;;  %v1658_v37 = vld [vmem:[%s2121_s25 + $0x1d4] sm:$0xf0]  ;;  %993 = vmatpush.bf16.msra.mxu1 %v1445_v22  ;;  %v1501_v39 = vor.u32 %v1642_v35, %v1500_v33  ;;  %v1428_v42 = vld [vmem:[%s2121_s25 + $0xc0] sm:$0xf]  ;;  %v1365_v49 = vor.u32 %v1608_v41, %v1364_v40 }
  0x96   : > { %1007 = vmatpush.bf16.msra.mxu2 %v1509_v26  ;;  %v1565_v43 = vor.u32 %v1658_v37, %v1564_v36  ;;  %v1624_v44 = vld [vmem:[%s2121_s25 + $0xc4] sm:$0xf0]  ;;  %v1492_v45 = vld [vmem:[%s2121_s25 + $0x140] sm:$0xf]  ;;  %v1356_v52 = vld [vmem:[%s2121_s25 + $0x30] sm:$0xf] }
  0x97   : > { %1021 = vmatpush.bf16.msra.mxu3 %v1573_v30  ;;  %v1640_v46 = vld [vmem:[%s2121_s25 + $0x144] sm:$0xf0]  ;;  %v1556_v47 = vld [vmem:[%s2121_s25 + $0x1c0] sm:$0xf]  ;;  %v1429_v50 = vor.u32 %v1624_v44, %v1428_v42  ;;  %v1606_v53 = vld [vmem:[%s2121_s25 + $0x34] sm:$0xf0] }
  0x98   : > { %v1656_v48 = vld [vmem:[%s2121_s25 + $0x1c4] sm:$0xf0]  ;;  %980 = vmatpush.bf16.msra.mxu0 %v1373_v34  ;;  %v1493_v51 = vor.u32 %v1640_v46, %v1492_v45  ;;  %v1420_v54 = vld [vmem:[%s2121_s25 + $0xb0] sm:$0xf]  ;;  %v1622_v56 = vld [vmem:[%s2121_s25 + $0xb4] sm:$0xf0]  ;;  %v1357_v61 = vor.u32 %v1606_v53, %v1356_v52 }
  0x99   : > { %994 = vmatpush.bf16.msra.mxu1 %v1437_v38  ;;  %v1557_v55 = vor.u32 %v1656_v48, %v1556_v47  ;;  %v1484_v57 = vld [vmem:[%s2121_s25 + $0x130] sm:$0xf]  ;;  %v1638_v58 = vld [vmem:[%s2121_s25 + $0x134] sm:$0xf0]  ;;  %v1421_v62 = vor.u32 %v1622_v56, %v1420_v54  ;;  %v1348_v0 = vld [vmem:[%s2121_s25 + $0x20] sm:$0xf] }
  0x9a   : > { %1008 = vmatpush.bf16.msra.mxu2 %v1501_v39  ;;  %v1548_v59 = vld [vmem:[%s2121_s25 + $0x1b0] sm:$0xf]  ;;  %v1654_v60 = vld [vmem:[%s2121_s25 + $0x1b4] sm:$0xf0]  ;;  %v1485_v63 = vor.u32 %v1638_v58, %v1484_v57  ;;  %v1604_v1 = vld [vmem:[%s2121_s25 + $0x24] sm:$0xf0] }
  0x9b   : > { %1022 = vmatpush.bf16.msra.mxu3 %v1565_v43  ;;  %v1412_v2 = vld [vmem:[%s2121_s25 + $0xa0] sm:$0xf]  ;;  %v1549_v3 = vor.u32 %v1654_v60, %v1548_v59  ;;  %v1620_v4 = vld [vmem:[%s2121_s25 + $0xa4] sm:$0xf0]  ;;  %v1349_v9 = vor.u32 %v1604_v1, %v1348_v0  ;;  %v1340_v12 = vld [vmem:[%s2121_s25 + $0x10] sm:$0xf] }
  0x9c   : > { %981 = vmatpush.bf16.msra.mxu0 %v1365_v49  ;;  %v1476_v5 = vld [vmem:[%s2121_s25 + $0x120] sm:$0xf]  ;;  %v1636_v6 = vld [vmem:[%s2121_s25 + $0x124] sm:$0xf0]  ;;  %v1413_v10 = vor.u32 %v1620_v4, %v1412_v2  ;;  %v1602_v13 = vld [vmem:[%s2121_s25 + $0x14] sm:$0xf0] }
  0x9d   : > { %995 = vmatpush.bf16.msra.mxu1 %v1429_v50  ;;  %v1540_v7 = vld [vmem:[%s2121_s25 + $0x1a0] sm:$0xf]  ;;  %v1652_v8 = vld [vmem:[%s2121_s25 + $0x1a4] sm:$0xf0]  ;;  %v1477_v11 = vor.u32 %v1636_v6, %v1476_v5  ;;  %v1404_v14 = vld [vmem:[%s2121_s25 + $0x90] sm:$0xf]  ;;  %v1341_v22 = vor.u32 %v1602_v13, %v1340_v12 }
  0x9e   : > { %1009 = vmatpush.bf16.msra.mxu2 %v1493_v51  ;;  %v1541_v15 = vor.u32 %v1652_v8, %v1540_v7  ;;  %v1618_v16 = vld [vmem:[%s2121_s25 + $0x94] sm:$0xf0]  ;;  %v1468_v17 = vld [vmem:[%s2121_s25 + $0x110] sm:$0xf]  ;;  %v1332_v21 = vld [vmem:[%s2121_s25] sm:$0xf] }
  0x9f   : > { %1023 = vmatpush.bf16.msra.mxu3 %v1557_v55  ;;  %v1634_v18 = vld [vmem:[%s2121_s25 + $0x114] sm:$0xf0]  ;;  %v1532_v19 = vld [vmem:[%s2121_s25 + $0x190] sm:$0xf]  ;;  %v1600_v23 = vld [vmem:[%s2121_s25 + $0x4] sm:$0xf0]  ;;  %v1405_v26 = vor.u32 %v1618_v16, %v1404_v14 }
  0xa0   : > { %982 = vmatpush.bf16.msra.mxu0 %v1357_v61  ;;  %v1650_v20 = vld [vmem:[%s2121_s25 + $0x194] sm:$0xf0]  ;;  %v1396_v24 = vld [vmem:[%s2121_s25 + $0x80] sm:$0xf]  ;;  %v1616_v25 = vld [vmem:[%s2121_s25 + $0x84] sm:$0xf0]  ;;  %v1469_v27 = vor.u32 %v1634_v18, %v1468_v17  ;;  %v1333_v38 = vor.u32 %v1600_v23, %v1332_v21 }
  0xa1   : > { %996 = vmatpush.bf16.msra.mxu1 %v1421_v62  ;;  %v1460_v28 = vld [vmem:[%s2121_s25 + $0x100] sm:$0xf]  ;;  %v1632_v29 = vld [vmem:[%s2121_s25 + $0x104] sm:$0xf0]  ;;  %v1533_v31 = vor.u32 %v1650_v20, %v1532_v19  ;;  %v1613_v33 = vld [vmem:[%s2121_s25 + $0x74] sm:$0xf]  ;;  %v1397_v42 = vor.u32 %v1616_v25, %v1396_v24 }
  0xa2   : > { %1010 = vmatpush.bf16.msra.mxu2 %v1485_v63  ;;  %v1524_v30 = vld [vmem:[%s2121_s25 + $0x180] sm:$0xf]  ;;  %v1648_v32 = vld [vmem:[%s2121_s25 + $0x184] sm:$0xf0]  ;;  %v1390_v34 = vld [vmem:[%s2121_s25 + $0x78] sm:$0xf0]  ;;  %v1461_v43 = vor.u32 %v1632_v29, %v1460_v28 }
  0xa3   : > { %1024 = vmatpush.bf16.msra.mxu3 %v1549_v3  ;;  %v1629_v35 = vld [vmem:[%s2121_s25 + $0xf4] sm:$0xf]  ;;  %v1454_v36 = vld [vmem:[%s2121_s25 + $0xf8] sm:$0xf0]  ;;  %v1611_v44 = vld [vmem:[%s2121_s25 + $0x64] sm:$0xf]  ;;  %v1525_v48 = vor.u32 %v1648_v32, %v1524_v30  ;;  %v1393_v49 = vor.u32 %v1613_v33, %v1390_v34 }
  0xa4   : > { %983 = vmatpush.bf16.msra.mxu0 %v1349_v9  ;;  %v1645_v37 = vld [vmem:[%s2121_s25 + $0x174] sm:$0xf]  ;;  %v1518_v39 = vld [vmem:[%s2121_s25 + $0x178] sm:$0xf0]  ;;  %v1382_v45 = vld [vmem:[%s2121_s25 + $0x68] sm:$0xf0]  ;;  %v1457_v54 = vor.u32 %v1629_v35, %v1454_v36 }
  0xa5   : > { %997 = vmatpush.bf16.msra.mxu1 %v1413_v10  ;;  %v1661_v40 = vld [vmem:[%s2121_s25 + $0x1f4] sm:$0xf]  ;;  %v1582_v41 = vld [vmem:[%s2121_s25 + $0x1f8] sm:$0xf0]  ;;  %v1324_v46 = vld [vmem:[%s2119_s1 + $0x8] sm:$0xf]  ;;  %v1521_v55 = vor.u32 %v1645_v37, %v1518_v39  ;;  %v1385_v4 = vor.u32 %v1611_v44, %v1382_v45 }
  0xa6   : > { %1011 = vmatpush.bf16.msra.mxu2 %v1477_v11  ;;  %v1598_v47 = vld [vmem:[%s2119_s1 + $0x14] sm:$0xf0]  ;;  %v1627_v50 = vld [vmem:[%s2121_s25 + $0xe4] sm:$0xf]  ;;  %v1446_v51 = vld [vmem:[%s2121_s25 + $0xe8] sm:$0xf0]  ;;  %v1585_v59 = vor.u32 %v1661_v40, %v1582_v41 }
  0xa7   : > { %1025 = vmatpush.bf16.msra.mxu3 %v1541_v15  ;;  %v1643_v52 = vld [vmem:[%s2121_s25 + $0x164] sm:$0xf]  ;;  %v1510_v53 = vld [vmem:[%s2121_s25 + $0x168] sm:$0xf0]  ;;  %v1326_v57 = vld [vmem:[%s2119_s1 + $0x18] sm:$0xf0]  ;;  %v2209_v60 = vor.u32 %v1598_v47, %v1324_v46  ;;  %v1449_v6 = vor.u32 %v1627_v50, %v1446_v51 }
  0xa8   : > { %984 = vmatpush.bf16.msra.mxu0 %v1341_v22  ;;  %v1596_v56 = vld [vmem:[%s2119_s1 + $0xc] sm:$0xf]  ;;  %v1316_v58 = vld [vmem:[%s2119_s1] sm:$0xf]  ;;  %v1597_v61 = vld [vmem:[%s2119_s1 + $0xc] sm:$0xf0]  ;;  %v1513_v7 = vor.u32 %v1643_v52, %v1510_v53 }
  0xa9   : > { %998 = vmatpush.bf16.msra.mxu1 %v1405_v26  ;;  %v1595_v62 = vld [vmem:[%s2119_s1 + $0x4] sm:$0xf]  ;;  %v1318_v63 = vld [vmem:[%s2119_s1 + $0x10] sm:$0xf0]  ;;  %v1574_v1 = vld [vmem:[%s2121_s25 + $0x1e8] sm:$0xf0]  ;;  %v2216_v2 = vor.u32 %v1596_v56, %v1326_v57  ;;  %v2218_v3 = vor.u32 %v1597_v61, %v1316_v58 }
  0xaa   : > { %1012 = vmatpush.bf16.msra.mxu2 %v1469_v27  ;;  %v1659_v0 = vld [vmem:[%s2121_s25 + $0x1e4] sm:$0xf]  ;;  %v2220_v5 = vor.u32 %v1595_v62, %v1318_v63  ;;  %v1609_v8 = vld [vmem:[%s2121_s25 + $0x54] sm:$0xf]  ;;  %v1374_v9 = vld [vmem:[%s2121_s25 + $0x58] sm:$0xf0] }
  0xab   : > { %1026 = vmatpush.bf16.msra.mxu3 %v1533_v31  ;;  %v1625_v10 = vld [vmem:[%s2121_s25 + $0xd4] sm:$0xf]  ;;  %v1577_v11 = vor.u32 %v1659_v0, %v1574_v1  ;;  %v1438_v12 = vld [vmem:[%s2121_s25 + $0xd8] sm:$0xf0]  ;;  %v1377_v17 = vor.u32 %v1609_v8, %v1374_v9  ;;  %v1607_v20 = vld [vmem:[%s2121_s25 + $0x44] sm:$0xf] }
  0xac   : > { %985 = vmatpush.bf16.msra.mxu0 %v1333_v38  ;;  %v1641_v13 = vld [vmem:[%s2121_s25 + $0x154] sm:$0xf]  ;;  %v1502_v14 = vld [vmem:[%s2121_s25 + $0x158] sm:$0xf0]  ;;  %v1441_v18 = vor.u32 %v1625_v10, %v1438_v12  ;;  %v1366_v21 = vld [vmem:[%s2121_s25 + $0x48] sm:$0xf0] }
  0xad   : > { %999 = vmatpush.bf16.msra.mxu1 %v1397_v42  ;;  %v1657_v15 = vld [vmem:[%s2121_s25 + $0x1d4] sm:$0xf]  ;;  %v1566_v16 = vld [vmem:[%s2121_s25 + $0x1d8] sm:$0xf0]  ;;  %v1505_v19 = vor.u32 %v1641_v13, %v1502_v14  ;;  %v1623_v22 = vld [vmem:[%s2121_s25 + $0xc4] sm:$0xf]  ;;  %v1369_v29 = vor.u32 %v1607_v20, %v1366_v21 }
  0xae   : > { %1013 = vmatpush.bf16.msra.mxu2 %v1461_v43  ;;  %v1569_v23 = vor.u32 %v1657_v15, %v1566_v16  ;;  %v1430_v24 = vld [vmem:[%s2121_s25 + $0xc8] sm:$0xf0]  ;;  %v1639_v25 = vld [vmem:[%s2121_s25 + $0x144] sm:$0xf]  ;;  %v1605_v32 = vld [vmem:[%s2121_s25 + $0x34] sm:$0xf] }
  0xaf   : > { %1027 = vmatpush.bf16.msra.mxu3 %v1525_v48  ;;  %986 = vmatmul.bf16.vlgmr.msra.gmra.mxu0 %v2218_v3  ;;  %v1494_v26 = vld [vmem:[%s2121_s25 + $0x148] sm:$0xf0]  ;;  %v1655_v27 = vld [vmem:[%s2121_s25 + $0x1c4] sm:$0xf]  ;;  %v1433_v30 = vor.u32 %v1623_v22, %v1430_v24  ;;  %v1358_v33 = vld [vmem:[%s2121_s25 + $0x38] sm:$0xf0] }
  0xb0   : > { %1034 = vmatpush.bf16.msrb.mxu0 %v1393_v49  ;;  %1000 = vmatmul.bf16.vlgmr.msra.gmra.mxu1 %v2220_v5  ;;  %v1558_v28 = vld [vmem:[%s2121_s25 + $0x1c8] sm:$0xf0]  ;;  %v1497_v31 = vor.u32 %v1639_v25, %v1494_v26  ;;  %v1621_v34 = vld [vmem:[%s2121_s25 + $0xb4] sm:$0xf]  ;;  %v1422_v36 = vld [vmem:[%s2121_s25 + $0xb8] sm:$0xf0]  ;;  %v1361_v41 = vor.u32 %v1605_v32, %v1358_v33 }
  0xb1   : > { %1048 = vmatpush.bf16.msrb.mxu1 %v1457_v54  ;;  %1014 = vmatmul.bf16.vlgmr.msra.gmra.mxu2 %v2209_v60  ;;  %v1561_v35 = vor.u32 %v1655_v27, %v1558_v28  ;;  %v1637_v37 = vld [vmem:[%s2121_s25 + $0x134] sm:$0xf]  ;;  %v1486_v38 = vld [vmem:[%s2121_s25 + $0x138] sm:$0xf0]  ;;  %v1425_v42 = vor.u32 %v1621_v34, %v1422_v36  ;;  %v1603_v44 = vld [vmem:[%s2121_s25 + $0x24] sm:$0xf] }
  0xb2   : > { %1062 = vmatpush.bf16.msrb.mxu2 %v1521_v55  ;;  %1028 = vmatmul.bf16.vlgmr.msra.gmra.mxu3 %v2216_v2  ;;  %v1653_v39 = vld [vmem:[%s2121_s25 + $0x1b4] sm:$0xf]  ;;  %v1550_v40 = vld [vmem:[%s2121_s25 + $0x1b8] sm:$0xf0]  ;;  %v1489_v43 = vor.u32 %v1637_v37, %v1486_v38  ;;  %v1350_v45 = vld [vmem:[%s2121_s25 + $0x28] sm:$0xf0] }
  0xb3   : > { %1076 = vmatpush.bf16.msrb.mxu3 %v1585_v59  ;;  %v1619_v46 = vld [vmem:[%s2121_s25 + $0xa4] sm:$0xf]  ;;  %v1553_v47 = vor.u32 %v1653_v39, %v1550_v40  ;;  %v1414_v48 = vld [vmem:[%s2121_s25 + $0xa8] sm:$0xf0]  ;;  %v1353_v53 = vor.u32 %v1603_v44, %v1350_v45  ;;  %v1601_v56 = vld [vmem:[%s2121_s25 + $0x14] sm:$0xf] }
  0xb4   : > { %1035 = vmatpush.bf16.msrb.mxu0 %v1385_v4  ;;  %v1635_v49 = vld [vmem:[%s2121_s25 + $0x124] sm:$0xf]  ;;  %v1478_v50 = vld [vmem:[%s2121_s25 + $0x128] sm:$0xf0]  ;;  %v1417_v54 = vor.u32 %v1619_v46, %v1414_v48  ;;  %v1342_v57 = vld [vmem:[%s2121_s25 + $0x18] sm:$0xf0] }
  0xb5   : > { %1049 = vmatpush.bf16.msrb.mxu1 %v1449_v6  ;;  %v1651_v51 = vld [vmem:[%s2121_s25 + $0x1a4] sm:$0xf]  ;;  %v1542_v52 = vld [vmem:[%s2121_s25 + $0x1a8] sm:$0xf0]  ;;  %v1481_v55 = vor.u32 %v1635_v49, %v1478_v50  ;;  %v1617_v58 = vld [vmem:[%s2121_s25 + $0x94] sm:$0xf]  ;;  %v1345_v4 = vor.u32 %v1601_v56, %v1342_v57 }
  0xb6   : > { %1063 = vmatpush.bf16.msrb.mxu2 %v1513_v7  ;;  %v1545_v59 = vor.u32 %v1651_v51, %v1542_v52  ;;  %v1406_v61 = vld [vmem:[%s2121_s25 + $0x98] sm:$0xf0]  ;;  %v1633_v62 = vld [vmem:[%s2121_s25 + $0x114] sm:$0xf]  ;;  %v1599_v8 = vld [vmem:[%s2121_s25 + $0x4] sm:$0xf] }
  0xb7   : > { %1077 = vmatpush.bf16.msrb.mxu3 %v1577_v11  ;;  %v1470_v63 = vld [vmem:[%s2121_s25 + $0x118] sm:$0xf0]  ;;  %v1649_v0 = vld [vmem:[%s2121_s25 + $0x194] sm:$0xf]  ;;  %v1409_v6 = vor.u32 %v1617_v58, %v1406_v61  ;;  %v1334_v9 = vld [vmem:[%s2121_s25 + $0x8] sm:$0xf0] }
  0xb8   : > { %1036 = vmatpush.bf16.msrb.mxu0 %v1377_v17  ;;  %v1534_v1 = vld [vmem:[%s2121_s25 + $0x198] sm:$0xf0]  ;;  %v1473_v7 = vor.u32 %v1633_v62, %v1470_v63  ;;  %v1615_v10 = vld [vmem:[%s2121_s25 + $0x84] sm:$0xf]  ;;  %v1398_v12 = vld [vmem:[%s2121_s25 + $0x88] sm:$0xf0]  ;;  %v1337_v17 = vor.u32 %v1599_v8, %v1334_v9 }
  0xb9   : > { %1050 = vmatpush.bf16.msrb.mxu1 %v1441_v18  ;;  %v1537_v11 = vor.u32 %v1649_v0, %v1534_v1  ;;  %v1631_v13 = vld [vmem:[%s2121_s25 + $0x104] sm:$0xf]  ;;  %v1462_v14 = vld [vmem:[%s2121_s25 + $0x108] sm:$0xf0]  ;;  %v1401_v18 = vor.u32 %v1615_v10, %v1398_v12  ;;  %v566_v27 = vld [vmem:[#allocation2 + $0x10] sm:$0xff]  ;;  %p1586_p5 = scmp.ne.s32.totalorder %s1823_s18, 8 }
  0xba   : > { %1064 = vmatpush.bf16.msrb.mxu2 %v1505_v19  ;;  %v1647_v15 = vld [vmem:[%s2121_s25 + $0x184] sm:$0xf]  ;;  %v1526_v16 = vld [vmem:[%s2121_s25 + $0x188] sm:$0xf0]  ;;  %v1465_v19 = vor.u32 %v1631_v13, %v1462_v14  ;;  %v568_v34 = vld [vmem:[#allocation2 + $0x18] sm:$0xff] }
  0xbb   : > { %1078 = vmatpush.bf16.msrb.mxu3 %v1569_v23  ;;  %v1529_v20 = vor.u32 %v1647_v15, %v1526_v16  ;;  %v569_v49 = vld [vmem:[#allocation2 + $0x8] sm:$0xff] }
  0xbc   : > { %1037 = vmatpush.bf16.msrb.mxu0 %v1369_v29 }
  0xbd   : > { %1051 = vmatpush.bf16.msrb.mxu1 %v1433_v30 }
  0xbe   : > { %1065 = vmatpush.bf16.msrb.mxu2 %v1497_v31 }
  0xbf   : > { %1079 = vmatpush.bf16.msrb.mxu3 %v1561_v35 }
  0xc0   : > { %1038 = vmatpush.bf16.msrb.mxu0 %v1361_v41  ;;  %v567_v41 = vld [vmem:[#allocation2] sm:$0xff] }
  0xc1   : > { %1052 = vmatpush.bf16.msrb.mxu1 %v1425_v42 }
  0xc2   : > { %1066 = vmatpush.bf16.msrb.mxu2 %v1489_v43 }
  0xc3   : > { %1080 = vmatpush.bf16.msrb.mxu3 %v1553_v47 }
  0xc4   : > { %1039 = vmatpush.bf16.msrb.mxu0 %v1353_v53 }
  0xc5   : > { %1053 = vmatpush.bf16.msrb.mxu1 %v1417_v54 }
  0xc6   : > { %1067 = vmatpush.bf16.msrb.mxu2 %v1481_v55 }
  0xc7   : > { %1081 = vmatpush.bf16.msrb.mxu3 %v1545_v59 }
  0xc8   : > { %1040 = vmatpush.bf16.msrb.mxu0 %v1345_v4 }
  0xc9   : > { %1054 = vmatpush.bf16.msrb.mxu1 %v1409_v6 }
  0xca   : > { %1068 = vmatpush.bf16.msrb.mxu2 %v1473_v7 }
  0xcb   : > { %1082 = vmatpush.bf16.msrb.mxu3 %v1537_v11 }
  0xcc   : > { %1041 = vmatpush.bf16.msrb.mxu0 %v1337_v17 }
  0xcd   : > { %1055 = vmatpush.bf16.msrb.mxu1 %v1401_v18 }
  0xce   : > { %1069 = vmatpush.bf16.msrb.mxu2 %v1465_v19 }
  0xcf   : > { %1083 = vmatpush.bf16.msrb.mxu3 %v1529_v20  ;;  %1042 = vmatmul.bf16.vlgmr.msrb.gmra.mxu0 %v2218_v3 }
  0xd0   : > { %1056 = vmatmul.bf16.vlgmr.msrb.gmra.mxu1 %v2220_v5 }
  0xd1   : > { %1070 = vmatmul.bf16.vlgmr.msrb.gmra.mxu2 %v2209_v60 }
  0xd2   : > { %1084 = vmatmul.bf16.vlgmr.msrb.gmra.mxu3 %v2216_v2 }
 0x12c   : > { %v987_v21 = vpop.f32.mrf.mxu0 }
 0x12d   : > { %v1001_v22 = vpop.f32.mrf.mxu1 }
 0x12e   : > { %v1002_v23 = vadd.f32 %v1001_v22, %v987_v21 }
 0x134   : > { %v1015_v24 = vpop.f32.mrf.mxu2  ;;  %v989_v29 = vpop.f32.mrf.mxu0 }
 0x135   : > { %v1016_v25 = vadd.f32 %v1015_v24, %v1002_v23  ;;  %v1029_v26 = vpop.f32.mrf.mxu3  ;;  %v1003_v30 = vpop.f32.mrf.mxu1 }
 0x136   : > { %v1004_v32 = vadd.f32 %v1003_v30, %v989_v29 }
 0x137   : > { %v1030_v28 = vadd.f32 %v1029_v26, %v1016_v25 }
 0x139   : > { %v1090_v31 = vadd.f32 %v1030_v28, %v566_v27 }
 0x13b   : > { %1094 = vst [vmem:[#allocation2 + $0x10] sm:$0xff] %v1090_v31 }
 0x13c   : > { %v1017_v3 = vpop.f32.mrf.mxu2 }
 0x13d   : > { %v1018_v33 = vadd.f32 %v1017_v3, %v1004_v32  ;;  %v1031_v5 = vpop.f32.mrf.mxu3 }
 0x13f   : > { %v1032_v60 = vadd.f32 %v1031_v5, %v1018_v33 }
 0x141   : > { %v1092_v35 = vadd.f32 %v1032_v60, %v568_v34 }
 0x143   : > { %1096 = vst [vmem:[#allocation2 + $0x18] sm:$0xff] %v1092_v35 }
 0x14c   : > { %v1043_v2 = vpop.f32.mrf.mxu0 }
 0x14d   : > { %v1057_v36 = vpop.f32.mrf.mxu1 }
 0x14e   : > { %v1058_v37 = vadd.f32 %v1057_v36, %v1043_v2 }
 0x154   : > { %v1071_v38 = vpop.f32.mrf.mxu2  ;;  %v1045_v43 = vpop.f32.mrf.mxu0 }
 0x155   : > { %v1072_v39 = vadd.f32 %v1071_v38, %v1058_v37  ;;  %v1085_v40 = vpop.f32.mrf.mxu3  ;;  %v1059_v44 = vpop.f32.mrf.mxu1 }
 0x156   : > { %v1060_v46 = vadd.f32 %v1059_v44, %v1045_v43 }
 0x157   : > { %v1086_v42 = vadd.f32 %v1085_v40, %v1072_v39 }
 0x159   : > { %v1091_v45 = vadd.f32 %v1086_v42, %v567_v41 }
 0x15b   : > { %1095 = vst [vmem:[#allocation2] sm:$0xff] %v1091_v45 }
 0x15c   : > { %v1073_v47 = vpop.f32.mrf.mxu2 }
 0x15d   : > { %v1074_v48 = vadd.f32 %v1073_v47, %v1060_v46  ;;  %v1087_v50 = vpop.f32.mrf.mxu3 }
 0x15f   : > { %v1088_v51 = vadd.f32 %v1087_v50, %v1074_v48  ;;  %1101 = sbr.rel (%p1586_p5) target bundleno = 372 (0x174), region = 101 }
 0x161   : > { %v1093_v52 = vadd.f32 %v1088_v51, %v569_v49 }
 0x163   : > { %1097 = vst [vmem:[#allocation2 + $0x8] sm:$0xff] %v1093_v52 }
 0x164   : > { %v1102_v53 = vld [vmem:[#allocation2 + $0x10] sm:$0xff]  ;;  %v1103_v54 = vld [vmem:[#allocation2] sm:$0xff]  ;;  %v1104_v59 = vld [vmem:[#allocation2 + $0x18] sm:$0xff] }
 0x165   : > { %v1106_v55 = vld [vmem:[%s2117_s6] ss:$2 sm:$0x3]  ;;  %v1587_v58 = vld [vmem:[%s2117_s6 + $0x1] ss:$2 sm:$0x3] }
 0x166   : > { %v1108_v56 = vperm.slane %v1106_v55, 0  ;;  %v1109_v57 = vperm.slane %v1106_v55, 1  ;;  %v1119_v61 = vperm.slane %v1587_v58, 0  ;;  %v1120_v62 = vperm.slane %v1587_v58, 1 }
 0x168   : > { %v1112_v0 = vmul.f32 %v1108_v56, %v1102_v53  ;;  %v1113_v1 = vmul.f32 %v1109_v57, %v1103_v54  ;;  %v1114_v4 = vmul.f32 %v1108_v56, %v1104_v59 }
 0x16a   : > { %v1105_v63 = vld [vmem:[#allocation2 + $0x8] sm:$0xff]  ;;  %v1123_v7 = vadd.f32 %v1119_v61, %v1112_v0  ;;  %v1124_v8 = vadd.f32 %v1120_v62, %v1113_v1  ;;  %v1125_v9 = vadd.f32 %v1119_v61, %v1114_v4 }
 0x16b   : > { %v1115_v6 = vmul.f32 %v1109_v57, %v1105_v63 }
 0x16c   : > { %v1127_v11 = vmax.f32 %v1123_v7, 0.0  ;;  %v1128_v12 = vmax.f32 %v1124_v8, 0.0  ;;  %v1129_v13 = vmax.f32 %v1125_v9, 0.0 }
 0x16d   : > { %v1126_v10 = vadd.f32 %v1120_v62, %v1115_v6 }
 0x16e   : > { %v1131_v15 = vpack.c.bf16 %v1128_v12, %v1127_v11 }
 0x16f   : > { %v1130_v14 = vmax.f32 %v1126_v10, 0.0 }
 0x170   : > { %1133 = vst [vmem:[%s2123_s24] sm:$0xff] %v1131_v15 }
 0x171   : > { %v1132_v16 = vpack.c.bf16 %v1130_v14, %v1129_v13 }
 0x173   : > { %1134 = vst [vmem:[%s2123_s24 + $0x8] sm:$0xff] %v1132_v16 }
 0x174 PF: > { %1141 = sbr.rel (!%p1956_p12) target bundleno = 380 (0x17c), region = 105  ;;  %s1663_s1 = sshll.u32 (%p1956_p12), %s1827_s19, 3 }
 0x175   : > { %s1147_s16 = scalar_lea.vmem (%p1956_p12), %s2327_s3, %s1663_s1 }
 0x177   : > { %v1178_v17 = vld [vmem:[%s2123_s24] sm:$0xff] (%p1956_p12) }
 0x178   : > { %1179 = vst [vmem:[%s1147_s16] sm:$0xff] (%p1956_p12), %v1178_v17 }
 0x17a   : > { %v1180_v18 = vld [vmem:[%s2123_s24 + $0x8] sm:$0xff] }
 0x17b   : > { %1181 = vst [vmem:[%s1147_s16 + $0x10] sm:$0xff] %v1180_v18 }
 0x17c PF: > { %s13_s22 = sadd.s32 1, %s1839_s22   ;;  %s2339_s24 = sld [smem:[#allocation6_spill]] }
 0x17d   : > { %p10_p6 = scmp.ge.s32.totalorder %s13_s22, 20   ;;  %s2340_s25 = sld [smem:[#allocation7_spill]] }
 0x17e   : > { %s2341_s12 = smov %s1803_s13  ;;  %s2342_s13 = smov %s1954_s9 }
 0x17f   : > { %s2343_s14 = smov %s1811_s15  ;;  %s2344_s15 = smov %s1951_s8 }
 0x180   : > { %s2345_s16 = smov %s1819_s17  ;;  %s2346_s17 = smov %s1937_s30 }
 0x181   : > { %s2347_s18 = smov %s1831_s20  ;;  %s2348_s19 = smov %s1835_s21 }
 0x182   : > { %s2349_s20 = smov %s2339_s24  ;;  %12 = sbr.rel (!%p10_p6) target bundleno = 9 (0x9), region = 186 }
 0x183   : > { %s2350_s21 = smov %s2340_s25 }

// kernel: resnet_forward.40
= control target key start
LH: loop header
LB: loop body
LE: loop exit
PB: predicated region body
PF: predicated region fallthrough
CT: control target
= control target key end

     0   :  { %s2484_s0 = inlined_call_operand.vmem [shape: bf16[16,4608], index: 0, kind: input, shape index: {}]   ;;  %s2485_s1 = inlined_call_operand.vmem [shape: bf16[4608,512], index: 1, kind: input, shape index: {}]   ;;  %s2486_s2 = inlined_call_operand.vmem [shape: f32[2,512], index: 2, kind: input, shape index: {}]   ;;  %s2487_s3 = inlined_call_operand.vmem [shape: bf16[16,512], index: 3, kind: input, shape index: {}]   ;;  %s2488_s4 = inlined_call_operand.vmem [shape: bf16[16,512], index: 4, kind: output, shape index: {}]  }
   0x1   :  { %2491 = sst [smem:[#allocation9_spill]] %s2484_s0 }
   0x2   :  { %s1997_s15 = smov 0   ;;  %s1999_s16 = smov 0  }
   0x3   :  { %s2001_s17 = smov 0   ;;  %s2003_s18 = smov 0  }
   0x4   :  { %s2005_s19 = smov 0   ;;  %s2007_s20 = smov 0  }
   0x5   :  { %s2009_s21 = smov 0   ;;  %s2011_s22 = smov 0  }
   0x6   :  { %s2013_s23 = smov 0   ;;  %s2015_s24 = smov 0  }
   0x7   :  { %s2017_s25 = smov 0  }
   0x8 LB: > { %s1420_s26 = sadd.s32 4294967295, %s1969_s25   ;;  %s26_s27 = sadd.s32 1, %s1961_s23  ;;  %s1969_s25 = sphi %s2017_s25, %s14_s25   ;;  %s1965_s24 = sphi %s2015_s24, %s2510_s24   ;;  %s1961_s23 = sphi %s2013_s23, %s2509_s23   ;;  %s1957_s22 = sphi %s2011_s22, %s2508_s22   ;;  %s1953_s21 = sphi %s2009_s21, %s2507_s21   ;;  %s1949_s20 = sphi %s2007_s20, %s2506_s20   ;;  %s1945_s19 = sphi %s2005_s19, %s2505_s19   ;;  %s1941_s18 = sphi %s2003_s18, %s2504_s18   ;;  %s1937_s17 = sphi %s2001_s17, %s2503_s17   ;;  %s1933_s16 = sphi %s1999_s16, %s2502_s16   ;;  %s1929_s15 = sphi %s1997_s15, %s2501_s15  }
   0x9   : > { %p27_p0 = scmp.ge.s32.totalorder %s26_s27, 9  ;;  %s29_s28 = sadd.s32 1, %s1965_s24 }
   0xa   : > { %s42_s29 = sadd.s32 1, %s1949_s20  ;;  %p49_p1 = scmp.ne.s32.totalorder %s1949_s20, %s1945_s19 }
   0xb   : > { %s2512_s27 = smov (%p27_p0, %s26_s27), 0  ;;  %s2514_s28 = smov (!%p27_p0, %s29_s28), %s1965_s24 }
   0xc   : > { %2492 = sst [smem:[#allocation7_spill]] %s2512_s27  ;;  %s38_s30 = ssub.s32 %s1961_s23, %s2512_s27 }
   0xd   : > { %p50_p2 = scmp.eq.s32.totalorder %s1969_s25, 0  ;;  %p31_p3 = scmp.ge.s32.totalorder %s2514_s28, 2 }
   0xe   : > { %p40_p4 = scmp.eq.s32.totalorder %s38_s30, 0  ;;  %s70_s6 = sadd.s32 1, %s1941_s18 }
   0xf   : > { %p2066_p5 = por %p50_p2, %p49_p1  ;;  %s2516_s28 = smov (%p31_p3, %s2514_s28), 0 }
  0x10   : > { %2494 = sst [smem:[#allocation8_spill]] %s2516_s28  ;;  %s66_s8 = ssub.s32 %s1965_s24, %s2516_s28 }
  0x11   : > { %s2074_s7 = scalar_select %p40_p4, %s1949_s20, %s42_s29  }
  0x12   : > { %p77_p6 = scmp.ne.s32.totalorder %s1941_s18, %s1937_s17  ;;  %s67_s9 = sor.u32 %s66_s8, %s38_s30 }
  0x13   : > { %p122_p7 = scmp.eq.s32.totalorder %s66_s8, 0  ;;  %p68_p8 = scmp.eq.s32.totalorder %s67_s9, 0 }
  0x14   : > { %p2082_p9 = por %p77_p6, %p50_p2  ;;  %s124_s11 = sadd.s32 1, %s1933_s16 }
  0x15   : > { %p131_p10 = scmp.ne.s32.totalorder %s1933_s16, %s1929_s15  ;;  %p163_p12 = scmp.eq.s32.totalorder %s1420_s26, 17 }
  0x16   : > { %s2090_s12 = scalar_select %p68_p8, %s1941_s18, %s70_s6  }
  0x17   : > { %s2093_s13 = scalar_select %p122_p7, %s1933_s16, %s124_s11  }
  0x18   : > { %p2097_p11 = por %p131_p10, %p50_p2  ;;  %p2101_p13 = por %p163_p12, %p131_p10 }
  0x19   : > { %p1423_p0 = scmp.ge.s32.totalorder %s1969_s25, 18 }
  0x1b   : > { %185 = sbr.rel (%p1423_p0) target bundleno = 123 (0x7b), region = 16 }
  0x20   : > { %188 = sbr.rel (!%p2066_p5) target bundleno = 46 (0x2e), region = 20  ;;  %s190_s30 = sand.u32 (%p2066_p5), 1, %s1949_s20  }
  0x21   : > { %s1722_s6 = sshll.u32 (%p2066_p5), %s1961_s23, 4  ;;  %s1424_s8 = sshll.u32 (%p2066_p5), %s190_s30, 5 }
  0x22   : > { %s2498_s0 = sld [smem:[#allocation9_spill]] (%p2066_p5)  ;;  %s192_s26 = scalar_lea.vmem (%p2066_p5), [#allocation3], %s1424_s8 }
  0x28   : > { %s198_s28 = scalar_lea.vmem %s2498_s0, %s1722_s6 }
  0x29   : > { %v211_v0 = vld [vmem:[%s198_s28] sm:$0xff]  ;;  %v213_v1 = vld [vmem:[%s198_s28 + $0x8] sm:$0xff]  ;;  %v215_v2 = vld [vmem:[%s198_s28 + $0x90] sm:$0xff] }
  0x2a   : > { %212 = vst [vmem:[%s192_s26] sm:$0xff] %v211_v0  ;;  %v217_v3 = vld [vmem:[%s198_s28 + $0x98] sm:$0xff] }
  0x2b   : > { %214 = vst [vmem:[%s192_s26 + $0x8] sm:$0xff] %v213_v1 }
  0x2c   : > { %216 = vst [vmem:[%s192_s26 + $0x10] sm:$0xff] %v215_v2 }
  0x2d   : > { %218 = vst [vmem:[%s192_s26 + $0x18] sm:$0xff] %v217_v3 }
  0x2e PF: > { %224 = sbr.rel (!%p2082_p9) target bundleno = 117 (0x75), region = 43  ;;  %s226_s5 = sand.u32 (%p2082_p9), 1, %s1941_s18  }
  0x2f   : > { %s1429_s30 = sshll.u32 (%p2082_p9), %s1965_s24, 1  ;;  %s1427_s9 = sshll.u32 (%p2082_p9), %s226_s5, 9 }
  0x30   : > { %s1723_s6 = sshll.u32 (%p2082_p9), %s1961_s23, 8  ;;  %s2126_s10 = scalar_lea.vmem (%p2082_p9), [#allocation4], %s1427_s9 }
  0x31   : > { %s232_s11 = sadd.s32 (%p2082_p9), %s1723_s6, %s1429_s30 }
  0x32   : > { %s1431_s0 = sshll.u32 (%p2082_p9), %s232_s11, 2 }
  0x33   : > { %s2121_s28 = scalar_lea.vmem %s2485_s1, %s1431_s0 }
  0x34   : > { %v389_v4 = vld [vmem:[%s2121_s28] sm:$0xff]  ;;  %v391_v5 = vld [vmem:[%s2121_s28 + $0x10] sm:$0xff] }
  0x35   : > { %v393_v6 = vld [vmem:[%s2121_s28 + $0x20] sm:$0xff]  ;;  %390 = vst [vmem:[%s2126_s10] sm:$0xff] %v389_v4  ;;  %v395_v7 = vld [vmem:[%s2121_s28 + $0x30] sm:$0xff] }
  0x36   : > { %392 = vst [vmem:[%s2126_s10 + $0x8] sm:$0xff] %v391_v5  ;;  %v397_v8 = vld [vmem:[%s2121_s28 + $0x40] sm:$0xff]  ;;  %v399_v9 = vld [vmem:[%s2121_s28 + $0x50] sm:$0xff] }
  0x37   : > { %394 = vst [vmem:[%s2126_s10 + $0x10] sm:$0xff] %v393_v6  ;;  %v401_v10 = vld [vmem:[%s2121_s28 + $0x60] sm:$0xff]  ;;  %v403_v11 = vld [vmem:[%s2121_s28 + $0x70] sm:$0xff] }
  0x38   : > { %396 = vst [vmem:[%s2126_s10 + $0x18] sm:$0xff] %v395_v7  ;;  %v405_v12 = vld [vmem:[%s2121_s28 + $0x80] sm:$0xff]  ;;  %v407_v13 = vld [vmem:[%s2121_s28 + $0x90] sm:$0xff] }
  0x39   : > { %398 = vst [vmem:[%s2126_s10 + $0x20] sm:$0xff] %v397_v8  ;;  %v409_v14 = vld [vmem:[%s2121_s28 + $0xa0] sm:$0xff]  ;;  %v411_v15 = vld [vmem:[%s2121_s28 + $0xb0] sm:$0xff] }
  0x3a   : > { %400 = vst [vmem:[%s2126_s10 + $0x28] sm:$0xff] %v399_v9  ;;  %v413_v16 = vld [vmem:[%s2121_s28 + $0xc0] sm:$0xff]  ;;  %v415_v17 = vld [vmem:[%s2121_s28 + $0xd0] sm:$0xff] }
  0x3b   : > { %402 = vst [vmem:[%s2126_s10 + $0x30] sm:$0xff] %v401_v10  ;;  %v417_v18 = vld [vmem:[%s2121_s28 + $0xe0] sm:$0xff]  ;;  %v419_v19 = vld [vmem:[%s2121_s28 + $0xf0] sm:$0xff] }
  0x3c   : > { %404 = vst [vmem:[%s2126_s10 + $0x38] sm:$0xff] %v403_v11  ;;  %v421_v20 = vld [vmem:[%s2121_s28 + $0x100] sm:$0xff]  ;;  %v423_v21 = vld [vmem:[%s2121_s28 + $0x110] sm:$0xff] }
  0x3d   : > { %406 = vst [vmem:[%s2126_s10 + $0x40] sm:$0xff] %v405_v12  ;;  %v425_v22 = vld [vmem:[%s2121_s28 + $0x120] sm:$0xff]  ;;  %v427_v23 = vld [vmem:[%s2121_s28 + $0x130] sm:$0xff] }
  0x3e   : > { %408 = vst [vmem:[%s2126_s10 + $0x48] sm:$0xff] %v407_v13  ;;  %v429_v24 = vld [vmem:[%s2121_s28 + $0x140] sm:$0xff]  ;;  %v431_v25 = vld [vmem:[%s2121_s28 + $0x150] sm:$0xff] }
  0x3f   : > { %410 = vst [vmem:[%s2126_s10 + $0x50] sm:$0xff] %v409_v14  ;;  %v433_v26 = vld [vmem:[%s2121_s28 + $0x160] sm:$0xff]  ;;  %v435_v27 = vld [vmem:[%s2121_s28 + $0x170] sm:$0xff] }
  0x40   : > { %412 = vst [vmem:[%s2126_s10 + $0x58] sm:$0xff] %v411_v15  ;;  %v437_v28 = vld [vmem:[%s2121_s28 + $0x180] sm:$0xff]  ;;  %v439_v29 = vld [vmem:[%s2121_s28 + $0x190] sm:$0xff] }
  0x41   : > { %414 = vst [vmem:[%s2126_s10 + $0x60] sm:$0xff] %v413_v16  ;;  %v441_v30 = vld [vmem:[%s2121_s28 + $0x1a0] sm:$0xff]  ;;  %v443_v31 = vld [vmem:[%s2121_s28 + $0x1b0] sm:$0xff] }
  0x42   : > { %416 = vst [vmem:[%s2126_s10 + $0x68] sm:$0xff] %v415_v17  ;;  %v445_v32 = vld [vmem:[%s2121_s28 + $0x1c0] sm:$0xff]  ;;  %v447_v33 = vld [vmem:[%s2121_s28 + $0x1d0] sm:$0xff] }
  0x43   : > { %418 = vst [vmem:[%s2126_s10 + $0x70] sm:$0xff] %v417_v18  ;;  %v449_v34 = vld [vmem:[%s2121_s28 + $0x1e0] sm:$0xff]  ;;  %v451_v35 = vld [vmem:[%s2121_s28 + $0x1f0] sm:$0xff] }
  0x44   : > { %420 = vst [vmem:[%s2126_s10 + $0x78] sm:$0xff] %v419_v19  ;;  %v453_v36 = vld [vmem:[%s2121_s28 + $0x200] sm:$0xff]  ;;  %v455_v37 = vld [vmem:[%s2121_s28 + $0x210] sm:$0xff] }
  0x45   : > { %422 = vst [vmem:[%s2126_s10 + $0x80] sm:$0xff] %v421_v20  ;;  %v457_v38 = vld [vmem:[%s2121_s28 + $0x220] sm:$0xff]  ;;  %v459_v39 = vld [vmem:[%s2121_s28 + $0x230] sm:$0xff] }
  0x46   : > { %424 = vst [vmem:[%s2126_s10 + $0x88] sm:$0xff] %v423_v21  ;;  %v461_v40 = vld [vmem:[%s2121_s28 + $0x240] sm:$0xff]  ;;  %v463_v41 = vld [vmem:[%s2121_s28 + $0x250] sm:$0xff] }
  0x47   : > { %426 = vst [vmem:[%s2126_s10 + $0x90] sm:$0xff] %v425_v22  ;;  %v465_v42 = vld [vmem:[%s2121_s28 + $0x260] sm:$0xff]  ;;  %v467_v43 = vld [vmem:[%s2121_s28 + $0x270] sm:$0xff] }
  0x48   : > { %428 = vst [vmem:[%s2126_s10 + $0x98] sm:$0xff] %v427_v23  ;;  %v469_v44 = vld [vmem:[%s2121_s28 + $0x280] sm:$0xff]  ;;  %v471_v45 = vld [vmem:[%s2121_s28 + $0x290] sm:$0xff] }
  0x49   : > { %430 = vst [vmem:[%s2126_s10 + $0xa0] sm:$0xff] %v429_v24  ;;  %v473_v46 = vld [vmem:[%s2121_s28 + $0x2a0] sm:$0xff]  ;;  %v475_v47 = vld [vmem:[%s2121_s28 + $0x2b0] sm:$0xff] }
  0x4a   : > { %432 = vst [vmem:[%s2126_s10 + $0xa8] sm:$0xff] %v431_v25  ;;  %v477_v48 = vld [vmem:[%s2121_s28 + $0x2c0] sm:$0xff]  ;;  %v479_v49 = vld [vmem:[%s2121_s28 + $0x2d0] sm:$0xff] }
  0x4b   : > { %434 = vst [vmem:[%s2126_s10 + $0xb0] sm:$0xff] %v433_v26  ;;  %v481_v50 = vld [vmem:[%s2121_s28 + $0x2e0] sm:$0xff]  ;;  %v483_v51 = vld [vmem:[%s2121_s28 + $0x2f0] sm:$0xff] }
  0x4c   : > { %436 = vst [vmem:[%s2126_s10 + $0xb8] sm:$0xff] %v435_v27  ;;  %v485_v52 = vld [vmem:[%s2121_s28 + $0x300] sm:$0xff]  ;;  %v487_v53 = vld [vmem:[%s2121_s28 + $0x310] sm:$0xff] }
  0x4d   : > { %438 = vst [vmem:[%s2126_s10 + $0xc0] sm:$0xff] %v437_v28  ;;  %v489_v54 = vld [vmem:[%s2121_s28 + $0x320] sm:$0xff]  ;;  %v491_v55 = vld [vmem:[%s2121_s28 + $0x330] sm:$0xff] }
  0x4e   : > { %440 = vst [vmem:[%s2126_s10 + $0xc8] sm:$0xff] %v439_v29  ;;  %v493_v56 = vld [vmem:[%s2121_s28 + $0x340] sm:$0xff]  ;;  %v495_v57 = vld [vmem:[%s2121_s28 + $0x350] sm:$0xff] }
  0x4f   : > { %442 = vst [vmem:[%s2126_s10 + $0xd0] sm:$0xff] %v441_v30  ;;  %v497_v58 = vld [vmem:[%s2121_s28 + $0x360] sm:$0xff]  ;;  %v499_v59 = vld [vmem:[%s2121_s28 + $0x370] sm:$0xff] }
  0x50   : > { %444 = vst [vmem:[%s2126_s10 + $0xd8] sm:$0xff] %v443_v31  ;;  %v501_v60 = vld [vmem:[%s2121_s28 + $0x380] sm:$0xff]  ;;  %v503_v61 = vld [vmem:[%s2121_s28 + $0x390] sm:$0xff] }
  0x51   : > { %446 = vst [vmem:[%s2126_s10 + $0xe0] sm:$0xff] %v445_v32  ;;  %v505_v62 = vld [vmem:[%s2121_s28 + $0x3a0] sm:$0xff]  ;;  %v507_v63 = vld [vmem:[%s2121_s28 + $0x3b0] sm:$0xff] }
  0x52   : > { %448 = vst [vmem:[%s2126_s10 + $0xe8] sm:$0xff] %v447_v33  ;;  %v509_v0 = vld [vmem:[%s2121_s28 + $0x3c0] sm:$0xff]  ;;  %v511_v1 = vld [vmem:[%s2121_s28 + $0x3d0] sm:$0xff] }
  0x53   : > { %450 = vst [vmem:[%s2126_s10 + $0xf0] sm:$0xff] %v449_v34  ;;  %v513_v2 = vld [vmem:[%s2121_s28 + $0x3e0] sm:$0xff]  ;;  %v515_v3 = vld [vmem:[%s2121_s28 + $0x3f0] sm:$0xff] }
  0x54   : > { %452 = vst [vmem:[%s2126_s10 + $0xf8] sm:$0xff] %v451_v35 }
  0x55   : > { %454 = vst [vmem:[%s2126_s10 + $0x100] sm:$0xff] %v453_v36 }
  0x56   : > { %456 = vst [vmem:[%s2126_s10 + $0x108] sm:$0xff] %v455_v37 }
  0x57   : > { %458 = vst [vmem:[%s2126_s10 + $0x110] sm:$0xff] %v457_v38 }
  0x58   : > { %460 = vst [vmem:[%s2126_s10 + $0x118] sm:$0xff] %v459_v39 }
  0x59   : > { %462 = vst [vmem:[%s2126_s10 + $0x120] sm:$0xff] %v461_v40 }
  0x5a   : > { %464 = vst [vmem:[%s2126_s10 + $0x128] sm:$0xff] %v463_v41 }
  0x5b   : > { %466 = vst [vmem:[%s2126_s10 + $0x130] sm:$0xff] %v465_v42 }
  0x5c   : > { %468 = vst [vmem:[%s2126_s10 + $0x138] sm:$0xff] %v467_v43 }
  0x5d   : > { %470 = vst [vmem:[%s2126_s10 + $0x140] sm:$0xff] %v469_v44 }
  0x5e   : > { %472 = vst [vmem:[%s2126_s10 + $0x148] sm:$0xff] %v471_v45 }
  0x5f   : > { %474 = vst [vmem:[%s2126_s10 + $0x150] sm:$0xff] %v473_v46 }
  0x60   : > { %476 = vst [vmem:[%s2126_s10 + $0x158] sm:$0xff] %v475_v47 }
  0x61   : > { %478 = vst [vmem:[%s2126_s10 + $0x160] sm:$0xff] %v477_v48 }
  0x62   : > { %480 = vst [vmem:[%s2126_s10 + $0x168] sm:$0xff] %v479_v49 }
  0x63   : > { %482 = vst [vmem:[%s2126_s10 + $0x170] sm:$0xff] %v481_v50 }
  0x64   : > { %484 = vst [vmem:[%s2126_s10 + $0x178] sm:$0xff] %v483_v51 }
  0x65   : > { %486 = vst [vmem:[%s2126_s10 + $0x180] sm:$0xff] %v485_v52 }
  0x66   : > { %488 = vst [vmem:[%s2126_s10 + $0x188] sm:$0xff] %v487_v53 }
  0x67   : > { %490 = vst [vmem:[%s2126_s10 + $0x190] sm:$0xff] %v489_v54 }
  0x68   : > { %492 = vst [vmem:[%s2126_s10 + $0x198] sm:$0xff] %v491_v55 }
  0x69   : > { %494 = vst [vmem:[%s2126_s10 + $0x1a0] sm:$0xff] %v493_v56 }
  0x6a   : > { %496 = vst [vmem:[%s2126_s10 + $0x1a8] sm:$0xff] %v495_v57 }
  0x6b   : > { %498 = vst [vmem:[%s2126_s10 + $0x1b0] sm:$0xff] %v497_v58 }
  0x6c   : > { %500 = vst [vmem:[%s2126_s10 + $0x1b8] sm:$0xff] %v499_v59 }
  0x6d   : > { %502 = vst [vmem:[%s2126_s10 + $0x1c0] sm:$0xff] %v501_v60 }
  0x6e   : > { %504 = vst [vmem:[%s2126_s10 + $0x1c8] sm:$0xff] %v503_v61 }
  0x6f   : > { %506 = vst [vmem:[%s2126_s10 + $0x1d0] sm:$0xff] %v505_v62 }
  0x70   : > { %508 = vst [vmem:[%s2126_s10 + $0x1d8] sm:$0xff] %v507_v63 }
  0x71   : > { %510 = vst [vmem:[%s2126_s10 + $0x1e0] sm:$0xff] %v509_v0 }
  0x72   : > { %512 = vst [vmem:[%s2126_s10 + $0x1e8] sm:$0xff] %v511_v1 }
  0x73   : > { %514 = vst [vmem:[%s2126_s10 + $0x1f0] sm:$0xff] %v513_v2 }
  0x74   : > { %516 = vst [vmem:[%s2126_s10 + $0x1f8] sm:$0xff] %v515_v3 }
  0x75 PF: > { %531 = sbr.rel (!%p2097_p11) target bundleno = 123 (0x7b), region = 85  ;;  %s533_s0 = sand.u32 (%p2097_p11), 1, %s1933_s16  }
  0x76   : > { %s1724_s27 = sshll.u32 (%p2097_p11), %s1965_s24, 3  ;;  %s1432_s26 = sshll.u32 (%p2097_p11), %s533_s0, 4 }
  0x77   : > { %s541_s9 = scalar_lea.vmem (%p2097_p11), %s2487_s3, %s1724_s27  ;;  %s535_s6 = scalar_lea.vmem (%p2097_p11), [#allocation5], %s1432_s26 }
  0x78   : > { %v572_v4 = vld [vmem:[%s541_s9] sm:$0xff] (%p2097_p11)  ;;  %v574_v5 = vld [vmem:[%s541_s9 + $0x10] sm:$0xff] (%p2097_p11) }
  0x79   : > { %573 = vst [vmem:[%s535_s6] sm:$0xff] (%p2097_p11), %v572_v4 }
  0x7a   : > { %575 = vst [vmem:[%s535_s6 + $0x8] sm:$0xff] %v574_v5 }
  0x7b PF: > { %p1435_p1 = scmp.ge.s32.totalorder %s1969_s25, 1  ;;  %p580_p2 = scmp.lt.s32.totalorder %s1969_s25, 19 }
  0x7d   : > { %p581_p3 = pnand %p1435_p1, %p580_p2 }
  0x7e   : > { %s587_s14 = sand.u32 (!%p581_p3), 1, %s1945_s19   ;;  %s594_s11 = sand.u32 (!%p581_p3), 1, %s1937_s17  }
  0x7f   : > { %584 = sbr.rel (%p581_p3) target bundleno = 386 (0x182), region = 123  ;;  %s1436_s8 = sshll.u32 (!%p581_p3), %s587_s14, 5 }
  0x80   : > { %s1437_s28 = sshll.u32 (!%p581_p3), %s594_s11, 9  ;;  %s601_s10 = sand.u32 (!%p581_p3), 1, %s1929_s15  }
  0x81   : > { %s1440_s0 = sshll.u32 (!%p581_p3), %s1957_s22, 1  ;;  %s2266_s27 = sshll.u32 (!%p581_p3), %s601_s10, 4 }
  0x82   : > { %p643_p4 = scmp.lt.s32.totalorder (!%p581_p3), %s1440_s0, 3  ;;  %s2273_s6 = scalar_lea.vmem (!%p581_p3), [#allocation3], %s1436_s8 }
  0x83   : > { %s2275_s19 = scalar_lea.vmem (!%p581_p3), [#allocation4], %s1437_s28  ;;  %s603_s17 = scalar_lea.vmem (!%p581_p3), [#allocation5], %s2266_s27 }
  0x84   : > { %s2518_s0 = smov (!%p643_p4, %s1440_s0), 3  ;;  %s2279_s14 = scalar_lea.vmem [#allocation6], %s2266_s27 }
  0x85   : > { %s1441_s26 = sshll.u32 %s2518_s0, 1  ;;  %p1442_p5 = scmp.ne.s32.totalorder %s1953_s21, 0 }
  0x86   : > { %s2271_s9 = scalar_lea.vmem %s2486_s2, %s1441_s26 }
  0x87   : > { %655 = sbr.rel (%p1442_p5) target bundleno = 145 (0x91), region = 139 }
  0x8c   : > { %v1971_v6 = vmov 0.0  }
  0x8d   : > { %656 = vst [vmem:[#allocation2 + $0x10] sm:$0xff] %v1971_v6 }
  0x8e   : > { %657 = vst [vmem:[#allocation2] sm:$0xff] %v1971_v6 }
  0x8f   : > { %658 = vst [vmem:[#allocation2 + $0x18] sm:$0xff] %v1971_v6 }
  0x90   : > { %659 = vst [vmem:[#allocation2 + $0x8] sm:$0xff] %v1971_v6 }
  0x91 PF: > { %v1517_v7 = vld [vmem:[%s2275_s19 + $0x70] sm:$0xf]  ;;  %v1744_v8 = vld [vmem:[%s2275_s19 + $0x74] sm:$0xf0]  ;;  %v1509_v18 = vld [vmem:[%s2275_s19 + $0x60] sm:$0xf] }
  0x92   : > { %v1581_v9 = vld [vmem:[%s2275_s19 + $0xf0] sm:$0xf]  ;;  %v1518_v10 = vor.u32 %v1744_v8, %v1517_v7  ;;  %v1760_v11 = vld [vmem:[%s2275_s19 + $0xf4] sm:$0xf0]  ;;  %v1742_v20 = vld [vmem:[%s2275_s19 + $0x64] sm:$0xf0] }
  0x93   : > { %v1645_v12 = vld [vmem:[%s2275_s19 + $0x170] sm:$0xf]  ;;  %v1776_v13 = vld [vmem:[%s2275_s19 + $0x174] sm:$0xf0]  ;;  %v1582_v14 = vor.u32 %v1760_v11, %v1581_v9  ;;  %v1573_v21 = vld [vmem:[%s2275_s19 + $0xe0] sm:$0xf]  ;;  %v1510_v23 = vor.u32 %v1742_v20, %v1509_v18 }
  0x94   : > { %v1646_v15 = vor.u32 %v1776_v13, %v1645_v12  ;;  %v1709_v16 = vld [vmem:[%s2275_s19 + $0x1f0] sm:$0xf]  ;;  %v1792_v17 = vld [vmem:[%s2275_s19 + $0x1f4] sm:$0xf0]  ;;  %1072 = vmatpush.bf16.msra.mxu0 %v1518_v10  ;;  %v1758_v22 = vld [vmem:[%s2275_s19 + $0xe4] sm:$0xf0] }
  0x95   : > { %v1710_v19 = vor.u32 %v1792_v17, %v1709_v16  ;;  %1086 = vmatpush.bf16.msra.mxu1 %v1582_v14  ;;  %v1574_v24 = vor.u32 %v1758_v22, %v1573_v21  ;;  %v1637_v25 = vld [vmem:[%s2275_s19 + $0x160] sm:$0xf]  ;;  %v1774_v26 = vld [vmem:[%s2275_s19 + $0x164] sm:$0xf0]  ;;  %v1501_v30 = vld [vmem:[%s2275_s19 + $0x50] sm:$0xf] }
  0x96   : > { %1100 = vmatpush.bf16.msra.mxu2 %v1646_v15  ;;  %v1701_v27 = vld [vmem:[%s2275_s19 + $0x1e0] sm:$0xf]  ;;  %v1638_v28 = vor.u32 %v1774_v26, %v1637_v25  ;;  %v1790_v29 = vld [vmem:[%s2275_s19 + $0x1e4] sm:$0xf0]  ;;  %v1740_v31 = vld [vmem:[%s2275_s19 + $0x54] sm:$0xf0] }
  0x97   : > { %1114 = vmatpush.bf16.msra.mxu3 %v1710_v19  ;;  %v1702_v32 = vor.u32 %v1790_v29, %v1701_v27  ;;  %v1565_v33 = vld [vmem:[%s2275_s19 + $0xd0] sm:$0xf]  ;;  %v1756_v34 = vld [vmem:[%s2275_s19 + $0xd4] sm:$0xf0]  ;;  %v1502_v36 = vor.u32 %v1740_v31, %v1501_v30  ;;  %v1493_v42 = vld [vmem:[%s2275_s19 + $0x40] sm:$0xf] }
  0x98   : > { %v1629_v35 = vld [vmem:[%s2275_s19 + $0x150] sm:$0xf]  ;;  %1073 = vmatpush.bf16.msra.mxu0 %v1510_v23  ;;  %v1772_v37 = vld [vmem:[%s2275_s19 + $0x154] sm:$0xf0]  ;;  %v1566_v40 = vor.u32 %v1756_v34, %v1565_v33  ;;  %v1738_v43 = vld [vmem:[%s2275_s19 + $0x44] sm:$0xf0] }
  0x99   : > { %v1693_v38 = vld [vmem:[%s2275_s19 + $0x1d0] sm:$0xf]  ;;  %v1788_v39 = vld [vmem:[%s2275_s19 + $0x1d4] sm:$0xf0]  ;;  %1087 = vmatpush.bf16.msra.mxu1 %v1574_v24  ;;  %v1630_v41 = vor.u32 %v1772_v37, %v1629_v35  ;;  %v1557_v44 = vld [vmem:[%s2275_s19 + $0xc0] sm:$0xf]  ;;  %v1494_v51 = vor.u32 %v1738_v43, %v1493_v42 }
  0x9a   : > { %1101 = vmatpush.bf16.msra.mxu2 %v1638_v28  ;;  %v1694_v45 = vor.u32 %v1788_v39, %v1693_v38  ;;  %v1754_v46 = vld [vmem:[%s2275_s19 + $0xc4] sm:$0xf0]  ;;  %v1621_v47 = vld [vmem:[%s2275_s19 + $0x140] sm:$0xf]  ;;  %v1485_v54 = vld [vmem:[%s2275_s19 + $0x30] sm:$0xf] }
  0x9b   : > { %1115 = vmatpush.bf16.msra.mxu3 %v1702_v32  ;;  %v1770_v48 = vld [vmem:[%s2275_s19 + $0x144] sm:$0xf0]  ;;  %v1685_v49 = vld [vmem:[%s2275_s19 + $0x1c0] sm:$0xf]  ;;  %v1558_v52 = vor.u32 %v1754_v46, %v1557_v44  ;;  %v1736_v55 = vld [vmem:[%s2275_s19 + $0x34] sm:$0xf0] }
  0x9c   : > { %v1786_v50 = vld [vmem:[%s2275_s19 + $0x1c4] sm:$0xf0]  ;;  %1074 = vmatpush.bf16.msra.mxu0 %v1502_v36  ;;  %v1622_v53 = vor.u32 %v1770_v48, %v1621_v47  ;;  %v1549_v56 = vld [vmem:[%s2275_s19 + $0xb0] sm:$0xf]  ;;  %v1752_v58 = vld [vmem:[%s2275_s19 + $0xb4] sm:$0xf0]  ;;  %v1486_v63 = vor.u32 %v1736_v55, %v1485_v54 }
  0x9d   : > { %1088 = vmatpush.bf16.msra.mxu1 %v1566_v40  ;;  %v1686_v57 = vor.u32 %v1786_v50, %v1685_v49  ;;  %v1613_v59 = vld [vmem:[%s2275_s19 + $0x130] sm:$0xf]  ;;  %v1768_v60 = vld [vmem:[%s2275_s19 + $0x134] sm:$0xf0]  ;;  %v1550_v0 = vor.u32 %v1752_v58, %v1549_v56  ;;  %v1477_v2 = vld [vmem:[%s2275_s19 + $0x20] sm:$0xf] }
  0x9e   : > { %1102 = vmatpush.bf16.msra.mxu2 %v1630_v41  ;;  %v1677_v61 = vld [vmem:[%s2275_s19 + $0x1b0] sm:$0xf]  ;;  %v1784_v62 = vld [vmem:[%s2275_s19 + $0x1b4] sm:$0xf0]  ;;  %v1614_v1 = vor.u32 %v1768_v60, %v1613_v59  ;;  %v1734_v3 = vld [vmem:[%s2275_s19 + $0x24] sm:$0xf0] }
  0x9f   : > { %1116 = vmatpush.bf16.msra.mxu3 %v1694_v45  ;;  %v1541_v4 = vld [vmem:[%s2275_s19 + $0xa0] sm:$0xf]  ;;  %v1678_v5 = vor.u32 %v1784_v62, %v1677_v61  ;;  %v1750_v6 = vld [vmem:[%s2275_s19 + $0xa4] sm:$0xf0]  ;;  %v1478_v11 = vor.u32 %v1734_v3, %v1477_v2  ;;  %v1469_v14 = vld [vmem:[%s2275_s19 + $0x10] sm:$0xf] }
  0xa0   : > { %1075 = vmatpush.bf16.msra.mxu0 %v1494_v51  ;;  %v1605_v7 = vld [vmem:[%s2275_s19 + $0x120] sm:$0xf]  ;;  %v1766_v8 = vld [vmem:[%s2275_s19 + $0x124] sm:$0xf0]  ;;  %v1542_v12 = vor.u32 %v1750_v6, %v1541_v4  ;;  %v1732_v15 = vld [vmem:[%s2275_s19 + $0x14] sm:$0xf0] }
  0xa1   : > { %1089 = vmatpush.bf16.msra.mxu1 %v1558_v52  ;;  %v1669_v9 = vld [vmem:[%s2275_s19 + $0x1a0] sm:$0xf]  ;;  %v1782_v10 = vld [vmem:[%s2275_s19 + $0x1a4] sm:$0xf0]  ;;  %v1606_v13 = vor.u32 %v1766_v8, %v1605_v7  ;;  %v1533_v16 = vld [vmem:[%s2275_s19 + $0x90] sm:$0xf]  ;;  %v1470_v24 = vor.u32 %v1732_v15, %v1469_v14 }
  0xa2   : > { %1103 = vmatpush.bf16.msra.mxu2 %v1622_v53  ;;  %v1670_v17 = vor.u32 %v1782_v10, %v1669_v9  ;;  %v1748_v18 = vld [vmem:[%s2275_s19 + $0x94] sm:$0xf0]  ;;  %v1597_v19 = vld [vmem:[%s2275_s19 + $0x110] sm:$0xf]  ;;  %v1461_v23 = vld [vmem:[%s2275_s19] sm:$0xf] }
  0xa3   : > { %1117 = vmatpush.bf16.msra.mxu3 %v1686_v57  ;;  %v1764_v20 = vld [vmem:[%s2275_s19 + $0x114] sm:$0xf0]  ;;  %v1661_v21 = vld [vmem:[%s2275_s19 + $0x190] sm:$0xf]  ;;  %v1730_v25 = vld [vmem:[%s2275_s19 + $0x4] sm:$0xf0]  ;;  %v1534_v28 = vor.u32 %v1748_v18, %v1533_v16 }
  0xa4   : > { %1076 = vmatpush.bf16.msra.mxu0 %v1486_v63  ;;  %v1780_v22 = vld [vmem:[%s2275_s19 + $0x194] sm:$0xf0]  ;;  %v1525_v26 = vld [vmem:[%s2275_s19 + $0x80] sm:$0xf]  ;;  %v1746_v27 = vld [vmem:[%s2275_s19 + $0x84] sm:$0xf0]  ;;  %v1598_v29 = vor.u32 %v1764_v20, %v1597_v19  ;;  %v1462_v40 = vor.u32 %v1730_v25, %v1461_v23 }
  0xa5   : > { %1090 = vmatpush.bf16.msra.mxu1 %v1550_v0  ;;  %v1589_v30 = vld [vmem:[%s2275_s19 + $0x100] sm:$0xf]  ;;  %v1762_v31 = vld [vmem:[%s2275_s19 + $0x104] sm:$0xf0]  ;;  %v1662_v33 = vor.u32 %v1780_v22, %v1661_v21  ;;  %v1743_v35 = vld [vmem:[%s2275_s19 + $0x74] sm:$0xf]  ;;  %v1526_v44 = vor.u32 %v1746_v27, %v1525_v26 }
  0xa6   : > { %1104 = vmatpush.bf16.msra.mxu2 %v1614_v1  ;;  %v1653_v32 = vld [vmem:[%s2275_s19 + $0x180] sm:$0xf]  ;;  %v1778_v34 = vld [vmem:[%s2275_s19 + $0x184] sm:$0xf0]  ;;  %v1519_v36 = vld [vmem:[%s2275_s19 + $0x78] sm:$0xf0]  ;;  %v1590_v45 = vor.u32 %v1762_v31, %v1589_v30 }
  0xa7   : > { %1118 = vmatpush.bf16.msra.mxu3 %v1678_v5  ;;  %v1759_v37 = vld [vmem:[%s2275_s19 + $0xf4] sm:$0xf]  ;;  %v1583_v38 = vld [vmem:[%s2275_s19 + $0xf8] sm:$0xf0]  ;;  %v1741_v46 = vld [vmem:[%s2275_s19 + $0x64] sm:$0xf]  ;;  %v1654_v50 = vor.u32 %v1778_v34, %v1653_v32  ;;  %v1522_v51 = vor.u32 %v1743_v35, %v1519_v36 }
  0xa8   : > { %1077 = vmatpush.bf16.msra.mxu0 %v1478_v11  ;;  %v1775_v39 = vld [vmem:[%s2275_s19 + $0x174] sm:$0xf]  ;;  %v1647_v41 = vld [vmem:[%s2275_s19 + $0x178] sm:$0xf0]  ;;  %v1511_v47 = vld [vmem:[%s2275_s19 + $0x68] sm:$0xf0]  ;;  %v1586_v56 = vor.u32 %v1759_v37, %v1583_v38 }
  0xa9   : > { %1091 = vmatpush.bf16.msra.mxu1 %v1542_v12  ;;  %v1791_v42 = vld [vmem:[%s2275_s19 + $0x1f4] sm:$0xf]  ;;  %v1711_v43 = vld [vmem:[%s2275_s19 + $0x1f8] sm:$0xf0]  ;;  %v1453_v48 = vld [vmem:[%s2273_s6 + $0x8] sm:$0xf]  ;;  %v1650_v57 = vor.u32 %v1775_v39, %v1647_v41  ;;  %v1514_v6 = vor.u32 %v1741_v46, %v1511_v47 }
  0xaa   : > { %1105 = vmatpush.bf16.msra.mxu2 %v1606_v13  ;;  %v1728_v49 = vld [vmem:[%s2273_s6 + $0x14] sm:$0xf0]  ;;  %v1757_v52 = vld [vmem:[%s2275_s19 + $0xe4] sm:$0xf]  ;;  %v1575_v53 = vld [vmem:[%s2275_s19 + $0xe8] sm:$0xf0]  ;;  %v1714_v61 = vor.u32 %v1791_v42, %v1711_v43 }
  0xab   : > { %1119 = vmatpush.bf16.msra.mxu3 %v1670_v17  ;;  %v1773_v54 = vld [vmem:[%s2275_s19 + $0x164] sm:$0xf]  ;;  %v1639_v55 = vld [vmem:[%s2275_s19 + $0x168] sm:$0xf0]  ;;  %v1455_v59 = vld [vmem:[%s2273_s6 + $0x18] sm:$0xf0]  ;;  %v2365_v62 = vor.u32 %v1728_v49, %v1453_v48  ;;  %v1578_v8 = vor.u32 %v1757_v52, %v1575_v53 }
  0xac   : > { %1078 = vmatpush.bf16.msra.mxu0 %v1470_v24  ;;  %v1726_v58 = vld [vmem:[%s2273_s6 + $0xc] sm:$0xf]  ;;  %v1445_v60 = vld [vmem:[%s2273_s6] sm:$0xf]  ;;  %v1727_v63 = vld [vmem:[%s2273_s6 + $0xc] sm:$0xf0]  ;;  %v1642_v9 = vor.u32 %v1773_v54, %v1639_v55 }
  0xad   : > { %1092 = vmatpush.bf16.msra.mxu1 %v1534_v28  ;;  %v1725_v0 = vld [vmem:[%s2273_s6 + $0x4] sm:$0xf]  ;;  %v1447_v1 = vld [vmem:[%s2273_s6 + $0x10] sm:$0xf0]  ;;  %v1703_v3 = vld [vmem:[%s2275_s19 + $0x1e8] sm:$0xf0]  ;;  %v2372_v4 = vor.u32 %v1726_v58, %v1455_v59  ;;  %v2374_v5 = vor.u32 %v1727_v63, %v1445_v60 }
  0xae   : > { %1106 = vmatpush.bf16.msra.mxu2 %v1598_v29  ;;  %v1789_v2 = vld [vmem:[%s2275_s19 + $0x1e4] sm:$0xf]  ;;  %v2376_v7 = vor.u32 %v1725_v0, %v1447_v1  ;;  %v1739_v10 = vld [vmem:[%s2275_s19 + $0x54] sm:$0xf]  ;;  %v1503_v11 = vld [vmem:[%s2275_s19 + $0x58] sm:$0xf0] }
  0xaf   : > { %1120 = vmatpush.bf16.msra.mxu3 %v1662_v33  ;;  %v1755_v12 = vld [vmem:[%s2275_s19 + $0xd4] sm:$0xf]  ;;  %v1706_v13 = vor.u32 %v1789_v2, %v1703_v3  ;;  %v1567_v14 = vld [vmem:[%s2275_s19 + $0xd8] sm:$0xf0]  ;;  %v1506_v19 = vor.u32 %v1739_v10, %v1503_v11  ;;  %v1737_v22 = vld [vmem:[%s2275_s19 + $0x44] sm:$0xf] }
  0xb0   : > { %1079 = vmatpush.bf16.msra.mxu0 %v1462_v40  ;;  %v1771_v15 = vld [vmem:[%s2275_s19 + $0x154] sm:$0xf]  ;;  %v1631_v16 = vld [vmem:[%s2275_s19 + $0x158] sm:$0xf0]  ;;  %v1570_v20 = vor.u32 %v1755_v12, %v1567_v14  ;;  %v1495_v23 = vld [vmem:[%s2275_s19 + $0x48] sm:$0xf0] }
  0xb1   : > { %1093 = vmatpush.bf16.msra.mxu1 %v1526_v44  ;;  %v1787_v17 = vld [vmem:[%s2275_s19 + $0x1d4] sm:$0xf]  ;;  %v1695_v18 = vld [vmem:[%s2275_s19 + $0x1d8] sm:$0xf0]  ;;  %v1634_v21 = vor.u32 %v1771_v15, %v1631_v16  ;;  %v1753_v24 = vld [vmem:[%s2275_s19 + $0xc4] sm:$0xf]  ;;  %v1498_v31 = vor.u32 %v1737_v22, %v1495_v23 }
  0xb2   : > { %1107 = vmatpush.bf16.msra.mxu2 %v1590_v45  ;;  %v1698_v25 = vor.u32 %v1787_v17, %v1695_v18  ;;  %v1559_v26 = vld [vmem:[%s2275_s19 + $0xc8] sm:$0xf0]  ;;  %v1769_v27 = vld [vmem:[%s2275_s19 + $0x144] sm:$0xf]  ;;  %v1735_v34 = vld [vmem:[%s2275_s19 + $0x34] sm:$0xf] }
  0xb3   : > { %1121 = vmatpush.bf16.msra.mxu3 %v1654_v50  ;;  %1080 = vmatmul.bf16.vlgmr.msra.gmra.mxu0 %v2374_v5  ;;  %v1623_v28 = vld [vmem:[%s2275_s19 + $0x148] sm:$0xf0]  ;;  %v1785_v29 = vld [vmem:[%s2275_s19 + $0x1c4] sm:$0xf]  ;;  %v1562_v32 = vor.u32 %v1753_v24, %v1559_v26  ;;  %v1487_v35 = vld [vmem:[%s2275_s19 + $0x38] sm:$0xf0] }
  0xb4   : > { %1128 = vmatpush.bf16.msrb.mxu0 %v1522_v51  ;;  %1094 = vmatmul.bf16.vlgmr.msra.gmra.mxu1 %v2376_v7  ;;  %v1687_v30 = vld [vmem:[%s2275_s19 + $0x1c8] sm:$0xf0]  ;;  %v1626_v33 = vor.u32 %v1769_v27, %v1623_v28  ;;  %v1751_v36 = vld [vmem:[%s2275_s19 + $0xb4] sm:$0xf]  ;;  %v1551_v38 = vld [vmem:[%s2275_s19 + $0xb8] sm:$0xf0]  ;;  %v1490_v43 = vor.u32 %v1735_v34, %v1487_v35 }
  0xb5   : > { %1142 = vmatpush.bf16.msrb.mxu1 %v1586_v56  ;;  %1108 = vmatmul.bf16.vlgmr.msra.gmra.mxu2 %v2365_v62  ;;  %v1690_v37 = vor.u32 %v1785_v29, %v1687_v30  ;;  %v1767_v39 = vld [vmem:[%s2275_s19 + $0x134] sm:$0xf]  ;;  %v1615_v40 = vld [vmem:[%s2275_s19 + $0x138] sm:$0xf0]  ;;  %v1554_v44 = vor.u32 %v1751_v36, %v1551_v38  ;;  %v1733_v46 = vld [vmem:[%s2275_s19 + $0x24] sm:$0xf] }
  0xb6   : > { %1156 = vmatpush.bf16.msrb.mxu2 %v1650_v57  ;;  %1122 = vmatmul.bf16.vlgmr.msra.gmra.mxu3 %v2372_v4  ;;  %v1783_v41 = vld [vmem:[%s2275_s19 + $0x1b4] sm:$0xf]  ;;  %v1679_v42 = vld [vmem:[%s2275_s19 + $0x1b8] sm:$0xf0]  ;;  %v1618_v45 = vor.u32 %v1767_v39, %v1615_v40  ;;  %v1479_v47 = vld [vmem:[%s2275_s19 + $0x28] sm:$0xf0] }
  0xb7   : > { %1170 = vmatpush.bf16.msrb.mxu3 %v1714_v61  ;;  %v1749_v48 = vld [vmem:[%s2275_s19 + $0xa4] sm:$0xf]  ;;  %v1682_v49 = vor.u32 %v1783_v41, %v1679_v42  ;;  %v1543_v50 = vld [vmem:[%s2275_s19 + $0xa8] sm:$0xf0]  ;;  %v1482_v55 = vor.u32 %v1733_v46, %v1479_v47  ;;  %v1731_v58 = vld [vmem:[%s2275_s19 + $0x14] sm:$0xf] }
  0xb8   : > { %1129 = vmatpush.bf16.msrb.mxu0 %v1514_v6  ;;  %v1765_v51 = vld [vmem:[%s2275_s19 + $0x124] sm:$0xf]  ;;  %v1607_v52 = vld [vmem:[%s2275_s19 + $0x128] sm:$0xf0]  ;;  %v1546_v56 = vor.u32 %v1749_v48, %v1543_v50  ;;  %v1471_v59 = vld [vmem:[%s2275_s19 + $0x18] sm:$0xf0] }
  0xb9   : > { %1143 = vmatpush.bf16.msrb.mxu1 %v1578_v8  ;;  %v1781_v53 = vld [vmem:[%s2275_s19 + $0x1a4] sm:$0xf]  ;;  %v1671_v54 = vld [vmem:[%s2275_s19 + $0x1a8] sm:$0xf0]  ;;  %v1610_v57 = vor.u32 %v1765_v51, %v1607_v52  ;;  %v1747_v60 = vld [vmem:[%s2275_s19 + $0x94] sm:$0xf]  ;;  %v1474_v6 = vor.u32 %v1731_v58, %v1471_v59 }
  0xba   : > { %1157 = vmatpush.bf16.msrb.mxu2 %v1642_v9  ;;  %v1674_v61 = vor.u32 %v1781_v53, %v1671_v54  ;;  %v1535_v63 = vld [vmem:[%s2275_s19 + $0x98] sm:$0xf0]  ;;  %v1763_v0 = vld [vmem:[%s2275_s19 + $0x114] sm:$0xf]  ;;  %v1729_v10 = vld [vmem:[%s2275_s19 + $0x4] sm:$0xf] }
  0xbb   : > { %1171 = vmatpush.bf16.msrb.mxu3 %v1706_v13  ;;  %v1599_v1 = vld [vmem:[%s2275_s19 + $0x118] sm:$0xf0]  ;;  %v1779_v2 = vld [vmem:[%s2275_s19 + $0x194] sm:$0xf]  ;;  %v1538_v8 = vor.u32 %v1747_v60, %v1535_v63  ;;  %v1463_v11 = vld [vmem:[%s2275_s19 + $0x8] sm:$0xf0] }
  0xbc   : > { %1130 = vmatpush.bf16.msrb.mxu0 %v1506_v19  ;;  %v1663_v3 = vld [vmem:[%s2275_s19 + $0x198] sm:$0xf0]  ;;  %v1602_v9 = vor.u32 %v1763_v0, %v1599_v1  ;;  %v1745_v12 = vld [vmem:[%s2275_s19 + $0x84] sm:$0xf]  ;;  %v1527_v14 = vld [vmem:[%s2275_s19 + $0x88] sm:$0xf0]  ;;  %v1466_v19 = vor.u32 %v1729_v10, %v1463_v11 }
  0xbd   : > { %1144 = vmatpush.bf16.msrb.mxu1 %v1570_v20  ;;  %v1666_v13 = vor.u32 %v1779_v2, %v1663_v3  ;;  %v1761_v15 = vld [vmem:[%s2275_s19 + $0x104] sm:$0xf]  ;;  %v1591_v16 = vld [vmem:[%s2275_s19 + $0x108] sm:$0xf0]  ;;  %v1530_v20 = vor.u32 %v1745_v12, %v1527_v14  ;;  %v660_v29 = vld [vmem:[#allocation2 + $0x10] sm:$0xff]  ;;  %p1715_p6 = scmp.ne.s32.totalorder %s1953_s21, 8 }
  0xbe   : > { %1158 = vmatpush.bf16.msrb.mxu2 %v1634_v21  ;;  %v1777_v17 = vld [vmem:[%s2275_s19 + $0x184] sm:$0xf]  ;;  %v1655_v18 = vld [vmem:[%s2275_s19 + $0x188] sm:$0xf0]  ;;  %v1594_v21 = vor.u32 %v1761_v15, %v1591_v16  ;;  %v662_v36 = vld [vmem:[#allocation2 + $0x18] sm:$0xff] }
  0xbf   : > { %1172 = vmatpush.bf16.msrb.mxu3 %v1698_v25  ;;  %v1658_v22 = vor.u32 %v1777_v17, %v1655_v18  ;;  %v663_v51 = vld [vmem:[#allocation2 + $0x8] sm:$0xff] }
  0xc0   : > { %1131 = vmatpush.bf16.msrb.mxu0 %v1498_v31 }
  0xc1   : > { %1145 = vmatpush.bf16.msrb.mxu1 %v1562_v32 }
  0xc2   : > { %1159 = vmatpush.bf16.msrb.mxu2 %v1626_v33 }
  0xc3   : > { %1173 = vmatpush.bf16.msrb.mxu3 %v1690_v37 }
  0xc4   : > { %1132 = vmatpush.bf16.msrb.mxu0 %v1490_v43  ;;  %v661_v43 = vld [vmem:[#allocation2] sm:$0xff] }
  0xc5   : > { %1146 = vmatpush.bf16.msrb.mxu1 %v1554_v44 }
  0xc6   : > { %1160 = vmatpush.bf16.msrb.mxu2 %v1618_v45 }
  0xc7   : > { %1174 = vmatpush.bf16.msrb.mxu3 %v1682_v49 }
  0xc8   : > { %1133 = vmatpush.bf16.msrb.mxu0 %v1482_v55 }
  0xc9   : > { %1147 = vmatpush.bf16.msrb.mxu1 %v1546_v56 }
  0xca   : > { %1161 = vmatpush.bf16.msrb.mxu2 %v1610_v57 }
  0xcb   : > { %1175 = vmatpush.bf16.msrb.mxu3 %v1674_v61 }
  0xcc   : > { %1134 = vmatpush.bf16.msrb.mxu0 %v1474_v6 }
  0xcd   : > { %1148 = vmatpush.bf16.msrb.mxu1 %v1538_v8 }
  0xce   : > { %1162 = vmatpush.bf16.msrb.mxu2 %v1602_v9 }
  0xcf   : > { %1176 = vmatpush.bf16.msrb.mxu3 %v1666_v13 }
  0xd0   : > { %1135 = vmatpush.bf16.msrb.mxu0 %v1466_v19 }
  0xd1   : > { %1149 = vmatpush.bf16.msrb.mxu1 %v1530_v20 }
  0xd2   : > { %1163 = vmatpush.bf16.msrb.mxu2 %v1594_v21 }
  0xd3   : > { %1177 = vmatpush.bf16.msrb.mxu3 %v1658_v22  ;;  %1136 = vmatmul.bf16.vlgmr.msrb.gmra.mxu0 %v2374_v5 }
  0xd4   : > { %1150 = vmatmul.bf16.vlgmr.msrb.gmra.mxu1 %v2376_v7 }
  0xd5   : > { %1164 = vmatmul.bf16.vlgmr.msrb.gmra.mxu2 %v2365_v62 }
  0xd6   : > { %1178 = vmatmul.bf16.vlgmr.msrb.gmra.mxu3 %v2372_v4 }
 0x130   : > { %v1081_v23 = vpop.f32.mrf.mxu0 }
 0x131   : > { %v1095_v24 = vpop.f32.mrf.mxu1 }
 0x132   : > { %v1096_v25 = vadd.f32 %v1095_v24, %v1081_v23 }
 0x138   : > { %v1109_v26 = vpop.f32.mrf.mxu2  ;;  %v1083_v31 = vpop.f32.mrf.mxu0 }
 0x139   : > { %v1110_v27 = vadd.f32 %v1109_v26, %v1096_v25  ;;  %v1123_v28 = vpop.f32.mrf.mxu3  ;;  %v1097_v32 = vpop.f32.mrf.mxu1 }
 0x13a   : > { %v1098_v34 = vadd.f32 %v1097_v32, %v1083_v31 }
 0x13b   : > { %v1124_v30 = vadd.f32 %v1123_v28, %v1110_v27 }
 0x13d   : > { %v1184_v33 = vadd.f32 %v1124_v30, %v660_v29 }
 0x13f   : > { %1188 = vst [vmem:[#allocation2 + $0x10] sm:$0xff] %v1184_v33 }
 0x140   : > { %v1111_v5 = vpop.f32.mrf.mxu2 }
 0x141   : > { %v1112_v35 = vadd.f32 %v1111_v5, %v1098_v34  ;;  %v1125_v7 = vpop.f32.mrf.mxu3 }
 0x143   : > { %v1126_v62 = vadd.f32 %v1125_v7, %v1112_v35 }
 0x145   : > { %v1186_v37 = vadd.f32 %v1126_v62, %v662_v36 }
 0x147   : > { %1190 = vst [vmem:[#allocation2 + $0x18] sm:$0xff] %v1186_v37 }
 0x150   : > { %v1137_v4 = vpop.f32.mrf.mxu0 }
 0x151   : > { %v1151_v38 = vpop.f32.mrf.mxu1 }
 0x152   : > { %v1152_v39 = vadd.f32 %v1151_v38, %v1137_v4 }
 0x158   : > { %v1165_v40 = vpop.f32.mrf.mxu2  ;;  %v1139_v45 = vpop.f32.mrf.mxu0 }
 0x159   : > { %v1166_v41 = vadd.f32 %v1165_v40, %v1152_v39  ;;  %v1179_v42 = vpop.f32.mrf.mxu3  ;;  %v1153_v46 = vpop.f32.mrf.mxu1 }
 0x15a   : > { %v1154_v48 = vadd.f32 %v1153_v46, %v1139_v45 }
 0x15b   : > { %v1180_v44 = vadd.f32 %v1179_v42, %v1166_v41 }
 0x15d   : > { %v1185_v47 = vadd.f32 %v1180_v44, %v661_v43 }
 0x15f   : > { %1189 = vst [vmem:[#allocation2] sm:$0xff] %v1185_v47 }
 0x160   : > { %v1167_v49 = vpop.f32.mrf.mxu2 }
 0x161   : > { %v1168_v50 = vadd.f32 %v1167_v49, %v1154_v48  ;;  %v1181_v52 = vpop.f32.mrf.mxu3 }
 0x163   : > { %v1182_v53 = vadd.f32 %v1181_v52, %v1168_v50  ;;  %1195 = sbr.rel (%p1715_p6) target bundleno = 378 (0x17a), region = 143 }
 0x165   : > { %v1187_v54 = vadd.f32 %v1182_v53, %v663_v51 }
 0x167   : > { %1191 = vst [vmem:[#allocation2 + $0x8] sm:$0xff] %v1187_v54 }
 0x168   : > { %v1196_v55 = vld [vmem:[#allocation2 + $0x10] sm:$0xff]  ;;  %v1197_v56 = vld [vmem:[#allocation2] sm:$0xff]  ;;  %v1198_v3 = vld [vmem:[#allocation2 + $0x18] sm:$0xff] }
 0x169   : > { %v1200_v57 = vld [vmem:[%s2271_s9] ss:$2 sm:$0x3]  ;;  %v1716_v60 = vld [vmem:[%s2271_s9 + $0x1] ss:$2 sm:$0x3] }
 0x16a   : > { %v1202_v58 = vperm.slane %v1200_v57, 0  ;;  %v1203_v59 = vperm.slane %v1200_v57, 1  ;;  %v1221_v61 = vld [vmem:[%s603_s17] sm:$0xff]  ;;  %v1213_v63 = vperm.slane %v1716_v60, 0  ;;  %v1214_v0 = vperm.slane %v1716_v60, 1  ;;  %v1222_v8 = vld [vmem:[%s603_s17 + $0x8] sm:$0xff] }
 0x16b   : > { %v1223_v1 = vunpack.c.l.bf16 %v1221_v61  ;;  %v1224_v2 = vunpack.c.h.bf16 %v1221_v61  ;;  %v1225_v13 = vunpack.c.l.bf16 %v1222_v8  ;;  %v1226_v14 = vunpack.c.h.bf16 %v1222_v8 }
 0x16c   : > { %v1206_v9 = vmul.f32 %v1202_v58, %v1196_v55  ;;  %v1207_v10 = vmul.f32 %v1203_v59, %v1197_v56  ;;  %v1208_v11 = vmul.f32 %v1202_v58, %v1198_v3 }
 0x16e   : > { %v1199_v6 = vld [vmem:[#allocation2 + $0x8] sm:$0xff]  ;;  %v1217_v15 = vadd.f32 %v1213_v63, %v1206_v9  ;;  %v1218_v16 = vadd.f32 %v1214_v0, %v1207_v10  ;;  %v1219_v17 = vadd.f32 %v1213_v63, %v1208_v11 }
 0x16f   : > { %v1209_v12 = vmul.f32 %v1203_v59, %v1199_v6 }
 0x170   : > { %v1227_v19 = vadd.f32 %v1223_v1, %v1217_v15  ;;  %v1228_v20 = vadd.f32 %v1224_v2, %v1218_v16  ;;  %v1229_v21 = vadd.f32 %v1225_v13, %v1219_v17 }
 0x171   : > { %v1220_v18 = vadd.f32 %v1214_v0, %v1209_v12 }
 0x172   : > { %v1231_v23 = vmax.f32 %v1227_v19, 0.0  ;;  %v1232_v24 = vmax.f32 %v1228_v20, 0.0  ;;  %v1233_v25 = vmax.f32 %v1229_v21, 0.0 }
 0x173   : > { %v1230_v22 = vadd.f32 %v1226_v14, %v1220_v18 }
 0x174   : > { %v1235_v27 = vpack.c.bf16 %v1232_v24, %v1231_v23 }
 0x175   : > { %v1234_v26 = vmax.f32 %v1230_v22, 0.0 }
 0x176   : > { %1237 = vst [vmem:[%s2279_s14] sm:$0xff] %v1235_v27 }
 0x177   : > { %v1236_v28 = vpack.c.bf16 %v1234_v26, %v1233_v25 }
 0x179   : > { %1238 = vst [vmem:[%s2279_s14 + $0x8] sm:$0xff] %v1236_v28 }
 0x17a PF: > { %1245 = sbr.rel (!%p2101_p13) target bundleno = 386 (0x182), region = 147  ;;  %s1793_s15 = sshll.u32 (%p2101_p13), %s1957_s22, 3 }
 0x17b   : > { %s1251_s8 = scalar_lea.vmem (%p2101_p13), %s2488_s4, %s1793_s15 }
 0x17d   : > { %v1282_v29 = vld [vmem:[%s2279_s14] sm:$0xff] (%p2101_p13) }
 0x17e   : > { %1283 = vst [vmem:[%s1251_s8] sm:$0xff] (%p2101_p13), %v1282_v29 }
 0x180   : > { %v1284_v30 = vld [vmem:[%s2279_s14 + $0x8] sm:$0xff] }
 0x181   : > { %1285 = vst [vmem:[%s1251_s8 + $0x10] sm:$0xff] %v1284_v30 }
 0x182 PF: > { %s14_s25 = sadd.s32 1, %s1969_s25   ;;  %s2499_s29 = sld [smem:[#allocation7_spill]] }
 0x183   : > { %p11_p7 = scmp.ge.s32.totalorder %s14_s25, 20   ;;  %s2500_s28 = sld [smem:[#allocation8_spill]] }
 0x184   : > { %s2501_s15 = smov %s1933_s16  ;;  %s2502_s16 = smov %s2093_s13 }
 0x185   : > { %s2503_s17 = smov %s1941_s18  ;;  %s2504_s18 = smov %s2090_s12 }
 0x186   : > { %s2505_s19 = smov %s1949_s20  ;;  %s2506_s20 = smov %s2074_s7 }
 0x187   : > { %s2507_s21 = smov %s1961_s23  ;;  %s2508_s22 = smov %s1965_s24 }
 0x188   : > { %s2509_s23 = smov %s2499_s29  ;;  %13 = sbr.rel (!%p11_p7) target bundleno = 8 (0x8), region = 236 }
 0x189   : > { %s2510_s24 = smov %s2500_s28 }

// kernel: resnet_forward.43
= control target key start
LH: loop header
LB: loop body
LE: loop exit
PB: predicated region body
PF: predicated region fallthrough
CT: control target
= control target key end

     0   :  { %s463_s0 = inlined_call_operand.vmem [shape: bf16[2,1,1,512], index: 0, kind: input, shape index: {}]   ;;  %s464_s1 = inlined_call_operand.vmem [shape: f32[512,128], index: 1, kind: input, shape index: {}]   ;;  %s465_s2 = inlined_call_operand.vmem [shape: f32[1,128], index: 2, kind: input, shape index: {}]   ;;  %s466_s3 = inlined_call_operand.hbm [shape: f32[2,128], index: 3, kind: output, shape index: {}]  }
   0x1   :  { %v68_v0 = vld [vmem:[%s464_s1 + $0x178] sm:$0xff]  ;;  %v67_v2 = vld [vmem:[%s464_s1 + $0x170] sm:$0xff]  ;;  %v66_v6 = vld [vmem:[%s464_s1 + $0x168] sm:$0xff] }
   0x2   :  { %v36_v1 = vld [vmem:[%s464_s1 + $0x78] sm:$0xff]  ;;  %148 = vmatpush.msra.mxu2 %v68_v0  ;;  %v35_v4 = vld [vmem:[%s464_s1 + $0x70] sm:$0xff]  ;;  %v34_v8 = vld [vmem:[%s464_s1 + $0x68] sm:$0xff] }
   0x3   :  { %108 = vmatpush.msra.mxu0 %v36_v1  ;;  %v84_v3 = vld [vmem:[%s464_s1 + $0x1f8] sm:$0xff]  ;;  %v83_v7 = vld [vmem:[%s464_s1 + $0x1f0] sm:$0xff]  ;;  %v82_v10 = vld [vmem:[%s464_s1 + $0x1e8] sm:$0xff] }
   0x4   :  { %v52_v5 = vld [vmem:[%s464_s1 + $0xf8] sm:$0xff]  ;;  %168 = vmatpush.msra.mxu3 %v84_v3  ;;  %149 = vmatpush.msra.mxu2 %v67_v2  ;;  %v51_v9 = vld [vmem:[%s464_s1 + $0xf0] sm:$0xff]  ;;  %v65_v11 = vld [vmem:[%s464_s1 + $0x160] sm:$0xff] }
   0x5   :  { %128 = vmatpush.msra.mxu1 %v52_v5  ;;  %109 = vmatpush.msra.mxu0 %v35_v4  ;;  %v33_v12 = vld [vmem:[%s464_s1 + $0x60] sm:$0xff]  ;;  %v50_v13 = vld [vmem:[%s464_s1 + $0xe8] sm:$0xff]  ;;  %v64_v16 = vld [vmem:[%s464_s1 + $0x158] sm:$0xff] }
   0x6   :  { %169 = vmatpush.msra.mxu3 %v83_v7  ;;  %150 = vmatpush.msra.mxu2 %v66_v6  ;;  %v81_v14 = vld [vmem:[%s464_s1 + $0x1e0] sm:$0xff]  ;;  %v32_v17 = vld [vmem:[%s464_s1 + $0x58] sm:$0xff]  ;;  %v63_v20 = vld [vmem:[%s464_s1 + $0x150] sm:$0xff] }
   0x7   :  { %129 = vmatpush.msra.mxu1 %v51_v9  ;;  %110 = vmatpush.msra.mxu0 %v34_v8  ;;  %v49_v15 = vld [vmem:[%s464_s1 + $0xe0] sm:$0xff]  ;;  %v80_v18 = vld [vmem:[%s464_s1 + $0x1d8] sm:$0xff]  ;;  %v31_v21 = vld [vmem:[%s464_s1 + $0x50] sm:$0xff] }
   0x8   :  { %170 = vmatpush.msra.mxu3 %v82_v10  ;;  %151 = vmatpush.msra.mxu2 %v65_v11  ;;  %v48_v19 = vld [vmem:[%s464_s1 + $0xd8] sm:$0xff]  ;;  %v79_v22 = vld [vmem:[%s464_s1 + $0x1d0] sm:$0xff]  ;;  %v62_v24 = vld [vmem:[%s464_s1 + $0x148] sm:$0xff] }
   0x9   :  { %130 = vmatpush.msra.mxu1 %v50_v13  ;;  %111 = vmatpush.msra.mxu0 %v33_v12  ;;  %v47_v23 = vld [vmem:[%s464_s1 + $0xd0] sm:$0xff]  ;;  %v30_v25 = vld [vmem:[%s464_s1 + $0x48] sm:$0xff]  ;;  %v61_v28 = vld [vmem:[%s464_s1 + $0x140] sm:$0xff] }
   0xa   :  { %171 = vmatpush.msra.mxu3 %v81_v14  ;;  %152 = vmatpush.msra.mxu2 %v64_v16  ;;  %v78_v26 = vld [vmem:[%s464_s1 + $0x1c8] sm:$0xff]  ;;  %v29_v29 = vld [vmem:[%s464_s1 + $0x40] sm:$0xff]  ;;  %v60_v32 = vld [vmem:[%s464_s1 + $0x138] sm:$0xff] }
   0xb   :  { %131 = vmatpush.msra.mxu1 %v49_v15  ;;  %112 = vmatpush.msra.mxu0 %v32_v17  ;;  %v46_v27 = vld [vmem:[%s464_s1 + $0xc8] sm:$0xff]  ;;  %v77_v30 = vld [vmem:[%s464_s1 + $0x1c0] sm:$0xff]  ;;  %v28_v33 = vld [vmem:[%s464_s1 + $0x38] sm:$0xff] }
   0xc   :  { %172 = vmatpush.msra.mxu3 %v80_v18  ;;  %153 = vmatpush.msra.mxu2 %v63_v20  ;;  %v45_v31 = vld [vmem:[%s464_s1 + $0xc0] sm:$0xff]  ;;  %v76_v34 = vld [vmem:[%s464_s1 + $0x1b8] sm:$0xff]  ;;  %v59_v36 = vld [vmem:[%s464_s1 + $0x130] sm:$0xff] }
   0xd   :  { %132 = vmatpush.msra.mxu1 %v48_v19  ;;  %113 = vmatpush.msra.mxu0 %v31_v21  ;;  %v44_v35 = vld [vmem:[%s464_s1 + $0xb8] sm:$0xff]  ;;  %v27_v37 = vld [vmem:[%s464_s1 + $0x30] sm:$0xff]  ;;  %v58_v40 = vld [vmem:[%s464_s1 + $0x128] sm:$0xff] }
   0xe   :  { %173 = vmatpush.msra.mxu3 %v79_v22  ;;  %154 = vmatpush.msra.mxu2 %v62_v24  ;;  %v75_v38 = vld [vmem:[%s464_s1 + $0x1b0] sm:$0xff]  ;;  %v26_v41 = vld [vmem:[%s464_s1 + $0x28] sm:$0xff]  ;;  %v57_v44 = vld [vmem:[%s464_s1 + $0x120] sm:$0xff] }
   0xf   :  { %133 = vmatpush.msra.mxu1 %v47_v23  ;;  %114 = vmatpush.msra.mxu0 %v30_v25  ;;  %v43_v39 = vld [vmem:[%s464_s1 + $0xb0] sm:$0xff]  ;;  %v74_v42 = vld [vmem:[%s464_s1 + $0x1a8] sm:$0xff]  ;;  %v25_v45 = vld [vmem:[%s464_s1 + $0x20] sm:$0xff] }
  0x10   :  { %174 = vmatpush.msra.mxu3 %v78_v26  ;;  %155 = vmatpush.msra.mxu2 %v61_v28  ;;  %v42_v43 = vld [vmem:[%s464_s1 + $0xa8] sm:$0xff]  ;;  %v206_v46 = vld [vmem:[%s463_s0] sm:$0xff]   ;;  %v56_v51 = vld [vmem:[%s464_s1 + $0x118] sm:$0xff] }
  0x11   :  { %134 = vmatpush.msra.mxu1 %v46_v27  ;;  %115 = vmatpush.msra.mxu0 %v29_v29  ;;  %v73_v47 = vld [vmem:[%s464_s1 + $0x1a0] sm:$0xff]  ;;  %v207_v49 = vunpack.c.l.bf16 %v206_v46  ;;  %v208_v50 = vunpack.c.h.bf16 %v206_v46  ;;  %v24_v52 = vld [vmem:[%s464_s1 + $0x18] sm:$0xff] }
  0x12   :  { %175 = vmatpush.msra.mxu3 %v77_v30  ;;  %156 = vmatpush.msra.mxu2 %v60_v32  ;;  %v41_v48 = vld [vmem:[%s464_s1 + $0xa0] sm:$0xff] }
  0x13   :  { %135 = vmatpush.msra.mxu1 %v45_v31  ;;  %116 = vmatpush.msra.mxu0 %v28_v33 }
  0x14   :  { %176 = vmatpush.msra.mxu3 %v76_v34  ;;  %157 = vmatpush.msra.mxu2 %v59_v36 }
  0x15   :  { %136 = vmatpush.msra.mxu1 %v44_v35  ;;  %117 = vmatpush.msra.mxu0 %v27_v37 }
  0x16   :  { %177 = vmatpush.msra.mxu3 %v75_v38  ;;  %158 = vmatpush.msra.mxu2 %v58_v40 }
  0x17   :  { %137 = vmatpush.msra.mxu1 %v43_v39  ;;  %118 = vmatpush.msra.mxu0 %v26_v41 }
  0x18   :  { %178 = vmatpush.msra.mxu3 %v74_v42 }
  0x19   :  { %138 = vmatpush.msra.mxu1 %v42_v43 }
  0x1a   :  { %8 = vsyncpa [#allocation3], 0  ;;  %159 = vmatpush.msra.mxu2 %v57_v44  ;;  %119 = vmatpush.msra.mxu0 %v25_v45  ;;  %v72_v53 = vld [vmem:[%s464_s1 + $0x198] sm:$0xff]  ;;  %v55_v55 = vld [vmem:[%s464_s1 + $0x110] sm:$0xff]  ;;  %v93_v59 = vperm.slane %v207_v49, 4  ;;  %v97_v60 = vperm.slane %v208_v50, 4 }
  0x1b   :  { %v40_v54 = vld [vmem:[%s464_s1 + $0x98] sm:$0xff]  ;;  %179 = vmatpush.msra.mxu3 %v73_v47  ;;  %139 = vmatpush.msra.mxu1 %v41_v48  ;;  %v23_v56 = vld [vmem:[%s464_s1 + $0x10] sm:$0xff]  ;;  %vm99_vm0 = vcmask 1041409   ;;  %v54_v61 = vld [vmem:[%s464_s1 + $0x108] sm:$0xff]  ;;  %v91_v63 = vperm.slane %v207_v49, 0  ;;  %v95_v0 = vperm.slane %v208_v50, 0 }
  0x1c   :  { %160 = vmatpush.msra.mxu2 %v56_v51  ;;  %120 = vmatpush.msra.mxu0 %v24_v52  ;;  %v71_v57 = vld [vmem:[%s464_s1 + $0x190] sm:$0xff]  ;;  %v22_v62 = vld [vmem:[%s464_s1 + $0x8] sm:$0xff]  ;;  %v94_v1 = vperm.slane %v207_v49, 6  ;;  %v98_v2 = vperm.slane %v208_v50, 6  ;;  %v53_v5 = vld [vmem:[%s464_s1 + $0x100] sm:$0xff]  ;;  %v92_v7 = vperm.slane %v207_v49, 2  ;;  %v102_v9 = vsel %vm99_vm0, %v97_v60, %v93_v59 }
  0x1d   :  { %v39_v58 = vld [vmem:[%s464_s1 + $0x90] sm:$0xff]  ;;  %180 = vmatpush.msra.mxu3 %v72_v53  ;;  %140 = vmatpush.msra.mxu1 %v40_v54  ;;  %v70_v3 = vld [vmem:[%s464_s1 + $0x188] sm:$0xff]  ;;  %v21_v6 = vld [vmem:[%s464_s1] sm:$0xff]  ;;  %v96_v8 = vperm.slane %v208_v50, 2  ;;  %v100_v11 = vsel %vm99_vm0, %v95_v0, %v91_v63  ;;  %s237_s7 = smov [#allocation2]   ;;  %s196_s10 = sshll.u32 %s466_s3, 4  ;;  %s197_s10 = int_to_ptr.hbm [resolvable:$true] %s196_s10 }
  0x1e   :  { %161 = vmatpush.msra.mxu2 %v55_v55  ;;  %121 = vmatpush.msra.mxu0 %v23_v56  ;;  %v38_v4 = vld [vmem:[%s464_s1 + $0x88] sm:$0xff]  ;;  %v69_v10 = vld [vmem:[%s464_s1 + $0x180] sm:$0xff]  ;;  %v103_v12 = vsel %vm99_vm0, %v98_v2, %v94_v1  ;;  %s194_s8 = sshll.u32 %s237_s7, 4  ;;  %s195_s8 = int_to_ptr.vmem [resolvable:$true] %s194_s8 }
  0x1f   :  { %181 = vmatpush.msra.mxu3 %v71_v57  ;;  %141 = vmatpush.msra.mxu1 %v39_v58  ;;  %v37_v13 = vld [vmem:[%s464_s1 + $0x80] sm:$0xff]  ;;  %v101_v14 = vsel %vm99_vm0, %v96_v8, %v92_v7 }
  0x20   :  { %162 = vmatpush.msra.mxu2 %v54_v61  ;;  %122 = vmatpush.msra.mxu0 %v22_v62  ;;  %v210_v15 = vld [vmem:[%s465_s2] ss:$0 sm:$0xff] }
  0x21   :  { %182 = vmatpush.msra.mxu3 %v70_v3  ;;  %142 = vmatpush.msra.mxu1 %v38_v4 }
  0x22   :  { %163 = vmatpush.msra.mxu2 %v53_v5  ;;  %123 = vmatpush.msra.mxu0 %v21_v6 }
  0x23   :  { %164 = vmatmul.f32.vlgmr.msra.gmra.mxu2 %v102_v9  ;;  %183 = vmatpush.msra.mxu3 %v69_v10 }
  0x24   :  { %124 = vmatmul.f32.vlgmr.msra.gmra.mxu0 %v100_v11  ;;  %184 = vmatmul.f32.vlgmr.msra.gmra.mxu3 %v103_v12 }
  0x25   :  { %143 = vmatpush.msra.mxu1 %v37_v13 }
  0x26   :  { %144 = vmatmul.f32.vlgmr.msra.gmra.mxu1 %v101_v14 }
  0xa1   :  { %v125_v16 = vpop.f32.mrf.mxu0 }
  0xa2   :  { %v126_v17 = vadd.f32 %v210_v15, %v125_v16 }
  0xa3   :  { %v145_v18 = vpop.f32.mrf.mxu1 }
  0xa4   :  { %v146_v19 = vadd.f32 %v145_v18, %v126_v17 }
  0xa6   :  { %v165_v20 = vpop.f32.mrf.mxu2 }
  0xa7   :  { %v166_v21 = vadd.f32 %v165_v20, %v146_v19  ;;  %v185_v22 = vpop.f32.mrf.mxu3 }
  0xa9   :  { %v186_v23 = vadd.f32 %v185_v22, %v166_v21 }
  0xab   :  { %188 = vst [vmem:[#allocation2] sm:$0x3] %v186_v23 }
  0xac   :  { %199 = dma.vmem_to_hbm [thread:$0]  %s195_s8, 32, %s197_s10, [#allocation3]  }
  0xad   :  { %235 = dma.done.wait [#allocation3], 32  }
  0xae   :  { %236 = vsyncadd [#allocation3], 4294967264 }
  0xaf   :  { %204 = vsyncpa [#allocation3], 1 }

</bundles_post_ra>
